<compile_context>
chip_gen: v7x
topology: tpu7x:2x2x1
jax: 0.10.0
libtpu: 0.0.40
codegen_flags: <defaults>
</compile_context>

<pallas_src>
import functools

import jax
import jax.numpy as jnp
from jax.experimental import pallas as pl
from jax.experimental.pallas import tpu as pltpu

LANE = 128


# ----------------------------- fused Pallas kernel ------------------------------

def _diffusion_fused_kernel(H, W, C, CH, CP,
                            sab_ref, s1m_ref, jcol_ref, x0_ref, ns_ref,
                            w1_ref, bt_ref, w2_ref, b2_ref, out_ref):
    # sab/s1m : (B,) f32 in SMEM          per-sample sqrt(alpha_bar), sqrt(1-alpha_bar)
    # jcol    : ((H+2)*W, 1) f32          column index (0..W-1), periodic; for border masks
    # x0 / ns : (1, H, W, C) f32          unpadded NHWC tiles
    # w1      : (9*C, CH) f32             conv1 weights, im2col-packed (row = (ki*3+kj)*C + c)
    # bt      : (1, 1, CH) f32            conv1 bias + per-sample time-conditioning bias
    # w2      : (9*CH, CP) bf16           conv2 weights, out-channels zero-padded to 128 lanes
    # b2      : (1, CP) f32               conv2 bias, zero-padded
    # out     : (1, 1, CP) f32            per-batch lane-dense sum-of-squared-error partial
    b = pl.program_id(0)
    HW = H * W
    n_col = (H + 2) * W

    # column-validity masks for the 'same' 3x3 gather (shared by both convs)
    jcol = jcol_ref[...]                                   # ((H+2)*W, 1) f32
    col_mask = {0: jcol >= 1.0, 2: jcol <= float(W - 2)}   # kj == 1 needs no mask

    def im2col_3x3(x3, c, dtype):
        # x3: (H, W, c) -> (H*W, 9*c). Zero 'same' border: 2 zero rows above/below (leading-axis
        # concat, then flatten), out-of-image columns handled by the column masks.
        z = jnp.zeros((2, W, c), dtype)
        flat = jnp.concatenate([z, x3, z], axis=0).reshape((H + 4) * W, c)
        cols = []
        for kj in range(3):                                # 3 column-shifted slabs (one relayout each)
            sl = flat[W + kj - 1: W + kj - 1 + n_col, :]
            if kj != 1:
                sl = jnp.where(col_mask[kj], sl, jnp.zeros((), dtype))
            cols.append(sl)
        # per-ki taps are 8/16-aligned row windows of the slabs -> cheap slices
        slabs = [cols[kj][ki * W: ki * W + HW, :] for ki in range(3) for kj in range(3)]
        return jnp.concatenate(slabs, axis=-1)             # (H*W, 9*c)

    # ---- fused q-sample: x_t = x0*sqrt(ab[t]) + noise*sqrt(1-ab[t]) ----
    ns = ns_ref[0]                                         # (H, W, C) f32
    xt = x0_ref[0] * sab_ref[b] + ns * s1m_ref[b]          # (H, W, C) f32

    # ---- conv1 (3x3 'same') + bias + time bias + ReLU : one K-collapsed MXU dot ----
    im1 = im2col_3x3(xt, C, jnp.float32)                   # (HW, 9*C)
    h = jnp.dot(im1, w1_ref[...], preferred_element_type=jnp.float32)   # (HW, CH) f32
    h = jnp.maximum(h + bt_ref[0], 0.0)

    # ---- conv2 (3x3 'same') + bias : hidden activations never leave VMEM ----
    h3 = h.astype(jnp.bfloat16).reshape(H, W, CH)
    im2 = im2col_3x3(h3, CH, jnp.bfloat16)                 # (HW, 9*CH) bf16
    pred = jnp.dot(im2, w2_ref[...], preferred_element_type=jnp.float32) + b2_ref[...]  # (HW, CP)

    # ---- fused MSE partial sum (per-batch, lane-dense) ----
    noise_flat = ns.reshape(HW, C)
    noise_p = jnp.concatenate(
        [noise_flat, jnp.zeros((HW, CP - C), jnp.float32)], axis=-1)    # padded lanes stay 0
    d = noise_p - pred                                     # padded lanes are exactly 0
    out_ref[0] = jnp.sum(d * d, axis=0, keepdims=True)     # (1, CP) unmasked lane-dense store


def _diffusion_pallas(sab, s1m, jcol, x0, noise, w1, bt, w2, b2, H, W, C, CH, CP):
    B = x0.shape[0]
    n_col = (H + 2) * W
    kernel = functools.partial(_diffusion_fused_kernel, H, W, C, CH, CP)
    return pl.pallas_call(
        kernel,
        out_shape=jax.ShapeDtypeStruct((B, 1, CP), jnp.float32),
        grid=(B,),
        in_specs=[
            pl.BlockSpec(memory_space=pltpu.MemorySpace.SMEM),       # sqrt(alpha_bar[t])
            pl.BlockSpec(memory_space=pltpu.MemorySpace.SMEM),       # sqrt(1 - alpha_bar[t])
            pl.BlockSpec((n_col, 1), lambda b: (0, 0)),              # column-index helper (resident)
            pl.BlockSpec((1, H, W, C), lambda b: (b, 0, 0, 0)),      # x0 (NHWC, unpadded)
            pl.BlockSpec((1, H, W, C), lambda b: (b, 0, 0, 0)),      # noise (NHWC, unpadded)
            pl.BlockSpec((9 * C, CH), lambda b: (0, 0)),             # conv1 weights (resident)
            pl.BlockSpec((1, 1, CH), lambda b: (b, 0, 0)),           # conv1 bias + time bias
            pl.BlockSpec((9 * CH, CP), lambda b: (0, 0)),            # conv2 weights (resident)
            pl.BlockSpec((1, CP), lambda b: (0, 0)),                 # conv2 bias
        ],
        out_specs=pl.BlockSpec((1, 1, CP), lambda b: (b, 0, 0)),     # per-batch lane-dense partial
        compiler_params=pltpu.CompilerParams(
            dimension_semantics=("parallel",)),
    )(sab, s1m, jcol, x0, noise, w1, bt, w2, b2)


# ------------------------------ JAX glue -----------------------------------

def _sinusoidal_embedding(t, dim):
    half = dim // 2
    freqs = jnp.exp(-jnp.log(10000.0) * jnp.arange(half, dtype=jnp.float32) / half)
    args = t.astype(jnp.float32)[:, None] * freqs[None, :]
    return jnp.concatenate([jnp.sin(args), jnp.cos(args)], axis=-1)   # (B, dim)


def init_params(key, c_in, c_hid, t_emb, t_hid):
    ks = jax.random.split(key, 4)
    s = 0.05
    return {
        "w1": jax.random.normal(ks[0], (t_emb, t_hid), jnp.float32) * s,
        "b1": jnp.zeros((t_hid,), jnp.float32),
        "w2": jax.random.normal(ks[1], (t_hid, c_hid), jnp.float32) * s,
        "b2": jnp.zeros((c_hid,), jnp.float32),
        "wc1": jax.random.normal(ks[2], (3, 3, c_in, c_hid), jnp.float32) * s,   # (kh,kw,Cin,Cout)
        "bc1": jnp.zeros((c_hid,), jnp.float32),
        "wc2": jax.random.normal(ks[3], (3, 3, c_hid, c_in), jnp.float32) * s,
        "bc2": jnp.zeros((c_in,), jnp.float32),
    }


def _time_cond_bias(params, t):
    # Tiny (M = batch) time-embedding MLP: plain XLA (a pallas_call here is pure launch overhead).
    emb = _sinusoidal_embedding(t, params["w1"].shape[0])
    h = emb @ params["w1"] + params["b1"]
    h = h * jax.nn.sigmoid(h)                                                    # SiLU
    return h @ params["w2"] + params["b2"]                                       # (B, c_hid)


def diffusion_loss(params, x0_nchw, key, timesteps=1000):
    B, C, H, W = x0_nchw.shape
    CH = params["wc1"].shape[-1]
    CP = LANE

    k_noise, k_t = jax.random.split(key)
    # Draw noise directly in NHWC (same distribution) so no transpose/copy is needed for it.
    noise = jax.random.normal(k_noise, (B, H, W, C), jnp.float32)
    t = jax.random.randint(k_t, (B,), 0, timesteps)

    beta = jnp.linspace(1e-4, 0.02, timesteps, dtype=jnp.float32)
    alpha_bar = jnp.cumprod(1.0 - beta)
    sab = jnp.sqrt(alpha_bar[t]).astype(jnp.float32)                             # (B,)
    s1m = jnp.sqrt(1.0 - alpha_bar[t]).astype(jnp.float32)                       # (B,)

    x0 = jnp.transpose(x0_nchw, (0, 2, 3, 1)).astype(jnp.float32)                # only full-tensor XLA op

    # conv1 weights packed for the K-collapsed im2col dot: row = (ki*3+kj)*C + c
    w1 = params["wc1"].reshape(9 * C, CH).astype(jnp.float32)
    # conv1 bias fused with the per-sample time-conditioning bias
    bt = (_time_cond_bias(params, t) + params["bc1"][None, :]).reshape(B, 1, CH).astype(jnp.float32)
    # conv2 weights: row = (ki*3+kj)*c_hid + ch; out-channels zero-padded to a full 128-lane tile
    w2 = jnp.pad(params["wc2"].reshape(9 * CH, C), ((0, 0), (0, CP - C))).astype(jnp.bfloat16)
    b2 = jnp.pad(params["bc2"], (0, CP - C)).reshape(1, CP).astype(jnp.float32)

    # column index helper (periodic 0..W-1 over (H+2)*W rows) for the in-kernel border masks
    jcol = jnp.tile(jnp.arange(W, dtype=jnp.float32), H + 2).reshape((H + 2) * W, 1)

    partial_sse = _diffusion_pallas(sab, s1m, jcol, x0, noise, w1, bt, w2, b2, H, W, C, CH, CP)
    return jnp.sum(partial_sse) / (B * C * H * W)                                # F.mse_loss(noise, pred)


if __name__ == "__main__":
    B, C, H, W = 2, 4, 16, 16
    key = jax.random.PRNGKey(0)
    k_x, k_p, k_fwd = jax.random.split(key, 3)
    x0 = jax.random.normal(k_x, (B, C, H, W), jnp.float32)
    params = init_params(k_p, c_in=C, c_hid=32, t_emb=32, t_hid=64)

    fwd = jax.jit(functools.partial(diffusion_loss, timesteps=1000))
    loss = jax.block_until_ready(fwd(params, x0, k_fwd))
    assert bool(jnp.isfinite(loss))
    print("KERNEL_OK")
</pallas_src>

<mosaic_0001>
module attributes {stable_mosaic.version = 11 : i64} {
  func.func @_diffusion_fused_kernel(%arg0: i32, %arg1: memref<2xf32, #tpu.memory_space<smem>>, %arg2: memref<2xf32, #tpu.memory_space<smem>>, %arg3: memref<288x1xf32, #tpu.memory_space<vmem>>, %arg4: memref<1x16x16x4xf32, #tpu.memory_space<vmem>>, %arg5: memref<1x16x16x4xf32, #tpu.memory_space<vmem>>, %arg6: memref<36x32xf32, #tpu.memory_space<vmem>>, %arg7: memref<1x1x32xf32, #tpu.memory_space<vmem>>, %arg8: memref<288x128xbf16, #tpu.memory_space<vmem>>, %arg9: memref<1x128xf32, #tpu.memory_space<vmem>>, %arg10: memref<1x1x128xf32, #tpu.memory_space<vmem>>) attributes {dimension_semantics = [#tpu.dimension_semantics<parallel>], iteration_bounds = array<i64: 2>, scalar_prefetch = 0 : i64, scratch_operands = 0 : i64, tpu.core_type = #tpu.core_type<tc>, window_params = [{transform_indices = @transform_0, window_bounds = array<i64: 2>}, {transform_indices = @transform_1, window_bounds = array<i64: 2>}, {pipeline_mode = #tpu.pipeline_mode<synchronous>, transform_indices = @transform_2, window_bounds = array<i64: 288, 1>}, {transform_indices = @transform_3, window_bounds = array<i64: 1, 16, 16, 4>}, {transform_indices = @transform_4, window_bounds = array<i64: 1, 16, 16, 4>}, {pipeline_mode = #tpu.pipeline_mode<synchronous>, transform_indices = @transform_5, window_bounds = array<i64: 36, 32>}, {transform_indices = @transform_6, window_bounds = array<i64: 1, 1, 32>}, {pipeline_mode = #tpu.pipeline_mode<synchronous>, transform_indices = @transform_7, window_bounds = array<i64: 288, 128>}, {pipeline_mode = #tpu.pipeline_mode<synchronous>, transform_indices = @transform_8, window_bounds = array<i64: 1, 128>}, {transform_indices = @transform_9, window_bounds = array<i64: 1, 1, 128>}]} {
    %c0 = arith.constant 0 : index
    %c0_0 = arith.constant 0 : index
    %0 = vector.load %arg3[%c0, %c0_0] : memref<288x1xf32, #tpu.memory_space<vmem>>, vector<288x1xf32>
    %cst = arith.constant 1.000000e+00 : f32
    %1 = vector.broadcast %cst : f32 to vector<288x1xf32>
    %2 = arith.cmpf oge, %0, %1 : vector<288x1xf32>
    %cst_1 = arith.constant 1.400000e+01 : f32
    %3 = vector.broadcast %cst_1 : f32 to vector<288x1xf32>
    %4 = arith.cmpf ole, %0, %3 : vector<288x1xf32>
    %c0_2 = arith.constant 0 : index
    %c0_3 = arith.constant 0 : index
    %c0_4 = arith.constant 0 : index
    %c0_5 = arith.constant 0 : index
    %5 = vector.load %arg5[%c0_2, %c0_3, %c0_4, %c0_5] : memref<1x16x16x4xf32, #tpu.memory_space<vmem>>, vector<1x16x16x4xf32>
    %6 = vector.shape_cast %5 : vector<1x16x16x4xf32> to vector<16x16x4xf32>
    %c0_6 = arith.constant 0 : index
    %c0_7 = arith.constant 0 : index
    %c0_8 = arith.constant 0 : index
    %c0_9 = arith.constant 0 : index
    %7 = vector.load %arg4[%c0_6, %c0_7, %c0_8, %c0_9] : memref<1x16x16x4xf32, #tpu.memory_space<vmem>>, vector<1x16x16x4xf32>
    %8 = vector.shape_cast %7 : vector<1x16x16x4xf32> to vector<16x16x4xf32>
    %9 = arith.index_cast %arg0 : i32 to index
    %10 = memref.load %arg1[%9] : memref<2xf32, #tpu.memory_space<smem>>
    %11 = vector.broadcast %10 : f32 to vector<16x16x4xf32>
    %12 = arith.mulf %8, %11 : vector<16x16x4xf32>
    %13 = arith.index_cast %arg0 : i32 to index
    %14 = memref.load %arg2[%13] : memref<2xf32, #tpu.memory_space<smem>>
    %15 = vector.broadcast %14 : f32 to vector<16x16x4xf32>
    %16 = arith.mulf %6, %15 : vector<16x16x4xf32>
    %17 = arith.addf %12, %16 : vector<16x16x4xf32>
    %cst_10 = arith.constant 0.000000e+00 : f32
    %18 = vector.broadcast %cst_10 : f32 to vector<2x16x4xf32>
    %19 = tpu.concatenate %18, %17, %18 in 0 : vector<2x16x4xf32>, vector<16x16x4xf32>, vector<2x16x4xf32> -> vector<20x16x4xf32>
    %20 = vector.shape_cast %19 : vector<20x16x4xf32> to vector<320x4xf32>
    %21 = vector.extract_strided_slice %20 {offsets = [15, 0], sizes = [288, 4], strides = [1, 1]} : vector<320x4xf32> to vector<288x4xf32>
    %cst_11 = arith.constant 0.000000e+00 : f32
    %22 = vector.shape_cast %2 : vector<288x1xi1> to vector<288x1xi1>
    %23 = vector.broadcast %22 : vector<288x1xi1> to vector<288x4xi1>
    %24 = vector.broadcast %cst_11 : f32 to vector<288x4xf32>
    %25 = arith.select %23, %21, %24 : vector<288x4xi1>, vector<288x4xf32>
    %26 = vector.extract_strided_slice %20 {offsets = [16, 0], sizes = [288, 4], strides = [1, 1]} : vector<320x4xf32> to vector<288x4xf32>
    %27 = vector.extract_strided_slice %20 {offsets = [17, 0], sizes = [288, 4], strides = [1, 1]} : vector<320x4xf32> to vector<288x4xf32>
    %cst_12 = arith.constant 0.000000e+00 : f32
    %28 = vector.shape_cast %4 : vector<288x1xi1> to vector<288x1xi1>
    %29 = vector.broadcast %28 : vector<288x1xi1> to vector<288x4xi1>
    %30 = vector.broadcast %cst_12 : f32 to vector<288x4xf32>
    %31 = arith.select %29, %27, %30 : vector<288x4xi1>, vector<288x4xf32>
    %32 = vector.extract_strided_slice %25 {offsets = [0, 0], sizes = [256, 4], strides = [1, 1]} : vector<288x4xf32> to vector<256x4xf32>
    %33 = vector.extract_strided_slice %26 {offsets = [0, 0], sizes = [256, 4], strides = [1, 1]} : vector<288x4xf32> to vector<256x4xf32>
    %34 = vector.extract_strided_slice %31 {offsets = [0, 0], sizes = [256, 4], strides = [1, 1]} : vector<288x4xf32> to vector<256x4xf32>
    %35 = vector.extract_strided_slice %25 {offsets = [16, 0], sizes = [256, 4], strides = [1, 1]} : vector<288x4xf32> to vector<256x4xf32>
    %36 = vector.extract_strided_slice %26 {offsets = [16, 0], sizes = [256, 4], strides = [1, 1]} : vector<288x4xf32> to vector<256x4xf32>
    %37 = vector.extract_strided_slice %31 {offsets = [16, 0], sizes = [256, 4], strides = [1, 1]} : vector<288x4xf32> to vector<256x4xf32>
    %38 = vector.extract_strided_slice %25 {offsets = [32, 0], sizes = [256, 4], strides = [1, 1]} : vector<288x4xf32> to vector<256x4xf32>
    %39 = vector.extract_strided_slice %26 {offsets = [32, 0], sizes = [256, 4], strides = [1, 1]} : vector<288x4xf32> to vector<256x4xf32>
    %40 = vector.extract_strided_slice %31 {offsets = [32, 0], sizes = [256, 4], strides = [1, 1]} : vector<288x4xf32> to vector<256x4xf32>
    %41 = tpu.concatenate %32, %33, %34, %35, %36, %37, %38, %39, %40 in 1 : vector<256x4xf32>, vector<256x4xf32>, vector<256x4xf32>, vector<256x4xf32>, vector<256x4xf32>, vector<256x4xf32>, vector<256x4xf32>, vector<256x4xf32>, vector<256x4xf32> -> vector<256x36xf32>
    %c0_13 = arith.constant 0 : index
    %c0_14 = arith.constant 0 : index
    %42 = vector.load %arg6[%c0_13, %c0_14] : memref<36x32xf32, #tpu.memory_space<vmem>>, vector<36x32xf32>
    %cst_15 = arith.constant dense<0.000000e+00> : vector<256x32xf32>
    %43 = tpu.matmul %41, %42, %cst_15 {dimension_numbers = #tpu.dot_dimension_numbers<[1], [0], [0], [1], [0, 0, 1, 1], [], []>} : vector<256x36xf32>, vector<36x32xf32>, vector<256x32xf32> -> vector<256x32xf32>
    %c0_16 = arith.constant 0 : index
    %c0_17 = arith.constant 0 : index
    %c0_18 = arith.constant 0 : index
    %44 = vector.load %arg7[%c0_16, %c0_17, %c0_18] : memref<1x1x32xf32, #tpu.memory_space<vmem>>, vector<1x1x32xf32>
    %45 = vector.shape_cast %44 : vector<1x1x32xf32> to vector<1x32xf32>
    %46 = vector.broadcast %45 : vector<1x32xf32> to vector<256x32xf32>
    %47 = arith.addf %43, %46 : vector<256x32xf32>
    %cst_19 = arith.constant 0.000000e+00 : f32
    %48 = vector.broadcast %cst_19 : f32 to vector<256x32xf32>
    %49 = arith.maximumf %47, %48 : vector<256x32xf32>
    %50 = arith.truncf %49 : vector<256x32xf32> to vector<256x32xbf16>
    %51 = vector.shape_cast %50 : vector<256x32xbf16> to vector<16x16x32xbf16>
    %cst_20 = arith.constant 0.000000e+00 : bf16
    %52 = vector.broadcast %cst_20 : bf16 to vector<2x16x32xbf16>
    %53 = tpu.concatenate %52, %51, %52 in 0 : vector<2x16x32xbf16>, vector<16x16x32xbf16>, vector<2x16x32xbf16> -> vector<20x16x32xbf16>
    %54 = vector.shape_cast %53 : vector<20x16x32xbf16> to vector<320x32xbf16>
    %55 = vector.extract_strided_slice %54 {offsets = [15, 0], sizes = [288, 32], strides = [1, 1]} : vector<320x32xbf16> to vector<288x32xbf16>
    %cst_21 = arith.constant 0.000000e+00 : bf16
    %56 = vector.shape_cast %2 : vector<288x1xi1> to vector<288x1xi1>
    %57 = vector.broadcast %56 : vector<288x1xi1> to vector<288x32xi1>
    %58 = vector.broadcast %cst_21 : bf16 to vector<288x32xbf16>
    %59 = arith.select %57, %55, %58 : vector<288x32xi1>, vector<288x32xbf16>
    %60 = vector.extract_strided_slice %54 {offsets = [16, 0], sizes = [288, 32], strides = [1, 1]} : vector<320x32xbf16> to vector<288x32xbf16>
    %61 = vector.extract_strided_slice %54 {offsets = [17, 0], sizes = [288, 32], strides = [1, 1]} : vector<320x32xbf16> to vector<288x32xbf16>
    %cst_22 = arith.constant 0.000000e+00 : bf16
    %62 = vector.shape_cast %4 : vector<288x1xi1> to vector<288x1xi1>
    %63 = vector.broadcast %62 : vector<288x1xi1> to vector<288x32xi1>
    %64 = vector.broadcast %cst_22 : bf16 to vector<288x32xbf16>
    %65 = arith.select %63, %61, %64 : vector<288x32xi1>, vector<288x32xbf16>
    %66 = vector.extract_strided_slice %59 {offsets = [0, 0], sizes = [256, 32], strides = [1, 1]} : vector<288x32xbf16> to vector<256x32xbf16>
    %67 = vector.extract_strided_slice %60 {offsets = [0, 0], sizes = [256, 32], strides = [1, 1]} : vector<288x32xbf16> to vector<256x32xbf16>
    %68 = vector.extract_strided_slice %65 {offsets = [0, 0], sizes = [256, 32], strides = [1, 1]} : vector<288x32xbf16> to vector<256x32xbf16>
    %69 = vector.extract_strided_slice %59 {offsets = [16, 0], sizes = [256, 32], strides = [1, 1]} : vector<288x32xbf16> to vector<256x32xbf16>
    %70 = vector.extract_strided_slice %60 {offsets = [16, 0], sizes = [256, 32], strides = [1, 1]} : vector<288x32xbf16> to vector<256x32xbf16>
    %71 = vector.extract_strided_slice %65 {offsets = [16, 0], sizes = [256, 32], strides = [1, 1]} : vector<288x32xbf16> to vector<256x32xbf16>
    %72 = vector.extract_strided_slice %59 {offsets = [32, 0], sizes = [256, 32], strides = [1, 1]} : vector<288x32xbf16> to vector<256x32xbf16>
    %73 = vector.extract_strided_slice %60 {offsets = [32, 0], sizes = [256, 32], strides = [1, 1]} : vector<288x32xbf16> to vector<256x32xbf16>
    %74 = vector.extract_strided_slice %65 {offsets = [32, 0], sizes = [256, 32], strides = [1, 1]} : vector<288x32xbf16> to vector<256x32xbf16>
    %75 = tpu.concatenate %66, %67, %68, %69, %70, %71, %72, %73, %74 in 1 : vector<256x32xbf16>, vector<256x32xbf16>, vector<256x32xbf16>, vector<256x32xbf16>, vector<256x32xbf16>, vector<256x32xbf16>, vector<256x32xbf16>, vector<256x32xbf16>, vector<256x32xbf16> -> vector<256x288xbf16>
    %c0_23 = arith.constant 0 : index
    %c0_24 = arith.constant 0 : index
    %76 = vector.load %arg8[%c0_23, %c0_24] : memref<288x128xbf16, #tpu.memory_space<vmem>>, vector<288x128xbf16>
    %cst_25 = arith.constant dense<0.000000e+00> : vector<256x128xf32>
    %77 = tpu.matmul %75, %76, %cst_25 {dimension_numbers = #tpu.dot_dimension_numbers<[1], [0], [0], [1], [0, 0, 1, 1], [], []>} : vector<256x288xbf16>, vector<288x128xbf16>, vector<256x128xf32> -> vector<256x128xf32>
    %c0_26 = arith.constant 0 : index
    %c0_27 = arith.constant 0 : index
    %78 = vector.load %arg9[%c0_26, %c0_27] : memref<1x128xf32, #tpu.memory_space<vmem>>, vector<1x128xf32>
    %79 = vector.broadcast %78 : vector<1x128xf32> to vector<256x128xf32>
    %80 = arith.addf %77, %79 : vector<256x128xf32>
    %81 = vector.shape_cast %6 : vector<16x16x4xf32> to vector<256x4xf32>
    %cst_28 = arith.constant 0.000000e+00 : f32
    %82 = vector.broadcast %cst_28 : f32 to vector<256x124xf32>
    %83 = tpu.concatenate %81, %82 in 1 : vector<256x4xf32>, vector<256x124xf32> -> vector<256x128xf32>
    %84 = arith.subf %83, %80 : vector<256x128xf32>
    %85 = arith.mulf %84, %84 : vector<256x128xf32>
    %cst_29 = arith.constant dense<0.000000e+00> : vector<128xf32>
    %86 = vector.multi_reduction <add>, %85, %cst_29 [0] : vector<256x128xf32> to vector<128xf32>
    %87 = vector.shape_cast %86 : vector<128xf32> to vector<1x128xf32>
    %c0_30 = arith.constant 0 : index
    %c0_31 = arith.constant 0 : index
    %c0_32 = arith.constant 0 : index
    %88 = vector.load %arg10[%c0_30, %c0_31, %c0_32] : memref<1x1x128xf32, #tpu.memory_space<vmem>>, vector<1x1x128xf32>
    %89 = vector.shape_cast %88 : vector<1x1x128xf32> to vector<1x128xf32>
    %90 = vector.shape_cast %87 : vector<1x128xf32> to vector<1x1x128xf32>
    tpu.vector_store %arg10[%c0_30, %c0_31, %c0_32], %90 {strides = array<i32>} : memref<1x1x128xf32, #tpu.memory_space<vmem>>, vector<1x1x128xf32>,
    return
  }
  func.func @transform_0(%arg0: i32) -> i32 {
    %c0_i32 = arith.constant 0 : i32
    %c0_i32_0 = arith.constant 0 : i32
    return %c0_i32 : i32
  }
  func.func @transform_1(%arg0: i32) -> i32 {
    %c0_i32 = arith.constant 0 : i32
    %c0_i32_0 = arith.constant 0 : i32
    return %c0_i32 : i32
  }
  func.func @transform_2(%arg0: i32) -> (i32, i32) {
    %c0_i32 = arith.constant 0 : i32
    %c0_i32_0 = arith.constant 0 : i32
    %c0_i32_1 = arith.constant 0 : i32
    return %c0_i32, %c0_i32_0 : i32, i32
  }
  func.func @transform_3(%arg0: i32) -> (i32, i32, i32, i32) {
    %c0_i32 = arith.constant 0 : i32
    %c0_i32_0 = arith.constant 0 : i32
    %c0_i32_1 = arith.constant 0 : i32
    %c0_i32_2 = arith.constant 0 : i32
    return %arg0, %c0_i32, %c0_i32_0, %c0_i32_1 : i32, i32, i32, i32
  }
  func.func @transform_4(%arg0: i32) -> (i32, i32, i32, i32) {
    %c0_i32 = arith.constant 0 : i32
    %c0_i32_0 = arith.constant 0 : i32
    %c0_i32_1 = arith.constant 0 : i32
    %c0_i32_2 = arith.constant 0 : i32
    return %arg0, %c0_i32, %c0_i32_0, %c0_i32_1 : i32, i32, i32, i32
  }
  func.func @transform_5(%arg0: i32) -> (i32, i32) {
    %c0_i32 = arith.constant 0 : i32
    %c0_i32_0 = arith.constant 0 : i32
    %c0_i32_1 = arith.constant 0 : i32
    return %c0_i32, %c0_i32_0 : i32, i32
  }
  func.func @transform_6(%arg0: i32) -> (i32, i32, i32) {
    %c0_i32 = arith.constant 0 : i32
    %c0_i32_0 = arith.constant 0 : i32
    %c0_i32_1 = arith.constant 0 : i32
    return %arg0, %c0_i32, %c0_i32_0 : i32, i32, i32
  }
  func.func @transform_7(%arg0: i32) -> (i32, i32) {
    %c0_i32 = arith.constant 0 : i32
    %c0_i32_0 = arith.constant 0 : i32
    %c0_i32_1 = arith.constant 0 : i32
    return %c0_i32, %c0_i32_0 : i32, i32
  }
  func.func @transform_8(%arg0: i32) -> (i32, i32) {
    %c0_i32 = arith.constant 0 : i32
    %c0_i32_0 = arith.constant 0 : i32
    %c0_i32_1 = arith.constant 0 : i32
    return %c0_i32, %c0_i32_0 : i32, i32
  }
  func.func @transform_9(%arg0: i32) -> (i32, i32, i32) {
    %c0_i32 = arith.constant 0 : i32
    %c0_i32_0 = arith.constant 0 : i32
    %c0_i32_1 = arith.constant 0 : i32
    return %arg0, %c0_i32, %c0_i32_0 : i32, i32, i32
  }
}

</mosaic_0001>

<bundles_post_ra>
// kernel: tile.0
= control target key start
LH: loop header
LB: loop body
LE: loop exit
PB: predicated region body
PF: predicated region fallthrough
CT: control target
= control target key end

     0   :  { %vm3_vm0 = vcmask 7168   ;;  %s691_s12 = smov 127   ;;  %s692_s29 = smov 126   ;;  %s1388_s0 = inlined_call_operand.vmem [shape: f32[18,16], index: 0, kind: input, shape index: {}]   ;;  %s1389_s1 = inlined_call_operand.vmem [shape: f32[288,1], index: 1, kind: output, shape index: {}]  }
   0x1   :  { %v719_v0 = vld [vmem:[%s1388_s0] sm:$0xff]   ;;  %v520_v1 = vld [vmem:[%s1388_s0 + $0x10] sm:$0x3]   ;;  %v727_v2 = vld [vmem:[%s1388_s0 + $0x8] sm:$0xff]   ;;  %s693_s3 = smov 125   ;;  %s694_s6 = smov 124  }
   0x2   :  { %25 = vrot.lane.b32.xlu0 %v719_v0, %s691_s12  ;;  %51 = vrot.lane.b32.xlu1 %v520_v1, %s691_s12  ;;  %4 = vst.msk [vmem:[%s1389_s1] ss:$16 sm:$0x3] %vm3_vm0, %v719_v0   ;;  %5 = vst.msk [vmem:[%s1389_s1] ss:$16 sm:$0xc] %vm3_vm0, %v719_v0  }
   0x3   :  { %6 = vst.msk [vmem:[%s1389_s1] ss:$16 sm:$0x30] %vm3_vm0, %v719_v0   ;;  %7 = vst.msk [vmem:[%s1389_s1] ss:$16 sm:$0xc0] %vm3_vm0, %v719_v0  }
   0x4   :  { %505 = vst.msk [vmem:[%s1389_s1 + $0x80] ss:$16 sm:$0x3] %vm3_vm0, %v727_v2   ;;  %506 = vst.msk [vmem:[%s1389_s1 + $0x80] ss:$16 sm:$0xc] %vm3_vm0, %v727_v2  }
   0x5   :  { %507 = vst.msk [vmem:[%s1389_s1 + $0x80] ss:$16 sm:$0x30] %vm3_vm0, %v727_v2   ;;  %508 = vst.msk [vmem:[%s1389_s1 + $0x80] ss:$16 sm:$0xc0] %vm3_vm0, %v727_v2  }
   0x6   :  { %38 = vrot.lane.b32.xlu0 %v727_v2, %s691_s12  ;;  %57 = vrot.lane.b32.xlu1 %v719_v0, %s692_s29  ;;  %v531_v3 = vld [vmem:[%s1388_s0 + $0x10] sm:$0x3]   ;;  %s695_s9 = smov 123   ;;  %s696_s12 = smov 122  }
   0x7   :  { %v542_v4 = vld [vmem:[%s1388_s0 + $0x10] sm:$0x3]   ;;  %s697_s15 = smov 121   ;;  %s698_s18 = smov 120  }
   0x8   :  { %v553_v5 = vld [vmem:[%s1388_s0 + $0x10] sm:$0x3]   ;;  %s699_s21 = smov 119   ;;  %s700_s24 = smov 118  }
   0x9   :  { %v564_v6 = vld [vmem:[%s1388_s0 + $0x10] sm:$0x3]   ;;  %s701_s27 = smov 117   ;;  %s702_s30 = smov 116  }
   0xa   :  { %70 = vrot.lane.b32.xlu0 %v727_v2, %s692_s29  ;;  %83 = vrot.lane.b32.xlu1 %v531_v3, %s692_s29  ;;  %v575_v7 = vld [vmem:[%s1388_s0 + $0x10] sm:$0x3]   ;;  %s703_s4 = smov 115   ;;  %s704_s11 = smov 114  }
   0xb   :  { %v586_v8 = vld [vmem:[%s1388_s0 + $0x10] sm:$0x3]   ;;  %s705_s14 = smov 113  }
   0xc   :  { %v597_v9 = vld [vmem:[%s1388_s0 + $0x10] sm:$0x3]  }
   0xd   :  { %v608_v10 = vld [vmem:[%s1388_s0 + $0x10] sm:$0x3]  }
   0xe   :  { %89 = vrot.lane.b32.xlu0 %v719_v0, %s693_s3  ;;  %102 = vrot.lane.b32.xlu1 %v727_v2, %s693_s3  ;;  %v619_v11 = vld [vmem:[%s1388_s0 + $0x10] sm:$0x3]  }
   0xf   :  { %v630_v12 = vld [vmem:[%s1388_s0 + $0x10] sm:$0x3]  }
  0x10   :  { %v641_v13 = vld [vmem:[%s1388_s0 + $0x10] sm:$0x3]  }
  0x11   :  { %v652_v14 = vld [vmem:[%s1388_s0 + $0x10] sm:$0x3]  }
  0x12   :  { %115 = vrot.lane.b32.xlu0 %v542_v4, %s693_s3  ;;  %121 = vrot.lane.b32.xlu1 %v719_v0, %s694_s6  ;;  %v509_v15 = vld [vmem:[%s1388_s0 + $0x10] sm:$0x3]  }
  0x13   :  { %510 = vst.msk [vmem:[%s1389_s1 + $0x100] ss:$16 sm:$0x3] %vm3_vm0, %v509_v15   ;;  %v663_v16 = vld [vmem:[%s1388_s0 + $0x10] sm:$0x3]  }
  0x14   :  { %v674_v17 = vld [vmem:[%s1388_s0 + $0x10] sm:$0x3]  }
  0x16   :  { %134 = vrot.lane.b32.xlu0 %v727_v2, %s694_s6  ;;  %147 = vrot.lane.b32.xlu1 %v553_v5, %s694_s6 }
  0x1a   :  { %153 = vrot.lane.b32.xlu0 %v719_v0, %s695_s9  ;;  %166 = vrot.lane.b32.xlu1 %v727_v2, %s695_s9 }
  0x1e   :  { %179 = vrot.lane.b32.xlu0 %v564_v6, %s695_s9  ;;  %185 = vrot.lane.b32.xlu1 %v719_v0, %s696_s12 }
  0x22   :  { %198 = vrot.lane.b32.xlu0 %v727_v2, %s696_s12  ;;  %211 = vrot.lane.b32.xlu1 %v575_v7, %s696_s12 }
  0x26   :  { %217 = vrot.lane.b32.xlu0 %v719_v0, %s697_s15  ;;  %230 = vrot.lane.b32.xlu1 %v727_v2, %s697_s15 }
  0x2a   :  { %243 = vrot.lane.b32.xlu0 %v586_v8, %s697_s15  ;;  %249 = vrot.lane.b32.xlu1 %v719_v0, %s698_s18 }
  0x2e   :  { %262 = vrot.lane.b32.xlu0 %v727_v2, %s698_s18  ;;  %275 = vrot.lane.b32.xlu1 %v597_v9, %s698_s18 }
  0x32   :  { %281 = vrot.lane.b32.xlu0 %v719_v0, %s699_s21  ;;  %294 = vrot.lane.b32.xlu1 %v727_v2, %s699_s21 }
  0x36   :  { %307 = vrot.lane.b32.xlu0 %v608_v10, %s699_s21  ;;  %313 = vrot.lane.b32.xlu1 %v719_v0, %s700_s24 }
  0x3a   :  { %326 = vrot.lane.b32.xlu0 %v727_v2, %s700_s24  ;;  %339 = vrot.lane.b32.xlu1 %v619_v11, %s700_s24 }
  0x3e   :  { %345 = vrot.lane.b32.xlu0 %v719_v0, %s701_s27  ;;  %358 = vrot.lane.b32.xlu1 %v727_v2, %s701_s27 }
  0x42   :  { %371 = vrot.lane.b32.xlu0 %v630_v12, %s701_s27  ;;  %377 = vrot.lane.b32.xlu1 %v719_v0, %s702_s30 }
  0x46   :  { %390 = vrot.lane.b32.xlu0 %v727_v2, %s702_s30  ;;  %403 = vrot.lane.b32.xlu1 %v641_v13, %s702_s30 }
  0x4a   :  { %409 = vrot.lane.b32.xlu0 %v719_v0, %s703_s4  ;;  %422 = vrot.lane.b32.xlu1 %v727_v2, %s703_s4 }
  0x4e   :  { %435 = vrot.lane.b32.xlu0 %v652_v14, %s703_s4  ;;  %441 = vrot.lane.b32.xlu1 %v719_v0, %s704_s11 }
  0x52   :  { %454 = vrot.lane.b32.xlu0 %v727_v2, %s704_s11  ;;  %467 = vrot.lane.b32.xlu1 %v663_v16, %s704_s11 }
  0x56   :  { %473 = vrot.lane.b32.xlu0 %v719_v0, %s705_s14  ;;  %486 = vrot.lane.b32.xlu1 %v727_v2, %s705_s14 }
  0x5a   :  { %499 = vrot.lane.b32.xlu0 %v674_v17, %s705_s14 }
  0x74   :  { %v26_v18 = vpop.permute.xlu0 %25   ;;  %v52_v19 = vpop.permute.xlu1 %51  }
  0x75   :  { %511 = vst.msk [vmem:[%s1389_s1 + $0x1] ss:$16 sm:$0x3] %vm3_vm0, %v26_v18   ;;  %512 = vst.msk [vmem:[%s1389_s1 + $0x1] ss:$16 sm:$0xc] %vm3_vm0, %v26_v18  }
  0x76   :  { %513 = vst.msk [vmem:[%s1389_s1 + $0x1] ss:$16 sm:$0x30] %vm3_vm0, %v26_v18   ;;  %514 = vst.msk [vmem:[%s1389_s1 + $0x1] ss:$16 sm:$0xc0] %vm3_vm0, %v26_v18  }
  0x77   :  { %521 = vst.msk [vmem:[%s1389_s1 + $0x101] ss:$16 sm:$0x3] %vm3_vm0, %v52_v19  }
  0x78   :  { %v39_v20 = vpop.permute.xlu0 %38   ;;  %v58_v21 = vpop.permute.xlu1 %57  }
  0x79   :  { %516 = vst.msk [vmem:[%s1389_s1 + $0x81] ss:$16 sm:$0x3] %vm3_vm0, %v39_v20   ;;  %517 = vst.msk [vmem:[%s1389_s1 + $0x81] ss:$16 sm:$0xc] %vm3_vm0, %v39_v20  }
  0x7a   :  { %518 = vst.msk [vmem:[%s1389_s1 + $0x81] ss:$16 sm:$0x30] %vm3_vm0, %v39_v20   ;;  %519 = vst.msk [vmem:[%s1389_s1 + $0x81] ss:$16 sm:$0xc0] %vm3_vm0, %v39_v20  }
  0x7b   :  { %522 = vst.msk [vmem:[%s1389_s1 + $0x2] ss:$16 sm:$0x3] %vm3_vm0, %v58_v21   ;;  %523 = vst.msk [vmem:[%s1389_s1 + $0x2] ss:$16 sm:$0xc] %vm3_vm0, %v58_v21  }
  0x7c   :  { %524 = vst.msk [vmem:[%s1389_s1 + $0x2] ss:$16 sm:$0x30] %vm3_vm0, %v58_v21   ;;  %525 = vst.msk [vmem:[%s1389_s1 + $0x2] ss:$16 sm:$0xc0] %vm3_vm0, %v58_v21   ;;  %v71_v22 = vpop.permute.xlu0 %70   ;;  %v84_v23 = vpop.permute.xlu1 %83  }
  0x7d   :  { %527 = vst.msk [vmem:[%s1389_s1 + $0x82] ss:$16 sm:$0x3] %vm3_vm0, %v71_v22   ;;  %528 = vst.msk [vmem:[%s1389_s1 + $0x82] ss:$16 sm:$0xc] %vm3_vm0, %v71_v22  }
  0x7e   :  { %529 = vst.msk [vmem:[%s1389_s1 + $0x82] ss:$16 sm:$0x30] %vm3_vm0, %v71_v22   ;;  %530 = vst.msk [vmem:[%s1389_s1 + $0x82] ss:$16 sm:$0xc0] %vm3_vm0, %v71_v22  }
  0x7f   :  { %532 = vst.msk [vmem:[%s1389_s1 + $0x102] ss:$16 sm:$0x3] %vm3_vm0, %v84_v23  }
  0x80   :  { %v90_v24 = vpop.permute.xlu0 %89   ;;  %v103_v25 = vpop.permute.xlu1 %102  }
  0x81   :  { %533 = vst.msk [vmem:[%s1389_s1 + $0x3] ss:$16 sm:$0x3] %vm3_vm0, %v90_v24   ;;  %534 = vst.msk [vmem:[%s1389_s1 + $0x3] ss:$16 sm:$0xc] %vm3_vm0, %v90_v24  }
  0x82   :  { %535 = vst.msk [vmem:[%s1389_s1 + $0x3] ss:$16 sm:$0x30] %vm3_vm0, %v90_v24   ;;  %536 = vst.msk [vmem:[%s1389_s1 + $0x3] ss:$16 sm:$0xc0] %vm3_vm0, %v90_v24  }
  0x83   :  { %538 = vst.msk [vmem:[%s1389_s1 + $0x83] ss:$16 sm:$0x3] %vm3_vm0, %v103_v25   ;;  %539 = vst.msk [vmem:[%s1389_s1 + $0x83] ss:$16 sm:$0xc] %vm3_vm0, %v103_v25  }
  0x84   :  { %540 = vst.msk [vmem:[%s1389_s1 + $0x83] ss:$16 sm:$0x30] %vm3_vm0, %v103_v25   ;;  %541 = vst.msk [vmem:[%s1389_s1 + $0x83] ss:$16 sm:$0xc0] %vm3_vm0, %v103_v25   ;;  %v116_v26 = vpop.permute.xlu0 %115   ;;  %v122_v27 = vpop.permute.xlu1 %121  }
  0x85   :  { %543 = vst.msk [vmem:[%s1389_s1 + $0x103] ss:$16 sm:$0x3] %vm3_vm0, %v116_v26   ;;  %544 = vst.msk [vmem:[%s1389_s1 + $0x4] ss:$16 sm:$0x3] %vm3_vm0, %v122_v27  }
  0x86   :  { %545 = vst.msk [vmem:[%s1389_s1 + $0x4] ss:$16 sm:$0xc] %vm3_vm0, %v122_v27   ;;  %546 = vst.msk [vmem:[%s1389_s1 + $0x4] ss:$16 sm:$0x30] %vm3_vm0, %v122_v27  }
  0x87   :  { %547 = vst.msk [vmem:[%s1389_s1 + $0x4] ss:$16 sm:$0xc0] %vm3_vm0, %v122_v27  }
  0x88   :  { %v135_v28 = vpop.permute.xlu0 %134   ;;  %v148_v29 = vpop.permute.xlu1 %147  }
  0x89   :  { %549 = vst.msk [vmem:[%s1389_s1 + $0x84] ss:$16 sm:$0x3] %vm3_vm0, %v135_v28   ;;  %550 = vst.msk [vmem:[%s1389_s1 + $0x84] ss:$16 sm:$0xc] %vm3_vm0, %v135_v28  }
  0x8a   :  { %551 = vst.msk [vmem:[%s1389_s1 + $0x84] ss:$16 sm:$0x30] %vm3_vm0, %v135_v28   ;;  %552 = vst.msk [vmem:[%s1389_s1 + $0x84] ss:$16 sm:$0xc0] %vm3_vm0, %v135_v28  }
  0x8b   :  { %554 = vst.msk [vmem:[%s1389_s1 + $0x104] ss:$16 sm:$0x3] %vm3_vm0, %v148_v29  }
  0x8c   :  { %v154_v30 = vpop.permute.xlu0 %153   ;;  %v167_v31 = vpop.permute.xlu1 %166  }
  0x8d   :  { %555 = vst.msk [vmem:[%s1389_s1 + $0x5] ss:$16 sm:$0x3] %vm3_vm0, %v154_v30   ;;  %556 = vst.msk [vmem:[%s1389_s1 + $0x5] ss:$16 sm:$0xc] %vm3_vm0, %v154_v30  }
  0x8e   :  { %557 = vst.msk [vmem:[%s1389_s1 + $0x5] ss:$16 sm:$0x30] %vm3_vm0, %v154_v30   ;;  %558 = vst.msk [vmem:[%s1389_s1 + $0x5] ss:$16 sm:$0xc0] %vm3_vm0, %v154_v30  }
  0x8f   :  { %560 = vst.msk [vmem:[%s1389_s1 + $0x85] ss:$16 sm:$0x3] %vm3_vm0, %v167_v31   ;;  %561 = vst.msk [vmem:[%s1389_s1 + $0x85] ss:$16 sm:$0xc] %vm3_vm0, %v167_v31  }
  0x90   :  { %562 = vst.msk [vmem:[%s1389_s1 + $0x85] ss:$16 sm:$0x30] %vm3_vm0, %v167_v31   ;;  %563 = vst.msk [vmem:[%s1389_s1 + $0x85] ss:$16 sm:$0xc0] %vm3_vm0, %v167_v31   ;;  %v180_v32 = vpop.permute.xlu0 %179   ;;  %v186_v33 = vpop.permute.xlu1 %185  }
  0x91   :  { %565 = vst.msk [vmem:[%s1389_s1 + $0x105] ss:$16 sm:$0x3] %vm3_vm0, %v180_v32   ;;  %566 = vst.msk [vmem:[%s1389_s1 + $0x6] ss:$16 sm:$0x3] %vm3_vm0, %v186_v33  }
  0x92   :  { %567 = vst.msk [vmem:[%s1389_s1 + $0x6] ss:$16 sm:$0xc] %vm3_vm0, %v186_v33   ;;  %568 = vst.msk [vmem:[%s1389_s1 + $0x6] ss:$16 sm:$0x30] %vm3_vm0, %v186_v33  }
  0x93   :  { %569 = vst.msk [vmem:[%s1389_s1 + $0x6] ss:$16 sm:$0xc0] %vm3_vm0, %v186_v33  }
  0x94   :  { %v199_v34 = vpop.permute.xlu0 %198   ;;  %v212_v35 = vpop.permute.xlu1 %211  }
  0x95   :  { %571 = vst.msk [vmem:[%s1389_s1 + $0x86] ss:$16 sm:$0x3] %vm3_vm0, %v199_v34   ;;  %572 = vst.msk [vmem:[%s1389_s1 + $0x86] ss:$16 sm:$0xc] %vm3_vm0, %v199_v34  }
  0x96   :  { %573 = vst.msk [vmem:[%s1389_s1 + $0x86] ss:$16 sm:$0x30] %vm3_vm0, %v199_v34   ;;  %574 = vst.msk [vmem:[%s1389_s1 + $0x86] ss:$16 sm:$0xc0] %vm3_vm0, %v199_v34  }
  0x97   :  { %576 = vst.msk [vmem:[%s1389_s1 + $0x106] ss:$16 sm:$0x3] %vm3_vm0, %v212_v35  }
  0x98   :  { %v218_v36 = vpop.permute.xlu0 %217   ;;  %v231_v37 = vpop.permute.xlu1 %230  }
  0x99   :  { %577 = vst.msk [vmem:[%s1389_s1 + $0x7] ss:$16 sm:$0x3] %vm3_vm0, %v218_v36   ;;  %578 = vst.msk [vmem:[%s1389_s1 + $0x7] ss:$16 sm:$0xc] %vm3_vm0, %v218_v36  }
  0x9a   :  { %579 = vst.msk [vmem:[%s1389_s1 + $0x7] ss:$16 sm:$0x30] %vm3_vm0, %v218_v36   ;;  %580 = vst.msk [vmem:[%s1389_s1 + $0x7] ss:$16 sm:$0xc0] %vm3_vm0, %v218_v36  }
  0x9b   :  { %582 = vst.msk [vmem:[%s1389_s1 + $0x87] ss:$16 sm:$0x3] %vm3_vm0, %v231_v37   ;;  %583 = vst.msk [vmem:[%s1389_s1 + $0x87] ss:$16 sm:$0xc] %vm3_vm0, %v231_v37  }
  0x9c   :  { %584 = vst.msk [vmem:[%s1389_s1 + $0x87] ss:$16 sm:$0x30] %vm3_vm0, %v231_v37   ;;  %585 = vst.msk [vmem:[%s1389_s1 + $0x87] ss:$16 sm:$0xc0] %vm3_vm0, %v231_v37   ;;  %v244_v38 = vpop.permute.xlu0 %243   ;;  %v250_v39 = vpop.permute.xlu1 %249  }
  0x9d   :  { %587 = vst.msk [vmem:[%s1389_s1 + $0x107] ss:$16 sm:$0x3] %vm3_vm0, %v244_v38   ;;  %588 = vst.msk [vmem:[%s1389_s1 + $0x8] ss:$16 sm:$0x3] %vm3_vm0, %v250_v39  }
  0x9e   :  { %589 = vst.msk [vmem:[%s1389_s1 + $0x8] ss:$16 sm:$0xc] %vm3_vm0, %v250_v39   ;;  %590 = vst.msk [vmem:[%s1389_s1 + $0x8] ss:$16 sm:$0x30] %vm3_vm0, %v250_v39  }
  0x9f   :  { %591 = vst.msk [vmem:[%s1389_s1 + $0x8] ss:$16 sm:$0xc0] %vm3_vm0, %v250_v39  }
  0xa0   :  { %v263_v40 = vpop.permute.xlu0 %262   ;;  %v276_v41 = vpop.permute.xlu1 %275  }
  0xa1   :  { %593 = vst.msk [vmem:[%s1389_s1 + $0x88] ss:$16 sm:$0x3] %vm3_vm0, %v263_v40   ;;  %594 = vst.msk [vmem:[%s1389_s1 + $0x88] ss:$16 sm:$0xc] %vm3_vm0, %v263_v40  }
  0xa2   :  { %595 = vst.msk [vmem:[%s1389_s1 + $0x88] ss:$16 sm:$0x30] %vm3_vm0, %v263_v40   ;;  %596 = vst.msk [vmem:[%s1389_s1 + $0x88] ss:$16 sm:$0xc0] %vm3_vm0, %v263_v40  }
  0xa3   :  { %598 = vst.msk [vmem:[%s1389_s1 + $0x108] ss:$16 sm:$0x3] %vm3_vm0, %v276_v41  }
  0xa4   :  { %v282_v42 = vpop.permute.xlu0 %281   ;;  %v295_v43 = vpop.permute.xlu1 %294  }
  0xa5   :  { %599 = vst.msk [vmem:[%s1389_s1 + $0x9] ss:$16 sm:$0x3] %vm3_vm0, %v282_v42   ;;  %600 = vst.msk [vmem:[%s1389_s1 + $0x9] ss:$16 sm:$0xc] %vm3_vm0, %v282_v42  }
  0xa6   :  { %601 = vst.msk [vmem:[%s1389_s1 + $0x9] ss:$16 sm:$0x30] %vm3_vm0, %v282_v42   ;;  %602 = vst.msk [vmem:[%s1389_s1 + $0x9] ss:$16 sm:$0xc0] %vm3_vm0, %v282_v42  }
  0xa7   :  { %604 = vst.msk [vmem:[%s1389_s1 + $0x89] ss:$16 sm:$0x3] %vm3_vm0, %v295_v43   ;;  %605 = vst.msk [vmem:[%s1389_s1 + $0x89] ss:$16 sm:$0xc] %vm3_vm0, %v295_v43  }
  0xa8   :  { %606 = vst.msk [vmem:[%s1389_s1 + $0x89] ss:$16 sm:$0x30] %vm3_vm0, %v295_v43   ;;  %607 = vst.msk [vmem:[%s1389_s1 + $0x89] ss:$16 sm:$0xc0] %vm3_vm0, %v295_v43   ;;  %v308_v44 = vpop.permute.xlu0 %307   ;;  %v314_v45 = vpop.permute.xlu1 %313  }
  0xa9   :  { %609 = vst.msk [vmem:[%s1389_s1 + $0x109] ss:$16 sm:$0x3] %vm3_vm0, %v308_v44   ;;  %610 = vst.msk [vmem:[%s1389_s1 + $0xa] ss:$16 sm:$0x3] %vm3_vm0, %v314_v45  }
  0xaa   :  { %611 = vst.msk [vmem:[%s1389_s1 + $0xa] ss:$16 sm:$0xc] %vm3_vm0, %v314_v45   ;;  %612 = vst.msk [vmem:[%s1389_s1 + $0xa] ss:$16 sm:$0x30] %vm3_vm0, %v314_v45  }
  0xab   :  { %613 = vst.msk [vmem:[%s1389_s1 + $0xa] ss:$16 sm:$0xc0] %vm3_vm0, %v314_v45  }
  0xac   :  { %v327_v46 = vpop.permute.xlu0 %326   ;;  %v340_v47 = vpop.permute.xlu1 %339  }
  0xad   :  { %615 = vst.msk [vmem:[%s1389_s1 + $0x8a] ss:$16 sm:$0x3] %vm3_vm0, %v327_v46   ;;  %616 = vst.msk [vmem:[%s1389_s1 + $0x8a] ss:$16 sm:$0xc] %vm3_vm0, %v327_v46  }
  0xae   :  { %617 = vst.msk [vmem:[%s1389_s1 + $0x8a] ss:$16 sm:$0x30] %vm3_vm0, %v327_v46   ;;  %618 = vst.msk [vmem:[%s1389_s1 + $0x8a] ss:$16 sm:$0xc0] %vm3_vm0, %v327_v46  }
  0xaf   :  { %620 = vst.msk [vmem:[%s1389_s1 + $0x10a] ss:$16 sm:$0x3] %vm3_vm0, %v340_v47  }
  0xb0   :  { %v346_v48 = vpop.permute.xlu0 %345   ;;  %v359_v49 = vpop.permute.xlu1 %358  }
  0xb1   :  { %621 = vst.msk [vmem:[%s1389_s1 + $0xb] ss:$16 sm:$0x3] %vm3_vm0, %v346_v48   ;;  %622 = vst.msk [vmem:[%s1389_s1 + $0xb] ss:$16 sm:$0xc] %vm3_vm0, %v346_v48  }
  0xb2   :  { %623 = vst.msk [vmem:[%s1389_s1 + $0xb] ss:$16 sm:$0x30] %vm3_vm0, %v346_v48   ;;  %624 = vst.msk [vmem:[%s1389_s1 + $0xb] ss:$16 sm:$0xc0] %vm3_vm0, %v346_v48  }
  0xb3   :  { %626 = vst.msk [vmem:[%s1389_s1 + $0x8b] ss:$16 sm:$0x3] %vm3_vm0, %v359_v49   ;;  %627 = vst.msk [vmem:[%s1389_s1 + $0x8b] ss:$16 sm:$0xc] %vm3_vm0, %v359_v49  }
  0xb4   :  { %628 = vst.msk [vmem:[%s1389_s1 + $0x8b] ss:$16 sm:$0x30] %vm3_vm0, %v359_v49   ;;  %629 = vst.msk [vmem:[%s1389_s1 + $0x8b] ss:$16 sm:$0xc0] %vm3_vm0, %v359_v49   ;;  %v372_v50 = vpop.permute.xlu0 %371   ;;  %v378_v51 = vpop.permute.xlu1 %377  }
  0xb5   :  { %631 = vst.msk [vmem:[%s1389_s1 + $0x10b] ss:$16 sm:$0x3] %vm3_vm0, %v372_v50   ;;  %632 = vst.msk [vmem:[%s1389_s1 + $0xc] ss:$16 sm:$0x3] %vm3_vm0, %v378_v51  }
  0xb6   :  { %633 = vst.msk [vmem:[%s1389_s1 + $0xc] ss:$16 sm:$0xc] %vm3_vm0, %v378_v51   ;;  %634 = vst.msk [vmem:[%s1389_s1 + $0xc] ss:$16 sm:$0x30] %vm3_vm0, %v378_v51  }
  0xb7   :  { %635 = vst.msk [vmem:[%s1389_s1 + $0xc] ss:$16 sm:$0xc0] %vm3_vm0, %v378_v51  }
  0xb8   :  { %v391_v52 = vpop.permute.xlu0 %390   ;;  %v404_v53 = vpop.permute.xlu1 %403  }
  0xb9   :  { %637 = vst.msk [vmem:[%s1389_s1 + $0x8c] ss:$16 sm:$0x3] %vm3_vm0, %v391_v52   ;;  %638 = vst.msk [vmem:[%s1389_s1 + $0x8c] ss:$16 sm:$0xc] %vm3_vm0, %v391_v52  }
  0xba   :  { %639 = vst.msk [vmem:[%s1389_s1 + $0x8c] ss:$16 sm:$0x30] %vm3_vm0, %v391_v52   ;;  %640 = vst.msk [vmem:[%s1389_s1 + $0x8c] ss:$16 sm:$0xc0] %vm3_vm0, %v391_v52  }
  0xbb   :  { %642 = vst.msk [vmem:[%s1389_s1 + $0x10c] ss:$16 sm:$0x3] %vm3_vm0, %v404_v53  }
  0xbc   :  { %v410_v54 = vpop.permute.xlu0 %409   ;;  %v423_v55 = vpop.permute.xlu1 %422  }
  0xbd   :  { %643 = vst.msk [vmem:[%s1389_s1 + $0xd] ss:$16 sm:$0x3] %vm3_vm0, %v410_v54   ;;  %644 = vst.msk [vmem:[%s1389_s1 + $0xd] ss:$16 sm:$0xc] %vm3_vm0, %v410_v54  }
  0xbe   :  { %645 = vst.msk [vmem:[%s1389_s1 + $0xd] ss:$16 sm:$0x30] %vm3_vm0, %v410_v54   ;;  %646 = vst.msk [vmem:[%s1389_s1 + $0xd] ss:$16 sm:$0xc0] %vm3_vm0, %v410_v54  }
  0xbf   :  { %648 = vst.msk [vmem:[%s1389_s1 + $0x8d] ss:$16 sm:$0x3] %vm3_vm0, %v423_v55   ;;  %649 = vst.msk [vmem:[%s1389_s1 + $0x8d] ss:$16 sm:$0xc] %vm3_vm0, %v423_v55  }
  0xc0   :  { %650 = vst.msk [vmem:[%s1389_s1 + $0x8d] ss:$16 sm:$0x30] %vm3_vm0, %v423_v55   ;;  %651 = vst.msk [vmem:[%s1389_s1 + $0x8d] ss:$16 sm:$0xc0] %vm3_vm0, %v423_v55   ;;  %v436_v56 = vpop.permute.xlu0 %435   ;;  %v442_v57 = vpop.permute.xlu1 %441  }
  0xc1   :  { %653 = vst.msk [vmem:[%s1389_s1 + $0x10d] ss:$16 sm:$0x3] %vm3_vm0, %v436_v56   ;;  %654 = vst.msk [vmem:[%s1389_s1 + $0xe] ss:$16 sm:$0x3] %vm3_vm0, %v442_v57  }
  0xc2   :  { %655 = vst.msk [vmem:[%s1389_s1 + $0xe] ss:$16 sm:$0xc] %vm3_vm0, %v442_v57   ;;  %656 = vst.msk [vmem:[%s1389_s1 + $0xe] ss:$16 sm:$0x30] %vm3_vm0, %v442_v57  }
  0xc3   :  { %657 = vst.msk [vmem:[%s1389_s1 + $0xe] ss:$16 sm:$0xc0] %vm3_vm0, %v442_v57  }
  0xc4   :  { %v455_v58 = vpop.permute.xlu0 %454   ;;  %v468_v59 = vpop.permute.xlu1 %467  }
  0xc5   :  { %659 = vst.msk [vmem:[%s1389_s1 + $0x8e] ss:$16 sm:$0x3] %vm3_vm0, %v455_v58   ;;  %660 = vst.msk [vmem:[%s1389_s1 + $0x8e] ss:$16 sm:$0xc] %vm3_vm0, %v455_v58  }
  0xc6   :  { %661 = vst.msk [vmem:[%s1389_s1 + $0x8e] ss:$16 sm:$0x30] %vm3_vm0, %v455_v58   ;;  %662 = vst.msk [vmem:[%s1389_s1 + $0x8e] ss:$16 sm:$0xc0] %vm3_vm0, %v455_v58  }
  0xc7   :  { %664 = vst.msk [vmem:[%s1389_s1 + $0x10e] ss:$16 sm:$0x3] %vm3_vm0, %v468_v59  }
  0xc8   :  { %v474_v60 = vpop.permute.xlu0 %473   ;;  %v487_v61 = vpop.permute.xlu1 %486  }
  0xc9   :  { %665 = vst.msk [vmem:[%s1389_s1 + $0xf] ss:$16 sm:$0x3] %vm3_vm0, %v474_v60   ;;  %666 = vst.msk [vmem:[%s1389_s1 + $0xf] ss:$16 sm:$0xc] %vm3_vm0, %v474_v60  }
  0xca   :  { %667 = vst.msk [vmem:[%s1389_s1 + $0xf] ss:$16 sm:$0x30] %vm3_vm0, %v474_v60   ;;  %668 = vst.msk [vmem:[%s1389_s1 + $0xf] ss:$16 sm:$0xc0] %vm3_vm0, %v474_v60  }
  0xcb   :  { %670 = vst.msk [vmem:[%s1389_s1 + $0x8f] ss:$16 sm:$0x3] %vm3_vm0, %v487_v61   ;;  %671 = vst.msk [vmem:[%s1389_s1 + $0x8f] ss:$16 sm:$0xc] %vm3_vm0, %v487_v61  }
  0xcc   :  { %672 = vst.msk [vmem:[%s1389_s1 + $0x8f] ss:$16 sm:$0x30] %vm3_vm0, %v487_v61   ;;  %673 = vst.msk [vmem:[%s1389_s1 + $0x8f] ss:$16 sm:$0xc0] %vm3_vm0, %v487_v61   ;;  %v500_v62 = vpop.permute.xlu0 %499  }
  0xcd   :  { %675 = vst.msk [vmem:[%s1389_s1 + $0x10f] ss:$16 sm:$0x3] %vm3_vm0, %v500_v62  }

// kernel: diffusion_loss.21
= control target key start
LH: loop header
LB: loop body
LE: loop exit
PB: predicated region body
PF: predicated region fallthrough
CT: control target
= control target key end

     0   :  { %14 = vsyncpa [#allocation3], 0  ;;  %s9627_s0 = inlined_call_operand.vmem [shape: f32[2], index: 0, kind: input, shape index: {}]   ;;  %s9628_s1 = inlined_call_operand.vmem [shape: f32[2], index: 1, kind: input, shape index: {}]   ;;  %s9629_s2 = inlined_call_operand.vmem [shape: f32[288,1], index: 2, kind: input, shape index: {}]   ;;  %s9630_s3 = inlined_call_operand.vmem [shape: f32[2,16,16,4], index: 3, kind: input, shape index: {}]   ;;  %s9631_s4 = inlined_call_operand.vmem [shape: f32[2,16,16,4], index: 4, kind: input, shape index: {}]   ;;  %s9632_s5 = inlined_call_operand.vmem [shape: f32[36,32], index: 5, kind: input, shape index: {}]   ;;  %s9633_s6 = inlined_call_operand.vmem [shape: f32[2,1,32], index: 6, kind: input, shape index: {}]   ;;  %s9634_s7 = inlined_call_operand.vmem [shape: bf16[288,128], index: 7, kind: input, shape index: {}]   ;;  %s9635_s8 = inlined_call_operand.vmem [shape: f32[1,128], index: 8, kind: input, shape index: {}]   ;;  %s9636_s9 = inlined_call_operand.vmem [shape: f32[2,1,128], index: 9, kind: output, shape index: {}]  }
   0x1   :  { %15 = vsyncpa [#allocation5], 0  ;;  %s5792_s30 = smov 0  }
   0x2 LB: > { %s5798_s10 = sadd.s32 4294967295, %s5726_s30   ;;  %p5172_p0 = scmp.ge.s32.totalorder %s5726_s30, 1  ;;  %s5726_s30 = sphi %s5792_s30, %s21_s30  }
   0x3   : > { %p256_p1 = scmp.lt.s32.totalorder %s5726_s30, 3  ;;  %s269_s13 = sshll.u32 %s9627_s0, 4  ;;  %s270_s13 = int_to_ptr.vmem [resolvable:$true] %s269_s13 }
   0x4   : > { %p9637_p3 = scmp.eq.s32.totalorder %s5798_s10, 0  ;;  %s280_s17 = sshll.u32 %s9628_s1, 4  ;;  %s281_s17 = int_to_ptr.vmem [resolvable:$true] %s280_s17 }
   0x5   : > { %p5805_p2 = pnand %p5172_p0, %p256_p1  ;;  %s5682_s19 = scalar_lea.vmem %s270_s13, 16 }
   0x6   : > { %p5683_p6 = scmp.ne.s32.totalorder %s270_s13, %s5682_s19  ;;  %p5690_p10 = scmp.lt.s32.totalorder %s270_s13, %s270_s13 }
   0x7   : > { %s9797_s14 = scalar_select %p5805_p2, 1, 0 }
   0x8   : > { %p5583_p4 = pneg %p5805_p2  ;;  %p5691_p11 = scmp.lt.s32.totalorder %s5682_s19, %s5682_s19 }
   0xa   : > { %p5817_p5 = pnand %p9637_p3, %p5583_p4  ;;  %p5692_p12 = por %p5691_p11, %p5690_p10 }
   0xc   : > { %p5684_p7 = pneg %p5817_p5 }
   0xe   : > { %p5685_p8 = pnand %p5684_p7, %p5683_p6 }
  0x10   : > { %p5686_p9 = pneg %p5685_p8 }
  0x12   : > { %p5693_p13 = pnand %p5692_p12, %p5686_p9 }
  0x14   : > { %5696 = shalt.err (!%p5693_p13)
}
  0x15   : > { %s5728_s20 = smov [#allocation2]   ;;  %s5697_s21 = scalar_lea.vmem %s281_s17, 16 }
  0x16   : > { %5586 = dma.vmem_to_smem (!%p5817_p5), %s270_s13, 16, %s5728_s20, [#allocation3]  }
  0x17   : > { %p5698_p0 = scmp.ne.s32.totalorder %s281_s17, %s5697_s21  ;;  %p5705_p3 = scmp.lt.s32.totalorder %s281_s17, %s281_s17 }
  0x18   : > { %p5706_p2 = scmp.lt.s32.totalorder %s5697_s21, %s5697_s21 }
  0x19   : > { %p5700_p1 = pnand %p5698_p0, %p5684_p7 }
  0x1a   : > { %p5707_p6 = por %p5706_p2, %p5705_p3 }
  0x1b   : > { %p5701_p4 = pneg %p5700_p1 }
  0x1d   : > { %p5708_p8 = pnand %p5707_p6, %p5701_p4 }
  0x1f   : > { %5711 = shalt.err (!%p5708_p8)
}
  0x20   : > { %s5729_s22 = smov [#allocation4]   ;;  %p9799_p9 = scmp.ne.s32.totalorder %s9797_s14, 0 }
  0x21   : > { %5589 = dma.vmem_to_smem (!%p5817_p5), %s281_s17, 16, %s5729_s22, [#allocation5]  }
  0x22   : > { %327 = sbr.rel (%p9799_p9) target bundleno = 1503 (0x5df), region = 56 }
  0x29   : > { %p9800_p10 = scmp.eq.s32.totalorder %s5798_s10, 0 }
  0x2b   : > { %5717 = dma.done.wait (%p9800_p10), [#allocation3], 16   ;;  %p9801_p11 = pmov %p9800_p10 }
  0x2c   : > { %p9802_p7 = pmov %p9800_p10 }
  0x2d   : > { %5719 = vsyncadd (%p9801_p11), [#allocation3], 4294967280 }
  0x2e   : > { %5721 = dma.done.wait (%p9802_p7), [#allocation5], 16   ;;  %p9803_p2 = pmov %p9802_p7 }
  0x30   : > { %5723 = vsyncadd (%p9803_p2), [#allocation5], 4294967280 }
  0x31   : > { %337 = sfence }
  0x32   : > { %v5840_v0 = vld [vmem:[%s9629_s2 + $0x10] sm:$0xff]  ;;  %v5845_v1 = vld [vmem:[%s9629_s2] sm:$0xff]  ;;  %v5850_v2 = vld [vmem:[%s9629_s2 + $0x18] sm:$0xff]  ;;  %v9646_v3 = vmov 0   ;;  %p374_p3 = scmp.lt.s32.totalorder %s5798_s10, 1  ;;  %s5991_s13 = sld [smem:[#allocation2 + %s5798_s10]] }
  0x33   : > { %5617 = vset.pattern.permute.xlu1 %v9646_v3  ;;  %5616 = vset.pattern.permute.xlu0 %v9646_v3  ;;  %vm431_vm0 = vcmp.ge.f32.partialorder %v5840_v0, 1.0  ;;  %vm429_vm1 = vcmp.ge.f32.partialorder %v5845_v1, 1.0  ;;  %vm432_vm2 = vcmp.ge.f32.partialorder %v5850_v2, 1.0  ;;  %v5860_v4 = vld [vmem:[%s9629_s2 + $0x8] sm:$0xff]  ;;  %v5873_v8 = vld [vmem:[%s9629_s2 + $0x20] sm:$0xff]  ;;  %v5882_v11 = vld [vmem:[%s9629_s2 + $0x38] sm:$0xff] }
  0x34   : > { %v667_v5 = vsel %vm431_vm0, 1, %v9646_v3  ;;  %v665_v6 = vsel %vm429_vm1, 1, %v9646_v3  ;;  %vm430_vm3 = vcmp.ge.f32.partialorder %v5860_v4, 1.0  ;;  %v5868_v7 = vld [vmem:[%s9629_s2 + $0x28] sm:$0xff]  ;;  %v668_v9 = vsel %vm432_vm2, 1, %v9646_v3  ;;  %v5887_v12 = vld [vmem:[%s9629_s2 + $0x30] sm:$0xff] }
  0x35   : > { %708 = vperm.xlu1 %5617, %v667_v5   ;;  %702 = vperm.xlu0 %5616, %v665_v6   ;;  %v666_v10 = vsel %vm430_vm3, 1, %v9646_v3  ;;  %vm434_vm4 = vcmp.ge.f32.partialorder %v5868_v7, 1.0  ;;  %vm433_vm5 = vcmp.ge.f32.partialorder %v5873_v8, 1.0  ;;  %vm436_vm6 = vcmp.ge.f32.partialorder %v5882_v11, 1.0  ;;  %v5896_v15 = vld [vmem:[%s9629_s2 + $0x48] sm:$0xff]  ;;  %v5901_v16 = vld [vmem:[%s9629_s2 + $0x40] sm:$0xff] }
  0x36   : > { %v670_v13 = vsel %vm434_vm4, 1, %v9646_v3  ;;  %v669_v14 = vsel %vm433_vm5, 1, %v9646_v3  ;;  %vm435_vm7 = vcmp.ge.f32.partialorder %v5887_v12, 1.0  ;;  %v672_v17 = vsel %vm436_vm6, 1, %v9646_v3  ;;  %v5910_v19 = vld [vmem:[%s9629_s2 + $0x58] sm:$0xff]  ;;  %v5915_v20 = vld [vmem:[%s9629_s2 + $0x50] sm:$0xff] }
  0x37   : > { %v671_v18 = vsel %vm435_vm7, 1, %v9646_v3  ;;  %vm438_vm8 = vcmp.ge.f32.partialorder %v5896_v15, 1.0  ;;  %vm437_vm9 = vcmp.ge.f32.partialorder %v5901_v16, 1.0  ;;  %vm440_vm10 = vcmp.ge.f32.partialorder %v5910_v19, 1.0  ;;  %v5924_v23 = vld [vmem:[%s9629_s2 + $0x68] sm:$0xff]  ;;  %v5929_v24 = vld [vmem:[%s9629_s2 + $0x60] sm:$0xff] }
  0x38   : > { %v674_v21 = vsel %vm438_vm8, 1, %v9646_v3  ;;  %v673_v22 = vsel %vm437_vm9, 1, %v9646_v3  ;;  %vm439_vm11 = vcmp.ge.f32.partialorder %v5915_v20, 1.0  ;;  %v676_v25 = vsel %vm440_vm10, 1, %v9646_v3  ;;  %v5938_v27 = vld [vmem:[%s9629_s2 + $0x78] sm:$0xff]  ;;  %v5943_v28 = vld [vmem:[%s9629_s2 + $0x70] sm:$0xff] }
  0x39   : > { %711 = vperm.xlu1 %5617, %v668_v9   ;;  %705 = vperm.xlu0 %5616, %v666_v10   ;;  %v675_v26 = vsel %vm439_vm11, 1, %v9646_v3  ;;  %vm442_vm12 = vcmp.ge.f32.partialorder %v5924_v23, 1.0  ;;  %vm441_vm13 = vcmp.ge.f32.partialorder %v5929_v24, 1.0  ;;  %v5949_v29 = vld [vmem:[%s9629_s2 + $0x88] sm:$0xff]  ;;  %v5956_v32 = vld [vmem:[%s9629_s2 + $0x80] sm:$0xff]  ;;  %vm444_vm14 = vcmp.ge.f32.partialorder %v5938_v27, 1.0 }
  0x3a   : > { %v678_v30 = vsel %vm442_vm12, 1, %v9646_v3  ;;  %v677_v31 = vsel %vm441_vm13, 1, %v9646_v3  ;;  %vm443_vm15 = vcmp.ge.f32.partialorder %v5943_v28, 1.0  ;;  %v5963_v33 = vld [vmem:[%s9629_s2 + $0x98] sm:$0xff]  ;;  %vm446_vm0 = vcmp.ge.f32.partialorder %v5949_v29, 1.0  ;;  %v5969_v34 = vld [vmem:[%s9629_s2 + $0x90] sm:$0xff] }
  0x3b   : > { %9804 = vst [vmem:[#allocation8_spill] sm:$0xff] %v5969_v34  ;;  %v5974_v35 = vld [vmem:[%s9629_s2 + $0xa8] sm:$0xff]  ;;  %s5977_s27 = scalar_select %p374_p3, %s5798_s10, 1  ;;  %vm445_vm1 = vcmp.ge.f32.partialorder %v5956_v32, 1.0  ;;  %v5983_v36 = vld [vmem:[%s9629_s2 + $0xa0] sm:$0xff]  ;;  %v5988_v37 = vld [vmem:[%s9629_s2 + $0xb8] sm:$0xff] }
  0x3c   : > { %9805 = vst [vmem:[#allocation9_spill] sm:$0xff] %v5974_v35  ;;  %9806 = vst [vmem:[#allocation10_spill] sm:$0xff] %v5983_v36  ;;  %v680_v38 = vsel %vm444_vm14, 1, %v9646_v3  ;;  %v679_v39 = vsel %vm443_vm15, 1, %v9646_v3  ;;  %vm448_vm2 = vcmp.ge.f32.partialorder %v5963_v33, 1.0  ;;  %v5999_v40 = vld [vmem:[%s9629_s2 + $0xb0] sm:$0xff] }
  0x3d   : > { %717 = vperm.xlu1 %5617, %v670_v13   ;;  %714 = vperm.xlu0 %5616, %v669_v14   ;;  %9807 = vst [vmem:[#allocation11_spill] sm:$0xff] %v5988_v37  ;;  %9808 = vst [vmem:[#allocation12_spill] sm:$0xff] %v5999_v40  ;;  %v6004_v41 = vld [vmem:[%s9629_s2 + $0xc8] sm:$0xff]  ;;  %v6009_v42 = vld [vmem:[%s9629_s2 + $0xc0] sm:$0xff]  ;;  %v682_v43 = vsel %vm446_vm0, 1, %v9646_v3  ;;  %vm447_vm3 = vcmp.ge.f32.partialorder %v5969_v34, 1.0  ;;  %s8060_s23 = scalar_lea.vmem %s9633_s6, %s5977_s27  ;;  %s389_s29 = scalar_lea.vmem %s9636_s9, %s5977_s27 }
  0x3e   : > { %9809 = vst [vmem:[#allocation13_spill] sm:$0xff] %v6004_v41  ;;  %9810 = vst [vmem:[#allocation14_spill] sm:$0xff] %v6009_v42  ;;  %vm450_vm4 = vcmp.ge.f32.partialorder %v5974_v35, 1.0  ;;  %v6019_v44 = vld [vmem:[%s9629_s2 + $0xd8] sm:$0xff]  ;;  %v6024_v45 = vld [vmem:[%s9629_s2 + $0xd0] sm:$0xff]  ;;  %s6027_s24 = sld [smem:[#allocation4 + %s5798_s10]] }
  0x3f   : > { %9811 = vst [vmem:[#allocation15_spill] sm:$0xff] %v6019_v44  ;;  %9812 = vst [vmem:[#allocation16_spill] sm:$0xff] %v6024_v45  ;;  %v681_v46 = vsel %vm445_vm1, 1, %v9646_v3  ;;  %vm449_vm5 = vcmp.ge.f32.partialorder %v5983_v36, 1.0  ;;  %vm452_vm6 = vcmp.ge.f32.partialorder %v5988_v37, 1.0  ;;  %v6037_v47 = vld [vmem:[%s9629_s2 + $0xe8] sm:$0xff] }
  0x40   : > { %9813 = vst [vmem:[#allocation17_spill] sm:$0xff] %v6037_v47  ;;  %v6042_v48 = vld [vmem:[%s9629_s2 + $0xe0] sm:$0xff]  ;;  %s5288_s10 = sshll.u32 %s5977_s27, 8  ;;  %v684_v49 = vsel %vm448_vm2, 1, %v9646_v3  ;;  %vm451_vm7 = vcmp.ge.f32.partialorder %v5999_v40, 1.0  ;;  %vm454_vm8 = vcmp.ge.f32.partialorder %v6004_v41, 1.0 }
  0x41   : > { %723 = vperm.xlu1 %5617, %v672_v17   ;;  %720 = vperm.xlu0 %5616, %v671_v18   ;;  %9814 = vst [vmem:[#allocation18_spill] sm:$0xff] %v6042_v48  ;;  %vm453_vm9 = vcmp.ge.f32.partialorder %v6009_v42, 1.0  ;;  %v6054_v50 = vld [vmem:[%s9629_s2 + $0xf8] sm:$0xff]  ;;  %v683_v51 = vsel %vm447_vm3, 1, %v9646_v3  ;;  %v6062_v52 = vsel %vm450_vm4, 1, %v9646_v3  ;;  %vm456_vm10 = vcmp.ge.f32.partialorder %v6019_v44, 1.0  ;;  %s6091_s20 = scalar_lea.vmem %s9630_s3, %s5288_s10  ;;  %s6111_s26 = scalar_lea.vmem %s9631_s4, %s5288_s10 }
  0x42   : > { %9815 = vst [vmem:[#allocation19_spill] sm:$0xff] %v6054_v50  ;;  %vm455_vm11 = vcmp.ge.f32.partialorder %v6024_v45, 1.0  ;;  %v6069_v53 = vld [vmem:[%s9629_s2 + $0xf0] sm:$0xff]  ;;  %v6074_v54 = vsel %vm449_vm5, 1, %v9646_v3  ;;  %v6079_v55 = vsel %vm452_vm6, 1, %v9646_v3  ;;  %vm458_vm12 = vcmp.ge.f32.partialorder %v6037_v47, 1.0 }
  0x43   : > { %9816 = vst [vmem:[#allocation20_spill] sm:$0xff] %v6069_v53  ;;  %vm457_vm13 = vcmp.ge.f32.partialorder %v6042_v48, 1.0  ;;  %v6086_v56 = vld [vmem:[%s9629_s2 + $0x108] sm:$0xff]  ;;  %v6094_v57 = vsel %vm451_vm7, 1, %v9646_v3  ;;  %v6097_v58 = vsel %vm454_vm8, 1, %v9646_v3  ;;  %v6100_v59 = vsel %vm453_vm9, 1, %v9646_v3 }
  0x44   : > { %9817 = vst [vmem:[#allocation21_spill] sm:$0xff] %v6086_v56  ;;  %vm460_vm14 = vcmp.ge.f32.partialorder %v6054_v50, 1.0  ;;  %v6106_v60 = vld [vmem:[%s9629_s2 + $0x100] sm:$0xff]  ;;  %v538_v61 = vld [vmem:[%s6091_s20 + $0x28] sm:$0xff]  ;;  %v6117_v62 = vsel %vm456_vm10, 1, %v9646_v3  ;;  %v6122_v63 = vsel %vm455_vm11, 1, %v9646_v3  ;;  %v6145_v17 = vstv %s5991_s13 }
  0x45   : > { %729 = vperm.xlu1 %5617, %v674_v21   ;;  %726 = vperm.xlu0 %5616, %v673_v22   ;;  %9818 = vst [vmem:[#allocation22_spill] sm:$0xff] %v6106_v60  ;;  %vm459_vm15 = vcmp.ge.f32.partialorder %v6069_v53, 1.0  ;;  %v428_v5 = vld [vmem:[%s9629_s2 + $0x118] sm:$0xff]  ;;  %v506_v6 = vld [vmem:[%s6111_s26 + $0x28] sm:$0xff]  ;;  %v539_v9 = vld [vmem:[%s6091_s20 + $0x30] sm:$0xff]  ;;  %v6133_v10 = vsel %vm458_vm12, 1, %v9646_v3 }
  0x46   : > { %v6138_v13 = vsel %vm457_vm13, 1, %v9646_v3  ;;  %vm462_vm0 = vcmp.ge.f32.partialorder %v6086_v56, 1.0  ;;  %v427_v14 = vld [vmem:[%s9629_s2 + $0x110] sm:$0xff]  ;;  %v540_v21 = vld [vmem:[%s6091_s20 + $0x38] sm:$0xff]  ;;  %v6152_v22 = vsel %vm460_vm14, 1, %v9646_v3  ;;  %vm461_vm1 = vcmp.ge.f32.partialorder %v6106_v60, 1.0 }
  0x47   : > { %v507_v18 = vld [vmem:[%s6111_s26 + $0x30] sm:$0xff]  ;;  %vm464_vm2 = vcmp.ge.f32.partialorder %v428_v5, 1.0  ;;  %v542_v50 = vld [vmem:[%s6091_s20 + $0x48] sm:$0xff]  ;;  %vm463_vm3 = vcmp.ge.f32.partialorder %v427_v14, 1.0  ;;  %v574_v53 = vmul.f32 %v6145_v17, %v540_v21  ;;  %v544_v14 = vld [vmem:[%s6091_s20 + $0x58] sm:$0xff]  ;;  %vm878_vm4 = vcmask 1040384  }
  0x48   : > { %v510_v47 = vld [vmem:[%s6111_s26 + $0x48] sm:$0xff]  ;;  %v543_v56 = vld [vmem:[%s6091_s20 + $0x50] sm:$0xff]  ;;  %v6191_v21 = vsel %vm464_vm2, 1, %v9646_v3  ;;  %v576_v60 = vmul.f32 %v6145_v17, %v542_v50  ;;  %v516_v41 = vld [vmem:[%s6111_s26 + $0x78] sm:$0xff]  ;;  %vm466_vm5 = vcmp.le.f32.partialorder %v5860_v4, 14.0  ;;  %vm465_vm6 = vcmp.le.f32.partialorder %v5845_v1, 14.0 }
  0x49   : > { %735 = vperm.xlu1 %5617, %v676_v25   ;;  %732 = vperm.xlu0 %5616, %v675_v26   ;;  %v6156_v25 = vstv %s6027_s24  ;;  %v572_v26 = vmul.f32 %v6145_v17, %v538_v61  ;;  %v6173_v61 = vsel %vm462_vm0, 1, %v9646_v3  ;;  %v547_v40 = vld [vmem:[%s6091_s20 + $0x70] sm:$0xff]  ;;  %v548_v37 = vld [vmem:[%s6091_s20 + $0x78] sm:$0xff]  ;;  %vm468_vm7 = vcmp.le.f32.partialorder %v5850_v2, 14.0  ;;  %s5732_s13 = smov 4   ;;  %s5733_s24 = smov 8  }
  0x4a   : > { %v607_v48 = vmul.f32 %v6156_v25, %v507_v18  ;;  %v610_v5 = vmul.f32 %v6156_v25, %v510_v47  ;;  %v546_v47 = vld [vmem:[%s6091_s20 + $0x68] sm:$0xff]  ;;  %vm467_vm8 = vcmp.le.f32.partialorder %v5840_v0, 14.0  ;;  %vm470_vm9 = vcmp.le.f32.partialorder %v5868_v7, 14.0  ;;  %s5734_s12 = smov 12   ;;  %s5735_s14 = smov 16  }
  0x4b   : > { %vm469_vm10 = vcmp.le.f32.partialorder %v5873_v8, 14.0  ;;  %vm472_vm11 = vcmp.le.f32.partialorder %v5882_v11, 14.0  ;;  %vm471_vm12 = vcmp.le.f32.partialorder %v5887_v12, 14.0  ;;  %vm474_vm13 = vcmp.le.f32.partialorder %v5896_v15, 14.0  ;;  %s5736_s15 = smov 20   ;;  %s5737_s16 = smov 24  }
  0x4c   : > { %v6218_v44 = vadd.f32 %v610_v5, %v576_v60  ;;  %vm473_vm14 = vcmp.le.f32.partialorder %v5901_v16, 14.0  ;;  %vm475_vm0 = vcmp.le.f32.partialorder %v5915_v20, 14.0  ;;  %vm478_vm2 = vcmp.le.f32.partialorder %v5924_v23, 14.0  ;;  %s5738_s28 = smov 28   ;;  %s5739_s11 = smov 32  }
  0x4d   : > { %741 = vperm.xlu1 %5617, %v678_v30   ;;  %738 = vperm.xlu0 %5616, %v677_v31   ;;  %v508_v30 = vld [vmem:[%s6111_s26 + $0x38] sm:$0xff]  ;;  %v541_v31 = vld [vmem:[%s6091_s20 + $0x40] sm:$0xff]  ;;  %s5740_s17 = smov 64   ;;  %s5741_s22 = smov 96  }
  0x4e   : > { %v899_v60 = vrot.slane %v6218_v44, 7  ;;  %v1217_v20 = vrot.slane %v6218_v44, 1 }
  0x51   : > { %747 = vperm.xlu1 %5617, %v680_v38   ;;  %744 = vperm.xlu0 %5616, %v679_v39   ;;  %v6164_v38 = vsel %vm459_vm15, 1, %v9646_v3  ;;  %v606_v39 = vmul.f32 %v6156_v25, %v506_v6  ;;  %v6181_v6 = vsel %vm461_vm1, 1, %v9646_v3  ;;  %vm476_vm15 = vcmp.le.f32.partialorder %v5910_v19, 14.0 }
  0x52   : > { %vm1196_vm1 = vcmask 1046528  }
  0x55   : > { %753 = vperm.xlu1 %5617, %v682_v43   ;;  %750 = vperm.xlu0 %5616, %v681_v46   ;;  %v573_v43 = vmul.f32 %v6145_v17, %v539_v9  ;;  %v509_v46 = vld [vmem:[%s6111_s26 + $0x40] sm:$0xff]  ;;  %v575_v9 = vmul.f32 %v6145_v17, %v541_v31  ;;  %v514_v31 = vld [vmem:[%s6111_s26 + $0x68] sm:$0xff] }
  0x56   : > { %v609_v45 = vmul.f32 %v6156_v25, %v509_v46 }
  0x57   : > { %v6193_v18 = vadd.f32 %v607_v48, %v573_v43  ;;  %v512_v48 = vld [vmem:[%s6111_s26 + $0x58] sm:$0xff]  ;;  %v545_v43 = vld [vmem:[%s6091_s20 + $0x60] sm:$0xff] }
  0x58   : > { %v6210_v46 = vadd.f32 %v609_v45, %v575_v9  ;;  %v579_v5 = vmul.f32 %v6145_v17, %v545_v43 }
  0x59   : > { %759 = vperm.xlu1 %5617, %v684_v49   ;;  %756 = vperm.xlu0 %5616, %v683_v51   ;;  %v6183_v49 = vadd.f32 %v606_v39, %v572_v26  ;;  %v608_v51 = vmul.f32 %v6156_v25, %v508_v30  ;;  %v511_v26 = vld [vmem:[%s6111_s26 + $0x50] sm:$0xff]  ;;  %v6199_v30 = vsel %vm463_vm3, 1, %v9646_v3  ;;  %v893_v50 = vrot.slane %v6193_v18, 7 }
  0x5a   : > { %v577_v3 = vmul.f32 %v6145_v17, %v543_v56  ;;  %v897_v9 = vrot.slane %v6210_v46, 7  ;;  %v611_v56 = vmul.f32 %v6156_v25, %v511_v26  ;;  %v9666_v11 = vrot.slane %v6193_v18, 1 }
  0x5b   : > { %9819 = vst [vmem:[#allocation23_spill] sm:$0xff] %v6183_v49  ;;  %v6202_v39 = vadd.f32 %v608_v51, %v574_v53  ;;  %v578_v53 = vmul.f32 %v6145_v17, %v544_v14  ;;  %v513_v51 = vld [vmem:[%s6111_s26 + $0x60] sm:$0xff]  ;;  %v9820_v42 = vrot.slane %v6183_v49, 7  ;;  %v612_v14 = vmul.f32 %v6156_v25, %v512_v48 }
  0x5c   : > { %v6244_v48 = vadd.f32 %v611_v56, %v577_v3  ;;  %v613_v43 = vmul.f32 %v6156_v25, %v513_v51  ;;  %v517_v49 = vld [vmem:[%s6111_s26 + $0x80] sm:$0xff]  ;;  %v582_v3 = vmul.f32 %v6145_v17, %v548_v37  ;;  %v550_v56 = vld [vmem:[%s6091_s20 + $0x88] sm:$0xff]  ;;  %vm477_vm3 = vcmp.le.f32.partialorder %v5929_v24, 14.0 }
  0x5d   : > { %765 = vperm.xlu1 %5617, %v6062_v52   ;;  %762 = vperm.xlu0 %5616, %v6074_v54   ;;  %v895_v52 = vrot.slane %v6202_v39, 7  ;;  %v515_v54 = vld [vmem:[%s6111_s26 + $0x70] sm:$0xff]  ;;  %v6224_v45 = vsel %vm878_vm4, %v9820_v42, %v893_v50  ;;  %v580_v42 = vmul.f32 %v6145_v17, %v546_v47  ;;  %v614_v47 = vmul.f32 %v6156_v25, %v514_v31 }
  0x5e   : > { %9821 = vst [vmem:[#allocation24_spill] sm:$0xff] %v6224_v45  ;;  %v549_v45 = vld [vmem:[%s6091_s20 + $0x80] sm:$0xff]  ;;  %v617_v35 = vmul.f32 %v6156_v25, %v517_v49  ;;  %v555_v49 = vld [vmem:[%s6091_s20 + $0xb0] sm:$0xff]  ;;  %v1213_v12 = vrot.slane %v6202_v39, 1 }
  0x5f   : > { %v6233_v36 = vsel %vm878_vm4, %v893_v50, %v895_v52  ;;  %v6242_v26 = vsel %vm878_vm4, %v895_v52, %v897_v9  ;;  %v6246_v50 = vadd.f32 %v612_v14, %v578_v53  ;;  %v615_v53 = vmul.f32 %v6156_v25, %v515_v54  ;;  %v551_v14 = vld [vmem:[%s6091_s20 + $0x90] sm:$0xff] }
  0x60   : > { %9822 = vst [vmem:[#allocation25_spill] sm:$0xff] %v6233_v36  ;;  %9823 = vst [vmem:[#allocation26_spill] sm:$0xff] %v6242_v26  ;;  %v6249_v36 = vsel %vm878_vm4, %v897_v9, %v899_v60  ;;  %v518_v9 = vld [vmem:[%s6111_s26 + $0x88] sm:$0xff]  ;;  %v6262_v26 = vadd.f32 %v613_v43, %v579_v5  ;;  %v6264_v31 = vadd.f32 %v614_v47, %v580_v42  ;;  %v519_v42 = vld [vmem:[%s6111_s26 + $0x90] sm:$0xff] }
  0x61   : > { %771 = vperm.xlu1 %5617, %v6079_v55   ;;  %768 = vperm.xlu0 %5616, %v6094_v57   ;;  %9824 = vst [vmem:[#allocation27_spill] sm:$0xff] %v6249_v36  ;;  %v581_v55 = vmul.f32 %v6145_v17, %v547_v40  ;;  %v901_v57 = vrot.slane %v6244_v48, 7  ;;  %v903_v52 = vrot.slane %v6246_v50, 7  ;;  %v616_v40 = vmul.f32 %v6156_v25, %v516_v41  ;;  %v552_v36 = vld [vmem:[%s6091_s20 + $0x98] sm:$0xff]  ;;  %v521_v47 = vld [vmem:[%s6111_s26 + $0xa0] sm:$0xff] }
  0x62   : > { %9825 = vst [vmem:[#allocation28_spill] sm:$0xff] %v6262_v26  ;;  %v583_v51 = vmul.f32 %v6145_v17, %v549_v45  ;;  %v520_v41 = vld [vmem:[%s6111_s26 + $0x98] sm:$0xff]  ;;  %v905_v45 = vrot.slane %v6262_v26, 7  ;;  %v6506_v19 = vsel %vm1196_vm1, %v9666_v11, %v1213_v12  ;;  %v1221_v23 = vrot.slane %v6246_v50, 1 }
  0x63   : > { %v6272_v37 = vsel %vm878_vm4, %v901_v57, %v903_v52  ;;  %v6275_v54 = vsel %vm878_vm4, %v899_v60, %v901_v57  ;;  %v6277_v5 = vadd.f32 %v615_v53, %v581_v55  ;;  %v6283_v43 = vadd.f32 %v616_v40, %v582_v3  ;;  %v522_v57 = vld [vmem:[%s6111_s26 + $0xa8] sm:$0xff]  ;;  %v553_v53 = vld [vmem:[%s6091_s20 + $0xa0] sm:$0xff] }
  0x64   : > { %9826 = vst [vmem:[#allocation29_spill] sm:$0xff] %v6272_v37  ;;  %9827 = vst [vmem:[#allocation30_spill] sm:$0xff] %v6275_v54  ;;  %v618_v60 = vmul.f32 %v6156_v25, %v518_v9  ;;  %v585_v55 = vmul.f32 %v6145_v17, %v551_v14  ;;  %v554_v54 = vld [vmem:[%s6091_s20 + $0xa8] sm:$0xff]  ;;  %v6298_v3 = vsel %vm878_vm4, %v903_v52, %v905_v45  ;;  %v1223_v24 = vrot.slane %v6262_v26, 1 }
  0x65   : > { %777 = vperm.xlu1 %5617, %v6097_v58   ;;  %774 = vperm.xlu0 %5616, %v6100_v59   ;;  %9828 = vst [vmem:[#allocation31_spill] sm:$0xff] %v6277_v5  ;;  %v907_v58 = vrot.slane %v6264_v31, 7  ;;  %9829 = vst [vmem:[#allocation32_spill] sm:$0xff] %v6283_v43  ;;  %v584_v59 = vmul.f32 %v6145_v17, %v550_v56  ;;  %v909_v37 = vrot.slane %v6277_v5, 7  ;;  %v911_v56 = vrot.slane %v6283_v43, 7  ;;  %v523_v43 = vld [vmem:[%s6111_s26 + $0xb0] sm:$0xff] }
  0x66   : > { %9830 = vst [vmem:[#allocation33_spill] sm:$0xff] %v6298_v3  ;;  %v586_v40 = vmul.f32 %v6145_v17, %v552_v36  ;;  %v6308_v14 = vadd.f32 %v617_v35, %v583_v51  ;;  %v619_v36 = vmul.f32 %v6156_v25, %v519_v42  ;;  %v588_v35 = vmul.f32 %v6145_v17, %v554_v54  ;;  %v531_v3 = vld [vmem:[%s6111_s26 + $0xf0] sm:$0xff] }
  0x67   : > { %v6295_v34 = vsel %vm878_vm4, %v905_v45, %v907_v58  ;;  %v6306_v9 = vsel %vm878_vm4, %v907_v58, %v909_v37  ;;  %v6310_v5 = vadd.f32 %v618_v60, %v584_v59  ;;  %v6313_v52 = vsel %vm878_vm4, %v909_v37, %v911_v56  ;;  %v524_v59 = vld [vmem:[%s6111_s26 + $0xb8] sm:$0xff]  ;;  %v557_v37 = vld [vmem:[%s6091_s20 + $0xc0] sm:$0xff] }
  0x68   : > { %9831 = vst [vmem:[#allocation34_spill] sm:$0xff] %v6306_v9  ;;  %9832 = vst [vmem:[#allocation35_spill] sm:$0xff] %v6308_v14  ;;  %v620_v45 = vmul.f32 %v6156_v25, %v520_v41  ;;  %v621_v51 = vmul.f32 %v6156_v25, %v521_v47  ;;  %v556_v60 = vld [vmem:[%s6091_s20 + $0xb8] sm:$0xff]  ;;  %v6326_v9 = vadd.f32 %v619_v36, %v585_v55 }
  0x69   : > { %783 = vperm.xlu1 %5617, %v6117_v62   ;;  %780 = vperm.xlu0 %5616, %v6122_v63   ;;  %9833 = vst [vmem:[#allocation36_spill] sm:$0xff] %v6310_v5  ;;  %9834 = vst [vmem:[#allocation37_spill] sm:$0xff] %v6313_v52  ;;  %v587_v62 = vmul.f32 %v6145_v17, %v553_v53  ;;  %v913_v63 = vrot.slane %v6308_v14, 7  ;;  %v915_v58 = vrot.slane %v6310_v5, 7  ;;  %v558_v53 = vld [vmem:[%s6091_s20 + $0xc8] sm:$0xff]  ;;  %v563_v14 = vld [vmem:[%s6091_s20 + $0xf0] sm:$0xff] }
  0x6a   : > { %9835 = vst [vmem:[#allocation38_spill] sm:$0xff] %v6326_v9  ;;  %v6328_v52 = vadd.f32 %v620_v45, %v586_v40  ;;  %v622_v42 = vmul.f32 %v6156_v25, %v522_v57  ;;  %v589_v41 = vmul.f32 %v6145_v17, %v555_v49  ;;  %v917_v57 = vrot.slane %v6326_v9, 7  ;;  %v525_v45 = vld [vmem:[%s6111_s26 + $0xc0] sm:$0xff] }
  0x6b   : > { %v6336_v54 = vsel %vm878_vm4, %v913_v63, %v915_v58  ;;  %v6339_v47 = vsel %vm878_vm4, %v911_v56, %v913_v63  ;;  %v6341_v55 = vadd.f32 %v621_v51, %v587_v62  ;;  %v623_v36 = vmul.f32 %v6156_v25, %v523_v43  ;;  %v526_v62 = vld [vmem:[%s6111_s26 + $0xc8] sm:$0xff]  ;;  %v559_v51 = vld [vmem:[%s6091_s20 + $0xd0] sm:$0xff] }
  0x6c   : > { %9836 = vst [vmem:[#allocation39_spill] sm:$0xff] %v6328_v52  ;;  %9837 = vst [vmem:[#allocation40_spill] sm:$0xff] %v6336_v54  ;;  %v919_v40 = vrot.slane %v6328_v52, 7  ;;  %v624_v56 = vmul.f32 %v6156_v25, %v524_v59  ;;  %v591_v63 = vmul.f32 %v6145_v17, %v557_v37  ;;  %v527_v43 = vld [vmem:[%s6111_s26 + $0xd0] sm:$0xff]  ;;  %v560_v54 = vld [vmem:[%s6091_s20 + $0xd8] sm:$0xff] }
  0x6d   : > { %789 = vperm.xlu1 %5617, %v6133_v10   ;;  %786 = vperm.xlu0 %5616, %v6138_v13   ;;  %9838 = vst [vmem:[#allocation41_spill] sm:$0xff] %v6339_v47  ;;  %9839 = vst [vmem:[#allocation42_spill] sm:$0xff] %v6341_v55  ;;  %v6346_v10 = vadd.f32 %v622_v42, %v588_v35  ;;  %v590_v13 = vmul.f32 %v6145_v17, %v556_v60  ;;  %v921_v49 = vrot.slane %v6341_v55, 7 }
  0x6e   : > { %v6357_v47 = vsel %vm878_vm4, %v917_v57, %v919_v40  ;;  %v6360_v35 = vsel %vm878_vm4, %v915_v58, %v917_v57  ;;  %v592_v42 = vmul.f32 %v6145_v17, %v558_v53  ;;  %v6372_v37 = vadd.f32 %v623_v36, %v589_v41  ;;  %v528_v57 = vld [vmem:[%s6111_s26 + $0xd8] sm:$0xff]  ;;  %v561_v53 = vld [vmem:[%s6091_s20 + $0xe0] sm:$0xff] }
  0x6f   : > { %9840 = vst [vmem:[#allocation43_spill] sm:$0xff] %v6346_v10  ;;  %9841 = vst [vmem:[#allocation44_spill] sm:$0xff] %v6357_v47  ;;  %v923_v60 = vrot.slane %v6346_v10, 7  ;;  %v6370_v59 = vsel %vm878_vm4, %v919_v40, %v921_v49  ;;  %v6374_v58 = vadd.f32 %v624_v56, %v590_v13  ;;  %v593_v47 = vmul.f32 %v6145_v17, %v559_v51  ;;  %v562_v56 = vld [vmem:[%s6091_s20 + $0xe8] sm:$0xff] }
  0x70   : > { %9842 = vst [vmem:[#allocation45_spill] sm:$0xff] %v6360_v35  ;;  %9843 = vst [vmem:[#allocation46_spill] sm:$0xff] %v6370_v59  ;;  %v925_v40 = vrot.slane %v6372_v37, 7  ;;  %v594_v13 = vmul.f32 %v6145_v17, %v560_v54  ;;  %v627_v36 = vmul.f32 %v6156_v25, %v527_v43  ;;  %v595_v51 = vmul.f32 %v6145_v17, %v561_v53  ;;  %v564_v43 = vld [vmem:[%s6091_s20 + $0xf8] sm:$0xff] }
  0x71   : > { %795 = vperm.xlu1 %5617, %v6152_v22   ;;  %792 = vperm.xlu0 %5616, %v6164_v38   ;;  %9844 = vst [vmem:[#allocation47_spill] sm:$0xff] %v6372_v37  ;;  %9845 = vst [vmem:[#allocation48_spill] sm:$0xff] %v6374_v58  ;;  %v6379_v35 = vsel %vm878_vm4, %v921_v49, %v923_v60  ;;  %v625_v22 = vmul.f32 %v6156_v25, %v525_v45  ;;  %v927_v41 = vrot.slane %v6374_v58, 7 }
  0x72   : > { %9846 = vst [vmem:[#allocation49_spill] sm:$0xff] %v6379_v35  ;;  %v626_v38 = vmul.f32 %v6156_v25, %v526_v62  ;;  %v628_v45 = vmul.f32 %v6156_v25, %v528_v57  ;;  %v529_v35 = vld [vmem:[%s6111_s26 + $0xe0] sm:$0xff]  ;;  %v530_v62 = vld [vmem:[%s6111_s26 + $0xe8] sm:$0xff] }
  0x73   : > { %v6389_v59 = vadd.f32 %v625_v22, %v591_v63  ;;  %v6402_v54 = vsel %vm878_vm4, %v925_v40, %v927_v41  ;;  %v6405_v63 = vsel %vm878_vm4, %v923_v60, %v925_v40  ;;  %v532_v60 = vld [vmem:[%s6111_s26 + $0xf8] sm:$0xff] }
  0x74   : > { %v6391_v49 = vadd.f32 %v626_v38, %v592_v42  ;;  %9849 = vst [vmem:[#allocation52_spill] sm:$0xff] %v6402_v54  ;;  %9850 = vst [vmem:[#allocation53_spill] sm:$0xff] %v6405_v63  ;;  %v6407_v42 = vadd.f32 %v627_v36, %v593_v47  ;;  %v6412_v22 = vadd.f32 %v628_v45, %v594_v13 }
  0x75   : > { %9847 = vst [vmem:[#allocation50_spill] sm:$0xff] %v6389_v59  ;;  %801 = vperm.xlu1 %5617, %v6173_v61   ;;  %798 = vperm.xlu0 %5616, %v6181_v6   ;;  %v929_v57 = vrot.slane %v6389_v59, 7  ;;  %v596_v61 = vmul.f32 %v6145_v17, %v562_v56  ;;  %v629_v38 = vmul.f32 %v6156_v25, %v529_v35  ;;  %v9855_v35 = vmov 0  }
  0x76   : > { %9848 = vst [vmem:[#allocation51_spill] sm:$0xff] %v6391_v49  ;;  %9851 = vst [vmem:[#allocation54_spill] sm:$0xff] %v6407_v42  ;;  %v931_v53 = vrot.slane %v6391_v49, 7  ;;  %v933_v6 = vrot.slane %v6407_v42, 7  ;;  %v630_v54 = vmul.f32 %v6156_v25, %v530_v62  ;;  %v597_v47 = vmul.f32 %v6145_v17, %v563_v14 }
  0x77   : > { %9852 = vst [vmem:[#allocation55_spill] sm:$0xff] %v6412_v22  ;;  %v6425_v36 = vsel %vm878_vm4, %v927_v41, %v929_v57  ;;  %v935_v13 = vrot.slane %v6412_v22, 7  ;;  %v598_v56 = vmul.f32 %v6145_v17, %v564_v43  ;;  %v1017_v45 = vsel %vm466_vm5, 1, %v9855_v35 }
  0x78   : > { %v6422_v40 = vsel %vm878_vm4, %v929_v57, %v931_v53  ;;  %9854 = vst [vmem:[#allocation57_spill] sm:$0xff] %v6425_v36  ;;  %v6435_v14 = vsel %vm878_vm4, %v931_v53, %v933_v6  ;;  %v6437_v62 = vadd.f32 %v629_v38, %v595_v51  ;;  %v1016_v41 = vsel %vm465_vm6, 1, %v9855_v35 }
  0x79   : > { %9853 = vst [vmem:[#allocation56_spill] sm:$0xff] %v6422_v40  ;;  %807 = vperm.xlu1 %5617, %v6191_v21   ;;  %804 = vperm.xlu0 %5616, %v6199_v30   ;;  %9856 = vst [vmem:[#allocation58_spill] sm:$0xff] %v6435_v14  ;;  %v6439_v40 = vadd.f32 %v630_v54, %v596_v61  ;;  %v6445_v43 = vsel %vm878_vm4, %v933_v6, %v935_v13  ;;  %v1019_v1 = vsel %vm468_vm7, 1, %v9855_v35  ;;  %v9667_v61 = vmov 0.0  }
  0x7a   : > { %9857 = vst [vmem:[#allocation59_spill] sm:$0xff] %v6437_v62  ;;  %9859 = vst [vmem:[#allocation61_spill] sm:$0xff] %v6445_v43  ;;  %v631_v21 = vmul.f32 %v6156_v25, %v531_v3  ;;  %v632_v30 = vmul.f32 %v6156_v25, %v532_v60  ;;  %v937_v4 = vrot.slane %v6437_v62, 7  ;;  %v1018_v0 = vsel %vm467_vm8, 1, %v9855_v35 }
  0x7b   : > { %9858 = vst [vmem:[#allocation60_spill] sm:$0xff] %v6439_v40  ;;  %v939_v51 = vrot.slane %v6439_v40, 7  ;;  %v6467_v6 = vrot.slane %v9667_v61, 7  ;;  %v1023_v7 = vsel %vm472_vm11, 1, %v9855_v35  ;;  %v1022_v8 = vsel %vm471_vm12, 1, %v9855_v35 }
  0x7c   : > { %v6452_v57 = vadd.f32 %v631_v21, %v597_v47  ;;  %v6454_v54 = vadd.f32 %v632_v30, %v598_v56  ;;  %v6463_v53 = vsel %vm878_vm4, %v935_v13, %v937_v4  ;;  %v1021_v56 = vsel %vm470_vm9, 1, %v9855_v35 }
  0x7d   : > { %1056 = vperm.xlu1 %5617, %v1017_v45   ;;  %1053 = vperm.xlu0 %5616, %v1016_v41   ;;  %v6460_v3 = vsel %vm878_vm4, %v937_v4, %v939_v51  ;;  %9863 = vst [vmem:[#allocation65_spill] sm:$0xff] %v6463_v53  ;;  %v1020_v45 = vsel %vm469_vm10, 1, %v9855_v35  ;;  %v1025_v41 = vsel %vm474_vm13, 1, %v9855_v35  ;;  %v1024_v21 = vsel %vm473_vm14, 1, %v9855_v35 }
  0x7e   : > { %9860 = vst [vmem:[#allocation62_spill] sm:$0xff] %v6452_v57  ;;  %9861 = vst [vmem:[#allocation63_spill] sm:$0xff] %v6454_v54  ;;  %v941_v38 = vrot.slane %v6452_v57, 7  ;;  %v943_v60 = vrot.slane %v6454_v54, 7  ;;  %v1215_v30 = vrot.slane %v6210_v46, 1  ;;  %v1027_v15 = vsel %vm476_vm15, 1, %v9855_v35 }
  0x7f   : > { %9862 = vst [vmem:[#allocation64_spill] sm:$0xff] %v6460_v3  ;;  %v1026_v16 = vsel %vm475_vm0, 1, %v9855_v35  ;;  %vm480_vm5 = vcmp.le.f32.partialorder %v5938_v27, 14.0  ;;  %vm479_vm6 = vcmp.le.f32.partialorder %v5943_v28, 14.0  ;;  %vm482_vm7 = vcmp.le.f32.partialorder %v5949_v29, 14.0 }
  0x80   : > { %v6474_v2 = vsel %vm878_vm4, %v941_v38, %v943_v60  ;;  %v6477_v47 = vsel %vm878_vm4, %v939_v51, %v941_v38  ;;  %v6481_v13 = vsel %vm878_vm4, %v943_v60, %v6467_v6  ;;  %v6501_v4 = vsel %vm1196_vm1, %v1213_v12, %v1215_v30  ;;  %v9868_v12 = vld [vmem:[#allocation8_spill] sm:$0xff] }
  0x81   : > { %9864 = vst [vmem:[#allocation66_spill] sm:$0xff] %v6474_v2  ;;  %9865 = vst [vmem:[#allocation67_spill] sm:$0xff] %v6477_v47  ;;  %1062 = vperm.xlu1 %5617, %v1019_v1   ;;  %1059 = vperm.xlu0 %5616, %v1018_v0   ;;  %v1219_v51 = vrot.slane %v6244_v48, 1  ;;  %v1029_v1 = vsel %vm478_vm2, 1, %v9855_v35  ;;  %v1028_v0 = vsel %vm477_vm3, 1, %v9855_v35  ;;  %v6518_v60 = vsel %vm1196_vm1, %v1215_v30, %v1217_v20  ;;  %v9869_v30 = vld [vmem:[#allocation9_spill] sm:$0xff] }
  0x82   : > { %9866 = vst [vmem:[#allocation68_spill] sm:$0xff] %v6481_v13  ;;  %vm481_vm8 = vcmp.le.f32.partialorder %v5956_v32, 14.0  ;;  %v9665_v27 = vrot.slane %v6264_v31, 1  ;;  %v1033_v28 = vsel %vm482_vm7, 1, %v9855_v35  ;;  %vm484_vm9 = vcmp.le.f32.partialorder %v5963_v33, 14.0  ;;  %v9893_v47 = vld [vmem:[#allocation22_spill] sm:$0xff] }
  0x83   : > { %v6515_v38 = vsel %vm1196_vm1, %v1217_v20, %v1219_v51  ;;  %vm483_vm10 = vcmp.le.f32.partialorder %v9868_v12, 14.0  ;;  %v1035_v29 = vsel %vm484_vm9, 1, %v9855_v35  ;;  %vm486_vm11 = vcmp.le.f32.partialorder %v9869_v30, 14.0 }
  0x84   : > { %v1034_v32 = vsel %vm483_vm10, 1, %v9855_v35  ;;  %v1235_v20 = vrot.slane %v6326_v9, 1  ;;  %v1037_v33 = vsel %vm486_vm11, 1, %v9855_v35  ;;  %v1241_v30 = vrot.slane %v6346_v10, 1 }
  0x85   : > { %1068 = vperm.xlu1 %5617, %v1021_v56   ;;  %1065 = vperm.xlu0 %5616, %v1020_v45   ;;  %v1031_v56 = vsel %vm480_vm5, 1, %v9855_v35  ;;  %v1030_v45 = vsel %vm479_vm6, 1, %v9855_v35  ;;  %vm497_vm11 = vcmp.le.f32.partialorder %v9893_v47, 14.0  ;;  %v1257_v2 = vrot.slane %v6439_v40, 1 }
  0x86   : > { %v9675_v3 = vrot.slane %v6454_v54, 1 }
  0x89   : > { %1074 = vperm.xlu1 %5617, %v1023_v7   ;;  %1071 = vperm.xlu0 %5616, %v1022_v8   ;;  %v6527_v7 = vsel %vm1196_vm1, %v1221_v23, %v1223_v24  ;;  %v6530_v8 = vsel %vm1196_vm1, %v1219_v51, %v1221_v23  ;;  %v9873_v23 = vld [vmem:[#allocation12_spill] sm:$0xff] }
  0x8a   : > { %vm487_vm14 = vcmp.le.f32.partialorder %v9873_v23, 14.0  ;;  %v9880_v23 = vld [vmem:[#allocation15_spill] sm:$0xff] }
  0x8b   : > { %vm492_vm2 = vcmp.le.f32.partialorder %v9880_v23, 14.0  ;;  %v9885_v23 = vld [vmem:[#allocation18_spill] sm:$0xff] }
  0x8c   : > { %vm493_vm6 = vcmp.le.f32.partialorder %v9885_v23, 14.0 }
  0x8d   : > { %1080 = vperm.xlu1 %5617, %v1025_v41   ;;  %1077 = vperm.xlu0 %5616, %v1024_v21   ;;  %v1032_v41 = vsel %vm481_vm8, 1, %v9855_v35  ;;  %v6540_v21 = vsel %vm1196_vm1, %v1223_v24, %v9665_v27  ;;  %v1237_v24 = vrot.slane %v6328_v52, 1  ;;  %v1251_v27 = vrot.slane %v6407_v42, 1 }
  0x8e   : > { %9867 = vst [vmem:[#allocation69_spill] sm:$0xff] %v6540_v21  ;;  %v505_v21 = vld [vmem:[%s6111_s26 + $0x20] sm:$0xff] }
  0x8f   : > { %v6567_v12 = vsel %vm1196_vm1, %v1235_v20, %v1237_v24 }
  0x91   : > { %1086 = vperm.xlu1 %5617, %v1027_v15   ;;  %1083 = vperm.xlu0 %5616, %v1026_v16   ;;  %v9870_v15 = vld [vmem:[#allocation10_spill] sm:$0xff]  ;;  %v9664_v16 = vrot.slane %v6310_v5, 1 }
  0x92   : > { %vm485_vm12 = vcmp.le.f32.partialorder %v9870_v15, 14.0  ;;  %9875 = vst [vmem:[#allocation10_spill] sm:$0xff] %v6567_v12  ;;  %v1243_v15 = vrot.slane %v6372_v37, 1 }
  0x93   : > { %v1036_v51 = vsel %vm485_vm12, 1, %v9855_v35 }
  0x95   : > { %1092 = vperm.xlu1 %5617, %v1029_v1   ;;  %1089 = vperm.xlu0 %5616, %v1028_v0   ;;  %v6555_v1 = vsel %vm1196_vm1, %v9664_v16, %v1235_v20  ;;  %v9872_v0 = vld [vmem:[#allocation11_spill] sm:$0xff] }
  0x96   : > { %9871 = vst [vmem:[#allocation8_spill] sm:$0xff] %v6555_v1  ;;  %vm488_vm13 = vcmp.le.f32.partialorder %v9872_v0, 14.0  ;;  %v6576_v0 = vsel %vm1196_vm1, %v1241_v30, %v1243_v15 }
  0x97   : > { %9878 = vst [vmem:[#allocation11_spill] sm:$0xff] %v6576_v0 }
  0x99   : > { %1098 = vperm.xlu1 %5617, %v1031_v56   ;;  %1095 = vperm.xlu0 %5616, %v1030_v45   ;;  %v1239_v56 = vrot.slane %v6341_v55, 1  ;;  %v1039_v45 = vsel %vm488_vm13, 1, %v9855_v35 }
  0x9b   : > { %v6579_v20 = vsel %vm1196_vm1, %v1239_v56, %v1241_v30  ;;  %v9884_v30 = vld [vmem:[#allocation17_spill] sm:$0xff] }
  0x9c   : > { %9879 = vst [vmem:[#allocation12_spill] sm:$0xff] %v6579_v20  ;;  %vm494_vm5 = vcmp.le.f32.partialorder %v9884_v30, 14.0  ;;  %v9889_v30 = vld [vmem:[#allocation20_spill] sm:$0xff] }
  0x9d   : > { %1104 = vperm.xlu1 %5617, %v1033_v28   ;;  %1101 = vperm.xlu0 %5616, %v1032_v41   ;;  %v1038_v28 = vsel %vm487_vm14, 1, %v9855_v35  ;;  %v6564_v41 = vsel %vm1196_vm1, %v1237_v24, %v1239_v56  ;;  %v9881_v24 = vld [vmem:[#allocation16_spill] sm:$0xff]  ;;  %vm495_vm8 = vcmp.le.f32.partialorder %v9889_v30, 14.0  ;;  %v9892_v30 = vld [vmem:[#allocation21_spill] sm:$0xff] }
  0x9e   : > { %9874 = vst [vmem:[#allocation9_spill] sm:$0xff] %v6564_v41  ;;  %vm491_vm3 = vcmp.le.f32.partialorder %v9881_v24, 14.0  ;;  %v1249_v24 = vrot.slane %v6391_v49, 1  ;;  %vm498_vm10 = vcmp.le.f32.partialorder %v9892_v30, 14.0 }
  0x9f   : > { %v1049_v47 = vsel %vm498_vm10, 1, %v9855_v35  ;;  %vm9747_vm10 = vsmask.f32 7424 }
  0xa0   : > { %v6600_v11 = vsel %vm1196_vm1, %v1249_v24, %v1251_v27 }
  0xa1   : > { %1110 = vperm.xlu1 %5617, %v1035_v29   ;;  %1107 = vperm.xlu0 %5616, %v1034_v32   ;;  %v9876_v29 = vld [vmem:[#allocation13_spill] sm:$0xff]  ;;  %v9877_v32 = vld [vmem:[#allocation14_spill] sm:$0xff]  ;;  %9886 = vst [vmem:[#allocation15_spill] sm:$0xff] %v6600_v11 }
  0xa2   : > { %vm490_vm15 = vcmp.le.f32.partialorder %v9876_v29, 14.0  ;;  %vm489_vm0 = vcmp.le.f32.partialorder %v9877_v32, 14.0  ;;  %v1245_v29 = vrot.slane %v6374_v58, 1  ;;  %v1247_v32 = vrot.slane %v6389_v59, 1 }
  0xa4   : > { %v6588_v16 = vsel %vm1196_vm1, %v1245_v29, %v1247_v32  ;;  %v6591_v56 = vsel %vm1196_vm1, %v1243_v15, %v1245_v29  ;;  %v6603_v15 = vsel %vm1196_vm1, %v1247_v32, %v1249_v24  ;;  %v9888_v29 = vld [vmem:[#allocation19_spill] sm:$0xff]  ;;  %v1046_v32 = vsel %vm495_vm8, 1, %v9855_v35 }
  0xa5   : > { %1116 = vperm.xlu1 %5617, %v1037_v33   ;;  %1113 = vperm.xlu0 %5616, %v1036_v51   ;;  %v1041_v33 = vsel %vm490_vm15, 1, %v9855_v35  ;;  %v1040_v51 = vsel %vm489_vm0, 1, %v9855_v35  ;;  %9882 = vst [vmem:[#allocation13_spill] sm:$0xff] %v6588_v16  ;;  %9883 = vst [vmem:[#allocation14_spill] sm:$0xff] %v6591_v56  ;;  %vm496_vm7 = vcmp.le.f32.partialorder %v9888_v29, 14.0 }
  0xa6   : > { %9887 = vst [vmem:[#allocation16_spill] sm:$0xff] %v6603_v15  ;;  %v1047_v13 = vsel %vm496_vm7, 1, %v9855_v35 }
  0xa9   : > { %1122 = vperm.xlu1 %5617, %v1039_v45   ;;  %1119 = vperm.xlu0 %5616, %v1038_v28   ;;  %v1043_v45 = vsel %vm492_vm2, 1, %v9855_v35  ;;  %v1042_v28 = vsel %vm491_vm3, 1, %v9855_v35 }
  0xad   : > { %1128 = vperm.xlu1 %5617, %v1041_v33   ;;  %1125 = vperm.xlu0 %5616, %v1040_v51   ;;  %v1045_v33 = vsel %vm494_vm5, 1, %v9855_v35  ;;  %v1044_v51 = vsel %vm493_vm6, 1, %v9855_v35 }
  0xb1   : > { %1134 = vperm.xlu1 %5617, %v1043_v45   ;;  %1131 = vperm.xlu0 %5616, %v1042_v28   ;;  %v1253_v45 = vrot.slane %v6412_v22, 1  ;;  %v1255_v28 = vrot.slane %v6437_v62, 1  ;;  %v1259_v62 = vrot.slane %v6452_v57, 1 }
  0xb3   : > { %v6617_v24 = vsel %vm1196_vm1, %v1253_v45, %v1255_v28  ;;  %v6620_v29 = vsel %vm1196_vm1, %v1251_v27, %v1253_v45  ;;  %v1048_v27 = vsel %vm497_vm11, 1, %v9855_v35  ;;  %v6640_v45 = vsel %vm1196_vm1, %v1257_v2, %v1259_v62 }
  0xb4   : > { %v6607_v23 = vpop.permute.xlu1 %708  ;;  %v6609_v61 = vpop.permute.xlu0 %702  ;;  %9890 = vst [vmem:[#allocation17_spill] sm:$0xff] %v6617_v24  ;;  %9891 = vst [vmem:[#allocation18_spill] sm:$0xff] %v6620_v29  ;;  %v6643_v30 = vsel %vm1196_vm1, %v1255_v28, %v1257_v2 }
  0xb5   : > { %vm811_vm9 = vcmp.eq.s32.totalorder %v6607_v23, 1  ;;  %1140 = vperm.xlu1 %5617, %v1045_v33   ;;  %1137 = vperm.xlu0 %5616, %v1044_v51   ;;  %9894 = vst [vmem:[#allocation19_spill] sm:$0xff] %v6640_v45  ;;  %9895 = vst [vmem:[#allocation20_spill] sm:$0xff] %v6643_v30  ;;  %v9897_v30 = vmov 0.0  }
  0xb6   : > { %vm2816_vm12 = vmpackc.low %vm811_vm9, %vm811_vm9 }
  0xb7   : > { %v2850_v57 = vsel %vm2816_vm12, 65537, %v9855_v35 }
  0xb8   : > { %v6627_v33 = vpop.permute.xlu1 %711  ;;  %v6629_v51 = vpop.permute.xlu0 %705 }
  0xb9   : > { %vm812_vm13 = vcmp.eq.s32.totalorder %v6627_v33, 1  ;;  %1146 = vperm.xlu1 %5617, %v1047_v13   ;;  %1143 = vperm.xlu0 %5616, %v1046_v32  }
  0xba   : > { %vm2817_vm14 = vmpackc.low %vm812_vm13, %vm812_vm13 }
  0xbb   : > { %v2851_v40 = vsel %vm2817_vm14, 65537, %v9855_v35 }
  0xbc   : > { %v5217_v13 = vcombine.low %v2850_v57, %v2851_v40  ;;  %v6647_v32 = vpop.permute.xlu1 %717  ;;  %v6649_v53 = vpop.permute.xlu0 %714  ;;  %v6664_v40 = vsel %vm1196_vm1, %v1259_v62, %v9675_v3 }
  0xbd   : > { %vm814_vm15 = vcmp.eq.s32.totalorder %v6647_v32, 1  ;;  %vm813_vm0 = vcmp.eq.s32.totalorder %v6649_v53, 1  ;;  %1152 = vperm.xlu1 %5617, %v1049_v47   ;;  %1149 = vperm.xlu0 %5616, %v1048_v27   ;;  %9896 = vst [vmem:[#allocation21_spill] sm:$0xff] %v6664_v40  ;;  %v2430_v53 = vld [vmem:[%s9632_s5] sm:$0xff] }
  0xbe   : > { %v2939_v45 = vshll.u32 %v5217_v13, 16  ;;  %vm2819_vm2 = vmpackc.low %vm814_vm15, %vm814_vm15  ;;  %v2434_v32 = vld [vmem:[%s9632_s5 + $0x20] sm:$0xf] }
  0xbf   : > { %v2853_v2 = vsel %vm2819_vm2, 65537, %v9855_v35  ;;  %vm2818_vm3 = vmpackc.low %vm813_vm0, %vm813_vm0 }
  0xc0   : > { %v2852_v57 = vsel %vm2818_vm3, 65537, %v9855_v35  ;;  %v6667_v28 = vpop.permute.xlu1 %723  ;;  %v6669_v47 = vpop.permute.xlu0 %720  ;;  %v2941_v24 = vrot.slane %v2939_v45, 1 }
  0xc1   : > { %v5218_v27 = vcombine.low %v2852_v57, %v2853_v2  ;;  %vm816_vm5 = vcmp.eq.s32.totalorder %v6667_v28, 1  ;;  %vm815_vm6 = vcmp.eq.s32.totalorder %v6669_v47, 1  ;;  %1334 = vrot.lane.b32.xlu0 %v9897_v30, %s5732_s13  ;;  %v2937_v2 = vshrl.u32 %v5217_v13, 16 }
  0xc2   : > { %vm2821_vm7 = vmpackc.low %vm816_vm5, %vm816_vm5 }
  0xc3   : > { %v2944_v62 = vshll.u32 %v5218_v27, 16  ;;  %v2855_v3 = vsel %vm2821_vm7, 65537, %v9855_v35  ;;  %vm2820_vm8 = vmpackc.low %vm815_vm6, %vm815_vm6  ;;  %v2942_v42 = vor.u32 %v2941_v24, %v2937_v2  ;;  %v2948_v14 = vshrl.u32 %v5218_v27, 16 }
  0xc4   : > { %v2854_v57 = vsel %vm2820_vm8, 65537, %v9855_v35  ;;  %v6683_v40 = vpop.permute.xlu1 %729  ;;  %v6685_v54 = vpop.permute.xlu0 %726 }
  0xc5   : > { %v2946_v45 = vrot.slane %v2944_v62, 1  ;;  %v5219_v29 = vcombine.low %v2854_v57, %v2855_v3  ;;  %vm9750_vm11 = vcmp.eq.s32.totalorder %v6683_v40, 1  ;;  %vm9751_vm12 = vcmp.eq.s32.totalorder %v6685_v54, 1 }
  0xc6   : > { %vm2823_vm14 = vmpackc.low %vm9750_vm11, %vm9750_vm11  ;;  %vm9791_vm11 = vsmask.f32 256 }
  0xc7   : > { %v2952_v22 = vshll.u32 %v5219_v29, 16  ;;  %v2857_v13 = vsel %vm2823_vm14, 65537, %v9855_v35  ;;  %vm2822_vm2 = vmpackc.low %vm9751_vm12, %vm9751_vm12  ;;  %v6702_v24 = vsel %vm9747_vm10, %v2942_v42, %v2946_v45  ;;  %v2950_v11 = vor.u32 %v2948_v14, %v2946_v45 }
  0xc8   : > { %v2856_v62 = vsel %vm2822_vm2, 65537, %v9855_v35  ;;  %v6697_v3 = vpop.permute.xlu1 %735  ;;  %v6699_v57 = vpop.permute.xlu0 %732  ;;  %9898 = vst [vmem:[#allocation22_spill] sm:$0xff] %v6702_v24  ;;  %v2956_v42 = vshrl.u32 %v5219_v29, 16 }
  0xc9   : > { %v2954_v2 = vrot.slane %v2952_v22, 1  ;;  %v5220_v43 = vcombine.low %v2856_v62, %v2857_v13  ;;  %vm9748_vm3 = vcmp.eq.s32.totalorder %v6697_v3, 1  ;;  %vm9684_vm7 = vcmp.eq.s32.totalorder %v6699_v57, 1 }
  0xca   : > { %vm2825_vm8 = vmpackc.low %vm9748_vm3, %vm9748_vm3 }
  0xcb   : > { %v2960_v27 = vshll.u32 %v5220_v43, 16  ;;  %v2859_v15 = vsel %vm2825_vm8, 65537, %v9855_v35  ;;  %vm2824_vm14 = vmpackc.low %vm9684_vm7, %vm9684_vm7  ;;  %v6719_v14 = vsel %vm9747_vm10, %v2950_v11, %v2954_v2  ;;  %v2958_v59 = vor.u32 %v2956_v42, %v2954_v2 }
  0xcc   : > { %v2858_v22 = vsel %vm2824_vm14, 65537, %v9855_v35  ;;  %v6714_v13 = vpop.permute.xlu1 %741  ;;  %v6716_v62 = vpop.permute.xlu0 %738  ;;  %9899 = vst [vmem:[#allocation70_spill] sm:$0xff] %v6719_v14  ;;  %v2964_v11 = vshrl.u32 %v5220_v43, 16 }
  0xcd   : > { %v2962_v45 = vrot.slane %v2960_v27, 1  ;;  %v5221_v24 = vcombine.low %v2858_v22, %v2859_v15  ;;  %vm9688_vm2 = vcmp.eq.s32.totalorder %v6714_v13, 1  ;;  %vm9689_vm8 = vcmp.eq.s32.totalorder %v6716_v62, 1 }
  0xce   : > { %vm2827_vm7 = vmpackc.low %vm9688_vm2, %vm9688_vm2 }
  0xcf   : > { %v2968_v29 = vshll.u32 %v5221_v24, 16  ;;  %v2861_v49 = vsel %vm2827_vm7, 65537, %v9855_v35  ;;  %vm2826_vm14 = vmpackc.low %vm9689_vm8, %vm9689_vm8  ;;  %v6736_v2 = vsel %vm9747_vm10, %v2958_v59, %v2962_v45  ;;  %v2966_v36 = vor.u32 %v2964_v11, %v2962_v45 }
  0xd0   : > { %v2860_v27 = vsel %vm2826_vm14, 65537, %v9855_v35  ;;  %v6731_v15 = vpop.permute.xlu1 %747  ;;  %v6733_v22 = vpop.permute.xlu0 %744  ;;  %9900 = vst [vmem:[#allocation71_spill] sm:$0xff] %v6736_v2  ;;  %v2972_v59 = vshrl.u32 %v5221_v24, 16 }
  0xd1   : > { %v2970_v42 = vrot.slane %v2968_v29, 1  ;;  %v5222_v14 = vcombine.low %v2860_v27, %v2861_v49  ;;  %vm9691_vm2 = vcmp.eq.s32.totalorder %v6731_v15, 1  ;;  %vm9692_vm7 = vcmp.eq.s32.totalorder %v6733_v22, 1 }
  0xd2   : > { %vm2829_vm8 = vmpackc.low %vm9691_vm2, %vm9691_vm2 }
  0xd3   : > { %v2976_v43 = vshll.u32 %v5222_v14, 16  ;;  %v2863_v16 = vsel %vm2829_vm8, 65537, %v9855_v35  ;;  %vm2828_vm14 = vmpackc.low %vm9692_vm7, %vm9692_vm7  ;;  %v6753_v45 = vsel %vm9747_vm10, %v2966_v36, %v2970_v42  ;;  %v2974_v56 = vor.u32 %v2972_v59, %v2970_v42 }
  0xd4   : > { %v2862_v29 = vsel %vm2828_vm14, 65537, %v9855_v35  ;;  %v6748_v49 = vpop.permute.xlu1 %753  ;;  %v6750_v27 = vpop.permute.xlu0 %750  ;;  %9903 = vst [vmem:[#allocation74_spill] sm:$0xff] %v6753_v45  ;;  %v2980_v36 = vshrl.u32 %v5222_v14, 16 }
  0xd5   : > { %9901 = vst [vmem:[#allocation72_spill] sm:$0xff] %v6748_v49  ;;  %9902 = vst [vmem:[#allocation73_spill] sm:$0xff] %v6750_v27  ;;  %v2978_v11 = vrot.slane %v2976_v43, 1  ;;  %v5223_v2 = vcombine.low %v2862_v29, %v2863_v16  ;;  %vm9695_vm2 = vcmp.eq.s32.totalorder %v6748_v49, 1  ;;  %vm9698_vm8 = vcmp.eq.s32.totalorder %v6750_v27, 1 }
  0xd6   : > { %vm2831_vm7 = vmpackc.low %vm9695_vm2, %vm9695_vm2 }
  0xd7   : > { %v2984_v24 = vshll.u32 %v5223_v2, 16  ;;  %v2865_v37 = vsel %vm2831_vm7, 65537, %v9855_v35  ;;  %vm2830_vm14 = vmpackc.low %vm9698_vm8, %vm9698_vm8  ;;  %v6770_v42 = vsel %vm9747_vm10, %v2974_v56, %v2978_v11  ;;  %v2982_v58 = vor.u32 %v2980_v36, %v2978_v11 }
  0xd8   : > { %v2864_v43 = vsel %vm2830_vm14, 65537, %v9855_v35  ;;  %v6765_v16 = vpop.permute.xlu1 %759  ;;  %v6767_v29 = vpop.permute.xlu0 %756  ;;  %9906 = vst [vmem:[#allocation77_spill] sm:$0xff] %v6770_v42  ;;  %v2988_v56 = vshrl.u32 %v5223_v2, 16 }
  0xd9   : > { %9904 = vst [vmem:[#allocation75_spill] sm:$0xff] %v6765_v16  ;;  %9905 = vst [vmem:[#allocation76_spill] sm:$0xff] %v6767_v29  ;;  %v2986_v59 = vrot.slane %v2984_v24, 1  ;;  %v5224_v45 = vcombine.low %v2864_v43, %v2865_v37  ;;  %vm9699_vm2 = vcmp.eq.s32.totalorder %v6765_v16, 1  ;;  %vm9700_vm7 = vcmp.eq.s32.totalorder %v6767_v29, 1 }
  0xda   : > { %vm2833_vm8 = vmpackc.low %vm9699_vm2, %vm9699_vm2 }
  0xdb   : > { %v2992_v14 = vshll.u32 %v5224_v45, 16  ;;  %v2867_v63 = vsel %vm2833_vm8, 65537, %v9855_v35  ;;  %vm2832_vm14 = vmpackc.low %vm9700_vm7, %vm9700_vm7  ;;  %v6787_v11 = vsel %vm9747_vm10, %v2982_v58, %v2986_v59  ;;  %v2990_v0 = vor.u32 %v2988_v56, %v2986_v59 }
  0xdc   : > { %v2866_v24 = vsel %vm2832_vm14, 65537, %v9855_v35  ;;  %v6782_v37 = vpop.permute.xlu1 %765  ;;  %v6784_v43 = vpop.permute.xlu0 %762  ;;  %9909 = vst [vmem:[#allocation80_spill] sm:$0xff] %v6787_v11  ;;  %v2996_v58 = vshrl.u32 %v5224_v45, 16 }
  0xdd   : > { %9907 = vst [vmem:[#allocation78_spill] sm:$0xff] %v6782_v37  ;;  %9908 = vst [vmem:[#allocation79_spill] sm:$0xff] %v6784_v43  ;;  %v2994_v36 = vrot.slane %v2992_v14, 1  ;;  %v5225_v42 = vcombine.low %v2866_v24, %v2867_v63  ;;  %vm9701_vm2 = vcmp.eq.s32.totalorder %v6782_v37, 1  ;;  %vm9704_vm8 = vcmp.eq.s32.totalorder %v6784_v43, 1 }
  0xde   : > { %vm2835_vm7 = vmpackc.low %vm9701_vm2, %vm9701_vm2 }
  0xdf   : > { %v3000_v2 = vshll.u32 %v5225_v42, 16  ;;  %v2869_v20 = vsel %vm2835_vm7, 65537, %v9855_v35  ;;  %vm2834_vm14 = vmpackc.low %vm9704_vm8, %vm9704_vm8  ;;  %v6804_v59 = vsel %vm9747_vm10, %v2990_v0, %v2994_v36  ;;  %v2998_v55 = vor.u32 %v2996_v58, %v2994_v36 }
  0xe0   : > { %v2868_v14 = vsel %vm2834_vm14, 65537, %v9855_v35  ;;  %v6799_v63 = vpop.permute.xlu1 %771  ;;  %v6801_v24 = vpop.permute.xlu0 %768  ;;  %9912 = vst [vmem:[#allocation83_spill] sm:$0xff] %v6804_v59  ;;  %v3004_v0 = vshrl.u32 %v5225_v42, 16 }
  0xe1   : > { %9910 = vst [vmem:[#allocation81_spill] sm:$0xff] %v6799_v63  ;;  %9911 = vst [vmem:[#allocation82_spill] sm:$0xff] %v6801_v24  ;;  %v3002_v56 = vrot.slane %v3000_v2, 1  ;;  %v5226_v11 = vcombine.low %v2868_v14, %v2869_v20  ;;  %vm9707_vm2 = vcmp.eq.s32.totalorder %v6799_v63, 1  ;;  %vm9709_vm7 = vcmp.eq.s32.totalorder %v6801_v24, 1 }
  0xe2   : > { %vm2837_vm8 = vmpackc.low %vm9707_vm2, %vm9707_vm2 }
  0xe3   : > { %v3008_v45 = vshll.u32 %v5226_v11, 16  ;;  %v2871_v10 = vsel %vm2837_vm8, 65537, %v9855_v35  ;;  %vm2836_vm14 = vmpackc.low %vm9709_vm7, %vm9709_vm7  ;;  %v6821_v36 = vsel %vm9747_vm10, %v2998_v55, %v3002_v56  ;;  %v3006_v63 = vor.u32 %v3004_v0, %v3002_v56 }
  0xe4   : > { %v2870_v2 = vsel %vm2836_vm14, 65537, %v9855_v35  ;;  %v6816_v20 = vpop.permute.xlu1 %777  ;;  %v6818_v14 = vpop.permute.xlu0 %774  ;;  %9915 = vst [vmem:[#allocation86_spill] sm:$0xff] %v6821_v36  ;;  %v3012_v55 = vshrl.u32 %v5226_v11, 16 }
  0xe5   : > { %9913 = vst [vmem:[#allocation84_spill] sm:$0xff] %v6816_v20  ;;  %9914 = vst [vmem:[#allocation85_spill] sm:$0xff] %v6818_v14  ;;  %v3010_v58 = vrot.slane %v3008_v45, 1  ;;  %v5227_v59 = vcombine.low %v2870_v2, %v2871_v10  ;;  %vm9711_vm2 = vcmp.eq.s32.totalorder %v6816_v20, 1  ;;  %vm9714_vm8 = vcmp.eq.s32.totalorder %v6818_v14, 1 }
  0xe6   : > { %vm2839_vm7 = vmpackc.low %vm9711_vm2, %vm9711_vm2 }
  0xe7   : > { %v3016_v42 = vshll.u32 %v5227_v59, 16  ;;  %v2873_v24 = vsel %vm2839_vm7, 65537, %v9855_v35  ;;  %vm2838_vm14 = vmpackc.low %vm9714_vm8, %vm9714_vm8  ;;  %v6838_v56 = vsel %vm9747_vm10, %v3006_v63, %v3010_v58  ;;  %v3014_v14 = vor.u32 %v3012_v55, %v3010_v58 }
  0xe8   : > { %v2872_v45 = vsel %vm2838_vm14, 65537, %v9855_v35  ;;  %v6833_v10 = vpop.permute.xlu1 %783  ;;  %v6835_v2 = vpop.permute.xlu0 %780  ;;  %9918 = vst [vmem:[#allocation89_spill] sm:$0xff] %v6838_v56  ;;  %v3020_v63 = vshrl.u32 %v5227_v59, 16  ;;  %v533_v56 = vld [vmem:[%s6091_s20] sm:$0xff] }
  0xe9   : > { %9916 = vst [vmem:[#allocation87_spill] sm:$0xff] %v6833_v10  ;;  %9917 = vst [vmem:[#allocation88_spill] sm:$0xff] %v6835_v2  ;;  %v3018_v0 = vrot.slane %v3016_v42, 1  ;;  %v5228_v36 = vcombine.low %v2872_v45, %v2873_v24  ;;  %vm9716_vm2 = vcmp.eq.s32.totalorder %v6833_v10, 1  ;;  %vm9718_vm7 = vcmp.eq.s32.totalorder %v6835_v2, 1  ;;  %v501_v2 = vld [vmem:[%s6111_s26] sm:$0xff] }
  0xea   : > { %vm2841_vm14 = vmpackc.low %vm9716_vm2, %vm9716_vm2 }
  0xeb   : > { %v3024_v11 = vshll.u32 %v5228_v36, 16  ;;  %v2875_v20 = vsel %vm2841_vm14, 65537, %v9855_v35  ;;  %vm2840_vm8 = vmpackc.low %vm9718_vm7, %vm9718_vm7  ;;  %v6856_v58 = vsel %vm9747_vm10, %v3014_v14, %v3018_v0  ;;  %v3022_v59 = vor.u32 %v3020_v63, %v3018_v0  ;;  %v502_v63 = vld [vmem:[%s6111_s26 + $0x8] sm:$0xff] }
  0xec   : > { %v2874_v24 = vsel %vm2840_vm8, 65537, %v9855_v35  ;;  %v6850_v42 = vpop.permute.xlu1 %789  ;;  %v6852_v45 = vpop.permute.xlu0 %786  ;;  %9921 = vst [vmem:[#allocation92_spill] sm:$0xff] %v6856_v58  ;;  %v3028_v14 = vshrl.u32 %v5228_v36, 16  ;;  %v601_v0 = vmul.f32 %v6156_v25, %v501_v2 }
  0xed   : > { %9919 = vst [vmem:[#allocation90_spill] sm:$0xff] %v6850_v42  ;;  %9920 = vst [vmem:[#allocation91_spill] sm:$0xff] %v6852_v45  ;;  %v3026_v55 = vrot.slane %v3024_v11, 1  ;;  %v5229_v10 = vcombine.low %v2874_v24, %v2875_v20  ;;  %vm9727_vm14 = vcmp.eq.s32.totalorder %v6850_v42, 1  ;;  %vm9725_vm2 = vcmp.eq.s32.totalorder %v6852_v45, 1  ;;  %v534_v42 = vld [vmem:[%s6091_s20 + $0x8] sm:$0xff] }
  0xee   : > { %vm2843_vm8 = vmpackc.low %vm9727_vm14, %vm9727_vm14  ;;  %v567_v20 = vmul.f32 %v6145_v17, %v533_v56  ;;  %v568_v2 = vmul.f32 %v6145_v17, %v534_v42 }
  0xef   : > { %v3032_v41 = vshll.u32 %v5229_v10, 16  ;;  %v2877_v12 = vsel %vm2843_vm8, 65537, %v9855_v35  ;;  %vm2842_vm7 = vmpackc.low %vm9725_vm2, %vm9725_vm2  ;;  %v6878_v9 = vsel %vm9747_vm10, %v3022_v59, %v3026_v55  ;;  %v3030_v36 = vor.u32 %v3028_v14, %v3026_v55 }
  0xf0   : > { %v2876_v11 = vsel %vm2842_vm7, 65537, %v9855_v35  ;;  %v6870_v24 = vpop.permute.xlu1 %795  ;;  %v6872_v58 = vpop.permute.xlu0 %792  ;;  %9924 = vst [vmem:[#allocation95_spill] sm:$0xff] %v6878_v9  ;;  %v6896_v14 = vadd.f32 %v601_v0, %v567_v20 }
  0xf1   : > { %9922 = vst [vmem:[#allocation93_spill] sm:$0xff] %v6870_v24  ;;  %9923 = vst [vmem:[#allocation94_spill] sm:$0xff] %v6872_v58  ;;  %v3034_v52 = vrot.slane %v3032_v41, 1  ;;  %v5230_v45 = vcombine.low %v2876_v11, %v2877_v12  ;;  %vm9731_vm8 = vcmp.eq.s32.totalorder %v6870_v24, 1  ;;  %vm9730_vm2 = vcmp.eq.s32.totalorder %v6872_v58, 1 }
  0xf2   : > { %vm2845_vm7 = vmpackc.low %vm9731_vm8, %vm9731_vm8  ;;  %v602_v41 = vmul.f32 %v6156_v25, %v502_v63  ;;  %v3036_v12 = vshrl.u32 %v5229_v10, 16  ;;  %v6907_v10 = vrot.slane %v9897_v30, 1 }
  0xf3   : > { %v3040_v56 = vshll.u32 %v5230_v45, 16  ;;  %v2879_v43 = vsel %vm2845_vm7, 65537, %v9855_v35  ;;  %vm2844_vm14 = vmpackc.low %vm9730_vm2, %vm9730_vm2  ;;  %v6899_v9 = vsel %vm9747_vm10, %v3030_v36, %v3034_v52  ;;  %v3044_v36 = vshrl.u32 %v5230_v45, 16 }
  0xf4   : > { %v2878_v59 = vsel %vm2844_vm14, 65537, %v9855_v35  ;;  %v6892_v11 = vpop.permute.xlu1 %801  ;;  %v6894_v55 = vpop.permute.xlu0 %798  ;;  %9927 = vst [vmem:[#allocation98_spill] sm:$0xff] %v6899_v9  ;;  %v3038_v42 = vor.u32 %v3036_v12, %v3034_v52  ;;  %9928 = vst [vmem:[#allocation99_spill] sm:$0xff] %v6907_v10  ;;  %v6914_v0 = vadd.f32 %v602_v41, %v568_v2  ;;  %v881_v45 = vrot.slane %v6896_v14, 7 }
  0xf5   : > { %9925 = vst [vmem:[#allocation96_spill] sm:$0xff] %v6892_v11  ;;  %9926 = vst [vmem:[#allocation97_spill] sm:$0xff] %v6894_v55  ;;  %v3042_v24 = vrot.slane %v3040_v56, 1  ;;  %v5231_v58 = vcombine.low %v2878_v59, %v2879_v43  ;;  %vm9735_vm7 = vcmp.eq.s32.totalorder %v6892_v11, 1  ;;  %vm9733_vm2 = vcmp.eq.s32.totalorder %v6894_v55, 1 }
  0xf6   : > { %vm2847_vm14 = vmpackc.low %vm9735_vm7, %vm9735_vm7  ;;  %v1201_v23 = vrot.slane %v6914_v0, 1 }
  0xf7   : > { %v3048_v63 = vshll.u32 %v5231_v58, 16  ;;  %v2881_v20 = vsel %vm2847_vm14, 65537, %v9855_v35  ;;  %vm2846_vm8 = vmpackc.low %vm9733_vm2, %vm9733_vm2  ;;  %v6922_v59 = vsel %vm9747_vm10, %v3038_v42, %v3042_v24  ;;  %v3046_v55 = vor.u32 %v3044_v36, %v3042_v24 }
  0xf8   : > { %v2880_v52 = vsel %vm2846_vm8, 65537, %v9855_v35  ;;  %v6917_v56 = vpop.permute.xlu1 %807  ;;  %v6919_v12 = vpop.permute.xlu0 %804  ;;  %9931 = vst [vmem:[#allocation102_spill] sm:$0xff] %v6922_v59  ;;  %v3052_v43 = vshrl.u32 %v5231_v58, 16  ;;  %v9932_v42 = vrot.slane %v6896_v14, 1 }
  0xf9   : > { %9929 = vst [vmem:[#allocation100_spill] sm:$0xff] %v6917_v56  ;;  %9930 = vst [vmem:[#allocation101_spill] sm:$0xff] %v6919_v12  ;;  %v3050_v9 = vrot.slane %v3048_v63, 1  ;;  %v5232_v30 = vcombine.low %v2880_v52, %v2881_v20  ;;  %vm9740_vm14 = vcmp.eq.s32.totalorder %v6917_v56, 1  ;;  %vm9738_vm2 = vcmp.eq.s32.totalorder %v6919_v12, 1 }
  0xfa   : > { %vm2849_vm7 = vmpackc.low %vm9740_vm14, %vm9740_vm14  ;;  %v1200_v63 = vsel %vm1196_vm1, %v6907_v10, %v9932_v42 }
  0xfb   : > { %v3056_v2 = vshll.u32 %v5232_v30, 16  ;;  %v2883_v41 = vsel %vm2849_vm7, 65537, %v9855_v35  ;;  %vm2848_vm8 = vmpackc.low %vm9738_vm2, %vm9738_vm2  ;;  %v3054_v24 = vor.u32 %v3052_v43, %v3050_v9  ;;  %v6941_v59 = vsel %vm9747_vm10, %v3046_v55, %v3050_v9  ;;  %v503_v55 = vld [vmem:[%s6111_s26 + $0x10] sm:$0xff] }
  0xfc   : > { %v2882_v20 = vsel %vm2848_vm8, 65537, %v9855_v35  ;;  %v1057_v36 = vpop.permute.xlu1 %1056  ;;  %v1054_v52 = vpop.permute.xlu0 %1053  ;;  %9933 = vst [vmem:[#allocation103_spill] sm:$0xff] %v6941_v59  ;;  %v3060_v11 = vshrl.u32 %v5232_v30, 16  ;;  %v882_v43 = vsel %vm878_vm4, %v6467_v6, %v881_v45  ;;  %v9934_v9 = vrot.slane %v6914_v0, 7 }
  0xfd   : > { %v3058_v56 = vrot.slane %v3056_v2, 1  ;;  %v5233_v12 = vcombine.low %v2882_v20, %v2883_v41  ;;  %vm1161_vm7 = vcmp.eq.s32.totalorder %v1057_v36, 1  ;;  %vm1160_vm2 = vcmp.eq.s32.totalorder %v1054_v52, 1  ;;  %v535_v2 = vld [vmem:[%s6091_s20 + $0x10] sm:$0xff] }
  0xfe   : > { %vm3101_vm14 = vmpackc.low %vm1161_vm7, %vm1161_vm7  ;;  %v1298_v42 = vsel %vm1160_vm2, %v6907_v10, 0.0  ;;  %v1299_v37 = vsel %vm1161_vm7, %v1200_v63, 0.0  ;;  %v884_v30 = vsel %vm878_vm4, %v881_v45, %v9934_v9 }
  0xff   : > { %v3064_v58 = vshll.u32 %v5233_v12, 16  ;;  %v3135_v1 = vsel %vm3101_vm14, 65537, %v9855_v35  ;;  %vm3100_vm8 = vmpackc.low %vm1160_vm2, %vm1160_vm2  ;;  %1459 = vrot.lane.b32.xlu1 %v1298_v42, %s5733_s24  ;;  %1461 = vrot.lane.b32.xlu0 %v1299_v37, %s5733_s24  ;;  %v6955_v41 = vsel %vm9747_vm10, %v3054_v24, %v3058_v56  ;;  %v3062_v63 = vor.u32 %v3060_v11, %v3058_v56 }
 0x100   : > { %9935 = vst [vmem:[#allocation104_spill] sm:$0xff] %v6955_v41  ;;  %v3134_v12 = vsel %vm3100_vm8, 65537, %v9855_v35  ;;  %v6958_v20 = vpop.permute.xlu1 %1062  ;;  %v1060_v36 = vpop.permute.xlu0 %1059  ;;  %v6966_v37 = vsel %vm812_vm13, %v884_v30, 0.0  ;;  %v6970_v11 = vsel %vm811_vm9, %v882_v43, 0.0  ;;  %v569_v56 = vmul.f32 %v6145_v17, %v535_v2  ;;  %v536_v43 = vld [vmem:[%s6091_s20 + $0x18] sm:$0xff] }
 0x101   : > { %v3066_v52 = vrot.slane %v3064_v58, 1  ;;  %v5234_v59 = vcombine.low %v3134_v12, %v3135_v1  ;;  %vm1163_vm2 = vcmp.eq.s32.totalorder %v6958_v20, 1  ;;  %vm1162_vm14 = vcmp.eq.s32.totalorder %v1060_v36, 1  ;;  %9936 = vst [vmem:[#allocation105_spill] sm:$0xff] %v6966_v37 }
 0x102   : > { %vm3103_vm7 = vmpackc.low %vm1163_vm2, %vm1163_vm2  ;;  %v603_v1 = vmul.f32 %v6156_v25, %v503_v55  ;;  %v504_v55 = vld [vmem:[%s6111_s26 + $0x18] sm:$0xff]  ;;  %v9938_v12 = vrot.slane %v6896_v14, 1 }
 0x103   : > { %v3137_v45 = vsel %vm3103_vm7, 65537, %v9855_v35  ;;  %vm3102_vm8 = vmpackc.low %vm1162_vm14, %vm1162_vm14  ;;  %1589 = vrot.lane.b32.xlu0 %v6966_v37, %s5734_s12  ;;  %1587 = vrot.lane.b32.xlu1 %v6970_v11, %s5734_s12  ;;  %v6983_v33 = vsel %vm9747_vm10, %v3062_v63, %v3066_v52 }
 0x104   : > { %9937 = vst [vmem:[#allocation106_spill] sm:$0xff] %v6983_v33  ;;  %v3136_v58 = vsel %vm3102_vm8, 65537, %v9855_v35  ;;  %v6986_v24 = vpop.permute.xlu1 %1068  ;;  %v6988_v42 = vpop.permute.xlu0 %1065  ;;  %v6996_v30 = vadd.f32 %v603_v1, %v569_v56  ;;  %v1202_v52 = vsel %vm1196_vm1, %v9938_v12, %v1201_v23  ;;  %v570_v56 = vmul.f32 %v6145_v17, %v536_v43 }
 0x105   : > { %v5235_v9 = vcombine.low %v3136_v58, %v3137_v45  ;;  %vm1165_vm9 = vcmp.eq.s32.totalorder %v6986_v24, 1  ;;  %vm1164_vm13 = vcmp.eq.s32.totalorder %v6988_v42, 1  ;;  %v3221_v1 = vshrl.u32 %v5234_v59, 16 }
 0x106   : > { %vm3105_vm7 = vmpackc.low %vm1165_vm9, %vm1165_vm9  ;;  %v1300_v59 = vsel %vm1162_vm14, %v1202_v52, 0.0 }
 0x107   : > { %v3225_v2 = vshrl.u32 %v5235_v9, 16  ;;  %v3139_v63 = vsel %vm3105_vm7, 65537, %v9855_v35  ;;  %vm3104_vm8 = vmpackc.low %vm1164_vm13, %vm1164_vm13  ;;  %1336 = vrot.lane.b32.xlu0 %v6896_v14, %s5732_s13  ;;  %1683 = vrot.lane.b32.xlu1 %v6896_v14, %s5735_s14  ;;  %v3228_v45 = vshll.u32 %v5235_v9, 16  ;;  %v604_v14 = vmul.f32 %v6156_v25, %v504_v55 }
 0x108   : > { %v3138_v58 = vsel %vm3104_vm8, 65537, %v9855_v35  ;;  %v7012_v33 = vpop.permute.xlu1 %1074  ;;  %v7014_v41 = vpop.permute.xlu0 %1071  ;;  %v3223_v36 = vrot.slane %v3221_v1, 7  ;;  %v9940_v1 = vrot.slane %v6914_v0, 7 }
 0x109   : > { %v3227_v10 = vrot.slane %v3225_v2, 7  ;;  %v5236_v5 = vcombine.low %v3138_v58, %v3139_v63  ;;  %vm1167_vm7 = vcmp.eq.s32.totalorder %v7012_v33, 1  ;;  %vm1166_vm10 = vcmp.eq.s32.totalorder %v7014_v41, 1  ;;  %v9984_v33 = vld [vmem:[#allocation25_spill] sm:$0xff] }
 0x10a   : > { %vm3107_vm3 = vmpackc.low %vm1167_vm7, %vm1167_vm7  ;;  %v7039_v43 = vadd.f32 %v604_v14, %v570_v56  ;;  %v9942_v56 = vrot.slane %v6996_v30, 1 }
 0x10b   : > { %v3230_v12 = vor.u32 %v3228_v45, %v3227_v10  ;;  %v3233_v29 = vshrl.u32 %v5236_v5, 16  ;;  %v3141_v2 = vsel %vm3107_vm3, 65537, %v9855_v35  ;;  %vm3106_vm8 = vmpackc.low %vm1166_vm10, %vm1166_vm10  ;;  %1781 = vrot.lane.b32.xlu0 %v1300_v59, %s5736_s15  ;;  %1685 = vrot.lane.b32.xlu1 %v6914_v0, %s5735_s14  ;;  %v3236_v55 = vshll.u32 %v5236_v5, 16 }
 0x10c   : > { %v3140_v63 = vsel %vm3106_vm8, 65537, %v9855_v35  ;;  %v7033_v52 = vpop.permute.xlu1 %1080  ;;  %v7035_v45 = vpop.permute.xlu0 %1077  ;;  %v9939_v5 = vrot.slane %v6996_v30, 7  ;;  %v1204_v14 = vsel %vm1196_vm1, %v1201_v23, %v9942_v56 }
 0x10d   : > { %v3235_v58 = vrot.slane %v3233_v29, 7  ;;  %v5237_v9 = vcombine.low %v3140_v63, %v3141_v2  ;;  %vm9754_vm3 = vcmp.eq.s32.totalorder %v7033_v52, 1  ;;  %vm9755_vm14 = vcmp.eq.s32.totalorder %v7035_v45, 1 }
 0x10e   : > { %vm3109_vm12 = vmpackc.low %vm9754_vm3, %vm9754_vm3  ;;  %v886_v16 = vsel %vm878_vm4, %v9940_v1, %v9939_v5  ;;  %v7050_v27 = vsel %vm9791_vm11, %v3223_v36, %v3230_v12  ;;  %v1301_v23 = vsel %vm1163_vm2, %v1204_v14, 0.0 }
 0x10f   : > { %9941 = vst [vmem:[#allocation107_spill] sm:$0xff] %v7050_v27  ;;  %v3238_v29 = vor.u32 %v3236_v55, %v3235_v58  ;;  %v3241_v2 = vshrl.u32 %v5237_v9, 16  ;;  %v3143_v63 = vsel %vm3109_vm12, 65537, %v9855_v35  ;;  %vm3108_vm8 = vmpackc.low %vm9755_vm14, %vm9755_vm14  ;;  %1463 = vrot.lane.b32.xlu0 %v1300_v59, %s5733_s24  ;;  %1338 = vrot.lane.b32.xlu1 %v6914_v0, %s5732_s13  ;;  %v3244_v5 = vshll.u32 %v5237_v9, 16 }
 0x110   : > { %v3142_v12 = vsel %vm3108_vm8, 65537, %v9855_v35  ;;  %v7063_v36 = vpop.permute.xlu1 %1086  ;;  %v7065_v55 = vpop.permute.xlu0 %1083  ;;  %v7074_v0 = vsel %vm813_vm0, %v886_v16, 0.0  ;;  %v2431_v16 = vld [vmem:[%s9632_s5 + $0x8] sm:$0xff] }
 0x111   : > { %v3243_v1 = vrot.slane %v3241_v2, 7  ;;  %v5238_v27 = vcombine.low %v3142_v12, %v3143_v63  ;;  %vm1171_vm12 = vcmp.eq.s32.totalorder %v7063_v36, 1  ;;  %vm1170_vm3 = vcmp.eq.s32.totalorder %v7065_v55, 1  ;;  %9943 = vst [vmem:[#allocation108_spill] sm:$0xff] %v7074_v0 }
 0x112   : > { %vm3111_vm14 = vmpackc.low %vm1171_vm12, %vm1171_vm12  ;;  %v7079_v59 = vsel %vm9791_vm11, %v3227_v10, %v3238_v29 }
 0x113   : > { %9944 = vst [vmem:[#allocation109_spill] sm:$0xff] %v7079_v59  ;;  %v3246_v2 = vor.u32 %v3244_v5, %v3243_v1  ;;  %v3249_v63 = vshrl.u32 %v5238_v27, 16  ;;  %v3145_v56 = vsel %vm3111_vm14, 65537, %v9855_v35  ;;  %vm3110_vm8 = vmpackc.low %vm1170_vm3, %vm1170_vm3  ;;  %1879 = vrot.lane.b32.xlu0 %v7074_v0, %s5737_s16  ;;  %1783 = vrot.lane.b32.xlu1 %v1301_v23, %s5736_s15  ;;  %v3252_v10 = vshll.u32 %v5238_v27, 16  ;;  %v537_v59 = vld [vmem:[%s6091_s20 + $0x20] sm:$0xff] }
 0x114   : > { %v3144_v20 = vsel %vm3110_vm8, 65537, %v9855_v35  ;;  %v7096_v29 = vpop.permute.xlu1 %1092  ;;  %v7098_v14 = vpop.permute.xlu0 %1089  ;;  %v5551_v5 = vpack.c.bf16 %v2431_v16, %v2430_v53  ;;  %v2433_v16 = vld [vmem:[%s9632_s5 + $0x18] sm:$0xff] }
 0x115   : > { %v3251_v12 = vrot.slane %v3249_v63, 7  ;;  %v5239_v9 = vcombine.low %v3144_v20, %v3145_v56  ;;  %vm9762_vm0 = vcmp.eq.s32.totalorder %v7096_v29, 1  ;;  %vm9763_vm2 = vcmp.eq.s32.totalorder %v7098_v14, 1 }
 0x116   : > { %vm3113_vm14 = vmpackc.low %vm9762_vm0, %vm9762_vm0  ;;  %5552 = vmatprep.subr.bf16.mxu0 %v5551_v5  ;;  %v7107_v27 = vsel %vm9791_vm11, %v3235_v58, %v3246_v2  ;;  %v9946_v63 = vrot.slane %v7039_v43, 7  ;;  %v9947_v56 = vrot.slane %v6996_v30, 7  ;;  %v2432_v2 = vld [vmem:[%s9632_s5 + $0x10] sm:$0xff] }
 0x117   : > { %9945 = vst [vmem:[#allocation110_spill] sm:$0xff] %v7107_v27  ;;  %v3254_v49 = vor.u32 %v3252_v10, %v3251_v12  ;;  %v3257_v37 = vshrl.u32 %v5239_v9, 16  ;;  %v3147_v53 = vsel %vm3113_vm14, 65537, %v9855_v35  ;;  %vm3112_vm8 = vmpackc.low %vm9763_vm2, %vm9763_vm2  ;;  %1591 = vrot.lane.b32.xlu0 %v7074_v0, %s5734_s12  ;;  %1465 = vrot.lane.b32.xlu1 %v1301_v23, %s5733_s24  ;;  %v3260_v10 = vshll.u32 %v5239_v9, 16 }
 0x118   : > { %v888_v58 = vsel %vm878_vm4, %v9947_v56, %v9946_v63  ;;  %v3146_v20 = vsel %vm3112_vm8, 65537, %v9855_v35  ;;  %v7128_v27 = vpop.permute.xlu1 %1098  ;;  %v7130_v23 = vpop.permute.xlu0 %1095  ;;  %5554 = vmatpush3.bf16.msra.mxu0 %v5551_v5  ;;  %v5555_v0 = vpack.c.bf16 %v2433_v16, %v2432_v2  ;;  %v571_v56 = vmul.f32 %v6145_v17, %v537_v59 }
 0x119   : > { %v3259_v26 = vrot.slane %v3257_v37, 7  ;;  %v5240_v63 = vcombine.low %v3146_v20, %v3147_v53  ;;  %vm9764_vm14 = vcmp.eq.s32.totalorder %v7128_v27, 1  ;;  %vm9765_vm0 = vcmp.eq.s32.totalorder %v7130_v23, 1 }
 0x11a   : > { %vm3115_vm2 = vmpackc.low %vm9764_vm14, %vm9764_vm14  ;;  %v7141_v9 = vsel %vm814_vm15, %v888_v58, 0.0  ;;  %5556 = vmatprep.subr.bf16.mxu0 %v5555_v0  ;;  %v7144_v5 = vsel %vm9791_vm11, %v3243_v1, %v3254_v49  ;;  %v1205_v17 = vrot.slane %v7039_v43, 1  ;;  %v605_v49 = vmul.f32 %v6156_v25, %v505_v21 }
 0x11b   : > { %9948 = vst [vmem:[#allocation111_spill] sm:$0xff] %v7144_v5  ;;  %v3262_v37 = vor.u32 %v3260_v10, %v3259_v26  ;;  %v3265_v53 = vshrl.u32 %v5240_v63, 16  ;;  %v3149_v2 = vsel %vm3115_vm2, 65537, %v9855_v35  ;;  %vm3114_vm8 = vmpackc.low %vm9765_vm0, %vm9765_vm0  ;;  %1975 = vrot.lane.b32.xlu0 %v6996_v30, %s5738_s28  ;;  %1881 = vrot.lane.b32.xlu1 %v7141_v9, %s5737_s16  ;;  %v3268_v1 = vshll.u32 %v5240_v63, 16 }
 0x11c   : > { %v3148_v59 = vsel %vm3114_vm8, 65537, %v9855_v35  ;;  %v7160_v58 = vpop.permute.xlu1 %1104  ;;  %v7162_v16 = vpop.permute.xlu0 %1101  ;;  %5558 = vmatpush3.bf16.msra.mxu0 %v5555_v0  ;;  %vm2539_vm15 = vcmask 1043456  }
 0x11d   : > { %9949 = vst [vmem:[#allocation112_spill] sm:$0xff] %v7160_v58  ;;  %v3267_v10 = vrot.slane %v3265_v53, 7  ;;  %v5241_v20 = vcombine.low %v3148_v59, %v3149_v2  ;;  %vm9767_vm2 = vcmp.eq.s32.totalorder %v7160_v58, 1  ;;  %vm9768_vm14 = vcmp.eq.s32.totalorder %v7162_v16, 1  ;;  %5465 = vmatprep.subr.msk.mxu0 %vm2539_vm15, %v2434_v32 }
 0x11e   : > { %vm3117_vm0 = vmpackc.low %vm9767_vm2, %vm9767_vm2  ;;  %v7171_v25 = vsel %vm9791_vm11, %v3251_v12, %v3262_v37  ;;  %v9951_v53 = vrot.slane %v6996_v30, 1  ;;  %v7184_v12 = vadd.f32 %v605_v49, %v571_v56 }
 0x11f   : > { %9950 = vst [vmem:[#allocation113_spill] sm:$0xff] %v7171_v25  ;;  %v3270_v21 = vor.u32 %v3268_v1, %v3267_v10  ;;  %v3273_v63 = vshrl.u32 %v5241_v20, 16  ;;  %v3151_v0 = vsel %vm3117_vm0, 65537, %v9855_v35  ;;  %vm3116_vm8 = vmpackc.low %vm9768_vm14, %vm9768_vm14  ;;  %1687 = vrot.lane.b32.xlu0 %v6996_v30, %s5735_s14  ;;  %1593 = vrot.lane.b32.xlu1 %v7141_v9, %s5734_s12  ;;  %v3276_v37 = vshll.u32 %v5241_v20, 16 }
 0x120   : > { %v1206_v2 = vsel %vm1196_vm1, %v9951_v53, %v1205_v17  ;;  %v3150_v1 = vsel %vm3116_vm8, 65537, %v9855_v35  ;;  %v7187_v59 = vpop.permute.xlu1 %1110  ;;  %v7189_v25 = vpop.permute.xlu0 %1107  ;;  %5466 = vmatpush3.msk.msra.mxu0 %vm2539_vm15, %v2434_v32 }
 0x121   : > { %v3275_v5 = vrot.slane %v3273_v63, 7  ;;  %v5242_v58 = vcombine.low %v3150_v1, %v3151_v0  ;;  %vm1179_vm0 = vcmp.eq.s32.totalorder %v7187_v59, 1  ;;  %vm1178_vm2 = vcmp.eq.s32.totalorder %v7189_v25, 1 }
 0x122   : > { %vm3119_vm14 = vmpackc.low %vm1179_vm0, %vm1179_vm0  ;;  %v1302_v56 = vsel %vm1164_vm13, %v1206_v2, 0.0  ;;  %v7200_v49 = vsel %vm9791_vm11, %v3259_v26, %v3270_v21 }
 0x123   : > { %9952 = vst [vmem:[#allocation114_spill] sm:$0xff] %v7200_v49  ;;  %v3278_v53 = vor.u32 %v3276_v37, %v3275_v5  ;;  %v3281_v32 = vshrl.u32 %v5242_v58, 16  ;;  %v3153_v63 = vsel %vm3119_vm14, 65537, %v9855_v35  ;;  %vm3118_vm15 = vmpackc.low %vm1178_vm2, %vm1178_vm2  ;;  %2070 = vrot.lane.b32.xlu0 %v1302_v56, %s5739_s11  ;;  %1977 = vrot.lane.b32.xlu1 %v7039_v43, %s5738_s28  ;;  %v3284_v42 = vshll.u32 %v5242_v58, 16 }
 0x124   : > { %v3152_v26 = vsel %vm3118_vm15, 65537, %v9855_v35  ;;  %v7211_v21 = vpop.permute.xlu1 %1116  ;;  %v7213_v0 = vpop.permute.xlu0 %1113 }
 0x125   : > { %9953 = vst [vmem:[#allocation115_spill] sm:$0xff] %v7211_v21  ;;  %9954 = vst [vmem:[#allocation116_spill] sm:$0xff] %v7213_v0  ;;  %v3283_v2 = vrot.slane %v3281_v32, 7  ;;  %v5243_v37 = vcombine.low %v3152_v26, %v3153_v63  ;;  %vm9770_vm13 = vcmp.eq.s32.totalorder %v7211_v21, 1  ;;  %vm9771_vm14 = vcmp.eq.s32.totalorder %v7213_v0, 1 }
 0x126   : > { %vm3121_vm8 = vmpackc.low %vm9770_vm13, %vm9770_vm13  ;;  %v7221_v1 = vsel %vm9791_vm11, %v3267_v10, %v3278_v53  ;;  %v9956_v32 = vrot.slane %v7184_v12, 1 }
 0x127   : > { %9955 = vst [vmem:[#allocation117_spill] sm:$0xff] %v7221_v1  ;;  %v3286_v58 = vor.u32 %v3284_v42, %v3283_v2  ;;  %v3289_v20 = vshrl.u32 %v5243_v37, 16  ;;  %v3155_v49 = vsel %vm3121_vm8, 65537, %v9855_v35  ;;  %vm3120_vm15 = vmpackc.low %vm9771_vm14, %vm9771_vm14  ;;  %1689 = vrot.lane.b32.xlu0 %v7039_v43, %s5735_s14  ;;  %1340 = vrot.lane.b32.xlu1 %v6996_v30, %s5732_s13  ;;  %v3292_v10 = vshll.u32 %v5243_v37, 16 }
 0x128   : > { %v1208_v63 = vsel %vm1196_vm1, %v1205_v17, %v9956_v32  ;;  %v3154_v53 = vsel %vm3120_vm15, 65537, %v9855_v35  ;;  %v7235_v42 = vpop.permute.xlu1 %1122  ;;  %v7237_v26 = vpop.permute.xlu0 %1119  ;;  %v889_v37 = vrot.slane %v7184_v12, 7 }
 0x129   : > { %9957 = vst [vmem:[#allocation118_spill] sm:$0xff] %v7235_v42  ;;  %9958 = vst [vmem:[#allocation119_spill] sm:$0xff] %v7237_v26  ;;  %v3291_v1 = vrot.slane %v3289_v20, 7  ;;  %v5244_v21 = vcombine.low %v3154_v53, %v3155_v49  ;;  %vm9773_vm8 = vcmp.eq.s32.totalorder %v7235_v42, 1  ;;  %vm1182_vm13 = vcmp.eq.s32.totalorder %v7237_v26, 1 }
 0x12a   : > { %vm3123_vm14 = vmpackc.low %vm9773_vm8, %vm9773_vm8  ;;  %v1303_v30 = vsel %vm1165_vm9, %v1208_v63, 0.0  ;;  %v7247_v17 = vsel %vm9791_vm11, %v3275_v5, %v3286_v58 }
 0x12b   : > { %9959 = vst [vmem:[#allocation120_spill] sm:$0xff] %v7247_v17  ;;  %v3294_v32 = vor.u32 %v3292_v10, %v3291_v1  ;;  %v3297_v0 = vshrl.u32 %v5244_v21, 16  ;;  %v3157_v49 = vsel %vm3123_vm14, 65537, %v9855_v35  ;;  %vm3122_vm15 = vmpackc.low %vm1182_vm13, %vm1182_vm13  ;;  %2072 = vrot.lane.b32.xlu0 %v1303_v30, %s5739_s11  ;;  %1785 = vrot.lane.b32.xlu1 %v1302_v56, %s5736_s15  ;;  %v3300_v20 = vshll.u32 %v5244_v21, 16 }
 0x12c   : > { %v3156_v24 = vsel %vm3122_vm15, 65537, %v9855_v35  ;;  %v7257_v63 = vpop.permute.xlu1 %1128  ;;  %v7259_v5 = vpop.permute.xlu0 %1125  ;;  %v9963_v21 = vrot.slane %v7039_v43, 7 }
 0x12d   : > { %9960 = vst [vmem:[#allocation121_spill] sm:$0xff] %v7257_v63  ;;  %9961 = vst [vmem:[#allocation122_spill] sm:$0xff] %v7259_v5  ;;  %v3299_v58 = vrot.slane %v3297_v0, 7  ;;  %v5245_v10 = vcombine.low %v3156_v24, %v3157_v49  ;;  %vm9776_vm9 = vcmp.eq.s32.totalorder %v7257_v63, 1  ;;  %vm9777_vm14 = vcmp.eq.s32.totalorder %v7259_v5, 1 }
 0x12e   : > { %vm3125_vm8 = vmpackc.low %vm9776_vm9, %vm9776_vm9  ;;  %v7267_v53 = vsel %vm9791_vm11, %v3283_v2, %v3294_v32  ;;  %v890_v17 = vsel %vm878_vm4, %v9963_v21, %v889_v37 }
 0x12f   : > { %9962 = vst [vmem:[#allocation123_spill] sm:$0xff] %v7267_v53  ;;  %v3302_v42 = vor.u32 %v3300_v20, %v3299_v58  ;;  %v3305_v26 = vshrl.u32 %v5245_v10, 16  ;;  %v3159_v0 = vsel %vm3125_vm8, 65537, %v9855_v35  ;;  %vm3124_vm15 = vmpackc.low %vm9777_vm14, %vm9777_vm14  ;;  %1467 = vrot.lane.b32.xlu0 %v1302_v56, %s5733_s24  ;;  %1342 = vrot.lane.b32.xlu1 %v7039_v43, %s5732_s13  ;;  %v3308_v49 = vshll.u32 %v5245_v10, 16 }
 0x130   : > { %v3158_v2 = vsel %vm3124_vm15, 65537, %v9855_v35  ;;  %v7280_v32 = vpop.permute.xlu1 %1134  ;;  %v7282_v24 = vpop.permute.xlu0 %1131  ;;  %v7288_v53 = vsel %vm815_vm6, %v890_v17, 0.0 }
 0x131   : > { %9964 = vst [vmem:[#allocation124_spill] sm:$0xff] %v7280_v32  ;;  %9965 = vst [vmem:[#allocation125_spill] sm:$0xff] %v7282_v24  ;;  %v3307_v20 = vrot.slane %v3305_v26, 7  ;;  %v5246_v21 = vcombine.low %v3158_v2, %v3159_v0  ;;  %vm9778_vm8 = vcmp.eq.s32.totalorder %v7280_v32, 1  ;;  %vm1186_vm9 = vcmp.eq.s32.totalorder %v7282_v24, 1 }
 0x132   : > { %vm3127_vm14 = vmpackc.low %vm9778_vm8, %vm9778_vm8  ;;  %v7294_v43 = vsel %vm9791_vm11, %v3291_v1, %v3302_v42 }
 0x133   : > { %9966 = vst [vmem:[#allocation126_spill] sm:$0xff] %v7294_v43  ;;  %v3310_v56 = vor.u32 %v3308_v49, %v3307_v20  ;;  %v3313_v10 = vshrl.u32 %v5246_v21, 16  ;;  %v3161_v26 = vsel %vm3127_vm14, 65537, %v9855_v35  ;;  %vm3126_vm15 = vmpackc.low %vm1186_vm9, %vm1186_vm9  ;;  %1883 = vrot.lane.b32.xlu0 %v7288_v53, %s5737_s16  ;;  %1787 = vrot.lane.b32.xlu1 %v1303_v30, %s5736_s15  ;;  %v3316_v47 = vshll.u32 %v5246_v21, 16  ;;  %v9970_v21 = vld [vmem:[#allocation23_spill] sm:$0xff] }
 0x134   : > { %v3160_v17 = vsel %vm3126_vm15, 65537, %v9855_v35  ;;  %v7304_v0 = vpop.permute.xlu1 %1140  ;;  %v7306_v1 = vpop.permute.xlu0 %1137  ;;  %v9971_v43 = vrot.slane %v9970_v21, 7 }
 0x135   : > { %9967 = vst [vmem:[#allocation127_spill] sm:$0xff] %v7304_v0  ;;  %9968 = vst [vmem:[#allocation128_spill] sm:$0xff] %v7306_v1  ;;  %v3315_v42 = vrot.slane %v3313_v10, 7  ;;  %v5247_v49 = vcombine.low %v3160_v17, %v3161_v26  ;;  %vm9782_vm6 = vcmp.eq.s32.totalorder %v7304_v0, 1  ;;  %vm9795_vm14 = vcmp.eq.s32.totalorder %v7306_v1, 1 }
 0x136   : > { %vm3129_vm8 = vmpackc.low %vm9782_vm6, %vm9782_vm6  ;;  %v7314_v2 = vsel %vm9791_vm11, %v3299_v58, %v3310_v56  ;;  %v892_v32 = vsel %vm878_vm4, %v889_v37, %v9971_v43 }
 0x137   : > { %9969 = vst [vmem:[#allocation129_spill] sm:$0xff] %v7314_v2  ;;  %v3318_v24 = vor.u32 %v3316_v47, %v3315_v42  ;;  %v3321_v63 = vshrl.u32 %v5247_v49, 16  ;;  %v3163_v10 = vsel %vm3129_vm8, 65537, %v9855_v35  ;;  %vm3128_vm15 = vmpackc.low %vm9795_vm14, %vm9795_vm14  ;;  %1595 = vrot.lane.b32.xlu0 %v7288_v53, %s5734_s12  ;;  %1469 = vrot.lane.b32.xlu1 %v1303_v30, %s5733_s24  ;;  %v3324_v26 = vshll.u32 %v5247_v49, 16 }
 0x138   : > { %v3162_v58 = vsel %vm3128_vm15, 65537, %v9855_v35  ;;  %v7327_v56 = vpop.permute.xlu1 %1146  ;;  %v7329_v17 = vpop.permute.xlu0 %1143  ;;  %v7335_v47 = vsel %vm816_vm5, %v892_v32, 0.0  ;;  %v1209_v49 = vrot.slane %v9970_v21, 1  ;;  %vm9996_vm14 = vcmp.eq.s32.totalorder %v7098_v14, 1 }
 0x139   : > { %9972 = vst [vmem:[#allocation23_spill] sm:$0xff] %v7327_v56  ;;  %9973 = vst [vmem:[#allocation130_spill] sm:$0xff] %v7329_v17  ;;  %v3323_v37 = vrot.slane %v3321_v63, 7  ;;  %v5248_v43 = vcombine.low %v3162_v58, %v3163_v10  ;;  %vm9783_vm4 = vcmp.eq.s32.totalorder %v7327_v56, 1  ;;  %vm9794_vm8 = vcmp.eq.s32.totalorder %v7329_v17, 1 }
 0x13a   : > { %vm3131_vm6 = vmpackc.low %vm9783_vm4, %vm9783_vm4  ;;  %v7341_v30 = vsel %vm9791_vm11, %v3307_v20, %v3318_v24 }
 0x13b   : > { %9974 = vst [vmem:[#allocation131_spill] sm:$0xff] %v7341_v30  ;;  %v3326_v2 = vor.u32 %v3324_v26, %v3323_v37  ;;  %v3329_v63 = vshrl.u32 %v5248_v43, 16  ;;  %v3165_v10 = vsel %vm3131_vm6, 65537, %v9855_v35  ;;  %vm3130_vm15 = vmpackc.low %vm9794_vm8, %vm9794_vm8  ;;  %1979 = vrot.lane.b32.xlu0 %v7184_v12, %s5738_s28  ;;  %1885 = vrot.lane.b32.xlu1 %v7335_v47, %s5737_s16  ;;  %v3332_v28 = vshll.u32 %v5248_v43, 16 }
 0x13c   : > { %v3164_v32 = vsel %vm3130_vm15, 65537, %v9855_v35  ;;  %v7353_v24 = vpop.permute.xlu1 %1152  ;;  %v7355_v20 = vpop.permute.xlu0 %1149  ;;  %v9978_v43 = vrot.slane %v7184_v12, 1  ;;  %vm2442_vm8 = vcmask 293888  }
 0x13d   : > { %9975 = vst [vmem:[#allocation132_spill] sm:$0xff] %v7353_v24  ;;  %9976 = vst [vmem:[#allocation133_spill] sm:$0xff] %v7355_v20  ;;  %v3331_v26 = vrot.slane %v3329_v63, 7  ;;  %v5249_v58 = vcombine.low %v3164_v32, %v3165_v10  ;;  %vm9792_vm5 = vcmp.eq.s32.totalorder %v7353_v24, 1  ;;  %vm9793_vm6 = vcmp.eq.s32.totalorder %v7355_v20, 1 }
 0x13e   : > { %vm3133_vm4 = vmpackc.low %vm9792_vm5, %vm9792_vm5  ;;  %v7363_v30 = vsel %vm9791_vm11, %v3315_v42, %v3326_v2  ;;  %v1210_v56 = vsel %vm1196_vm1, %v9978_v43, %v1209_v49  ;;  %vm810_vm5 = vcmp.eq.s32.totalorder %v6629_v51, 1  ;;  %v7544_v51 = vsel %vm9996_vm14, %v6530_v8, 0.0 }
 0x13f   : > { %9977 = vst [vmem:[#allocation134_spill] sm:$0xff] %v7363_v30  ;;  %v3334_v17 = vor.u32 %v3332_v28, %v3331_v26  ;;  %v3337_v0 = vshrl.u32 %v5249_v58, 16  ;;  %v3167_v63 = vsel %vm3133_vm4, 65537, %v9855_v35  ;;  %vm3132_vm15 = vmpackc.low %vm9793_vm6, %vm9793_vm6  ;;  %1691 = vrot.lane.b32.xlu0 %v7184_v12, %s5735_s14  ;;  %1597 = vrot.lane.b32.xlu1 %v7335_v47, %s5734_s12  ;;  %v3340_v10 = vshll.u32 %v5249_v58, 16 }
 0x140   : > { %v3166_v42 = vsel %vm3132_vm15, 65537, %v9855_v35  ;;  %v1304_v28 = vsel %vm1166_vm10, %v1210_v56, 0.0  ;;  %vm9983_vm10 = vcmp.eq.s32.totalorder %v6685_v54, 1  ;;  %vm9986_vm4 = vcmp.eq.s32.totalorder %v7035_v45, 1  ;;  %v7443_v45 = vpop.permute.xlu0 %1334 }
 0x141   : > { %v3339_v2 = vrot.slane %v3337_v0, 7  ;;  %v5250_v32 = vcombine.low %v3166_v42, %v3167_v63  ;;  %v7380_v43 = vsel %vm9791_vm11, %v3323_v37, %v3334_v17  ;;  %v9980_v0 = vrot.slane %v6193_v18, 1 }
 0x142   : > { %v1306_v54 = vsel %vm9986_vm4, %v6506_v19, 0.0  ;;  %vm9987_vm15 = vcmp.eq.s32.totalorder %v7033_v52, 1  ;;  %v9988_v19 = vld [vmem:[#allocation27_spill] sm:$0xff]  ;;  %v7481_v63 = vsel %vm1171_vm12, %v6515_v38, 0.0  ;;  %vm2166_vm12 = vcmask 31744  }
 0x143   : > { %v3342_v30 = vor.u32 %v3340_v10, %v3339_v2  ;;  %v3345_v24 = vshrl.u32 %v5250_v32, 16  ;;  %2074 = vrot.lane.b32.xlu0 %v1304_v28, %s5739_s11  ;;  %1981 = vrot.lane.b32.xlu1 %v9970_v21, %s5738_s28  ;;  %v3348_v1 = vshll.u32 %v5250_v32, 16  ;;  %v1212_v41 = vsel %vm1196_vm1, %v1209_v49, %v9980_v0  ;;  %v9990_v49 = vld [vmem:[#allocation26_spill] sm:$0xff]  ;;  %v9992_v0 = vld [vmem:[#allocation29_spill] sm:$0xff] }
 0x144   : > { %v1305_v37 = vsel %vm1167_vm7, %v1212_v41, 0.0  ;;  %vm9985_vm7 = vcmp.eq.s32.totalorder %v6683_v40, 1  ;;  %v1307_v40 = vsel %vm9987_vm15, %v6501_v4, 0.0  ;;  %vm2199_vm4 = vcmask 64512  }
 0x145   : > { %v3347_v20 = vrot.slane %v3345_v24, 7  ;;  %v7386_v5 = vsel %vm9791_vm11, %v3331_v26, %v3342_v30  ;;  %vm9993_vm15 = vcmp.eq.s32.totalorder %v6714_v13, 1  ;;  %vm2397_vm6 = vcmask 261120  }
 0x146   : > { %9979 = vst [vmem:[#allocation135_spill] sm:$0xff] %v7386_v5  ;;  %v7514_v41 = vsel %vm9993_vm15, %v9992_v0, 0.0  ;;  %vm2331_vm15 = vcmask 195584   ;;  %vm9997_vm14 = vcmp.eq.s32.totalorder %v7096_v29, 1  ;;  %v10133_v5 = vld [vmem:[#allocation99_spill] sm:$0xff] }
 0x147   : > { %v3350_v56 = vor.u32 %v3348_v1, %v3347_v20  ;;  %1693 = vrot.lane.b32.xlu0 %v9970_v21, %s5735_s14  ;;  %1344 = vrot.lane.b32.xlu1 %v7184_v12, %s5732_s13  ;;  %v9982_v1 = vld [vmem:[#allocation24_spill] sm:$0xff]  ;;  %v7419_v12 = vsel %vm9985_vm7, %v9984_v33, 0.0  ;;  %vm9991_vm7 = vcmp.eq.s32.totalorder %v6699_v57, 1  ;;  %v7470_v20 = vsel %vm1170_vm3, %v6518_v60, 0.0 }
 0x148   : > { %v7408_v30 = vsel %vm9983_vm10, %v9982_v1, 0.0  ;;  %vm9989_vm10 = vcmp.eq.s32.totalorder %v6697_v3, 1  ;;  %v7453_v24 = vsel %vm9991_vm7, %v9990_v49, 0.0  ;;  %vm809_vm3 = vcmp.eq.s32.totalorder %v6609_v61, 1 }
 0x149   : > { %v7396_v17 = vsel %vm9791_vm11, %v3339_v2, %v3350_v56  ;;  %v9994_v56 = vld [vmem:[#allocation30_spill] sm:$0xff]  ;;  %vm2232_vm7 = vcmask 97280   ;;  %vm2265_vm11 = vcmask 130048  }
 0x14a   : > { %9981 = vst [vmem:[#allocation136_spill] sm:$0xff] %v7396_v17 }
 0x14b   : > { %2076 = vrot.lane.b32.xlu0 %v1305_v37, %s5739_s11  ;;  %1789 = vrot.lane.b32.xlu1 %v1304_v28, %s5736_s15 }
 0x14f   : > { %1471 = vrot.lane.b32.xlu0 %v1304_v28, %s5733_s24  ;;  %1346 = vrot.lane.b32.xlu1 %v9970_v21, %s5732_s13  ;;  %v7448_v21 = vsel %vm9989_vm10, %v9988_v19, 0.0  ;;  %v980_v28 = vsel %vm809_vm3, %v6467_v6, 0.0  ;;  %vm9995_vm10 = vcmp.eq.s32.totalorder %v6716_v62, 1  ;;  %vm2298_vm3 = vcmask 162816  }
 0x150   : > { %v7519_v61 = vsel %vm9995_vm10, %v9994_v56, 0.0  ;;  %vm2364_vm10 = vcmask 228352  }
 0x153   : > { %1887 = vrot.lane.b32.xlu0 %v7408_v30, %s5737_s16  ;;  %1791 = vrot.lane.b32.xlu1 %v1305_v37, %s5736_s15 }
 0x157   : > { %1599 = vrot.lane.b32.xlu0 %v7408_v30, %s5734_s12  ;;  %1473 = vrot.lane.b32.xlu1 %v1305_v37, %s5733_s24  ;;  %v2167_v37 = vsel %vm2166_vm12, %v980_v28, %v7443_v45 }
 0x15b   : > { %1983 = vrot.lane.b32.xlu0 %v6193_v18, %s5738_s28  ;;  %1889 = vrot.lane.b32.xlu1 %v7419_v12, %s5737_s16 }
 0x15f   : > { %1695 = vrot.lane.b32.xlu0 %v6193_v18, %s5735_s14  ;;  %1601 = vrot.lane.b32.xlu1 %v7419_v12, %s5734_s12 }
 0x163   : > { %2078 = vrot.lane.b32.xlu0 %v1306_v54, %s5739_s11  ;;  %1985 = vrot.lane.b32.xlu1 %v6202_v39, %s5738_s28 }
 0x167   : > { %1793 = vrot.lane.b32.xlu0 %v1306_v54, %s5736_s15  ;;  %1697 = vrot.lane.b32.xlu1 %v6202_v39, %s5735_s14 }
 0x16b   : > { %1795 = vrot.lane.b32.xlu0 %v1307_v40, %s5736_s15  ;;  %2080 = vrot.lane.b32.xlu1 %v1307_v40, %s5739_s11 }
 0x16f   : > { %1893 = vrot.lane.b32.xlu0 %v7448_v21, %s5737_s16  ;;  %1891 = vrot.lane.b32.xlu1 %v7453_v24, %s5737_s16 }
 0x171   : > { %v1460_v4 = vpop.permute.xlu1 %1459  ;;  %v7459_v52 = vpop.permute.xlu0 %1461 }
 0x172   : > { %v2200_v13 = vsel %vm2199_vm4, %v2167_v37, %v1460_v4 }
 0x173   : > { %1989 = vrot.lane.b32.xlu0 %v6218_v44, %s5738_s28  ;;  %1987 = vrot.lane.b32.xlu1 %v6210_v46, %s5738_s28 }
 0x175   : > { %v7465_v3 = vpop.permute.xlu0 %1589  ;;  %v1588_v57 = vpop.permute.xlu1 %1587 }
 0x176   : > { %v2233_v1 = vsel %vm2232_vm7, %v2200_v13, %v1588_v57 }
 0x177   : > { %1348 = vrot.lane.b32.xlu0 %v6193_v18, %s5732_s13  ;;  %2082 = vrot.lane.b32.xlu1 %v7470_v20, %s5739_s11 }
 0x179   : > { %v7476_v26 = vpop.permute.xlu0 %1336  ;;  %v1684_v58 = vpop.permute.xlu1 %1683 }
 0x17b   : > { %1350 = vrot.lane.b32.xlu0 %v6202_v39, %s5732_s13  ;;  %2084 = vrot.lane.b32.xlu1 %v7481_v63, %s5739_s11 }
 0x17d   : > { %v1782_v60 = vpop.permute.xlu0 %1781  ;;  %v1686_v55 = vpop.permute.xlu1 %1685 }
 0x17f   : > { %1477 = vrot.lane.b32.xlu0 %v1307_v40, %s5733_s24  ;;  %1475 = vrot.lane.b32.xlu1 %v1306_v54, %s5733_s24  ;;  %v2266_v54 = vsel %vm2265_vm11, %v2233_v1, %v1684_v58  ;;  %v981_v58 = vsel %vm810_vm5, %v6467_v6, 0.0  ;;  %vm9998_vm5 = vcmp.eq.s32.totalorder %v6731_v15, 1 }
 0x180   : > { %v2299_v40 = vsel %vm2298_vm3, %v2266_v54, %v1782_v60  ;;  %v2168_v28 = vsel %vm2166_vm12, %v981_v58, %v7443_v45  ;;  %v7563_v45 = vsel %vm9997_vm14, %v6527_v7, 0.0  ;;  %v7602_v1 = vsel %vm9998_vm5, %v6295_v34, 0.0  ;;  %v9999_v54 = vld [vmem:[#allocation33_spill] sm:$0xff] }
 0x181   : > { %v7489_v18 = vpop.permute.xlu0 %1463  ;;  %v7491_v42 = vpop.permute.xlu1 %1338  ;;  %vm10000_vm14 = vcmp.eq.s32.totalorder %v6733_v22, 1  ;;  %vm10004_vm5 = vcmp.eq.s32.totalorder %v7130_v23, 1 }
 0x183   : > { %1605 = vrot.lane.b32.xlu0 %v7448_v21, %s5734_s12  ;;  %1603 = vrot.lane.b32.xlu1 %v7453_v24, %s5734_s12 }
 0x185   : > { %v1880_v39 = vpop.permute.xlu0 %1879  ;;  %v1784_v38 = vpop.permute.xlu1 %1783 }
 0x186   : > { %v2332_v19 = vsel %vm2331_vm15, %v2299_v40, %v1880_v39  ;;  %v2201_v39 = vsel %vm2199_vm4, %v2168_v28, %v7459_v52  ;;  %v7607_v40 = vsel %vm10000_vm14, %v9999_v54, 0.0  ;;  %vm10007_vm14 = vcmp.eq.s32.totalorder %v7128_v27, 1 }
 0x187   : > { %1701 = vrot.lane.b32.xlu0 %v6218_v44, %s5735_s14  ;;  %1699 = vrot.lane.b32.xlu1 %v6210_v46, %s5735_s14  ;;  %v2234_v8 = vsel %vm2232_vm7, %v2201_v39, %v7465_v3  ;;  %v10003_v39 = vld [vmem:[#allocation69_spill] sm:$0xff] }
 0x189   : > { %v7501_v36 = vpop.permute.xlu0 %1591  ;;  %v7503_v2 = vpop.permute.xlu1 %1465 }
 0x18b   : > { %1799 = vrot.lane.b32.xlu0 %v7481_v63, %s5736_s15  ;;  %1797 = vrot.lane.b32.xlu1 %v7470_v20, %s5736_s15 }
 0x18d   : > { %v1976_v10 = vpop.permute.xlu0 %1975  ;;  %v1882_v32 = vpop.permute.xlu1 %1881 }
 0x18e   : > { %v2365_v49 = vsel %vm2364_vm10, %v2332_v19, %v1976_v10  ;;  %v2169_v19 = vsel %vm2166_vm12, %v6970_v11, %v7476_v26  ;;  %v10002_v26 = vld [vmem:[#allocation28_spill] sm:$0xff] }
 0x18f   : > { %1897 = vrot.lane.b32.xlu0 %v7514_v41, %s5737_s16  ;;  %1895 = vrot.lane.b32.xlu1 %v7519_v61, %s5737_s16  ;;  %v2202_v15 = vsel %vm2199_vm4, %v2169_v19, %v7489_v18 }
 0x190   : > { %v2235_v34 = vsel %vm2232_vm7, %v2202_v15, %v7501_v36 }
 0x191   : > { %v1688_v62 = vpop.permute.xlu0 %1687  ;;  %v7529_v33 = vpop.permute.xlu1 %1593 }
 0x193   : > { %1993 = vrot.lane.b32.xlu0 %v6246_v50, %s5738_s28  ;;  %1991 = vrot.lane.b32.xlu1 %v6244_v48, %s5738_s28 }
 0x195   : > { %v2071_v4 = vpop.permute.xlu0 %2070  ;;  %v1978_v57 = vpop.permute.xlu1 %1977 }
 0x196   : > { %v2398_v60 = vsel %vm2397_vm6, %v2365_v49, %v2071_v4  ;;  %v2268_v4 = vsel %vm2265_vm11, %v2235_v34, %v1688_v62  ;;  %v7634_v62 = vsel %vm10004_vm5, %v10003_v39, 0.0  ;;  %v10008_v34 = vld [vmem:[#allocation37_spill] sm:$0xff] }
 0x197   : > { %1352 = vrot.lane.b32.xlu0 %v6210_v46, %s5732_s13  ;;  %2086 = vrot.lane.b32.xlu1 %v7544_v51, %s5739_s11  ;;  %v2267_v46 = vsel %vm2265_vm11, %v2234_v8, %v1686_v55 }
 0x198   : > { %5467 = vmatprep.mubr.msk.f32.mxu0 %vm2442_vm8, %v2398_v60  ;;  %v2300_v0 = vsel %vm2298_vm3, %v2267_v46, %v1784_v38  ;;  %v10005_v46 = vrot.slane %v6264_v31, 1 }
 0x199   : > { %v1690_v14 = vpop.permute.xlu0 %1689  ;;  %v7558_v10 = vpop.permute.xlu1 %1340  ;;  %v2333_v52 = vsel %vm2331_vm15, %v2300_v0, %v1882_v32 }
 0x19a   : > { %v2366_v3 = vsel %vm2364_vm10, %v2333_v52, %v1978_v57  ;;  %v10001_v57 = vld [vmem:[#allocation31_spill] sm:$0xff]  ;;  %v10006_v52 = vld [vmem:[#allocation105_spill] sm:$0xff] }
 0x19b   : > { %1354 = vrot.lane.b32.xlu0 %v6218_v44, %s5732_s13  ;;  %2088 = vrot.lane.b32.xlu1 %v7563_v45, %s5739_s11  ;;  %v1227_v58 = vrot.slane %v10001_v57, 1 }
 0x19d   : > { %v2073_v56 = vpop.permute.xlu0 %2072  ;;  %v1786_v37 = vpop.permute.xlu1 %1785  ;;  %v1228_v0 = vsel %vm1196_vm1, %v10005_v46, %v1227_v58 }
 0x19e   : > { %v2399_v29 = vsel %vm2397_vm6, %v2366_v3, %v2073_v56  ;;  %v2301_v11 = vsel %vm2298_vm3, %v2268_v4, %v1786_v37  ;;  %v2170_v3 = vsel %vm2166_vm12, %v10006_v52, %v7491_v42  ;;  %v7656_v42 = vsel %vm10007_vm14, %v1228_v0, 0.0  ;;  %v10009_v4 = vld [vmem:[#allocation72_spill] sm:$0xff] }
 0x19f   : > { %1481 = vrot.lane.b32.xlu0 %v7481_v63, %s5733_s24  ;;  %1479 = vrot.lane.b32.xlu1 %v7470_v20, %s5733_s24  ;;  %v2203_v23 = vsel %vm2199_vm4, %v2170_v3, %v7503_v2  ;;  %vm10010_vm5 = vcmp.eq.s32.totalorder %v10009_v4, 1  ;;  %v10018_v4 = vld [vmem:[#allocation112_spill] sm:$0xff] }
 0x1a0   : > { %5468 = vmatmul.mubr.msk.f32.vlgmr.msra.gmra.mrb[0].mxu0 %vm2442_vm8, %v2399_v29  ;;  %v2236_v56 = vsel %vm2232_vm7, %v2203_v23, %v7529_v33 }
 0x1a1   : > { %v7579_v44 = vpop.permute.xlu0 %1467  ;;  %v7581_v7 = vpop.permute.xlu1 %1342 }
 0x1a3   : > { %1609 = vrot.lane.b32.xlu0 %v7514_v41, %s5734_s12  ;;  %1607 = vrot.lane.b32.xlu1 %v7519_v61, %s5734_s12 }
 0x1a5   : > { %v1884_v55 = vpop.permute.xlu0 %1883  ;;  %v1788_v38 = vpop.permute.xlu1 %1787 }
 0x1a6   : > { %v2334_v18 = vsel %vm2331_vm15, %v2301_v11, %v1884_v55  ;;  %v7693_v11 = vsel %vm10010_vm5, %v10008_v34, 0.0  ;;  %vm10017_vm5 = vcmp.eq.s32.totalorder %v7162_v16, 1 }
 0x1a7   : > { %1705 = vrot.lane.b32.xlu0 %v6246_v50, %s5735_s14  ;;  %1703 = vrot.lane.b32.xlu1 %v6244_v48, %s5735_s14 }
 0x1a9   : > { %v7591_v20 = vpop.permute.xlu0 %1595  ;;  %v7593_v63 = vpop.permute.xlu1 %1469 }
 0x1ab   : > { %1803 = vrot.lane.b32.xlu0 %v7563_v45, %s5736_s15  ;;  %1801 = vrot.lane.b32.xlu1 %v7544_v51, %s5736_s15 }
 0x1ad   : > { %v1980_v32 = vpop.permute.xlu0 %1979  ;;  %v1886_v13 = vpop.permute.xlu1 %1885 }
 0x1ae   : > { %v2367_v60 = vsel %vm2364_vm10, %v2334_v18, %v1980_v32  ;;  %v10011_v18 = vld [vmem:[#allocation34_spill] sm:$0xff] }
 0x1af   : > { %1901 = vrot.lane.b32.xlu0 %v7602_v1, %s5737_s16  ;;  %1899 = vrot.lane.b32.xlu1 %v7607_v40, %s5737_s16 }
 0x1b1   : > { %v1692_v49 = vpop.permute.xlu0 %1691  ;;  %v7620_v22 = vpop.permute.xlu1 %1597 }
 0x1b3   : > { %1997 = vrot.lane.b32.xlu0 %v6264_v31, %s5738_s28  ;;  %1995 = vrot.lane.b32.xlu1 %v10002_v26, %s5738_s28 }
 0x1b5   : > { %v2075_v36 = vpop.permute.xlu0 %2074  ;;  %v1982_v28 = vpop.permute.xlu1 %1981 }
 0x1b6   : > { %v2400_v8 = vsel %vm2397_vm6, %v2367_v60, %v2075_v36  ;;  %v10012_v60 = vld [vmem:[#allocation73_spill] sm:$0xff] }
 0x1b7   : > { %1356 = vrot.lane.b32.xlu0 %v6244_v48, %s5732_s13  ;;  %2090 = vrot.lane.b32.xlu1 %v7634_v62, %s5739_s11  ;;  %v2269_v48 = vsel %vm2265_vm11, %v2236_v56, %v1690_v14  ;;  %vm10013_vm14 = vcmp.eq.s32.totalorder %v10012_v60, 1 }
 0x1b8   : > { %5470 = vmatprep.mubr.msk.f32.mxu0 %vm2442_vm8, %v2400_v8  ;;  %v2302_v55 = vsel %vm2298_vm3, %v2269_v48, %v1788_v38  ;;  %v7698_v36 = vsel %vm10013_vm14, %v10011_v18, 0.0  ;;  %v10015_v8 = vld [vmem:[#allocation108_spill] sm:$0xff]  ;;  %v10016_v48 = vld [vmem:[#allocation35_spill] sm:$0xff]  ;;  %vm10019_vm14 = vcmp.eq.s32.totalorder %v10018_v4, 1  ;;  %v10023_v4 = vld [vmem:[#allocation41_spill] sm:$0xff] }
 0x1b9   : > { %v1694_v37 = vpop.permute.xlu0 %1693  ;;  %v7652_v29 = vpop.permute.xlu1 %1344  ;;  %v2335_v2 = vsel %vm2331_vm15, %v2302_v55, %v1886_v13  ;;  %v2171_v46 = vsel %vm2166_vm12, %v10015_v8, %v7558_v10  ;;  %v1231_v55 = vrot.slane %v10016_v48, 1 }
 0x1ba   : > { %v2368_v33 = vsel %vm2364_vm10, %v2335_v2, %v1982_v28  ;;  %v10014_v28 = vld [vmem:[#allocation32_spill] sm:$0xff]  ;;  %v2204_v0 = vsel %vm2199_vm4, %v2171_v46, %v7579_v44 }
 0x1bb   : > { %1358 = vrot.lane.b32.xlu0 %v6246_v50, %s5732_s13  ;;  %2092 = vrot.lane.b32.xlu1 %v7656_v42, %s5739_s11  ;;  %v1229_v39 = vrot.slane %v10014_v28, 1  ;;  %v2237_v52 = vsel %vm2232_vm7, %v2204_v0, %v7591_v20 }
 0x1bc   : > { %v2270_v56 = vsel %vm2265_vm11, %v2237_v52, %v1692_v49 }
 0x1bd   : > { %v2077_v32 = vpop.permute.xlu0 %2076  ;;  %v1790_v54 = vpop.permute.xlu1 %1789  ;;  %v1230_v10 = vsel %vm1196_vm1, %v1227_v58, %v1229_v39 }
 0x1be   : > { %v2401_v27 = vsel %vm2397_vm6, %v2368_v33, %v2077_v32  ;;  %v2303_v2 = vsel %vm2298_vm3, %v2270_v56, %v1790_v54  ;;  %v7724_v49 = vsel %vm10017_vm5, %v1230_v10, 0.0  ;;  %v1232_v54 = vsel %vm1196_vm1, %v1229_v39, %v1231_v55 }
 0x1bf   : > { %1485 = vrot.lane.b32.xlu0 %v7563_v45, %s5733_s24  ;;  %1483 = vrot.lane.b32.xlu1 %v7544_v51, %s5733_s24  ;;  %v7744_v18 = vsel %vm10019_vm14, %v1232_v54, 0.0 }
 0x1c0   : > { %5471 = vmatmul.mubr.msk.f32.gmra.mrb[2].mxu0 %vm2442_vm8, %v2401_v27  ;;  %v2172_v27 = vsel %vm2166_vm12, %v7141_v9, %v7581_v7 }
 0x1c1   : > { %v7672_v50 = vpop.permute.xlu0 %1471  ;;  %v7674_v14 = vpop.permute.xlu1 %1346  ;;  %v2205_v16 = vsel %vm2199_vm4, %v2172_v27, %v7593_v63 }
 0x1c3   : > { %1613 = vrot.lane.b32.xlu0 %v7602_v1, %s5734_s12  ;;  %1611 = vrot.lane.b32.xlu1 %v7607_v40, %s5734_s12 }
 0x1c5   : > { %v1888_v38 = vpop.permute.xlu0 %1887  ;;  %v1792_v13 = vpop.permute.xlu1 %1791 }
 0x1c6   : > { %v2336_v44 = vsel %vm2331_vm15, %v2303_v2, %v1888_v38  ;;  %v2238_v38 = vsel %vm2232_vm7, %v2205_v16, %v7620_v22 }
 0x1c7   : > { %1709 = vrot.lane.b32.xlu0 %v6264_v31, %s5735_s14  ;;  %1707 = vrot.lane.b32.xlu1 %v10002_v26, %s5735_s14  ;;  %v2271_v9 = vsel %vm2265_vm11, %v2238_v38, %v1694_v37  ;;  %v10020_v38 = vld [vmem:[#allocation40_spill] sm:$0xff] }
 0x1c8   : > { %v2304_v7 = vsel %vm2298_vm3, %v2271_v9, %v1792_v13  ;;  %v5646_v13 = vld [vmem:[%s9629_s2 + $0x110] sm:$0xff]  ;;  %v10024_v9 = vld [vmem:[#allocation76_spill] sm:$0xff] }
 0x1c9   : > { %v1600_v51 = vpop.permute.xlu0 %1599  ;;  %v7684_v45 = vpop.permute.xlu1 %1473  ;;  %vm499_vm5 = vcmp.le.f32.partialorder %v5646_v13, 14.0 }
 0x1cb   : > { %1807 = vrot.lane.b32.xlu0 %v7656_v42, %s5736_s15  ;;  %1805 = vrot.lane.b32.xlu1 %v7634_v62, %s5736_s15 }
 0x1cd   : > { %v1984_v19 = vpop.permute.xlu0 %1983  ;;  %v1890_v15 = vpop.permute.xlu1 %1889 }
 0x1ce   : > { %v2369_v20 = vsel %vm2364_vm10, %v2336_v44, %v1984_v19  ;;  %v2337_v63 = vsel %vm2331_vm15, %v2304_v7, %v1890_v15  ;;  %v2173_v15 = vsel %vm2166_vm12, %v7288_v53, %v7652_v29  ;;  %v2174_v53 = vsel %vm2166_vm12, %v7335_v47, %v7674_v14  ;;  %v5647_v47 = vld [vmem:[%s9629_s2 + $0x118] sm:$0xff] }
 0x1cf   : > { %1905 = vrot.lane.b32.xlu0 %v7693_v11, %s5737_s16  ;;  %1903 = vrot.lane.b32.xlu1 %v7698_v36, %s5737_s16  ;;  %vm500_vm14 = vcmp.le.f32.partialorder %v5647_v47, 14.0 }
 0x1d1   : > { %v1696_v3 = vpop.permute.xlu0 %1695  ;;  %v1602_v23 = vpop.permute.xlu1 %1601 }
 0x1d3   : > { %2001 = vrot.lane.b32.xlu0 %v10014_v28, %s5738_s28  ;;  %1999 = vrot.lane.b32.xlu1 %v10001_v57, %s5738_s28 }
 0x1d5   : > { %v2079_v33 = vpop.permute.xlu0 %2078  ;;  %v1986_v32 = vpop.permute.xlu1 %1985 }
 0x1d6   : > { %v2402_v58 = vsel %vm2397_vm6, %v2369_v20, %v2079_v33  ;;  %v2370_v22 = vsel %vm2364_vm10, %v2337_v63, %v1986_v32 }
 0x1d7   : > { %1360 = vrot.lane.b32.xlu0 %v10002_v26, %s5732_s13  ;;  %2094 = vrot.lane.b32.xlu1 %v7724_v49, %s5739_s11 }
 0x1d8   : > { %5473 = vmatprep.mubr.msk.f32.mxu0 %vm2442_vm8, %v2402_v58 }
 0x1d9   : > { %v1794_v19 = vpop.permute.xlu0 %1793  ;;  %v1698_v34 = vpop.permute.xlu1 %1697 }
 0x1db   : > { %1362 = vrot.lane.b32.xlu0 %v6264_v31, %s5732_s13  ;;  %2096 = vrot.lane.b32.xlu1 %v7744_v18, %s5739_s11 }
 0x1dd   : > { %v1796_v26 = vpop.permute.xlu0 %1795  ;;  %v2081_v60 = vpop.permute.xlu1 %2080 }
 0x1de   : > { %v2403_v39 = vsel %vm2397_vm6, %v2370_v22, %v2081_v60 }
 0x1df   : > { %1489 = vrot.lane.b32.xlu0 %v7656_v42, %s5733_s24  ;;  %1487 = vrot.lane.b32.xlu1 %v7634_v62, %s5733_s24  ;;  %v2206_v62 = vsel %vm2199_vm4, %v2173_v15, %v7672_v50  ;;  %v1050_v42 = vsel %vm499_vm5, 1, %v9855_v35  ;;  %v2207_v50 = vsel %vm2199_vm4, %v2174_v53, %v7684_v45 }
 0x1e0   : > { %5474 = vmatmul.mubr.msk.f32.gmra.mrb[4].mxu0 %vm2442_vm8, %v2403_v39  ;;  %v2239_v8 = vsel %vm2232_vm7, %v2206_v62, %v1600_v51  ;;  %v2240_v51 = vsel %vm2232_vm7, %v2207_v50, %v1602_v23  ;;  %v1051_v23 = vsel %vm500_vm14, 1, %v9855_v35  ;;  %vm10025_vm14 = vcmp.eq.s32.totalorder %v10024_v9, 1  ;;  %v10028_v62 = vld [vmem:[#allocation8_spill] sm:$0xff]  ;;  %v10036_v9 = vld [vmem:[#allocation38_spill] sm:$0xff] }
 0x1e1   : > { %v1894_v31 = vpop.permute.xlu0 %1893  ;;  %v1892_v37 = vpop.permute.xlu1 %1891  ;;  %v2272_v52 = vsel %vm2265_vm11, %v2239_v8, %v1696_v3  ;;  %v2273_v14 = vsel %vm2265_vm11, %v2240_v51, %v1698_v34  ;;  %v7812_v7 = vsel %vm10025_vm14, %v10023_v4, 0.0  ;;  %v10035_v4 = vld [vmem:[#allocation39_spill] sm:$0xff] }
 0x1e2   : > { %v2305_v29 = vsel %vm2298_vm3, %v2272_v52, %v1794_v19  ;;  %v2306_v20 = vsel %vm2298_vm3, %v2273_v14, %v1796_v26  ;;  %v10021_v19 = vld [vmem:[#allocation75_spill] sm:$0xff]  ;;  %v10026_v26 = vld [vmem:[#allocation36_spill] sm:$0xff] }
 0x1e3   : > { %1617 = vrot.lane.b32.xlu0 %v7693_v11, %s5734_s12  ;;  %1615 = vrot.lane.b32.xlu1 %v7698_v36, %s5734_s12  ;;  %v2338_v56 = vsel %vm2331_vm15, %v2305_v29, %v1892_v37  ;;  %v2339_v45 = vsel %vm2331_vm15, %v2306_v20, %v1894_v31  ;;  %vm10022_vm5 = vcmp.eq.s32.totalorder %v10021_v19, 1  ;;  %v10027_v60 = vrot.slane %v10026_v26, 1 }
 0x1e4   : > { %v7807_v34 = vsel %vm10022_vm5, %v10020_v38, 0.0 }
 0x1e5   : > { %v1990_v46 = vpop.permute.xlu0 %1989  ;;  %v1988_v0 = vpop.permute.xlu1 %1987  ;;  %v1234_v39 = vsel %vm1196_vm1, %v1231_v55, %v10027_v60  ;;  %v10037_v60 = vld [vmem:[#allocation10_spill] sm:$0xff] }
 0x1e6   : > { %v2371_v10 = vsel %vm2364_vm10, %v2338_v56, %v1988_v0  ;;  %v2372_v33 = vsel %vm2364_vm10, %v2339_v45, %v1990_v46  ;;  %v7829_v13 = vsel %vm1178_vm2, %v1234_v39, 0.0  ;;  %v10038_v39 = vld [vmem:[#allocation116_spill] sm:$0xff] }
 0x1e7   : > { %1155 = vperm.xlu0 %5616, %v1050_v42   ;;  %1711 = vrot.lane.b32.xlu1 %v10001_v57, %s5735_s14  ;;  %v1317_v42 = vsel %vm1179_vm0, %v10028_v62, 0.0  ;;  %vm10039_vm5 = vcmp.eq.s32.totalorder %v10038_v39, 1  ;;  %v10041_v62 = vld [vmem:[#allocation115_spill] sm:$0xff] }
 0x1e8   : > { %vm10042_vm14 = vcmp.eq.s32.totalorder %v10041_v62, 1 }
 0x1e9   : > { %v1349_v3 = vpop.permute.xlu0 %1348  ;;  %v2083_v2 = vpop.permute.xlu1 %2082 }
 0x1ea   : > { %v2404_v44 = vsel %vm2397_vm6, %v2371_v10, %v2083_v2  ;;  %v2175_v46 = vsel %vm2166_vm12, %v7408_v30, %v1349_v3 }
 0x1eb   : > { %1809 = vrot.lane.b32.xlu0 %v7724_v49, %s5736_s15  ;;  %1713 = vrot.lane.b32.xlu1 %v10014_v28, %s5735_s14 }
 0x1ec   : > { %5476 = vmatprep.mubr.msk.f32.mxu0 %vm2442_vm8, %v2404_v44 }
 0x1ed   : > { %v1351_v32 = vpop.permute.xlu0 %1350  ;;  %v2085_v58 = vpop.permute.xlu1 %2084 }
 0x1ee   : > { %v2405_v54 = vsel %vm2397_vm6, %v2372_v33, %v2085_v58  ;;  %v2176_v53 = vsel %vm2166_vm12, %v7419_v12, %v1351_v32  ;;  %v10029_v33 = vld [vmem:[#allocation44_spill] sm:$0xff]  ;;  %v10030_v32 = vld [vmem:[#allocation78_spill] sm:$0xff] }
 0x1ef   : > { %1811 = vrot.lane.b32.xlu0 %v7744_v18, %s5736_s15  ;;  %1158 = vperm.xlu1 %5617, %v1051_v23   ;;  %vm10031_vm2 = vcmp.eq.s32.totalorder %v10030_v32, 1 }
 0x1f0   : > { %5477 = vmatmul.mubr.msk.f32.gmra.mrb[6].mxu0 %vm2442_vm8, %v2405_v54  ;;  %v7879_v58 = vsel %vm10031_vm2, %v10029_v33, 0.0  ;;  %v10032_v54 = vld [vmem:[#allocation45_spill] sm:$0xff] }
 0x1f1   : > { %v1478_v27 = vpop.permute.xlu0 %1477  ;;  %v1476_v16 = vpop.permute.xlu1 %1475 }
 0x1f2   : > { %v2209_v30 = vsel %vm2199_vm4, %v2176_v53, %v1478_v27  ;;  %v10033_v27 = vld [vmem:[#allocation79_spill] sm:$0xff] }
 0x1f3   : > { %1909 = vrot.lane.b32.xlu0 %v7807_v34, %s5737_s16  ;;  %1907 = vrot.lane.b32.xlu1 %v7812_v7, %s5737_s16  ;;  %vm10034_vm0 = vcmp.eq.s32.totalorder %v10033_v27, 1  ;;  %v10049_v27 = vld [vmem:[#allocation43_spill] sm:$0xff] }
 0x1f5   : > { %v1606_v63 = vpop.permute.xlu0 %1605  ;;  %v1604_v22 = vpop.permute.xlu1 %1603 }
 0x1f7   : > { %2005 = vrot.lane.b32.xlu0 %v10026_v26, %s5738_s28  ;;  %2003 = vrot.lane.b32.xlu1 %v10016_v48, %s5738_s28 }
 0x1f9   : > { %v1702_v31 = vpop.permute.xlu0 %1701  ;;  %v1700_v37 = vpop.permute.xlu1 %1699 }
 0x1fb   : > { %1364 = vrot.lane.b32.xlu0 %v10001_v57, %s5732_s13  ;;  %2098 = vrot.lane.b32.xlu1 %v7829_v13, %s5739_s11  ;;  %v2208_v57 = vsel %vm2199_vm4, %v2175_v46, %v1476_v16  ;;  %v7884_v16 = vsel %vm10034_vm0, %v10032_v54, 0.0 }
 0x1fc   : > { %v2241_v59 = vsel %vm2232_vm7, %v2208_v57, %v1604_v22 }
 0x1fd   : > { %v1800_v15 = vpop.permute.xlu0 %1799  ;;  %v1798_v55 = vpop.permute.xlu1 %1797 }
 0x1ff   : > { %1366 = vrot.lane.b32.xlu0 %v10014_v28, %s5732_s13  ;;  %2100 = vrot.lane.b32.xlu1 %v1317_v42, %s5739_s11  ;;  %v2274_v28 = vsel %vm2265_vm11, %v2241_v59, %v1700_v37 }
 0x200   : > { %v2307_v29 = vsel %vm2298_vm3, %v2274_v28, %v1798_v55  ;;  %v10040_v55 = vld [vmem:[#allocation9_spill] sm:$0xff] }
 0x201   : > { %v1898_v25 = vpop.permute.xlu0 %1897  ;;  %v1896_v8 = vpop.permute.xlu1 %1895 }
 0x203   : > { %1493 = vrot.lane.b32.xlu0 %v7744_v18, %s5733_s24  ;;  %1491 = vrot.lane.b32.xlu1 %v7724_v49, %s5733_s24  ;;  %v2340_v49 = vsel %vm2331_vm15, %v2307_v29, %v1896_v8  ;;  %v2242_v18 = vsel %vm2232_vm7, %v2209_v30, %v1606_v63 }
 0x204   : > { %v2275_v12 = vsel %vm2265_vm11, %v2242_v18, %v1702_v31  ;;  %v7897_v31 = vsel %vm10039_vm5, %v10037_v60, 0.0 }
 0x205   : > { %v1994_v0 = vpop.permute.xlu0 %1993  ;;  %v1992_v52 = vpop.permute.xlu1 %1991  ;;  %v2308_v3 = vsel %vm2298_vm3, %v2275_v12, %v1800_v15 }
 0x206   : > { %v2373_v50 = vsel %vm2364_vm10, %v2340_v49, %v1992_v52  ;;  %v2341_v2 = vsel %vm2331_vm15, %v2308_v3, %v1898_v25  ;;  %v1319_v25 = vsel %vm10042_vm14, %v10040_v55, 0.0  ;;  %v10054_v55 = vld [vmem:[#allocation118_spill] sm:$0xff] }
 0x207   : > { %1621 = vrot.lane.b32.xlu0 %v7807_v34, %s5734_s12  ;;  %1619 = vrot.lane.b32.xlu1 %v7812_v7, %s5734_s12  ;;  %v2374_v47 = vsel %vm2364_vm10, %v2341_v2, %v1994_v0  ;;  %vm10055_vm5 = vcmp.eq.s32.totalorder %v10054_v55, 1 }
 0x209   : > { %v1353_v56 = vpop.permute.xlu0 %1352  ;;  %v2087_v51 = vpop.permute.xlu1 %2086 }
 0x20a   : > { %v2406_v10 = vsel %vm2397_vm6, %v2373_v50, %v2087_v51  ;;  %v2177_v57 = vsel %vm2166_vm12, %v7453_v24, %v1353_v56 }
 0x20b   : > { %1717 = vrot.lane.b32.xlu0 %v10026_v26, %s5735_s14  ;;  %1715 = vrot.lane.b32.xlu1 %v10016_v48, %s5735_s14 }
 0x20c   : > { %5479 = vmatprep.mubr.msk.f32.mxu0 %vm2442_vm8, %v2406_v10 }
 0x20d   : > { %v1355_v14 = vpop.permute.xlu0 %1354  ;;  %v2089_v44 = vpop.permute.xlu1 %2088 }
 0x20e   : > { %v2407_v20 = vsel %vm2397_vm6, %v2374_v47, %v2089_v44  ;;  %v2178_v28 = vsel %vm2166_vm12, %v7448_v21, %v1355_v14  ;;  %v10043_v14 = vld [vmem:[#allocation49_spill] sm:$0xff] }
 0x20f   : > { %1815 = vrot.lane.b32.xlu0 %v1317_v42, %s5736_s15  ;;  %1813 = vrot.lane.b32.xlu1 %v7829_v13, %s5736_s15  ;;  %v10044_v44 = vld [vmem:[#allocation81_spill] sm:$0xff] }
 0x210   : > { %5480 = vmatmul.mubr.msk.f32.gmra.mrb[8].mxu0 %vm2442_vm8, %v2407_v20  ;;  %vm10045_vm2 = vcmp.eq.s32.totalorder %v10044_v44, 1 }
 0x211   : > { %v1482_v45 = vpop.permute.xlu0 %1481  ;;  %v1480_v23 = vpop.permute.xlu1 %1479  ;;  %v7946_v20 = vsel %vm10045_vm2, %v10043_v14, 0.0  ;;  %v10063_v14 = vld [vmem:[#allocation47_spill] sm:$0xff] }
 0x212   : > { %v2211_v24 = vsel %vm2199_vm4, %v2178_v28, %v1482_v45  ;;  %v10046_v45 = vld [vmem:[#allocation46_spill] sm:$0xff] }
 0x213   : > { %1913 = vrot.lane.b32.xlu0 %v7879_v58, %s5737_s16  ;;  %1911 = vrot.lane.b32.xlu1 %v7884_v16, %s5737_s16 }
 0x215   : > { %v1610_v38 = vpop.permute.xlu0 %1609  ;;  %v1608_v19 = vpop.permute.xlu1 %1607 }
 0x217   : > { %2009 = vrot.lane.b32.xlu0 %v10035_v4, %s5738_s28  ;;  %2007 = vrot.lane.b32.xlu1 %v10036_v9, %s5738_s28 }
 0x219   : > { %v1706_v63 = vpop.permute.xlu0 %1705  ;;  %v1704_v22 = vpop.permute.xlu1 %1703 }
 0x21b   : > { %1368 = vrot.lane.b32.xlu0 %v10016_v48, %s5732_s13  ;;  %2102 = vrot.lane.b32.xlu1 %v7897_v31, %s5739_s11  ;;  %v2210_v48 = vsel %vm2199_vm4, %v2177_v57, %v1480_v23  ;;  %v10047_v23 = vld [vmem:[#allocation82_spill] sm:$0xff] }
 0x21c   : > { %v2243_v59 = vsel %vm2232_vm7, %v2210_v48, %v1608_v19  ;;  %vm10048_vm0 = vcmp.eq.s32.totalorder %v10047_v23, 1  ;;  %v10065_v23 = vld [vmem:[#allocation122_spill] sm:$0xff] }
 0x21d   : > { %v1804_v37 = vpop.permute.xlu0 %1803  ;;  %v1802_v15 = vpop.permute.xlu1 %1801  ;;  %v7951_v33 = vsel %vm10048_vm0, %v10046_v45, 0.0  ;;  %v10064_v45 = vld [vmem:[#allocation14_spill] sm:$0xff]  ;;  %vm10066_vm2 = vcmp.eq.s32.totalorder %v10065_v23, 1 }
 0x21f   : > { %1370 = vrot.lane.b32.xlu0 %v10026_v26, %s5732_s13  ;;  %2104 = vrot.lane.b32.xlu1 %v1319_v25, %s5739_s11  ;;  %v2276_v26 = vsel %vm2265_vm11, %v2243_v59, %v1704_v22  ;;  %v10051_v22 = vld [vmem:[#allocation12_spill] sm:$0xff] }
 0x220   : > { %v2309_v53 = vsel %vm2298_vm3, %v2276_v26, %v1802_v15  ;;  %v1320_v39 = vsel %vm1182_vm13, %v10051_v22, 0.0  ;;  %v10053_v15 = vld [vmem:[#allocation11_spill] sm:$0xff] }
 0x221   : > { %v1902_v8 = vpop.permute.xlu0 %1901  ;;  %v1900_v46 = vpop.permute.xlu1 %1899  ;;  %v1321_v62 = vsel %vm10055_vm5, %v10053_v15, 0.0 }
 0x223   : > { %1497 = vrot.lane.b32.xlu0 %v1317_v42, %s5733_s24  ;;  %1495 = vrot.lane.b32.xlu1 %v7829_v13, %s5733_s24  ;;  %v2342_v13 = vsel %vm2331_vm15, %v2309_v53, %v1900_v46  ;;  %v2244_v42 = vsel %vm2232_vm7, %v2211_v24, %v1610_v38  ;;  %v10050_v38 = vld [vmem:[#allocation42_spill] sm:$0xff] }
 0x224   : > { %v2277_v21 = vsel %vm2265_vm11, %v2244_v42, %v1706_v63 }
 0x225   : > { %v1998_v0 = vpop.permute.xlu0 %1997  ;;  %v1996_v52 = vpop.permute.xlu1 %1995  ;;  %v2310_v50 = vsel %vm2298_vm3, %v2277_v21, %v1804_v37 }
 0x226   : > { %v2375_v29 = vsel %vm2364_vm10, %v2342_v13, %v1996_v52  ;;  %v2343_v56 = vsel %vm2331_vm15, %v2310_v50, %v1902_v8  ;;  %v10056_v50 = vld [vmem:[#allocation52_spill] sm:$0xff] }
 0x227   : > { %1625 = vrot.lane.b32.xlu0 %v7879_v58, %s5734_s12  ;;  %1623 = vrot.lane.b32.xlu1 %v7884_v16, %s5734_s12  ;;  %v2376_v51 = vsel %vm2364_vm10, %v2343_v56, %v1998_v0  ;;  %v10057_v56 = vld [vmem:[#allocation84_spill] sm:$0xff] }
 0x228   : > { %vm10058_vm13 = vcmp.eq.s32.totalorder %v10057_v56, 1 }
 0x229   : > { %v1357_v30 = vpop.permute.xlu0 %1356  ;;  %v2091_v49 = vpop.permute.xlu1 %2090 }
 0x22a   : > { %v2408_v18 = vsel %vm2397_vm6, %v2375_v29, %v2091_v49  ;;  %v2179_v57 = vsel %vm2166_vm12, %v7519_v61, %v1357_v30 }
 0x22b   : > { %1721 = vrot.lane.b32.xlu0 %v10035_v4, %s5735_s14  ;;  %1719 = vrot.lane.b32.xlu1 %v10036_v9, %s5735_s14 }
 0x22c   : > { %5482 = vmatprep.mubr.msk.f32.mxu0 %vm2442_vm8, %v2408_v18 }
 0x22d   : > { %v1359_v12 = vpop.permute.xlu0 %1358  ;;  %v2093_v10 = vpop.permute.xlu1 %2092 }
 0x22e   : > { %v2409_v3 = vsel %vm2397_vm6, %v2376_v51, %v2093_v10  ;;  %v8009_v51 = vsel %vm10058_vm13, %v10056_v50, 0.0  ;;  %v10060_v10 = vld [vmem:[#allocation85_spill] sm:$0xff] }
 0x22f   : > { %1819 = vrot.lane.b32.xlu0 %v1319_v25, %s5736_s15  ;;  %1817 = vrot.lane.b32.xlu1 %v7897_v31, %s5736_s15  ;;  %vm10061_vm14 = vcmp.eq.s32.totalorder %v10060_v10, 1  ;;  %v10078_v10 = vld [vmem:[#allocation16_spill] sm:$0xff] }
 0x230   : > { %5483 = vmatmul.mubr.msk.f32.gmra.mrb[10].mxu0 %vm2442_vm8, %v2409_v3 }
 0x231   : > { %v1486_v2 = vpop.permute.xlu0 %1485  ;;  %v1484_v47 = vpop.permute.xlu1 %1483 }
 0x233   : > { %1917 = vrot.lane.b32.xlu0 %v7946_v20, %s5737_s16  ;;  %1915 = vrot.lane.b32.xlu1 %v7951_v33, %s5737_s16 }
 0x235   : > { %v1614_v32 = vpop.permute.xlu0 %1613  ;;  %v1612_v54 = vpop.permute.xlu1 %1611 }
 0x237   : > { %2013 = vrot.lane.b32.xlu0 %v10049_v27, %s5738_s28  ;;  %2011 = vrot.lane.b32.xlu1 %v10050_v38, %s5738_s28 }
 0x239   : > { %v1710_v19 = vpop.permute.xlu0 %1709  ;;  %v1708_v63 = vpop.permute.xlu1 %1707 }
 0x23b   : > { %1372 = vrot.lane.b32.xlu0 %v10036_v9, %s5732_s13  ;;  %2106 = vrot.lane.b32.xlu1 %v1320_v39, %s5739_s11  ;;  %v2212_v9 = vsel %vm2199_vm4, %v2179_v57, %v1484_v47  ;;  %v10062_v47 = vld [vmem:[#allocation48_spill] sm:$0xff]  ;;  %v10071_v57 = vld [vmem:[#allocation87_spill] sm:$0xff] }
 0x23c   : > { %v2245_v59 = vsel %vm2232_vm7, %v2212_v9, %v1612_v54  ;;  %vm10072_vm5 = vcmp.eq.s32.totalorder %v10071_v57, 1  ;;  %v10083_v57 = vld [vmem:[#allocation124_spill] sm:$0xff] }
 0x23d   : > { %v1806_v37 = vpop.permute.xlu1 %1805  ;;  %v1808_v8 = vpop.permute.xlu0 %1807  ;;  %v2278_v52 = vsel %vm2265_vm11, %v2245_v59, %v1708_v63  ;;  %v10068_v63 = vld [vmem:[#allocation121_spill] sm:$0xff]  ;;  %v10074_v59 = vld [vmem:[#allocation88_spill] sm:$0xff] }
 0x23e   : > { %v2311_v26 = vsel %vm2298_vm3, %v2278_v52, %v1806_v37  ;;  %vm10069_vm0 = vcmp.eq.s32.totalorder %v10068_v63, 1  ;;  %vm10075_vm13 = vcmp.eq.s32.totalorder %v10074_v59, 1 }
 0x23f   : > { %1374 = vrot.lane.b32.xlu0 %v10035_v4, %s5732_s13  ;;  %2108 = vrot.lane.b32.xlu1 %v1321_v62, %s5739_s11  ;;  %v2180_v4 = vsel %vm2166_vm12, %v7514_v41, %v1359_v12  ;;  %v10059_v12 = vld [vmem:[#allocation53_spill] sm:$0xff] }
 0x240   : > { %v2213_v61 = vsel %vm2199_vm4, %v2180_v4, %v1486_v2  ;;  %v8014_v3 = vsel %vm10061_vm14, %v10059_v12, 0.0 }
 0x241   : > { %v1904_v46 = vpop.permute.xlu1 %1903  ;;  %v1906_v48 = vpop.permute.xlu0 %1905 }
 0x243   : > { %1501 = vrot.lane.b32.xlu0 %v1319_v25, %s5733_s24  ;;  %1499 = vrot.lane.b32.xlu1 %v7897_v31, %s5733_s24  ;;  %v2344_v31 = vsel %vm2331_vm15, %v2311_v26, %v1904_v46  ;;  %v2246_v25 = vsel %vm2232_vm7, %v2213_v61, %v1614_v32  ;;  %v8027_v32 = vsel %vm10066_vm2, %v10064_v45, 0.0  ;;  %v10070_v46 = vld [vmem:[#allocation56_spill] sm:$0xff]  ;;  %v8104_v45 = vsel %vm1186_vm9, %v10078_v10, 0.0 }
 0x244   : > { %v2279_v24 = vsel %vm2265_vm11, %v2246_v25, %v1710_v19  ;;  %v10067_v19 = vld [vmem:[#allocation13_spill] sm:$0xff]  ;;  %v8072_v9 = vsel %vm10072_vm5, %v10070_v46, 0.0  ;;  %vm10084_vm2 = vcmp.eq.s32.totalorder %v10083_v57, 1 }
 0x245   : > { %v2000_v0 = vpop.permute.xlu1 %1999  ;;  %v2002_v41 = vpop.permute.xlu0 %2001  ;;  %v2312_v42 = vsel %vm2298_vm3, %v2279_v24, %v1808_v8  ;;  %v8036_v22 = vsel %vm10069_vm0, %v10067_v19, 0.0  ;;  %v10093_v57 = vld [vmem:[#allocation109_spill] sm:$0xff] }
 0x246   : > { %v2377_v28 = vsel %vm2364_vm10, %v2344_v31, %v2000_v0  ;;  %v2345_v29 = vsel %vm2331_vm15, %v2312_v42, %v1906_v48  ;;  %v10073_v48 = vld [vmem:[#allocation57_spill] sm:$0xff] }
 0x247   : > { %1629 = vrot.lane.b32.xlu0 %v7946_v20, %s5734_s12  ;;  %1627 = vrot.lane.b32.xlu1 %v7951_v33, %s5734_s12  ;;  %v2378_v30 = vsel %vm2364_vm10, %v2345_v29, %v2002_v41  ;;  %v8077_v0 = vsel %vm10075_vm13, %v10073_v48, 0.0  ;;  %vm3353_vm13 = vcmp.ne.s16.totalorder %v10093_v57, 0  ;;  %v10103_v57 = vld [vmem:[#allocation93_spill] sm:$0xff] }
 0x249   : > { %v2095_v53 = vpop.permute.xlu1 %2094  ;;  %v1361_v18 = vpop.permute.xlu0 %1360 }
 0x24a   : > { %v2410_v13 = vsel %vm2397_vm6, %v2377_v28, %v2095_v53  ;;  %v2181_v61 = vsel %vm2166_vm12, %v7607_v40, %v1361_v18  ;;  %v10077_v40 = vld [vmem:[#allocation50_spill] sm:$0xff] }
 0x24b   : > { %1725 = vrot.lane.b32.xlu0 %v10049_v27, %s5735_s14  ;;  %1723 = vrot.lane.b32.xlu1 %v10050_v38, %s5735_s14 }
 0x24c   : > { %5485 = vmatprep.mubr.msk.f32.mxu0 %vm2442_vm8, %v2410_v13 }
 0x24d   : > { %v2097_v49 = vpop.permute.xlu1 %2096  ;;  %v1363_v2 = vpop.permute.xlu0 %1362 }
 0x24e   : > { %v2411_v21 = vsel %vm2397_vm6, %v2378_v30, %v2097_v49  ;;  %v10076_v49 = vld [vmem:[#allocation51_spill] sm:$0xff] }
 0x24f   : > { %1823 = vrot.lane.b32.xlu0 %v1321_v62, %s5736_s15  ;;  %1821 = vrot.lane.b32.xlu1 %v1320_v39, %s5736_s15 }
 0x250   : > { %5486 = vmatmul.mubr.msk.f32.gmra.mrb[12].mxu0 %vm2442_vm8, %v2411_v21  ;;  %v2182_v21 = vsel %vm2166_vm12, %v7602_v1, %v1363_v2 }
 0x251   : > { %v1488_v44 = vpop.permute.xlu1 %1487  ;;  %v1490_v54 = vpop.permute.xlu0 %1489 }
 0x252   : > { %v2214_v28 = vsel %vm2199_vm4, %v2181_v61, %v1488_v44  ;;  %v2215_v50 = vsel %vm2199_vm4, %v2182_v21, %v1490_v54  ;;  %v10080_v54 = vld [vmem:[#allocation107_spill] sm:$0xff] }
 0x253   : > { %1921 = vrot.lane.b32.xlu0 %v8009_v51, %s5737_s16  ;;  %1919 = vrot.lane.b32.xlu1 %v8014_v3, %s5737_s16  ;;  %vm3352_vm14 = vcmp.ne.s16.totalorder %v10080_v54, 0 }
 0x255   : > { %v1616_v60 = vpop.permute.xlu1 %1615  ;;  %v1618_v37 = vpop.permute.xlu0 %1617 }
 0x256   : > { %v2247_v24 = vsel %vm2232_vm7, %v2214_v28, %v1616_v60  ;;  %v2248_v23 = vsel %vm2232_vm7, %v2215_v50, %v1618_v37 }
 0x257   : > { %2017 = vrot.lane.b32.xlu0 %v10062_v47, %s5738_s28  ;;  %2015 = vrot.lane.b32.xlu1 %v10063_v14, %s5738_s28 }
 0x25b   : > { %1376 = vrot.lane.b32.xlu0 %v10050_v38, %s5732_s13  ;;  %2110 = vrot.lane.b32.xlu1 %v8027_v32, %s5739_s11  ;;  %v1712_v38 = vpop.permute.xlu1 %1711 }
 0x25c   : > { %v2280_v29 = vsel %vm2265_vm11, %v2247_v24, %v1712_v38  ;;  %v10081_v38 = vld [vmem:[#allocation22_spill] sm:$0xff] }
 0x25d   : > { %vm3068_vm9 = vcmp.ne.s16.totalorder %v10081_v38, 0  ;;  %v10086_v24 = vld [vmem:[#allocation90_spill] sm:$0xff] }
 0x25e   : > { %vm10087_vm0 = vcmp.eq.s32.totalorder %v10086_v24, 1 }
 0x25f   : > { %1378 = vrot.lane.b32.xlu0 %v10049_v27, %s5732_s13  ;;  %2112 = vrot.lane.b32.xlu1 %v8036_v22, %s5739_s11  ;;  %v1714_v55 = vpop.permute.xlu1 %1713 }
 0x260   : > { %v2281_v1 = vsel %vm2265_vm11, %v2248_v23, %v1714_v55 }
 0x263   : > { %1505 = vrot.lane.b32.xlu0 %v1321_v62, %s5733_s24  ;;  %1503 = vrot.lane.b32.xlu1 %v1320_v39, %s5733_s24  ;;  %v8067_v39 = vld [vmem:[%s8060_s23] ss:$0 sm:$0xff] }
 0x266   : > { %v8044_v15 = vpop.permute.xlu0 %1155 }
 0x267   : > { %1633 = vrot.lane.b32.xlu0 %v8009_v51, %s5734_s12  ;;  %1631 = vrot.lane.b32.xlu1 %v8014_v3, %s5734_s12 }
 0x26a   : > { %v1810_v8 = vpop.permute.xlu0 %1809 }
 0x26b   : > { %1729 = vrot.lane.b32.xlu0 %v10062_v47, %s5735_s14  ;;  %1727 = vrot.lane.b32.xlu1 %v10063_v14, %s5735_s14  ;;  %v2313_v18 = vsel %vm2298_vm3, %v2280_v29, %v1810_v8 }
 0x26e   : > { %v1812_v27 = vpop.permute.xlu0 %1811  ;;  %v8054_v62 = vpop.permute.xlu1 %1158 }
 0x26f   : > { %1827 = vrot.lane.b32.xlu0 %v8036_v22, %s5736_s15  ;;  %1825 = vrot.lane.b32.xlu1 %v8027_v32, %s5736_s15  ;;  %v2314_v37 = vsel %vm2298_vm3, %v2281_v1, %v1812_v27 }
 0x272   : > { %v1910_v52 = vpop.permute.xlu0 %1909  ;;  %v1908_v4 = vpop.permute.xlu1 %1907 }
 0x273   : > { %v5469_v26 = vpop.f32.mrb[0].mxu0  ;;  %1925 = vrot.lane.b32.xlu0 %v8072_v9, %s5737_s16  ;;  %1923 = vrot.lane.b32.xlu1 %v8077_v0, %s5737_s16  ;;  %v2346_v56 = vsel %vm2331_vm15, %v2313_v18, %v1908_v4  ;;  %v2347_v46 = vsel %vm2331_vm15, %v2314_v37, %v1910_v52 }
 0x274   : > { %v2615_v31 = vadd.f32 %v5469_v26, %v8067_v39  ;;  %v2609_v25 = vpop.f32.mrb[1].mxu0 }
 0x275   : > { %v2610_v53 = vadd.f32 %v8067_v39, %v2609_v25 }
 0x276   : > { %v2769_v41 = vmax.f32 %v2615_v31, 0.0  ;;  %v2006_v13 = vpop.permute.xlu0 %2005  ;;  %v2004_v42 = vpop.permute.xlu1 %2003 }
 0x277   : > { %v2768_v30 = vmax.f32 %v2610_v53, 0.0  ;;  %2021 = vrot.lane.b32.xlu0 %v10076_v49, %s5738_s28  ;;  %2019 = vrot.lane.b32.xlu1 %v10077_v40, %s5738_s28  ;;  %v2379_v19 = vsel %vm2364_vm10, %v2346_v56, %v2004_v42  ;;  %v2380_v59 = vsel %vm2364_vm10, %v2347_v46, %v2006_v13  ;;  %v10088_v13 = vld [vmem:[#allocation58_spill] sm:$0xff]  ;;  %v10089_v42 = vld [vmem:[#allocation91_spill] sm:$0xff] }
 0x278   : > { %vm10090_vm5 = vcmp.eq.s32.totalorder %v10089_v42, 1  ;;  %v10091_v46 = vld [vmem:[#allocation55_spill] sm:$0xff] }
 0x279   : > { %v8099_v12 = vpack.c.bf16 %v2769_v41, %v2768_v30  ;;  %v8161_v29 = vsel %vm10090_vm5, %v10088_v13, 0.0  ;;  %vm10104_vm5 = vcmp.eq.s32.totalorder %v10103_v57, 1 }
 0x27a   : > { %v1365_v63 = vpop.permute.xlu0 %1364  ;;  %v2099_v60 = vpop.permute.xlu1 %2098 }
 0x27b   : > { %v2412_v2 = vsel %vm2397_vm6, %v2379_v19, %v2099_v60  ;;  %1380 = vrot.lane.b32.xlu0 %v10063_v14, %s5732_s13  ;;  %2114 = vrot.lane.b32.xlu1 %v8104_v45, %s5739_s11  ;;  %v8119_v8 = vsel %vm3352_vm14, %v8099_v12, 0  ;;  %v8122_v55 = vsel %vm3068_vm9, %v8099_v12, 0  ;;  %v10082_v14 = vld [vmem:[#allocation15_spill] sm:$0xff]  ;;  %v2183_v50 = vsel %vm2166_vm12, %v7698_v36, %v1365_v63  ;;  %v10092_v36 = vld [vmem:[#allocation54_spill] sm:$0xff] }
 0x27c   : > { %5488 = vmatprep.mubr.msk.f32.mxu0 %vm2442_vm8, %v2412_v2  ;;  %v8128_v48 = vsel %vm10084_vm2, %v10082_v14, 0.0  ;;  %v3392_v44 = vshll.u32 %v8099_v12, 16  ;;  %v3396_v42 = vshrl.u32 %v8099_v12, 16 }
 0x27e   : > { %v1367_v4 = vpop.permute.xlu0 %1366  ;;  %v2101_v26 = vpop.permute.xlu1 %2100 }
 0x27f   : > { %v2413_v27 = vsel %vm2397_vm6, %v2380_v59, %v2101_v26  ;;  %1382 = vrot.lane.b32.xlu0 %v10062_v47, %s5732_s13  ;;  %2116 = vrot.lane.b32.xlu1 %v8128_v48, %s5739_s11  ;;  %v2184_v63 = vsel %vm2166_vm12, %v7693_v11, %v1367_v4  ;;  %v10094_v59 = vld [vmem:[#allocation70_spill] sm:$0xff]  ;;  %v8184_v26 = vrot.slane %v3392_v44, 1  ;;  %v10099_v44 = vld [vmem:[#allocation127_spill] sm:$0xff] }
 0x280   : > { %5489 = vmatmul.mubr.msk.f32.gmra.mrb[14].mxu0 %vm2442_vm8, %v2413_v27  ;;  %vm3069_vm14 = vcmp.ne.s16.totalorder %v10094_v59, 0  ;;  %vm10100_vm2 = vcmp.eq.s32.totalorder %v10099_v44, 1 }
 0x282   : > { %v1494_v52 = vpop.permute.xlu0 %1493  ;;  %v1492_v61 = vpop.permute.xlu1 %1491 }
 0x283   : > { %1509 = vrot.lane.b32.xlu0 %v8036_v22, %s5733_s24  ;;  %1507 = vrot.lane.b32.xlu1 %v8027_v32, %s5733_s24  ;;  %v10085_v32 = vld [vmem:[#allocation61_spill] sm:$0xff]  ;;  %v2216_v23 = vsel %vm2199_vm4, %v2183_v50, %v1492_v61  ;;  %v2217_v27 = vsel %vm2199_vm4, %v2184_v63, %v1494_v52 }
 0x284   : > { %v8156_v41 = vsel %vm10087_vm0, %v10085_v32, 0.0  ;;  %v10096_v32 = vld [vmem:[#allocation128_spill] sm:$0xff]  ;;  %vm10101_vm0 = vsmask.f32 7424 }
 0x285   : > { %vm10097_vm9 = vcmp.eq.s32.totalorder %v10096_v32, 1 }
 0x286   : > { %v1622_v31 = vpop.permute.xlu0 %1621  ;;  %v1620_v25 = vpop.permute.xlu1 %1619 }
 0x287   : > { %1637 = vrot.lane.b32.xlu0 %v8072_v9, %s5734_s12  ;;  %1635 = vrot.lane.b32.xlu1 %v8077_v0, %s5734_s12  ;;  %v2249_v60 = vsel %vm2232_vm7, %v2216_v23, %v1620_v25  ;;  %v2250_v11 = vsel %vm2232_vm7, %v2217_v27, %v1622_v31  ;;  %v10105_v27 = vld [vmem:[#allocation65_spill] sm:$0xff] }
 0x28a   : > { %v1718_v47 = vpop.permute.xlu0 %1717  ;;  %v1716_v28 = vpop.permute.xlu1 %1715 }
 0x28b   : > { %1733 = vrot.lane.b32.xlu0 %v10076_v49, %s5735_s14  ;;  %1731 = vrot.lane.b32.xlu1 %v10077_v40, %s5735_s14  ;;  %v2282_v38 = vsel %vm2265_vm11, %v2249_v60, %v1716_v28  ;;  %v10095_v28 = vld [vmem:[#allocation18_spill] sm:$0xff] }
 0x28c   : > { %v8193_v24 = vsel %vm10097_vm9, %v10095_v28, 0.0 }
 0x28e   : > { %v1816_v22 = vpop.permute.xlu0 %1815  ;;  %v1814_v53 = vpop.permute.xlu1 %1813 }
 0x28f   : > { %1831 = vrot.lane.b32.xlu0 %v8128_v48, %s5736_s15  ;;  %1829 = vrot.lane.b32.xlu1 %v8104_v45, %s5736_s15  ;;  %v2315_v14 = vsel %vm2298_vm3, %v2282_v38, %v1814_v53 }
 0x292   : > { %v1914_v30 = vpop.permute.xlu0 %1913  ;;  %v1912_v21 = vpop.permute.xlu1 %1911 }
 0x293   : > { %v5472_v18 = vpop.f32.mrb[2].mxu0  ;;  %1929 = vrot.lane.b32.xlu0 %v8156_v41, %s5737_s16  ;;  %1927 = vrot.lane.b32.xlu1 %v8161_v29, %s5737_s16  ;;  %v2348_v61 = vsel %vm2331_vm15, %v2315_v14, %v1912_v21 }
 0x294   : > { %v2625_v56 = vadd.f32 %v5472_v18, %v8067_v39  ;;  %v2619_v10 = vpop.f32.mrb[3].mxu0  ;;  %v2283_v18 = vsel %vm2265_vm11, %v2250_v11, %v1718_v47  ;;  %v3398_v47 = vor.u32 %v3396_v42, %v8184_v26 }
 0x295   : > { %v2620_v19 = vadd.f32 %v8067_v39, %v2619_v10  ;;  %v2316_v50 = vsel %vm2298_vm3, %v2283_v18, %v1816_v22  ;;  %v10098_v10 = vld [vmem:[#allocation17_spill] sm:$0xff] }
 0x296   : > { %v2771_v1 = vmax.f32 %v2625_v56, 0.0  ;;  %v2010_v2 = vpop.permute.xlu0 %2009  ;;  %v2008_v54 = vpop.permute.xlu1 %2007  ;;  %v8224_v23 = vsel %vm10100_vm2, %v10098_v10, 0.0 }
 0x297   : > { %v2770_v37 = vmax.f32 %v2620_v19, 0.0  ;;  %2025 = vrot.lane.b32.xlu0 %v10091_v46, %s5738_s28  ;;  %2023 = vrot.lane.b32.xlu1 %v10092_v36, %s5738_s28  ;;  %v2381_v4 = vsel %vm2364_vm10, %v2348_v61, %v2008_v54  ;;  %v10106_v61 = vld [vmem:[#allocation94_spill] sm:$0xff] }
 0x299   : > { %v8188_v25 = vpack.c.bf16 %v2771_v1, %v2770_v37 }
 0x29a   : > { %v1369_v53 = vpop.permute.xlu0 %1368  ;;  %v2103_v13 = vpop.permute.xlu1 %2102 }
 0x29b   : > { %v2414_v52 = vsel %vm2397_vm6, %v2381_v4, %v2103_v13  ;;  %1384 = vrot.lane.b32.xlu0 %v10077_v40, %s5732_s13  ;;  %2118 = vrot.lane.b32.xlu1 %v8193_v24, %s5739_s11  ;;  %v3400_v21 = vshll.u32 %v8188_v25, 16  ;;  %v8208_v31 = vsel %vm3353_vm13, %v8188_v25, 0  ;;  %v8215_v12 = vsel %vm3069_vm14, %v8188_v25, 0 }
 0x29c   : > { %5491 = vmatprep.mubr.msk.f32.mxu0 %vm2442_vm8, %v2414_v52  ;;  %v2349_v40 = vsel %vm2331_vm15, %v2316_v50, %v1914_v30  ;;  %vm10107_vm13 = vcmp.eq.s32.totalorder %v10106_v61, 1  ;;  %v2185_v13 = vsel %vm2166_vm12, %v7812_v7, %v1369_v53  ;;  %v10109_v7 = vld [vmem:[#allocation59_spill] sm:$0xff]  ;;  %v10113_v61 = vld [vmem:[#allocation130_spill] sm:$0xff] }
 0x29d   : > { %v8219_v56 = vrot.slane %v3400_v21, 1  ;;  %v2382_v22 = vsel %vm2364_vm10, %v2349_v40, %v2010_v2  ;;  %v8261_v28 = vsel %vm10107_vm13, %v10105_v27, 0.0  ;;  %v10112_v27 = vld [vmem:[#allocation20_spill] sm:$0xff]  ;;  %vm10114_vm2 = vcmp.eq.s32.totalorder %v10113_v61, 1 }
 0x29e   : > { %v1371_v19 = vpop.permute.xlu0 %1370  ;;  %v2105_v60 = vpop.permute.xlu1 %2104 }
 0x29f   : > { %v2415_v1 = vsel %vm2397_vm6, %v2382_v22, %v2105_v60  ;;  %1386 = vrot.lane.b32.xlu0 %v10076_v49, %s5732_s13  ;;  %2120 = vrot.lane.b32.xlu1 %v8224_v23, %s5739_s11  ;;  %v8234_v30 = vsel %vm10101_vm0, %v3398_v47, %v8219_v56  ;;  %v10108_v60 = vld [vmem:[#allocation60_spill] sm:$0xff]  ;;  %v2186_v53 = vsel %vm2166_vm12, %v7807_v34, %v1371_v19 }
 0x2a0   : > { %5492 = vmatmul.mubr.msk.f32.gmra.mrb[16].mxu0 %vm2442_vm8, %v2415_v1 }
 0x2a2   : > { %v1498_v54 = vpop.permute.xlu0 %1497  ;;  %v1496_v38 = vpop.permute.xlu1 %1495 }
 0x2a3   : > { %1513 = vrot.lane.b32.xlu0 %v8128_v48, %s5733_s24  ;;  %1511 = vrot.lane.b32.xlu1 %v8104_v45, %s5733_s24  ;;  %v10102_v45 = vld [vmem:[#allocation64_spill] sm:$0xff]  ;;  %v2218_v52 = vsel %vm2199_vm4, %v2185_v13, %v1496_v38  ;;  %v10110_v38 = vld [vmem:[#allocation71_spill] sm:$0xff] }
 0x2a4   : > { %v8256_v59 = vsel %vm10104_vm5, %v10102_v45, 0.0  ;;  %vm3070_vm14 = vcmp.ne.s16.totalorder %v10110_v38, 0  ;;  %vm10118_vm5 = vsmask.f32 7424 }
 0x2a6   : > { %v1626_v2 = vpop.permute.xlu0 %1625  ;;  %v1624_v37 = vpop.permute.xlu1 %1623 }
 0x2a7   : > { %1641 = vrot.lane.b32.xlu0 %v8156_v41, %s5734_s12  ;;  %1639 = vrot.lane.b32.xlu1 %v8161_v29, %s5734_s12  ;;  %v2251_v50 = vsel %vm2232_vm7, %v2218_v52, %v1624_v37  ;;  %v2219_v37 = vsel %vm2199_vm4, %v2186_v53, %v1498_v54 }
 0x2a8   : > { %v2252_v13 = vsel %vm2232_vm7, %v2219_v37, %v1626_v2 }
 0x2aa   : > { %v1722_v49 = vpop.permute.xlu0 %1721  ;;  %v1720_v63 = vpop.permute.xlu1 %1719 }
 0x2ab   : > { %1737 = vrot.lane.b32.xlu0 %v10091_v46, %s5735_s14  ;;  %1735 = vrot.lane.b32.xlu1 %v10092_v36, %s5735_s14  ;;  %v2284_v44 = vsel %vm2265_vm11, %v2251_v50, %v1720_v63  ;;  %v10111_v63 = vld [vmem:[#allocation110_spill] sm:$0xff]  ;;  %v2285_v54 = vsel %vm2265_vm11, %v2252_v13, %v1722_v49  ;;  %v3404_v49 = vshrl.u32 %v8188_v25, 16  ;;  %v10115_v50 = vld [vmem:[#allocation19_spill] sm:$0xff] }
 0x2ac   : > { %vm3354_vm9 = vcmp.ne.s16.totalorder %v10111_v63, 0 }
 0x2ad   : > { %v3406_v38 = vor.u32 %v3404_v49, %v8219_v56  ;;  %v10120_v49 = vld [vmem:[#allocation74_spill] sm:$0xff] }
 0x2ae   : > { %v1820_v48 = vpop.permute.xlu0 %1819  ;;  %v1818_v14 = vpop.permute.xlu1 %1817 }
 0x2af   : > { %1835 = vrot.lane.b32.xlu0 %v8224_v23, %s5736_s15  ;;  %1833 = vrot.lane.b32.xlu1 %v8193_v24, %s5736_s15  ;;  %v2317_v1 = vsel %vm2298_vm3, %v2284_v44, %v1818_v14  ;;  %v2318_v52 = vsel %vm2298_vm3, %v2285_v54, %v1820_v48 }
 0x2b2   : > { %v1918_v32 = vpop.permute.xlu0 %1917  ;;  %v1916_v11 = vpop.permute.xlu1 %1915 }
 0x2b3   : > { %v5475_v4 = vpop.f32.mrb[4].mxu0  ;;  %1933 = vrot.lane.b32.xlu0 %v8256_v59, %s5737_s16  ;;  %1931 = vrot.lane.b32.xlu1 %v8261_v28, %s5737_s16  ;;  %v2350_v45 = vsel %vm2331_vm15, %v2317_v1, %v1916_v11 }
 0x2b4   : > { %v2635_v42 = vadd.f32 %v5475_v4, %v8067_v39  ;;  %v2629_v18 = vpop.f32.mrb[5].mxu0  ;;  %v8288_v4 = vsel %vm10114_vm2, %v10112_v27, 0.0 }
 0x2b5   : > { %v2630_v21 = vadd.f32 %v8067_v39, %v2629_v18 }
 0x2b6   : > { %v2773_v40 = vmax.f32 %v2635_v42, 0.0  ;;  %v2014_v47 = vpop.permute.xlu0 %2013  ;;  %v2012_v10 = vpop.permute.xlu1 %2011  ;;  %v8295_v42 = vrot.slane %v8208_v31, 1 }
 0x2b7   : > { %v2772_v22 = vmax.f32 %v2630_v21, 0.0  ;;  %2029 = vrot.lane.b32.xlu0 %v10108_v60, %s5738_s28  ;;  %2027 = vrot.lane.b32.xlu1 %v10109_v7, %s5738_s28  ;;  %v2383_v34 = vsel %vm2364_vm10, %v2350_v45, %v2012_v10  ;;  %v2351_v10 = vsel %vm2331_vm15, %v2318_v52, %v1918_v32 }
 0x2b8   : > { %v2384_v44 = vsel %vm2364_vm10, %v2351_v10, %v2014_v47 }
 0x2b9   : > { %v2802_v57 = vpack.c.bf16 %v2773_v40, %v2772_v22  ;;  %v10116_v40 = vld [vmem:[#allocation23_spill] sm:$0xff] }
 0x2ba   : > { %v8292_v19 = vpop.permute.xlu0 %1372  ;;  %v2107_v14 = vpop.permute.xlu1 %2106  ;;  %vm10117_vm0 = vcmp.eq.s32.totalorder %v10116_v40, 1 }
 0x2bb   : > { %v2416_v11 = vsel %vm2397_vm6, %v2383_v34, %v2107_v14  ;;  %1388 = vrot.lane.b32.xlu0 %v10092_v36, %s5732_s13  ;;  %2122 = vrot.lane.b32.xlu1 %v8288_v4, %s5739_s11  ;;  %v3370_v18 = vsel %vm3354_vm9, %v2802_v57, 0  ;;  %v8305_v2 = vsel %vm3070_vm14, %v2802_v57, 0  ;;  %v3408_v21 = vshll.u32 %v2802_v57, 16  ;;  %vm10121_vm9 = vmmov %vm10118_vm5 }
 0x2bc   : > { %5494 = vmatprep.mubr.msk.f32.mxu0 %vm2442_vm8, %v2416_v11  ;;  %v3568_v31 = vrot.slane %v3370_v18, 1  ;;  %v8313_v36 = vsel %vm10117_vm0, %v10115_v50, 0.0  ;;  %v3412_v18 = vshrl.u32 %v2802_v57, 16  ;;  %vm3071_vm14 = vcmp.ne.s16.totalorder %v10120_v49, 0 }
 0x2bd   : > { %v3410_v1 = vrot.slane %v3408_v21, 1 }
 0x2be   : > { %v1375_v22 = vpop.permute.xlu0 %1374  ;;  %v2109_v53 = vpop.permute.xlu1 %2108  ;;  %v8319_v48 = vsel %vm1196_vm1, %v8295_v42, %v3568_v31 }
 0x2bf   : > { %v2417_v25 = vsel %vm2397_vm6, %v2384_v44, %v2109_v53  ;;  %1390 = vrot.lane.b32.xlu0 %v10091_v46, %s5732_s13  ;;  %2124 = vrot.lane.b32.xlu1 %v8313_v36, %s5739_s11  ;;  %v8329_v32 = vsel %vm10118_vm5, %v3406_v38, %v3410_v1  ;;  %v3414_v10 = vor.u32 %v3412_v18, %v3410_v1  ;;  %v10122_v1 = vld [vmem:[#allocation66_spill] sm:$0xff] }
 0x2c0   : > { %5495 = vmatmul.mubr.msk.f32.gmra.mrb[18].mxu0 %vm2442_vm8, %v2417_v25 }
 0x2c2   : > { %v1502_v47 = vpop.permute.xlu0 %1501  ;;  %v1500_v37 = vpop.permute.xlu1 %1499 }
 0x2c3   : > { %v5478_v45 = vpop.f32.mrb[6].mxu0  ;;  %1517 = vrot.lane.b32.xlu0 %v8224_v23, %s5733_s24  ;;  %1515 = vrot.lane.b32.xlu1 %v8193_v24, %s5733_s24  ;;  %v10119_v24 = vld [vmem:[#allocation111_spill] sm:$0xff] }
 0x2c4   : > { %v2645_v63 = vadd.f32 %v5478_v45, %v8067_v39  ;;  %v2639_v46 = vpop.f32.mrb[7].mxu0  ;;  %vm3355_vm13 = vcmp.ne.s16.totalorder %v10119_v24, 0  ;;  %v10123_v45 = vld [vmem:[#allocation96_spill] sm:$0xff]  ;;  %v2187_v24 = vsel %vm2166_vm12, %v7884_v16, %v8292_v19 }
 0x2c5   : > { %v2640_v27 = vadd.f32 %v8067_v39, %v2639_v46  ;;  %vm10124_vm2 = vcmp.eq.s32.totalorder %v10123_v45, 1  ;;  %v10125_v46 = vld [vmem:[#allocation67_spill] sm:$0xff]  ;;  %v2220_v18 = vsel %vm2199_vm4, %v2187_v24, %v1500_v37  ;;  %v10130_v37 = vld [vmem:[#allocation21_spill] sm:$0xff] }
 0x2c6   : > { %v2775_v61 = vmax.f32 %v2645_v63, 0.0  ;;  %v1630_v13 = vpop.permute.xlu0 %1629  ;;  %v1628_v34 = vpop.permute.xlu1 %1627  ;;  %v1013_v63 = vsel %vm10124_vm2, %v10122_v1, 0.0  ;;  %v10128_v45 = vld [vmem:[#allocation63_spill] sm:$0xff]  ;;  %vm1195_vm2 = vcmp.eq.s32.totalorder %v8054_v62, 1 }
 0x2c7   : > { %v2774_v14 = vmax.f32 %v2640_v27, 0.0  ;;  %1645 = vrot.lane.b32.xlu0 %v8256_v59, %s5734_s12  ;;  %1643 = vrot.lane.b32.xlu1 %v8261_v28, %s5734_s12  ;;  %v10126_v27 = vld [vmem:[#allocation97_spill] sm:$0xff]  ;;  %v1333_v62 = vsel %vm1195_vm2, %v10133_v5, 0.0 }
 0x2c8   : > { %vm10127_vm0 = vcmp.eq.s32.totalorder %v10126_v27, 1  ;;  %v2188_v27 = vsel %vm2166_vm12, %v7879_v58, %v1375_v22  ;;  %v10134_v58 = vrot.slane %v10128_v45, 1 }
 0x2c9   : > { %v8341_v54 = vpack.c.bf16 %v2775_v61, %v2774_v14  ;;  %v1012_v61 = vsel %vm10127_vm0, %v10125_v46, 0.0  ;;  %v10129_v46 = vld [vmem:[#allocation62_spill] sm:$0xff]  ;;  %v2221_v16 = vsel %vm2199_vm4, %v2188_v27, %v1502_v47  ;;  %vm10140_vm0 = vsmask.f32 7424 }
 0x2ca   : > { %v1726_v23 = vpop.permute.xlu0 %1725  ;;  %v1724_v11 = vpop.permute.xlu1 %1723  ;;  %v1263_v22 = vsel %vm1196_vm1, %v10134_v58, %v10133_v5 }
 0x2cb   : > { %1741 = vrot.lane.b32.xlu0 %v10108_v60, %s5735_s14  ;;  %1739 = vrot.lane.b32.xlu1 %v10109_v7, %s5735_s14  ;;  %v3416_v52 = vshll.u32 %v8341_v54, 16  ;;  %v8350_v21 = vsel %vm3355_vm13, %v8341_v54, 0  ;;  %v8355_v40 = vsel %vm3071_vm14, %v8341_v54, 0 }
 0x2cc   : > { %v9796_v50 = vrot.slane %v8350_v21, 1 }
 0x2cd   : > { %v8357_v44 = vrot.slane %v3416_v52, 1  ;;  %v2253_v52 = vsel %vm2232_vm7, %v2220_v18, %v1628_v34  ;;  %v10131_v34 = vld [vmem:[#allocation133_spill] sm:$0xff] }
 0x2ce   : > { %v1824_v53 = vpop.permute.xlu0 %1823  ;;  %v1822_v38 = vpop.permute.xlu1 %1821  ;;  %v8362_v57 = vsel %vm1196_vm1, %v3568_v31, %v9796_v50  ;;  %v2286_v1 = vsel %vm2265_vm11, %v2253_v52, %v1724_v11  ;;  %vm10132_vm5 = vcmp.eq.s32.totalorder %v10131_v34, 1  ;;  %v2254_v11 = vsel %vm2232_vm7, %v2221_v16, %v1630_v13 }
 0x2cf   : > { %1839 = vrot.lane.b32.xlu0 %v8313_v36, %s5736_s15  ;;  %1837 = vrot.lane.b32.xlu1 %v8288_v4, %s5736_s15  ;;  %v8370_v25 = vsel %vm10121_vm9, %v3414_v10, %v8357_v44  ;;  %v2319_v50 = vsel %vm2298_vm3, %v2286_v1, %v1822_v38  ;;  %v1330_v24 = vsel %vm10132_vm5, %v10130_v37, 0.0  ;;  %v2287_v47 = vsel %vm2265_vm11, %v2254_v11, %v1726_v23 }
 0x2d0   : > { %v2320_v13 = vsel %vm2298_vm3, %v2287_v47, %v1824_v53  ;;  %vm1194_vm5 = vcmp.eq.s32.totalorder %v8044_v15, 1 }
 0x2d2   : > { %v1922_v31 = vpop.permute.xlu0 %1921  ;;  %v1920_v14 = vpop.permute.xlu1 %1919 }
 0x2d3   : > { %1937 = vrot.lane.b32.xlu0 %v1013_v63, %s5737_s16  ;;  %1935 = vrot.lane.b32.xlu1 %v1012_v61, %s5737_s16  ;;  %v2352_v19 = vsel %vm2331_vm15, %v2319_v50, %v1920_v14  ;;  %v2353_v38 = vsel %vm2331_vm15, %v2320_v13, %v1922_v31  ;;  %v10135_v14 = vld [vmem:[#allocation132_spill] sm:$0xff] }
 0x2d4   : > { %vm10136_vm13 = vcmp.eq.s32.totalorder %v10135_v14, 1 }
 0x2d6   : > { %v2018_v49 = vpop.permute.xlu0 %2017  ;;  %v2016_v10 = vpop.permute.xlu1 %2015 }
 0x2d7   : > { %2033 = vrot.lane.b32.xlu0 %v10128_v45, %s5738_s28  ;;  %2031 = vrot.lane.b32.xlu1 %v10129_v46, %s5738_s28  ;;  %v2385_v18 = vsel %vm2364_vm10, %v2352_v19, %v2016_v10  ;;  %v1331_v10 = vsel %vm10136_vm13, %v1263_v22, 0.0  ;;  %v2386_v1 = vsel %vm2364_vm10, %v2353_v38, %v2018_v49  ;;  %v10137_v22 = vld [vmem:[#allocation113_spill] sm:$0xff] }
 0x2d8   : > { %vm3356_vm14 = vcmp.ne.s16.totalorder %v10137_v22, 0 }
 0x2da   : > { %v8400_v52 = vpop.permute.xlu0 %1376  ;;  %v2111_v17 = vpop.permute.xlu1 %2110 }
 0x2db   : > { %v2418_v50 = vsel %vm2397_vm6, %v2385_v18, %v2111_v17  ;;  %1392 = vrot.lane.b32.xlu0 %v10109_v7, %s5732_s13  ;;  %2126 = vrot.lane.b32.xlu1 %v1330_v24, %s5739_s11  ;;  %v2189_v15 = vsel %vm2166_vm12, %v7951_v33, %v8400_v52 }
 0x2dc   : > { %5497 = vmatprep.mubr.msk.f32.mxu0 %vm2442_vm8, %v2418_v50 }
 0x2de   : > { %v1379_v27 = vpop.permute.xlu0 %1378  ;;  %v2113_v23 = vpop.permute.xlu1 %2112 }
 0x2df   : > { %v2419_v17 = vsel %vm2397_vm6, %v2386_v1, %v2113_v23  ;;  %1394 = vrot.lane.b32.xlu0 %v10108_v60, %s5732_s13  ;;  %2128 = vrot.lane.b32.xlu1 %v1331_v10, %s5739_s11  ;;  %v10141_v23 = vld [vmem:[#allocation100_spill] sm:$0xff]  ;;  %v2190_v33 = vsel %vm2166_vm12, %v7946_v20, %v1379_v27  ;;  %v5630_v20 = vld [vmem:[%s9634_s7 + $0x48] sm:$0xff]  }
 0x2e0   : > { %5498 = vmatmul.mubr.msk.f32.gmra.mrb[20].mxu0 %vm2442_vm8, %v2419_v17  ;;  %vm10142_vm13 = vcmp.eq.s32.totalorder %v10141_v23, 1 }
 0x2e1   : > { %v1015_v17 = vsel %vm10142_vm13, %v6467_v6, 0.0  ;;  %vm10151_vm13 = vsmask.f32 256 }
 0x2e2   : > { %v1506_v7 = vpop.permute.xlu0 %1505  ;;  %v1504_v53 = vpop.permute.xlu1 %1503 }
 0x2e3   : > { %v5481_v16 = vpop.f32.mrb[8].mxu0  ;;  %1521 = vrot.lane.b32.xlu0 %v8313_v36, %s5733_s24  ;;  %1519 = vrot.lane.b32.xlu1 %v8288_v4, %s5733_s24  ;;  %v3420_v4 = vshrl.u32 %v8341_v54, 16  ;;  %v10139_v54 = vrot.slane %v8350_v21, 1  ;;  %v10143_v21 = vld [vmem:[#allocation68_spill] sm:$0xff]  ;;  %v2222_v6 = vsel %vm2199_vm4, %v2189_v15, %v1504_v53 }
 0x2e4   : > { %v2655_v31 = vadd.f32 %v5481_v16, %v8067_v39  ;;  %v2649_v49 = vpop.f32.mrb[9].mxu0  ;;  %v10144_v16 = vld [vmem:[#allocation101_spill] sm:$0xff]  ;;  %v5629_v53 = vld [vmem:[%s9634_s7] sm:$0xff]  }
 0x2e5   : > { %v2650_v19 = vadd.f32 %v8067_v39, %v2649_v49  ;;  %v3422_v38 = vor.u32 %v3420_v4, %v8357_v44 }
 0x2e6   : > { %v2777_v37 = vmax.f32 %v2655_v31, 0.0  ;;  %v1634_v60 = vpop.permute.xlu0 %1633  ;;  %v1632_v34 = vpop.permute.xlu1 %1631 }
 0x2e7   : > { %v2776_v11 = vmax.f32 %v2650_v19, 0.0  ;;  %1649 = vrot.lane.b32.xlu0 %v1013_v63, %s5734_s12  ;;  %1647 = vrot.lane.b32.xlu1 %v1012_v61, %s5734_s12  ;;  %v10138_v61 = vld [vmem:[#allocation77_spill] sm:$0xff] }
 0x2e8   : > { %vm3072_vm9 = vcmp.ne.s16.totalorder %v10138_v61, 0 }
 0x2e9   : > { %v8430_v18 = vpack.c.bf16 %v2777_v37, %v2776_v11  ;;  %v2255_v37 = vsel %vm2232_vm7, %v2222_v6, %v1632_v34  ;;  %v2223_v34 = vsel %vm2199_vm4, %v2190_v33, %v1506_v7 }
 0x2ea   : > { %v1730_v58 = vpop.permute.xlu0 %1729  ;;  %v1728_v36 = vpop.permute.xlu1 %1727  ;;  %v2256_v61 = vsel %vm2232_vm7, %v2223_v34, %v1634_v60  ;;  %v5631_v60 = vld [vmem:[%s9634_s7 + $0x8] sm:$0xff]  }
 0x2eb   : > { %1745 = vrot.lane.b32.xlu0 %v10128_v45, %s5735_s14  ;;  %1743 = vrot.lane.b32.xlu1 %v10129_v46, %s5735_s14  ;;  %v3424_v47 = vshll.u32 %v8430_v18, 16  ;;  %v8440_v63 = vsel %vm3356_vm14, %v8430_v18, 0  ;;  %v8445_v13 = vsel %vm3072_vm9, %v8430_v18, 0  ;;  %vm10145_vm14 = vcmp.eq.s32.totalorder %v10144_v16, 1  ;;  %vm10147_vm9 = vmmov %vm10140_vm0 }
 0x2ec   : > { %v3572_v50 = vrot.slane %v8440_v63, 1  ;;  %v1014_v31 = vsel %vm10145_vm14, %v10143_v21, 0.0  ;;  %v2288_v4 = vsel %vm2265_vm11, %v2255_v37, %v1728_v36  ;;  %v2289_v27 = vsel %vm2265_vm11, %v2256_v61, %v1730_v58  ;;  %v5632_v58 = vld [vmem:[%s9634_s7 + $0x50] sm:$0xff]  }
 0x2ed   : > { %v8448_v45 = vrot.slane %v3424_v47, 1  ;;  %v10146_v47 = vmov 0.0   ;;  %v5641_v63 = vld [vmem:[%s9634_s7 + $0x30] sm:$0xff]  }
 0x2ee   : > { %v1828_v14 = vpop.permute.xlu0 %1827  ;;  %v1826_v46 = vpop.permute.xlu1 %1825  ;;  %v8455_v1 = vsel %vm1196_vm1, %v10139_v54, %v3572_v50 }
 0x2ef   : > { %1843 = vrot.lane.b32.xlu0 %v1331_v10, %s5736_s15  ;;  %1841 = vrot.lane.b32.xlu1 %v1330_v24, %s5736_s15  ;;  %v8462_v44 = vsel %vm10140_vm0, %v3422_v38, %v8448_v45  ;;  %v1332_v24 = vsel %vm1194_vm5, %v10133_v5, 0.0  ;;  %v5628_v5 = vld [vmem:[%s9634_s7 + $0x40] sm:$0xff]   ;;  %v2321_v52 = vsel %vm2298_vm3, %v2288_v4, %v1826_v46  ;;  %v2322_v46 = vsel %vm2298_vm3, %v2289_v27, %v1828_v14  ;;  %v10148_v27 = vld [vmem:[#allocation114_spill] sm:$0xff]  ;;  %vm10150_vm5 = vmmov %vm10147_vm9 }
 0x2f0   : > { %v5618_v19 = vpack.i.bf16 %v1333_v62, %v1332_v24  ;;  %5559 = vmatprep.subr.bf16.mxu1 %v5628_v5  ;;  %5327 = vmatprep.subr.bf16.mxu0 %v5628_v5  ;;  %vm3357_vm2 = vcmp.ne.s16.totalorder %v10148_v27, 0  ;;  %v5643_v27 = vld [vmem:[%s9634_s7 + $0x38] sm:$0xff]  }
 0x2f1   : > { %5567 = vmatpush3.bf16.msra.mxu1 %v5629_v53  ;;  %5328 = vmatpush3.bf16.msra.mxu0 %v5629_v53  ;;  %v5636_v53 = vld [vmem:[%s9634_s7 + $0x60] sm:$0xff]  }
 0x2f2   : > { %v1926_v49 = vpop.permute.xlu0 %1925  ;;  %v1924_v10 = vpop.permute.xlu1 %1923  ;;  %5560 = vmatprep.subr.bf16.mxu1 %v5630_v20  ;;  %5329 = vmatprep.subr.bf16.mxu0 %v5630_v20 }
 0x2f3   : > { %1941 = vrot.lane.b32.xlu0 %v1015_v17, %s5737_s16  ;;  %1939 = vrot.lane.b32.xlu1 %v1014_v31, %s5737_s16  ;;  %v2354_v36 = vsel %vm2331_vm15, %v2321_v52, %v1924_v10  ;;  %v8514_v17 = vrot.slane %v8119_v8, 1  ;;  %v2355_v21 = vsel %vm2331_vm15, %v2322_v46, %v1926_v49  ;;  %v5633_v49 = vld [vmem:[%s9634_s7 + $0x10] sm:$0xff]   ;;  %v5634_v10 = vld [vmem:[%s9634_s7 + $0x58] sm:$0xff]  }
 0x2f5   : > { %v3567_v14 = vsel %vm1196_vm1, %v8514_v17, %v8295_v42  ;;  %5568 = vmatpush3.bf16.msra.mxu1 %v5631_v60  ;;  %5330 = vmatpush3.bf16.msra.mxu0 %v5631_v60 }
 0x2f6   : > { %v2022_v11 = vpop.permute.xlu0 %2021  ;;  %v2020_v22 = vpop.permute.xlu1 %2019  ;;  %5561 = vmatprep.subr.bf16.mxu1 %v5632_v58  ;;  %5331 = vmatprep.subr.bf16.mxu0 %v5632_v58  ;;  %v10149_v58 = vld [vmem:[#allocation80_spill] sm:$0xff] }
 0x2f7   : > { %5619 = vrot.lane.b32.xlu0 %v5618_v19, %s5739_s11  ;;  %2035 = vrot.lane.b32.xlu1 %v10146_v47, %s5738_s28  ;;  %v2387_v38 = vsel %vm2364_vm10, %v2354_v36, %v2020_v22  ;;  %v2388_v16 = vsel %vm2364_vm10, %v2355_v21, %v2022_v11  ;;  %v8542_v19 = vrot.slane %v9855_v35, 1  ;;  %v5635_v22 = vld [vmem:[%s9634_s7 + $0x18] sm:$0xff]   ;;  %v5637_v36 = vld [vmem:[%s9634_s7 + $0x20] sm:$0xff]   ;;  %vm3073_vm0 = vcmp.ne.s16.totalorder %v10149_v58, 0 }
 0x2f8   : > { %v5638_v21 = vld [vmem:[%s9634_s7 + $0x68] sm:$0xff]  }
 0x2f9   : > { %5569 = vmatpush3.bf16.msra.mxu1 %v5633_v49  ;;  %5332 = vmatpush3.bf16.msra.mxu0 %v5633_v49  ;;  %v3395_v52 = vsel %vm10147_vm9, %v8542_v19, %v8184_v26  ;;  %v3565_v20 = vsel %vm1196_vm1, %v8542_v19, %v8514_v17 }
 0x2fa   : > { %v8497_v54 = vpop.permute.xlu0 %1380  ;;  %v2115_v23 = vpop.permute.xlu1 %2114  ;;  %5562 = vmatprep.subr.bf16.mxu1 %v5634_v10  ;;  %5333 = vmatprep.subr.bf16.mxu0 %v5634_v10 }
 0x2fb   : > { %v2420_v7 = vsel %vm2397_vm6, %v2387_v38, %v2115_v23  ;;  %3515 = vrot.lane.b32.xlu0 %v8234_v30, %s5739_s11  ;;  %3693 = vrot.lane.b32.xlu1 %v8319_v48, %s5739_s11 }
 0x2fc   : > { %5500 = vmatprep.mubr.msk.f32.mxu0 %vm2442_vm8, %v2420_v7  ;;  %v3428_v7 = vshrl.u32 %v8430_v18, 16  ;;  %v5639_v18 = vld [vmem:[%s9634_s7 + $0x28] sm:$0xff]  }
 0x2fd   : > { %5570 = vmatpush3.bf16.msra.mxu1 %v5635_v22  ;;  %5334 = vmatpush3.bf16.msra.mxu0 %v5635_v22 }
 0x2fe   : > { %v8521_v31 = vpop.permute.xlu0 %1382  ;;  %v2117_v62 = vpop.permute.xlu1 %2116  ;;  %5563 = vmatprep.subr.bf16.mxu1 %v5636_v53  ;;  %5335 = vmatprep.subr.bf16.mxu0 %v5636_v53 }
 0x2ff   : > { %v2421_v8 = vsel %vm2397_vm6, %v2388_v16, %v2117_v62  ;;  %3727 = vrot.lane.b32.xlu1 %v8305_v2, %s5740_s17  ;;  %3600 = vrot.lane.b32.xlu0 %v3567_v14, %s5740_s17 }
 0x300   : > { %5501 = vmatmul.mubr.msk.f32.gmra.mrb[22].mxu0 %vm2442_vm8, %v2421_v8  ;;  %v3430_v8 = vor.u32 %v3428_v7, %v8448_v45  ;;  %v4143_v45 = vshrl.u32 %v8455_v1, 16 }
 0x301   : > { %5571 = vmatpush3.bf16.msra.mxu1 %v5637_v36  ;;  %5336 = vmatpush3.bf16.msra.mxu0 %v5637_v36 }
 0x302   : > { %v8537_v24 = vpop.permute.xlu0 %1509  ;;  %v8539_v15 = vpop.permute.xlu1 %1507  ;;  %5564 = vmatprep.subr.bf16.mxu1 %v5638_v21  ;;  %5337 = vmatprep.subr.bf16.mxu0 %v5638_v21  ;;  %v8628_v53 = vrot.slane %v4143_v45, 7 }
 0x303   : > { %v5484_v6 = vpop.f32.mrb[10].mxu0  ;;  %3691 = vrot.lane.b32.xlu1 %v3567_v14, %s5739_s11  ;;  %3762 = vrot.lane.b32.xlu0 %v8370_v25, %s5741_s22  ;;  %v5640_v14 = vld [vmem:[%s9634_s7 + $0x70] sm:$0xff]  }
 0x304   : > { %v2665_v37 = vadd.f32 %v5484_v6, %v8067_v39  ;;  %v2659_v11 = vpop.f32.mrb[11].mxu0 }
 0x305   : > { %v2660_v4 = vadd.f32 %v8067_v39, %v2659_v11  ;;  %5572 = vmatpush3.bf16.msra.mxu1 %v5639_v18  ;;  %5338 = vmatpush3.bf16.msra.mxu0 %v5639_v18 }
 0x306   : > { %v2779_v47 = vmax.f32 %v2665_v37, 0.0  ;;  %v8552_v5 = vpop.permute.xlu0 %1637  ;;  %v8554_v33 = vpop.permute.xlu1 %1635  ;;  %5565 = vmatprep.subr.bf16.mxu1 %v5640_v14  ;;  %5339 = vmatprep.subr.bf16.mxu0 %v5640_v14 }
 0x307   : > { %v2778_v34 = vmax.f32 %v2660_v4, 0.0  ;;  %3513 = vrot.lane.b32.xlu1 %v3395_v52, %s5739_s11  ;;  %3650 = vrot.lane.b32.xlu0 %v8215_v12, %s5741_s22 }
 0x309   : > { %v8568_v61 = vpack.c.bf16 %v2779_v47, %v2778_v34  ;;  %5573 = vmatpush3.bf16.msra.mxu1 %v5641_v63  ;;  %5340 = vmatpush3.bf16.msra.mxu0 %v5641_v63  ;;  %v5642_v34 = vld [vmem:[%s9634_s7 + $0x78] sm:$0xff]  }
 0x30a   : > { %v8570_v38 = vpop.permute.xlu0 %1733  ;;  %v1732_v23 = vpop.permute.xlu1 %1731  ;;  %5566 = vmatprep.subr.bf16.mxu1 %v5642_v34  ;;  %5341 = vmatprep.subr.bf16.mxu0 %v5642_v34 }
 0x30b   : > { %3725 = vrot.lane.b32.xlu1 %v8215_v12, %s5740_s17  ;;  %3598 = vrot.lane.b32.xlu0 %v3565_v20, %s5740_s17  ;;  %v3432_v60 = vshll.u32 %v8568_v61, 16  ;;  %v8582_v46 = vsel %vm3357_vm2, %v8568_v61, 0  ;;  %v8590_v62 = vsel %vm3073_vm0, %v8568_v61, 0  ;;  %v2191_v20 = vsel %vm2166_vm12, %v8014_v3, %v8497_v54  ;;  %vm10154_vm2 = vmmov %vm10150_vm5 }
 0x30c   : > { %v3574_v16 = vrot.slane %v8582_v46, 1  ;;  %v2224_v7 = vsel %vm2199_vm4, %v2191_v20, %v8539_v15  ;;  %v2192_v54 = vsel %vm2166_vm12, %v8009_v51, %v8521_v31  ;;  %vm10155_vm0 = vmmov %vm10151_vm13 }
 0x30d   : > { %v8599_v49 = vrot.slane %v3432_v60, 1  ;;  %v2257_v58 = vsel %vm2232_vm7, %v2224_v7, %v8554_v33  ;;  %5574 = vmatpush3.bf16.msra.mxu1 %v5643_v27  ;;  %5342 = vmatpush3.bf16.msra.mxu0 %v5643_v27  ;;  %v2225_v33 = vsel %vm2199_vm4, %v2192_v54, %v8537_v24 }
 0x30e   : > { %v1832_v10 = vpop.permute.xlu0 %1831  ;;  %v1830_v6 = vpop.permute.xlu1 %1829  ;;  %v8606_v37 = vsel %vm1196_vm1, %v3572_v50, %v3574_v16  ;;  %v2290_v3 = vsel %vm2265_vm11, %v2257_v58, %v1732_v23  ;;  %v2258_v23 = vsel %vm2232_vm7, %v2225_v33, %v8552_v5 }
 0x30f   : > { %3760 = vrot.lane.b32.xlu1 %v8329_v32, %s5741_s22  ;;  %3648 = vrot.lane.b32.xlu0 %v8122_v55, %s5741_s22  ;;  %v8615_v11 = vsel %vm10150_vm5, %v3430_v8, %v8599_v49  ;;  %v4165_v22 = vshrl.u32 %v8606_v37, 16  ;;  %v4168_v4 = vshll.u32 %v8606_v37, 16  ;;  %v2323_v15 = vsel %vm2298_vm3, %v2290_v3, %v1830_v6 }
 0x310   : > { %v2291_v63 = vsel %vm2265_vm11, %v2258_v23, %v8570_v38  ;;  %v10153_v23 = vld [vmem:[#allocation83_spill] sm:$0xff] }
 0x311   : > { %v8621_v50 = vrot.slane %v4165_v22, 7  ;;  %v2324_v51 = vsel %vm2298_vm3, %v2291_v63, %v1832_v10  ;;  %vm3074_vm9 = vcmp.ne.s16.totalorder %v10153_v23, 0 }
 0x312   : > { %v1930_v47 = vpop.permute.xlu0 %1929  ;;  %v1928_v52 = vpop.permute.xlu1 %1927 }
 0x313   : > { %3695 = vrot.lane.b32.xlu1 %v8362_v57, %s5739_s11  ;;  %3517 = vrot.lane.b32.xlu0 %v8329_v32, %s5739_s11  ;;  %v4170_v36 = vor.u32 %v4168_v4, %v8621_v50  ;;  %v2356_v14 = vsel %vm2331_vm15, %v2323_v15, %v1928_v52  ;;  %v2357_v31 = vsel %vm2331_vm15, %v2324_v51, %v1930_v47  ;;  %v10152_v15 = vld [vmem:[#allocation117_spill] sm:$0xff] }
 0x314   : > { %vm3358_vm14 = vcmp.ne.s16.totalorder %v10152_v15, 0 }
 0x315   : > { %v8644_v60 = vsel %vm10151_vm13, %v8628_v53, %v4170_v36 }
 0x316   : > { %v2026_v21 = vpop.permute.xlu0 %2025  ;;  %v2024_v18 = vpop.permute.xlu1 %2023 }
 0x317   : > { %3729 = vrot.lane.b32.xlu1 %v8355_v40, %s5740_s17  ;;  %3602 = vrot.lane.b32.xlu0 %v8319_v48, %s5740_s17  ;;  %v2389_v8 = vsel %vm2364_vm10, %v2356_v14, %v2024_v18  ;;  %v2390_v24 = vsel %vm2364_vm10, %v2357_v31, %v2026_v21 }
 0x31a   : > { %v1385_v45 = vpop.permute.xlu0 %1384  ;;  %v2119_v22 = vpop.permute.xlu1 %2118 }
 0x31b   : > { %v2422_v4 = vsel %vm2397_vm6, %v2389_v8, %v2119_v22  ;;  %3764 = vrot.lane.b32.xlu1 %v8462_v44, %s5741_s22  ;;  %3652 = vrot.lane.b32.xlu0 %v8305_v2, %s5741_s22 }
 0x31c   : > { %5503 = vmatprep.mubr.msk.f32.mxu0 %vm2442_vm8, %v2422_v4 }
 0x31e   : > { %v1387_v5 = vpop.permute.xlu0 %1386  ;;  %v2121_v6 = vpop.permute.xlu1 %2120 }
 0x31f   : > { %v2423_v38 = vsel %vm2397_vm6, %v2390_v24, %v2121_v6  ;;  %3697 = vrot.lane.b32.xlu1 %v8455_v1, %s5739_s11  ;;  %3519 = vrot.lane.b32.xlu0 %v8370_v25, %s5739_s11 }
 0x320   : > { %5504 = vmatmul.mubr.msk.f32.gmra.mrb[24].mxu0 %vm2442_vm8, %v2423_v38 }
 0x322   : > { %v1514_v52 = vpop.permute.xlu0 %1513  ;;  %v1512_v10 = vpop.permute.xlu1 %1511 }
 0x323   : > { %v5487_v34 = vpop.f32.mrb[12].mxu0  ;;  %3731 = vrot.lane.b32.xlu1 %v8445_v13, %s5740_s17  ;;  %3604 = vrot.lane.b32.xlu0 %v8362_v57, %s5740_s17 }
 0x324   : > { %v2675_v47 = vadd.f32 %v5487_v34, %v8067_v39  ;;  %v2669_v36 = vpop.f32.mrb[13].mxu0 }
 0x325   : > { %v2670_v20 = vadd.f32 %v8067_v39, %v2669_v36  ;;  %v3436_v39 = vshrl.u32 %v8568_v61, 16 }
 0x326   : > { %v2781_v27 = vmax.f32 %v2675_v47, 0.0  ;;  %v1642_v7 = vpop.permute.xlu0 %1641  ;;  %v1640_v58 = vpop.permute.xlu1 %1639 }
 0x327   : > { %v2780_v21 = vmax.f32 %v2670_v20, 0.0  ;;  %3766 = vrot.lane.b32.xlu1 %v8615_v11, %s5741_s22  ;;  %3654 = vrot.lane.b32.xlu0 %v8355_v40, %s5741_s22  ;;  %v3438_v63 = vor.u32 %v3436_v39, %v8599_v49 }
 0x329   : > { %v8690_v18 = vpack.c.bf16 %v2781_v27, %v2780_v21 }
 0x32a   : > { %v1738_v3 = vpop.permute.xlu0 %1737  ;;  %v1736_v54 = vpop.permute.xlu1 %1735 }
 0x32b   : > { %3699 = vrot.lane.b32.xlu1 %v8606_v37, %s5739_s11  ;;  %3521 = vrot.lane.b32.xlu0 %v8462_v44, %s5739_s11  ;;  %v3440_v33 = vshll.u32 %v8690_v18, 16  ;;  %v8700_v14 = vsel %vm3358_vm14, %v8690_v18, 0  ;;  %v8705_v22 = vsel %vm3074_vm9, %v8690_v18, 0  ;;  %vm10158_vm14 = vmmov %vm10154_vm2 }
 0x32c   : > { %v3576_v8 = vrot.slane %v8700_v14, 1  ;;  %vm10159_vm9 = vmmov %vm10155_vm0 }
 0x32d   : > { %v8708_v4 = vrot.slane %v3440_v33, 1 }
 0x32e   : > { %v1836_v51 = vpop.permute.xlu0 %1835  ;;  %v1834_v31 = vpop.permute.xlu1 %1833  ;;  %v3577_v61 = vsel %vm1196_vm1, %v3574_v16, %v3576_v8  ;;  %v2193_v16 = vsel %vm2166_vm12, %v8077_v0, %v1385_v45  ;;  %v2194_v0 = vsel %vm2166_vm12, %v8072_v9, %v1387_v5 }
 0x32f   : > { %3733 = vrot.lane.b32.xlu1 %v8590_v62, %s5740_s17  ;;  %3606 = vrot.lane.b32.xlu0 %v8455_v1, %s5740_s17  ;;  %v8721_v24 = vsel %vm10154_vm2, %v3438_v63, %v8708_v4  ;;  %v4187_v49 = vshrl.u32 %v3577_v61, 16  ;;  %v4190_v38 = vshll.u32 %v3577_v61, 16  ;;  %v2226_v36 = vsel %vm2199_vm4, %v2193_v16, %v1512_v10 }
 0x330   : > { %v2259_v27 = vsel %vm2232_vm7, %v2226_v36, %v1640_v58  ;;  %v2227_v10 = vsel %vm2199_vm4, %v2194_v0, %v1514_v52  ;;  %v8771_v0 = vld [vmem:[%s8060_s23] ss:$0 sm:$0xff] }
 0x331   : > { %v8723_v6 = vrot.slane %v4187_v49, 7  ;;  %v2292_v39 = vsel %vm2265_vm11, %v2259_v27, %v1736_v54  ;;  %v2260_v58 = vsel %vm2232_vm7, %v2227_v10, %v1642_v7 }
 0x332   : > { %v1934_v34 = vpop.permute.xlu0 %1933  ;;  %v1932_v47 = vpop.permute.xlu1 %1931  ;;  %v2325_v45 = vsel %vm2298_vm3, %v2292_v39, %v1834_v31  ;;  %v2293_v63 = vsel %vm2265_vm11, %v2260_v58, %v1738_v3 }
 0x333   : > { %3768 = vrot.lane.b32.xlu1 %v8721_v24, %s5741_s22  ;;  %3656 = vrot.lane.b32.xlu0 %v8445_v13, %s5741_s22  ;;  %v4192_v46 = vor.u32 %v4190_v38, %v8723_v6  ;;  %v2326_v9 = vsel %vm2298_vm3, %v2293_v63, %v1836_v51 }
 0x334   : > { %v2359_v5 = vsel %vm2331_vm15, %v2326_v9, %v1934_v34 }
 0x335   : > { %v8735_v20 = vsel %vm10155_vm0, %v8621_v50, %v4192_v46  ;;  %v2358_v50 = vsel %vm2331_vm15, %v2325_v45, %v1932_v47 }
 0x336   : > { %v2030_v21 = vpop.permute.xlu0 %2029  ;;  %v2028_v15 = vpop.permute.xlu1 %2027 }
 0x337   : > { %3701 = vrot.lane.b32.xlu1 %v3577_v61, %s5739_s11  ;;  %3523 = vrot.lane.b32.xlu0 %v8615_v11, %s5739_s11  ;;  %v2391_v33 = vsel %vm2364_vm10, %v2358_v50, %v2028_v15  ;;  %v2392_v52 = vsel %vm2364_vm10, %v2359_v5, %v2030_v21 }
 0x33a   : > { %v1389_v23 = vpop.permute.xlu0 %1388  ;;  %v2123_v54 = vpop.permute.xlu1 %2122 }
 0x33b   : > { %v2424_v49 = vsel %vm2397_vm6, %v2391_v33, %v2123_v54  ;;  %3735 = vrot.lane.b32.xlu1 %v8705_v22, %s5740_s17  ;;  %3608 = vrot.lane.b32.xlu0 %v8606_v37, %s5740_s17  ;;  %v2195_v39 = vsel %vm2166_vm12, %v8161_v29, %v1389_v23 }
 0x33c   : > { %5506 = vmatprep.mubr.msk.f32.mxu0 %vm2442_vm8, %v2424_v49 }
 0x33e   : > { %v1391_v7 = vpop.permute.xlu0 %1390  ;;  %v2125_v31 = vpop.permute.xlu1 %2124 }
 0x33f   : > { %v2425_v3 = vsel %vm2397_vm6, %v2392_v52, %v2125_v31  ;;  %3658 = vrot.lane.b32.xlu0 %v8590_v62, %s5741_s22  ;;  %v2196_v29 = vsel %vm2166_vm12, %v8156_v41, %v1391_v7 }
 0x340   : > { %5507 = vmatmul.mubr.msk.f32.gmra.mrb[26].mxu0 %vm2442_vm8, %v2425_v3  ;;  %v10156_v3 = vld [vmem:[#allocation86_spill] sm:$0xff] }
 0x341   : > { %vm3075_vm5 = vcmp.ne.s16.totalorder %v10156_v3, 0 }
 0x342   : > { %v1518_v38 = vpop.permute.xlu0 %1517  ;;  %v1516_v37 = vpop.permute.xlu1 %1515 }
 0x343   : > { %3525 = vrot.lane.b32.xlu0 %v8721_v24, %s5739_s11  ;;  %v2229_v5 = vsel %vm2199_vm4, %v2196_v29, %v1518_v38 }
 0x346   : > { %v1646_v51 = vpop.permute.xlu0 %1645  ;;  %v1644_v47 = vpop.permute.xlu1 %1643 }
 0x347   : > { %3610 = vrot.lane.b32.xlu0 %v3577_v61, %s5740_s17  ;;  %v2228_v61 = vsel %vm2199_vm4, %v2195_v39, %v1516_v37  ;;  %v2262_v37 = vsel %vm2232_vm7, %v2229_v5, %v1646_v51  ;;  %v3444_v39 = vshrl.u32 %v8690_v18, 16 }
 0x348   : > { %v2261_v58 = vsel %vm2232_vm7, %v2228_v61, %v1644_v47 }
 0x34a   : > { %v1742_v34 = vpop.permute.xlu0 %1741  ;;  %v1740_v46 = vpop.permute.xlu1 %1739 }
 0x34b   : > { %3660 = vrot.lane.b32.xlu0 %v8705_v22, %s5741_s22  ;;  %v2294_v49 = vsel %vm2265_vm11, %v2261_v58, %v1740_v46  ;;  %v2295_v41 = vsel %vm2265_vm11, %v2262_v37, %v1742_v34  ;;  %v3446_v34 = vor.u32 %v3444_v39, %v8708_v4 }
 0x34e   : > { %v1840_v16 = vpop.permute.xlu0 %1839  ;;  %v1838_v36 = vpop.permute.xlu1 %1837 }
 0x34f   : > { %v2327_v23 = vsel %vm2298_vm3, %v2294_v49, %v1838_v36 }
 0x352   : > { %v1938_v27 = vpop.permute.xlu0 %1937  ;;  %v1936_v21 = vpop.permute.xlu1 %1935 }
 0x353   : > { %v5490_v15 = vpop.f32.mrb[14].mxu0  ;;  %v2360_v52 = vsel %vm2331_vm15, %v2327_v23, %v1936_v21  ;;  %v2328_v21 = vsel %vm2298_vm3, %v2295_v41, %v1840_v16 }
 0x354   : > { %v2685_v45 = vadd.f32 %v8771_v0, %v5490_v15  ;;  %v2679_v10 = vpop.f32.mrb[15].mxu0  ;;  %v2361_v18 = vsel %vm2331_vm15, %v2328_v21, %v1938_v27 }
 0x355   : > { %v2680_v50 = vadd.f32 %v8771_v0, %v2679_v10 }
 0x356   : > { %v2783_v33 = vmax.f32 %v2685_v45, 0.0  ;;  %v2034_v54 = vpop.permute.xlu0 %2033  ;;  %v2032_v63 = vpop.permute.xlu1 %2031  ;;  %v10157_v45 = vld [vmem:[#allocation120_spill] sm:$0xff] }
 0x357   : > { %v2782_v9 = vmax.f32 %v2680_v50, 0.0  ;;  %v2393_v47 = vsel %vm2364_vm10, %v2360_v52, %v2032_v63  ;;  %vm3359_vm13 = vcmp.ne.s16.totalorder %v10157_v45, 0  ;;  %v2394_v50 = vsel %vm2364_vm10, %v2361_v18, %v2034_v54 }
 0x359   : > { %v8783_v31 = vpack.c.bf16 %v2783_v33, %v2782_v9 }
 0x35a   : > { %v1393_v15 = vpop.permute.xlu0 %1392  ;;  %v2127_v46 = vpop.permute.xlu1 %2126 }
 0x35b   : > { %v2426_v7 = vsel %vm2397_vm6, %v2393_v47, %v2127_v46  ;;  %v3448_v38 = vshll.u32 %v8783_v31, 16  ;;  %v8794_v36 = vsel %vm3359_vm13, %v8783_v31, 0  ;;  %v8800_v10 = vsel %vm3075_vm5, %v8783_v31, 0 }
 0x35c   : > { %5509 = vmatprep.mubr.msk.f32.mxu0 %vm2442_vm8, %v2426_v7  ;;  %v3578_v51 = vrot.slane %v8794_v36, 1  ;;  %v2197_v46 = vsel %vm2166_vm12, %v8261_v28, %v1393_v15 }
 0x35d   : > { %v8804_v61 = vrot.slane %v3448_v38, 1 }
 0x35e   : > { %v1395_v58 = vpop.permute.xlu0 %1394  ;;  %v2129_v33 = vpop.permute.xlu1 %2128  ;;  %v3579_v16 = vsel %vm1196_vm1, %v3576_v8, %v3578_v51 }
 0x35f   : > { %v2427_v63 = vsel %vm2397_vm6, %v2394_v50, %v2129_v33  ;;  %v8815_v49 = vsel %vm10158_vm14, %v3446_v34, %v8804_v61  ;;  %v4209_v27 = vshrl.u32 %v3579_v16, 16  ;;  %v4212_v14 = vshll.u32 %v3579_v16, 16 }
 0x360   : > { %5510 = vmatmul.mubr.msk.f32.gmra.mrb[28].mxu0 %vm2442_vm8, %v2427_v63  ;;  %3770 = vrot.lane.b32.xlu1 %v8815_v49, %s5741_s22  ;;  %v2198_v39 = vsel %vm2166_vm12, %v8256_v59, %v1395_v58 }
 0x361   : > { %3527 = vrot.lane.b32.xlu0 %v8815_v49, %s5739_s11  ;;  %v8822_v4 = vrot.slane %v4209_v27, 7 }
 0x362   : > { %v1522_v54 = vpop.permute.xlu0 %1521  ;;  %v1520_v8 = vpop.permute.xlu1 %1519 }
 0x363   : > { %v4214_v9 = vor.u32 %v4212_v14, %v8822_v4  ;;  %v2231_v45 = vsel %vm2199_vm4, %v2198_v39, %v1522_v54 }
 0x364   : > { %3703 = vrot.lane.b32.xlu1 %v3579_v16, %s5739_s11 }
 0x365   : > { %3612 = vrot.lane.b32.xlu0 %v3579_v16, %s5740_s17  ;;  %v8829_v29 = vsel %vm10159_vm9, %v8723_v6, %v4214_v9  ;;  %v2230_v6 = vsel %vm2199_vm4, %v2197_v46, %v1520_v8 }
 0x366   : > { %v1650_v23 = vpop.permute.xlu0 %1649  ;;  %v1648_v5 = vpop.permute.xlu1 %1647 }
 0x367   : > { %v2264_v38 = vsel %vm2232_vm7, %v2231_v45, %v1650_v23  ;;  %v2263_v21 = vsel %vm2232_vm7, %v2230_v6, %v1648_v5  ;;  %v10160_v45 = vld [vmem:[#allocation123_spill] sm:$0xff]  ;;  %v3452_v6 = vshrl.u32 %v8783_v31, 16  ;;  %vm3842_vm7 = vcmask 523264  }
 0x368   : > { %3737 = vrot.lane.b32.xlu1 %v8800_v10, %s5740_s17 }
 0x36a   : > { %v1746_v52 = vpop.permute.xlu0 %1745  ;;  %v1744_v3 = vpop.permute.xlu1 %1743 }
 0x36b   : > { %v2297_v34 = vsel %vm2265_vm11, %v2264_v38, %v1746_v52  ;;  %v2296_v50 = vsel %vm2265_vm11, %v2263_v21, %v1744_v3  ;;  %vm3360_vm11 = vcmp.ne.s16.totalorder %v10160_v45, 0  ;;  %v10161_v38 = vld [vmem:[#allocation89_spill] sm:$0xff] }
 0x36c   : > { %vm3076_vm4 = vcmp.ne.s16.totalorder %v10161_v38, 0 }
 0x36e   : > { %v1844_v37 = vpop.permute.xlu0 %1843  ;;  %v1842_v47 = vpop.permute.xlu1 %1841 }
 0x36f   : > { %v2330_v59 = vsel %vm2298_vm3, %v2297_v34, %v1844_v37  ;;  %v2329_v58 = vsel %vm2298_vm3, %v2296_v50, %v1842_v47  ;;  %v3454_v34 = vor.u32 %v3452_v6, %v8804_v61  ;;  %vm3877_vm3 = vcmask 785408  }
 0x372   : > { %v1942_v41 = vpop.permute.xlu0 %1941  ;;  %v1940_v7 = vpop.permute.xlu1 %1939 }
 0x373   : > { %v5493_v18 = vpop.f32.mrb[16].mxu0  ;;  %v2363_v16 = vsel %vm2331_vm15, %v2330_v59, %v1942_v41  ;;  %v2362_v63 = vsel %vm2331_vm15, %v2329_v58, %v1940_v7  ;;  %vm10163_vm15 = vmmov %vm10155_vm0 }
 0x374   : > { %v2695_v28 = vadd.f32 %v8771_v0, %v5493_v18  ;;  %v2689_v15 = vpop.f32.mrb[17].mxu0 }
 0x375   : > { %v2690_v33 = vadd.f32 %v8771_v0, %v2689_v15 }
 0x376   : > { %v2785_v27 = vmax.f32 %v2695_v28, 0.0  ;;  %v5620_v14 = vpop.permute.xlu0 %5619  ;;  %v2036_v54 = vpop.permute.xlu1 %2035 }
 0x377   : > { %v2784_v8 = vmax.f32 %v2690_v33, 0.0  ;;  %v5622_v9 = vunpack.i.h.bf16 %v5620_v14  ;;  %v5621_v23 = vunpack.i.l.bf16 %v5620_v14  ;;  %v2395_v5 = vsel %vm2364_vm10, %v2362_v63, %v2036_v54 }
 0x378   : > { %v2396_v52 = vsel %vm2364_vm10, %v2363_v16, %v2036_v54  ;;  %vm10164_vm10 = vmmov %vm10155_vm0 }
 0x379   : > { %v8851_v3 = vpack.c.bf16 %v2785_v27, %v2784_v8  ;;  %v2428_v37 = vsel %vm2397_vm6, %v2395_v5, %v5621_v23  ;;  %v2429_v47 = vsel %vm2397_vm6, %v2396_v52, %v5622_v9 }
 0x37a   : > { %5512 = vmatprep.mubr.msk.f32.mxu0 %vm2442_vm8, %v2428_v37  ;;  %v3516_v46 = vpop.permute.xlu0 %3515  ;;  %v3694_v39 = vpop.permute.xlu1 %3693 }
 0x37b   : > { %5513 = vmatmul.mubr.msk.f32.gmra.mrb[30].mxu0 %vm2442_vm8, %v2429_v47  ;;  %v3456_v41 = vshll.u32 %v8851_v3, 16  ;;  %v8861_v7 = vsel %vm3360_vm11, %v8851_v3, 0  ;;  %v8866_v18 = vsel %vm3076_vm4, %v8851_v3, 0  ;;  %vm10162_vm8 = vmmov %vm10154_vm2  ;;  %v3799_v54 = vsel %vm2397_vm6, %v8122_v55, %v3516_v46 }
 0x37c   : > { %v3580_v21 = vrot.slane %v8861_v7, 1  ;;  %vm10165_vm2 = vmmov %vm10155_vm0 }
 0x37d   : > { %v8869_v50 = vrot.slane %v3456_v41, 1  ;;  %vm10168_vm13 = vmmov %vm10162_vm8 }
 0x37e   : > { %v3728_v28 = vpop.permute.xlu1 %3727  ;;  %v3601_v15 = vpop.permute.xlu0 %3600  ;;  %v8876_v31 = vsel %vm1196_vm1, %v3578_v51, %v3580_v21  ;;  %v3920_v51 = vsel %vm2397_vm6, %v8329_v32, %v3694_v39  ;;  %vm10169_vm14 = vmmov %vm10165_vm2 }
 0x37f   : > { %v8880_v59 = vsel %vm10162_vm8, %v3454_v34, %v8869_v50  ;;  %v4231_v58 = vshrl.u32 %v8876_v31, 16  ;;  %v4234_v33 = vshll.u32 %v8876_v31, 16  ;;  %v3968_v27 = vsel %vm3842_vm7, %v3920_v51, %v3728_v28  ;;  %vm10170_vm9 = vmmov %vm10165_vm2 }
 0x380   : > { %3772 = vrot.lane.b32.xlu1 %v8880_v59, %s5741_s22  ;;  %v3848_v5 = vsel %vm3842_vm7, %v3799_v54, %v3601_v15  ;;  %vm10171_vm11 = vmmov %vm10165_vm2 }
 0x381   : > { %v8885_v61 = vrot.slane %v4231_v58, 7  ;;  %vm10172_vm4 = vmmov %vm10165_vm2 }
 0x382   : > { %v3692_v16 = vpop.permute.xlu1 %3691  ;;  %v3763_v63 = vpop.permute.xlu0 %3762  ;;  %vm10173_vm8 = vmmov %vm10165_vm2 }
 0x383   : > { %v4236_v36 = vor.u32 %v4234_v33, %v8885_v61  ;;  %v4002_v8 = vsel %vm3877_vm3, %v3968_v27, %v3763_v63 }
 0x384   : > { %3705 = vrot.lane.b32.xlu1 %v8876_v31, %s5739_s11  ;;  %v4113_v52 = vshrl.u32 %v4002_v8, 16  ;;  %v4116_v28 = vshll.u32 %v4002_v8, 16 }
 0x385   : > { %v8896_v14 = vsel %vm10163_vm15, %v8822_v4, %v4236_v36  ;;  %v3917_v4 = vsel %vm2397_vm6, %v8234_v30, %v3692_v16  ;;  %vm10174_vm15 = vmmov %vm10165_vm2 }
 0x386   : > { %v3514_v9 = vpop.permute.xlu1 %3513  ;;  %v3651_v23 = vpop.permute.xlu0 %3650  ;;  %v8909_v46 = vrot.slane %v4113_v52, 7 }
 0x387   : > { %v3883_v32 = vsel %vm3877_vm3, %v3848_v5, %v3651_v23  ;;  %v3796_v45 = vsel %vm2397_vm6, 0, %v3514_v9 }
 0x388   : > { %3739 = vrot.lane.b32.xlu1 %v8866_v18, %s5740_s17  ;;  %v4106_v39 = vshrl.u32 %v3883_v32, 16  ;;  %v4109_v30 = vshll.u32 %v3883_v32, 16  ;;  %v4118_v16 = vor.u32 %v4116_v28, %v8909_v46 }
 0x38a   : > { %v3726_v37 = vpop.permute.xlu1 %3725  ;;  %v3599_v47 = vpop.permute.xlu0 %3598  ;;  %v8914_v15 = vrot.slane %v4106_v39, 7 }
 0x38b   : > { %v3966_v6 = vsel %vm3842_vm7, %v3917_v4, %v3726_v37  ;;  %v3846_v41 = vsel %vm3842_vm7, %v3796_v45, %v3599_v47 }
 0x38c   : > { %3689 = vrot.lane.b32.xlu1 %v8514_v17, %s5739_s11  ;;  %v4111_v23 = vor.u32 %v4109_v30, %v8914_v15 }
 0x38e   : > { %v3761_v38 = vpop.permute.xlu1 %3760  ;;  %v3649_v34 = vpop.permute.xlu0 %3648 }
 0x38f   : > { %v4000_v58 = vsel %vm3877_vm3, %v3966_v6, %v3761_v38  ;;  %v3881_v17 = vsel %vm3877_vm3, %v3846_v41, %v3649_v34  ;;  %v5623_v34 = vpack.i.bf16 %v9855_v35, %v8219_v56  ;;  %v10166_v56 = vld [vmem:[#allocation126_spill] sm:$0xff] }
 0x390   : > { %v4087_v33 = vshrl.u32 %v4000_v58, 16  ;;  %v4077_v63 = vshrl.u32 %v3881_v17, 16  ;;  %3511 = vrot.lane.b32.xlu1 %v8542_v19, %s5739_s11  ;;  %v4090_v51 = vshll.u32 %v4000_v58, 16  ;;  %v4080_v54 = vshll.u32 %v3881_v17, 16 }
 0x391   : > { %vm3361_vm0 = vcmp.ne.s16.totalorder %v10166_v56, 0 }
 0x392   : > { %v4089_v36 = vrot.slane %v4087_v33, 7  ;;  %v4079_v27 = vrot.slane %v4077_v63, 7  ;;  %v3696_v9 = vpop.permute.xlu1 %3695  ;;  %v3518_v8 = vpop.permute.xlu0 %3517 }
 0x393   : > { %v5496_v5 = vpop.f32.mrb[18].mxu0  ;;  %v3802_v58 = vsel %vm2397_vm6, %v8215_v12, %v3518_v8  ;;  %v10167_v8 = vld [vmem:[#allocation92_spill] sm:$0xff] }
 0x394   : > { %v8922_v52 = vor.u32 %v4090_v51, %v4089_v36  ;;  %v8924_v37 = vor.u32 %v4080_v54, %v4079_v27  ;;  %v2705_v47 = vadd.f32 %v8771_v0, %v5496_v5  ;;  %v2699_v39 = vpop.f32.mrb[19].mxu0  ;;  %3723 = vrot.lane.b32.xlu1 %v8122_v55, %s5740_s17  ;;  %v4119_v32 = vsel %vm10164_vm10, %v4089_v36, %v4118_v16  ;;  %vm10175_vm10 = vmmov %vm10165_vm2 }
 0x395   : > { %v2700_v4 = vadd.f32 %v8771_v0, %v2699_v39  ;;  %4664 = vmatprep.mubr.bf16.mxu1 %v4119_v32  ;;  %v4112_v45 = vsel %vm10165_vm2, %v4079_v27, %v4111_v23  ;;  %v3923_v55 = vsel %vm2397_vm6, %v8370_v25, %v3696_v9  ;;  %v3460_v36 = vshrl.u32 %v8851_v3, 16 }
 0x396   : > { %v2787_v6 = vmax.f32 %v2705_v47, 0.0  ;;  %v3730_v41 = vpop.permute.xlu1 %3729  ;;  %4665 = vmatmul.mubr.bf16.vlgmr.msra.gmra.mrb[0].mxu1 %v4112_v45  ;;  %v3603_v38 = vpop.permute.xlu0 %3602  ;;  %vm3077_vm5 = vcmp.ne.s16.totalorder %v10167_v8, 0 }
 0x397   : > { %v2786_v28 = vmax.f32 %v2700_v4, 0.0  ;;  %v3970_v33 = vsel %vm3842_vm7, %v3923_v55, %v3730_v41  ;;  %v3850_v63 = vsel %vm3842_vm7, %v3802_v58, %v3603_v38  ;;  %v3462_v3 = vor.u32 %v3460_v36, %v8869_v50  ;;  %v8977_v58 = vld [vmem:[%s9634_s7 + $0x80] sm:$0xff]  }
 0x398   : > { %5624 = vrot.lane.b32.xlu1 %v5623_v34, %s5741_s22  ;;  %5515 = vmatprep.subr.bf16.mxu0 %v8977_v58 }
 0x399   : > { %v8939_v17 = vpack.c.bf16 %v2787_v6, %v2786_v28 }
 0x39a   : > { %v3765_v30 = vpop.permute.xlu1 %3764  ;;  %v3653_v16 = vpop.permute.xlu0 %3652 }
 0x39b   : > { %v4004_v51 = vsel %vm3877_vm3, %v3970_v33, %v3765_v30  ;;  %v3885_v27 = vsel %vm3877_vm3, %v3850_v63, %v3653_v16  ;;  %v3464_v25 = vshll.u32 %v8939_v17, 16  ;;  %v8949_v12 = vsel %vm3361_vm0, %v8939_v17, 0 }
 0x39c   : > { %v4135_v54 = vshrl.u32 %v4004_v51, 16  ;;  %v4128_v9 = vshrl.u32 %v3885_v27, 16  ;;  %3529 = vrot.lane.b32.xlu1 %v8880_v59, %s5739_s11  ;;  %v3582_v5 = vrot.slane %v8949_v12, 1  ;;  %v8959_v47 = vsel %vm3077_vm5, %v8939_v17, 0  ;;  %vm10178_vm5 = vmmov %vm10168_vm13 }
 0x39d   : > { %v8955_v23 = vrot.slane %v3464_v25, 1  ;;  %v4138_v32 = vshll.u32 %v4004_v51, 16  ;;  %v4131_v45 = vshll.u32 %v3885_v27, 16 }
 0x39e   : > { %v4137_v39 = vrot.slane %v4135_v54, 7  ;;  %v4130_v4 = vrot.slane %v4128_v9, 7  ;;  %v3698_v6 = vpop.permute.xlu1 %3697  ;;  %v3520_v41 = vpop.permute.xlu0 %3519  ;;  %v3583_v50 = vsel %vm1196_vm1, %v3580_v21, %v3582_v5 }
 0x39f   : > { %v8963_v38 = vsel %vm10168_vm13, %v3462_v3, %v8955_v23  ;;  %v4253_v55 = vshrl.u32 %v3583_v50, 16  ;;  %vm10179_vm13 = vmmov %vm10172_vm4 }
 0x3a0   : > { %v4140_v34 = vor.u32 %v4138_v32, %v4137_v39  ;;  %v4133_v28 = vor.u32 %v4131_v45, %v4130_v4  ;;  %3614 = vrot.lane.b32.xlu1 %v8876_v31, %s5740_s17  ;;  %3774 = vrot.lane.b32.xlu0 %v8963_v38, %s5741_s22  ;;  %v4256_v31 = vshll.u32 %v3583_v50, 16 }
 0x3a1   : > { %v8983_v30 = vrot.slane %v4253_v55, 7 }
 0x3a2   : > { %v3732_v33 = vpop.permute.xlu1 %3731  ;;  %v3605_v63 = vpop.permute.xlu0 %3604  ;;  %v4141_v7 = vsel %vm10169_vm14, %v8909_v46, %v4140_v34  ;;  %v4134_v21 = vsel %vm10170_vm9, %v8914_v15, %v4133_v28  ;;  %v3926_v46 = vsel %vm2397_vm6, %v8462_v44, %v3698_v6  ;;  %v3805_v15 = vsel %vm2397_vm6, %v8305_v2, %v3520_v41  ;;  %vm10180_vm14 = vmmov %vm10172_vm4 }
 0x3a3   : > { %4672 = vmatprep.mubr.bf16.mxu1 %v4141_v7  ;;  %v4258_v16 = vor.u32 %v4256_v31, %v8983_v30  ;;  %v3972_v36 = vsel %vm3842_vm7, %v3926_v46, %v3732_v33  ;;  %v3852_v56 = vsel %vm3842_vm7, %v3805_v15, %v3605_v63 }
 0x3a4   : > { %3664 = vrot.lane.b32.xlu1 %v8866_v18, %s5741_s22  ;;  %3662 = vrot.lane.b32.xlu0 %v8800_v10, %s5741_s22 }
 0x3a5   : > { %4673 = vmatmul.mubr.bf16.gmra.mrb[4].mxu1 %v4134_v21  ;;  %v8999_v25 = vsel %vm10171_vm11, %v8885_v61, %v4258_v16 }
 0x3a6   : > { %v3767_v51 = vpop.permute.xlu1 %3766  ;;  %v3655_v27 = vpop.permute.xlu0 %3654 }
 0x3a7   : > { %v4006_v54 = vsel %vm3877_vm3, %v3972_v36, %v3767_v51  ;;  %v3887_v9 = vsel %vm3877_vm3, %v3852_v56, %v3655_v27 }
 0x3a8   : > { %v4157_v8 = vshrl.u32 %v4006_v54, 16  ;;  %v4150_v44 = vshrl.u32 %v3887_v9, 16  ;;  %3531 = vrot.lane.b32.xlu1 %v8963_v38, %s5739_s11  ;;  %3596 = vrot.lane.b32.xlu0 %v8542_v19, %s5740_s17  ;;  %v4160_v3 = vshll.u32 %v4006_v54, 16  ;;  %v4153_v45 = vshll.u32 %v3887_v9, 16 }
 0x3aa   : > { %v4159_v2 = vrot.slane %v4157_v8, 7  ;;  %v4152_v32 = vrot.slane %v4150_v44, 7  ;;  %v3700_v6 = vpop.permute.xlu1 %3699  ;;  %v3522_v41 = vpop.permute.xlu0 %3521 }
 0x3ab   : > { %v3929_v7 = vsel %vm2397_vm6, %v8615_v11, %v3700_v6  ;;  %v3808_v21 = vsel %vm2397_vm6, %v8355_v40, %v3522_v41 }
 0x3ac   : > { %v4162_v61 = vor.u32 %v4160_v3, %v4159_v2  ;;  %v4155_v34 = vor.u32 %v4153_v45, %v4152_v32  ;;  %3616 = vrot.lane.b32.xlu1 %v3583_v50, %s5740_s17  ;;  %3707 = vrot.lane.b32.xlu0 %v3583_v50, %s5739_s11 }
 0x3ae   : > { %v3734_v28 = vpop.permute.xlu1 %3733  ;;  %v3607_v55 = vpop.permute.xlu0 %3606  ;;  %v4163_v33 = vsel %vm10172_vm4, %v4137_v39, %v4162_v61  ;;  %v4156_v63 = vsel %vm10173_vm8, %v4130_v4, %v4155_v34  ;;  %vm10183_vm8 = vmmov %vm10178_vm5 }
 0x3af   : > { %4680 = vmatprep.mubr.bf16.mxu1 %v4163_v33  ;;  %v3974_v50 = vsel %vm3842_vm7, %v3929_v7, %v3734_v28  ;;  %v3854_v39 = vsel %vm3842_vm7, %v3808_v21, %v3607_v55  ;;  %v10176_v28 = vld [vmem:[#allocation129_spill] sm:$0xff]  ;;  %v3468_v55 = vshrl.u32 %v8939_v17, 16  ;;  %v10177_v7 = vld [vmem:[#allocation95_spill] sm:$0xff] }
 0x3b0   : > { %3666 = vrot.lane.b32.xlu1 %v8959_v47, %s5741_s22  ;;  %3741 = vrot.lane.b32.xlu0 %v8959_v47, %s5740_s17  ;;  %vm3362_vm2 = vcmp.ne.s16.totalorder %v10176_v28, 0  ;;  %vm3078_vm0 = vcmp.ne.s16.totalorder %v10177_v7, 0 }
 0x3b1   : > { %4681 = vmatmul.mubr.bf16.gmra.mrb[8].mxu1 %v4156_v63 }
 0x3b2   : > { %v3769_v31 = vpop.permute.xlu1 %3768  ;;  %v3657_v4 = vpop.permute.xlu0 %3656 }
 0x3b3   : > { %v4008_v16 = vsel %vm3877_vm3, %v3974_v50, %v3769_v31  ;;  %v3889_v46 = vsel %vm3877_vm3, %v3854_v39, %v3657_v4  ;;  %v5499_v15 = vpop.f32.mrb[20].mxu0 }
 0x3b4   : > { %v4179_v36 = vshrl.u32 %v4008_v16, 16  ;;  %v4172_v56 = vshrl.u32 %v3889_v46, 16  ;;  %v2709_v51 = vpop.f32.mrb[21].mxu0  ;;  %v2715_v11 = vadd.f32 %v8771_v0, %v5499_v15  ;;  %v4182_v54 = vshll.u32 %v4008_v16, 16 }
 0x3b5   : > { %v2710_v27 = vadd.f32 %v8771_v0, %v2709_v51  ;;  %v4175_v8 = vshll.u32 %v3889_v46, 16 }
 0x3b6   : > { %v9025_v40 = vrot.slane %v4179_v36, 7  ;;  %v9027_v9 = vrot.slane %v4172_v56, 7  ;;  %v2789_v44 = vmax.f32 %v2715_v11, 0.0 }
 0x3b7   : > { %v2788_v3 = vmax.f32 %v2710_v27, 0.0 }
 0x3b8   : > { %v4184_v45 = vor.u32 %v4182_v54, %v9025_v40  ;;  %v4177_v6 = vor.u32 %v4175_v8, %v9027_v9 }
 0x3b9   : > { %v9031_v41 = vpack.c.bf16 %v2789_v44, %v2788_v3 }
 0x3ba   : > { %v4185_v61 = vsel %vm10174_vm15, %v4159_v2, %v4184_v45  ;;  %v4178_v34 = vsel %vm10175_vm10, %v4152_v32, %v4177_v6  ;;  %v3524_v2 = vpop.permute.xlu0 %3523  ;;  %v3470_v32 = vor.u32 %v3468_v55, %v8955_v23  ;;  %v3702_v23 = vpop.permute.xlu1 %3701  ;;  %vm10184_vm15 = vmmov %vm10172_vm4 }
 0x3bb   : > { %4688 = vmatprep.mubr.bf16.mxu1 %v4185_v61  ;;  %v3472_v33 = vshll.u32 %v9031_v41, 16  ;;  %v9039_v63 = vsel %vm3362_vm2, %v9031_v41, 0  ;;  %v9044_v50 = vsel %vm3078_vm0, %v9031_v41, 0  ;;  %v3811_v56 = vsel %vm2397_vm6, %v8445_v13, %v3524_v2  ;;  %vm10185_vm10 = vmmov %vm10172_vm4 }
 0x3bc   : > { %4689 = vmatmul.mubr.bf16.gmra.mrb[12].mxu1 %v4178_v34  ;;  %v3584_v21 = vrot.slane %v9039_v63, 1  ;;  %vm10186_vm2 = vmmov %vm10172_vm4 }
 0x3bd   : > { %v3474_v39 = vrot.slane %v3472_v33, 1 }
 0x3be   : > { %v3585_v17 = vsel %vm1196_vm1, %v3582_v5, %v3584_v21  ;;  %v3609_v15 = vpop.permute.xlu0 %3608  ;;  %v3736_v27 = vpop.permute.xlu1 %3735 }
 0x3bf   : > { %v9051_v31 = vsel %vm10178_vm5, %v3470_v32, %v3474_v39  ;;  %v4275_v4 = vshrl.u32 %v3585_v17, 16  ;;  %v4278_v46 = vshll.u32 %v3585_v17, 16  ;;  %v3856_v51 = vsel %vm3842_vm7, %v3811_v56, %v3609_v15  ;;  %v10181_v15 = vld [vmem:[#allocation131_spill] sm:$0xff] }
 0x3c0   : > { %3533 = vrot.lane.b32.xlu1 %v9051_v31, %s5739_s11  ;;  %3776 = vrot.lane.b32.xlu0 %v9051_v31, %s5741_s22  ;;  %vm3363_vm9 = vcmp.ne.s16.totalorder %v10181_v15, 0 }
 0x3c1   : > { %v4277_v16 = vrot.slane %v4275_v4, 7 }
 0x3c2   : > { %v3659_v5 = vpop.permute.xlu0 %3658 }
 0x3c3   : > { %v4280_v36 = vor.u32 %v4278_v46, %v4277_v16  ;;  %v3891_v11 = vsel %vm3877_vm3, %v3856_v51, %v3659_v5  ;;  %v3476_v46 = vshrl.u32 %v9031_v41, 16 }
 0x3c4   : > { %3618 = vrot.lane.b32.xlu1 %v3585_v17, %s5740_s17  ;;  %3709 = vrot.lane.b32.xlu0 %v3585_v17, %s5739_s11  ;;  %v4194_v54 = vshrl.u32 %v3891_v11, 16  ;;  %v4197_v28 = vshll.u32 %v3891_v11, 16 }
 0x3c5   : > { %v9061_v12 = vsel %vm10179_vm13, %v8983_v30, %v4280_v36  ;;  %v3932_v30 = vsel %vm2397_vm6, %v8721_v24, %v3702_v23  ;;  %v10182_v36 = vld [vmem:[#allocation98_spill] sm:$0xff]  ;;  %v3478_v41 = vor.u32 %v3476_v46, %v3474_v39  ;;  %vm10189_vm13 = vmmov %vm10183_vm8 }
 0x3c6   : > { %v3976_v8 = vsel %vm3842_vm7, %v3932_v30, %v3736_v27  ;;  %v9074_v3 = vrot.slane %v4194_v54, 7  ;;  %vm3079_vm11 = vcmp.ne.s16.totalorder %v10182_v36, 0  ;;  %v3526_v11 = vpop.permute.xlu0 %3525 }
 0x3c8   : > { %3668 = vrot.lane.b32.xlu1 %v9044_v50, %s5741_s22  ;;  %3743 = vrot.lane.b32.xlu0 %v9044_v50, %s5740_s17  ;;  %v4199_v24 = vor.u32 %v4197_v28, %v9074_v3 }
 0x3ca   : > { %v4200_v23 = vsel %vm10172_vm4, %v9027_v9, %v4199_v24  ;;  %vm3365_vm4 = vcmp.ne.s16.totalorder %v7380_v43, 0 }
 0x3d2   : > { %v3771_v44 = vpop.permute.xlu1 %3770 }
 0x3d3   : > { %v4010_v45 = vsel %vm3877_vm3, %v3976_v8, %v3771_v44  ;;  %v5502_v6 = vpop.f32.mrb[22].mxu0 }
 0x3d4   : > { %v4201_v61 = vshrl.u32 %v4010_v45, 16  ;;  %v2725_v13 = vadd.f32 %v8771_v0, %v5502_v6  ;;  %v2719_v34 = vpop.f32.mrb[23].mxu0  ;;  %v4204_v63 = vshll.u32 %v4010_v45, 16  ;;  %v3611_v45 = vpop.permute.xlu0 %3610 }
 0x3d5   : > { %v2720_v55 = vadd.f32 %v8771_v0, %v2719_v34 }
 0x3d6   : > { %v9079_v33 = vrot.slane %v4201_v61, 7  ;;  %v2791_v7 = vmax.f32 %v2725_v13, 0.0  ;;  %v3704_v61 = vpop.permute.xlu1 %3703  ;;  %v3814_v13 = vsel %vm2397_vm6, %v8590_v62, %v3526_v11 }
 0x3d7   : > { %v2790_v2 = vmax.f32 %v2720_v55, 0.0  ;;  %v3858_v34 = vsel %vm3842_vm7, %v3814_v13, %v3611_v45  ;;  %v10188_v13 = vld [vmem:[#allocation102_spill] sm:$0xff] }
 0x3d8   : > { %v4206_v32 = vor.u32 %v4204_v63, %v9079_v33  ;;  %v3661_v39 = vpop.permute.xlu0 %3660  ;;  %vm3080_vm5 = vcmp.ne.s16.totalorder %v10188_v13, 0 }
 0x3d9   : > { %v9083_v17 = vpack.c.bf16 %v2791_v7, %v2790_v2  ;;  %v3893_v28 = vsel %vm3877_vm3, %v3858_v34, %v3661_v39 }
 0x3da   : > { %v4207_v4 = vsel %vm10180_vm14, %v9025_v40, %v4206_v32  ;;  %v4216_v55 = vshrl.u32 %v3893_v28, 16  ;;  %v3738_v63 = vpop.permute.xlu1 %3737  ;;  %v4219_v46 = vshll.u32 %v3893_v28, 16  ;;  %vm10190_vm14 = vmmov %vm10186_vm2 }
 0x3db   : > { %4696 = vmatprep.mubr.bf16.mxu1 %v4207_v4  ;;  %v3480_v5 = vshll.u32 %v9083_v17, 16  ;;  %v9094_v56 = vsel %vm3363_vm9, %v9083_v17, 0  ;;  %v9097_v51 = vsel %vm3079_vm11, %v9083_v17, 0  ;;  %v3484_v34 = vshrl.u32 %v9083_v17, 16  ;;  %vm10191_vm9 = vmmov %vm10186_vm2 }
 0x3dc   : > { %4697 = vmatmul.mubr.bf16.gmra.mrb[16].mxu1 %v4200_v23  ;;  %v3586_v40 = vrot.slane %v9094_v56, 1  ;;  %v9123_v7 = vrot.slane %v4216_v55, 7 }
 0x3dd   : > { %v3482_v27 = vrot.slane %v3480_v5, 1 }
 0x3de   : > { %v3587_v54 = vsel %vm1196_vm1, %v3584_v21, %v3586_v40  ;;  %v4221_v5 = vor.u32 %v4219_v46, %v9123_v7 }
 0x3df   : > { %v9102_v30 = vsel %vm10183_vm8, %v3478_v41, %v3482_v27  ;;  %v4297_v9 = vshrl.u32 %v3587_v54, 16  ;;  %v4300_v44 = vshll.u32 %v3587_v54, 16  ;;  %vm10193_vm8 = vmmov %vm10186_vm2 }
 0x3e0   : > { %3535 = vrot.lane.b32.xlu1 %v9102_v30, %s5739_s11  ;;  %3778 = vrot.lane.b32.xlu0 %v9102_v30, %s5741_s22  ;;  %v4222_v39 = vsel %vm10186_vm2, %v9074_v3, %v4221_v5 }
 0x3e1   : > { %v4299_v8 = vrot.slane %v4297_v9, 7 }
 0x3e3   : > { %v4302_v6 = vor.u32 %v4300_v44, %v4299_v8 }
 0x3e4   : > { %3620 = vrot.lane.b32.xlu1 %v3587_v54, %s5740_s17  ;;  %3711 = vrot.lane.b32.xlu0 %v3587_v54, %s5739_s11 }
 0x3e5   : > { %v9111_v21 = vsel %vm10184_vm15, %v4277_v16, %v4302_v6  ;;  %v3935_v16 = vsel %vm2397_vm6, %v8815_v49, %v3704_v61  ;;  %v10187_v61 = vld [vmem:[#allocation134_spill] sm:$0xff]  ;;  %vm10194_vm15 = vmmov %vm10186_vm2 }
 0x3e6   : > { %v3978_v24 = vsel %vm3842_vm7, %v3935_v16, %v3738_v63  ;;  %vm3364_vm0 = vcmp.ne.s16.totalorder %v10187_v61, 0  ;;  %v3486_v16 = vor.u32 %v3484_v34, %v3482_v27 }
 0x3e8   : > { %3670 = vrot.lane.b32.xlu1 %v9097_v51, %s5741_s22  ;;  %3745 = vrot.lane.b32.xlu0 %v9097_v51, %s5740_s17 }
 0x3f2   : > { %v3773_v2 = vpop.permute.xlu1 %3772 }
 0x3f3   : > { %v4012_v32 = vsel %vm3877_vm3, %v3978_v24, %v3773_v2  ;;  %v5505_v4 = vpop.f32.mrb[24].mxu0 }
 0x3f4   : > { %v4223_v15 = vshrl.u32 %v4012_v32, 16  ;;  %v2735_v62 = vadd.f32 %v8771_v0, %v5505_v4  ;;  %v2729_v36 = vpop.f32.mrb[25].mxu0  ;;  %v4226_v49 = vshll.u32 %v4012_v32, 16 }
 0x3f5   : > { %v2730_v23 = vadd.f32 %v8771_v0, %v2729_v36  ;;  %v3528_v36 = vpop.permute.xlu0 %3527 }
 0x3f6   : > { %v9130_v56 = vrot.slane %v4223_v15, 7  ;;  %v2793_v11 = vmax.f32 %v2735_v62, 0.0  ;;  %v3706_v41 = vpop.permute.xlu1 %3705 }
 0x3f7   : > { %v2792_v54 = vmax.f32 %v2730_v23, 0.0 }
 0x3f8   : > { %v4228_v9 = vor.u32 %v4226_v49, %v9130_v56 }
 0x3f9   : > { %v9133_v44 = vpack.c.bf16 %v2793_v11, %v2792_v54 }
 0x3fa   : > { %v3740_v45 = vpop.permute.xlu1 %3739  ;;  %v4229_v6 = vsel %vm10185_vm10, %v9079_v33, %v4228_v9  ;;  %v3613_v9 = vpop.permute.xlu0 %3612  ;;  %vm10195_vm10 = vmmov %vm10189_vm13 }
 0x3fb   : > { %4704 = vmatprep.mubr.bf16.mxu1 %v4229_v6  ;;  %v3488_v28 = vshll.u32 %v9133_v44, 16  ;;  %v9144_v55 = vsel %vm3364_vm0, %v9133_v44, 0  ;;  %v9147_v63 = vsel %vm3080_vm5, %v9133_v44, 0  ;;  %v3492_v43 = vshrl.u32 %v9133_v44, 16  ;;  %vm10196_vm0 = vmmov %vm10186_vm2 }
 0x3fc   : > { %4705 = vmatmul.mubr.bf16.gmra.mrb[20].mxu1 %v4222_v39  ;;  %v3588_v33 = vrot.slane %v9144_v55, 1  ;;  %v3938_v39 = vsel %vm2397_vm6, %v8880_v59, %v3706_v41  ;;  %vm10197_vm5 = vmmov %vm10196_vm0 }
 0x3fd   : > { %v9150_v3 = vrot.slane %v3488_v28, 1  ;;  %v3980_v61 = vsel %vm3842_vm7, %v3938_v39, %v3740_v45 }
 0x3fe   : > { %v3690_v24 = vpop.permute.xlu1 %3689  ;;  %v3589_v2 = vsel %vm1196_vm1, %v3586_v40, %v3588_v33 }
 0x3ff   : > { %v9157_v17 = vsel %vm10189_vm13, %v3486_v16, %v9150_v3  ;;  %v4319_v32 = vshrl.u32 %v3589_v2, 16  ;;  %v4322_v27 = vshll.u32 %v3589_v2, 16  ;;  %v3914_v5 = vsel %vm2397_vm6, %v8184_v26, %v3690_v24  ;;  %vm10198_vm13 = vmmov %vm10196_vm0 }
 0x400   : > { %3537 = vrot.lane.b32.xlu1 %v9157_v17, %s5739_s11  ;;  %3780 = vrot.lane.b32.xlu0 %v9157_v17, %s5741_s22 }
 0x401   : > { %v9163_v4 = vrot.slane %v4319_v32, 7  ;;  %v4099_v32 = vshrl.u32 %v8319_v48, 16 }
 0x402   : > { %v3512_v46 = vpop.permute.xlu1 %3511 }
 0x403   : > { %v4324_v15 = vor.u32 %v4322_v27, %v9163_v4  ;;  %v3817_v27 = vsel %vm2397_vm6, %v8705_v22, %v3528_v36  ;;  %v4101_v22 = vrot.slane %v4099_v32, 7  ;;  %v3494_v32 = vor.u32 %v3492_v43, %v9150_v3 }
 0x404   : > { %3622 = vrot.lane.b32.xlu1 %v3589_v2, %s5740_s17  ;;  %3713 = vrot.lane.b32.xlu0 %v3589_v2, %s5739_s11  ;;  %v3860_v41 = vsel %vm3842_vm7, %v3817_v27, %v3613_v9  ;;  %v4095_v9 = vshrl.u32 %v8295_v42, 16  ;;  %v4121_v42 = vshrl.u32 %v8362_v57, 16 }
 0x405   : > { %v9169_v40 = vsel %vm10190_vm14, %v4299_v8, %v4324_v15  ;;  %vm10199_vm14 = vmmov %vm10196_vm0 }
 0x406   : > { %v3724_v62 = vpop.permute.xlu1 %3723 }
 0x407   : > { %v3964_v11 = vsel %vm3842_vm7, %v3914_v5, %v3724_v62 }
 0x408   : > { %3672 = vrot.lane.b32.xlu1 %v9147_v63, %s5741_s22  ;;  %3747 = vrot.lane.b32.xlu0 %v9147_v63, %s5740_s17 }
 0x40a   : > { %v5625_v23 = vpop.permute.xlu1 %5624 }
 0x40b   : > { %v5626_v49 = vunpack.i.l.bf16 %v5625_v23  ;;  %v5627_v39 = vunpack.i.h.bf16 %v5625_v23 }
 0x40d   : > { %v3998_v54 = vsel %vm3877_vm3, %v3964_v11, %v5626_v49  ;;  %v10192_v11 = vld [vmem:[#allocation103_spill] sm:$0xff] }
 0x40e   : > { %v4084_v8 = vshrl.u32 %v3998_v54, 16  ;;  %vm3081_vm11 = vcmp.ne.s16.totalorder %v10192_v11, 0  ;;  %v3794_v54 = vsel %vm2397_vm6, 0, %v3512_v46 }
 0x410   : > { %v4086_v6 = vrot.slane %v4084_v8, 7 }
 0x412   : > { %v3775_v13 = vpop.permute.xlu0 %3774  ;;  %v4093_v34 = vsel %vm10191_vm9, %v4086_v6, %v8922_v52  ;;  %vm10200_vm9 = vmmov %vm10196_vm0 }
 0x413   : > { %v4014_v28 = vsel %vm3877_vm3, %v3980_v61, %v3775_v13  ;;  %v5508_v26 = vpop.f32.mrb[26].mxu0  ;;  %4656 = vmatprep.mubr.bf16.mxu0 %v4093_v34 }
 0x414   : > { %v4245_v16 = vshrl.u32 %v4014_v28, 16  ;;  %v2745_v24 = vadd.f32 %v8771_v0, %v5508_v26  ;;  %v2739_v2 = vpop.f32.mrb[27].mxu0  ;;  %v4248_v52 = vshll.u32 %v4014_v28, 16 }
 0x415   : > { %v2740_v59 = vadd.f32 %v8771_v0, %v2739_v2  ;;  %v4102_v0 = vshll.u32 %v8319_v48, 16  ;;  %v3530_v2 = vpop.permute.xlu1 %3529 }
 0x416   : > { %v9191_v45 = vrot.slane %v4245_v16, 7  ;;  %v2795_v15 = vmax.f32 %v2745_v24, 0.0  ;;  %v3663_v62 = vpop.permute.xlu0 %3662 }
 0x417   : > { %v2794_v5 = vmax.f32 %v2740_v59, 0.0  ;;  %v3895_v49 = vsel %vm3877_vm3, %v3860_v41, %v3663_v62  ;;  %v4104_v41 = vor.u32 %v4102_v0, %v4101_v22  ;;  %v4146_v0 = vshll.u32 %v8455_v1, 16 }
 0x418   : > { %v4250_v8 = vor.u32 %v4248_v52, %v9191_v45  ;;  %v4238_v6 = vshrl.u32 %v3895_v49, 16  ;;  %v4241_v13 = vshll.u32 %v3895_v49, 16 }
 0x419   : > { %v9199_v36 = vpack.c.bf16 %v2795_v15, %v2794_v5  ;;  %v4123_v5 = vrot.slane %v4121_v42, 7 }
 0x41a   : > { %v9202_v61 = vrot.slane %v4238_v6, 7  ;;  %v3597_v34 = vpop.permute.xlu0 %3596  ;;  %v4251_v46 = vsel %vm10193_vm8, %v9130_v56, %v4250_v8  ;;  %v4124_v8 = vshll.u32 %v8362_v57, 16  ;;  %v3615_v6 = vpop.permute.xlu1 %3614  ;;  %vm10203_vm8 = vmmov %vm10196_vm0 }
 0x41b   : > { %v3844_v28 = vsel %vm3842_vm7, %v3794_v54, %v3597_v34  ;;  %4712 = vmatprep.mubr.bf16.mxu1 %v4251_v46  ;;  %v3496_v26 = vshll.u32 %v9199_v36, 16  ;;  %v9210_v48 = vsel %vm3365_vm4, %v9199_v36, 0  ;;  %v9222_v44 = vsel %vm3081_vm11, %v9199_v36, 0 }
 0x41c   : > { %v4243_v23 = vor.u32 %v4241_v13, %v9202_v61  ;;  %v3879_v16 = vsel %vm3877_vm3, %v3844_v28, %v5627_v39  ;;  %v3590_v24 = vrot.slane %v9210_v48, 1  ;;  %v4148_v39 = vor.u32 %v4146_v0, %v8628_v53 }
 0x41d   : > { %v4074_v56 = vshrl.u32 %v3879_v16, 16  ;;  %v9217_v27 = vrot.slane %v3496_v26, 1  ;;  %v3820_v34 = vsel %vm2397_vm6, %v8800_v10, %v3530_v2 }
 0x41e   : > { %v4244_v59 = vsel %vm10194_vm15, %v9123_v7, %v4243_v23  ;;  %v3591_v52 = vsel %vm1196_vm1, %v3588_v33, %v3590_v24  ;;  %v4097_v7 = vrot.slane %v4095_v9, 7  ;;  %v5645_v33 = vld [vmem:[%s9634_s7 + $0x88] sm:$0xff]   ;;  %v4126_v9 = vor.u32 %v4124_v8, %v4123_v5  ;;  %v3665_v1 = vpop.permute.xlu1 %3664  ;;  %vm10204_vm15 = vmmov %vm10195_vm10 }
 0x41f   : > { %v4076_v15 = vrot.slane %v4074_v56, 7  ;;  %4713 = vmatmul.mubr.bf16.gmra.mrb[24].mxu1 %v4244_v59  ;;  %v9233_v3 = vsel %vm10195_vm10, %v3494_v32, %v9217_v27  ;;  %v4341_v62 = vshrl.u32 %v3591_v52, 16  ;;  %v4344_v54 = vshll.u32 %v3591_v52, 16  ;;  %v5649_v56 = vld [vmem:[%s8060_s23] ss:$0 sm:$0xff]  ;;  %vm10205_vm10 = vmmov %vm10196_vm0 }
 0x420   : > { %3539 = vrot.lane.b32.xlu1 %v9233_v3, %s5739_s11  ;;  %3782 = vrot.lane.b32.xlu0 %v9233_v3, %s5741_s22  ;;  %v4105_v49 = vsel %vm10196_vm0, %v4097_v7, %v4104_v41  ;;  %v4127_v13 = vsel %vm10198_vm13, %v4101_v22, %v4126_v9  ;;  %v4149_v53 = vsel %vm10199_vm14, %v4123_v5, %v4148_v39  ;;  %v3500_v8 = vshrl.u32 %v9199_v36, 16  ;;  %vm10209_vm13 = vmmov %vm10203_vm8 }
 0x421   : > { %v4083_v55 = vsel %vm10186_vm2, %v4076_v15, %v8924_v37  ;;  %v9245_v11 = vrot.slane %v4341_v62, 7  ;;  %vm10210_vm14 = vmmov %vm10203_vm8 }
 0x422   : > { %4657 = vmatmul.mubr.bf16.vlgmr.msra.gmra.mrb[32].mxu0 %v4083_v55  ;;  %v3502_v9 = vor.u32 %v3500_v8, %v9217_v27 }
 0x423   : > { %5516 = vmatpush3.bf16.msra.mxu0 %v8977_v58  ;;  %5519 = vmatprep.mubr.msk.bf16.mxu0 %vm2397_vm6, %v4105_v49  ;;  %v4346_v37 = vor.u32 %v4344_v54, %v9245_v11  ;;  %v3708_v58 = vpop.permute.xlu0 %3707  ;;  %v10202_v49 = vld [vmem:[#allocation104_spill] sm:$0xff] }
 0x424   : > { %3624 = vrot.lane.b32.xlu1 %v3591_v52, %s5740_s17  ;;  %3715 = vrot.lane.b32.xlu0 %v3591_v52, %s5739_s11  ;;  %v3941_v26 = vsel %vm2397_vm6, %v8963_v38, %v3708_v58  ;;  %vm3082_vm4 = vcmp.ne.s16.totalorder %v10202_v49, 0 }
 0x425   : > { %5517 = vmatprep.subr.bf16.mxu0 %v5645_v33  ;;  %v9257_v57 = vsel %vm10197_vm5, %v9163_v4, %v4346_v37  ;;  %v3862_v4 = vsel %vm3842_vm7, %v3820_v34, %v3615_v6  ;;  %v3532_v37 = vpop.permute.xlu1 %3531  ;;  %vm10208_vm5 = vmmov %vm10204_vm15 }
 0x426   : > { %v3897_v46 = vsel %vm3877_vm3, %v3862_v4, %v3665_v1 }
 0x427   : > { %5518 = vmatpush3.bf16.msra.mxu0 %v5645_v33  ;;  %v3742_v28 = vpop.permute.xlu0 %3741  ;;  %v4260_v43 = vshrl.u32 %v3897_v46, 16  ;;  %v4263_v41 = vshll.u32 %v3897_v46, 16  ;;  %v10201_v33 = vld [vmem:[#allocation135_spill] sm:$0xff] }
 0x428   : > { %3674 = vrot.lane.b32.xlu1 %v9222_v44, %s5741_s22  ;;  %3749 = vrot.lane.b32.xlu0 %v9222_v44, %s5740_s17  ;;  %v3982_v22 = vsel %vm3842_vm7, %v3941_v26, %v3742_v28  ;;  %vm3366_vm11 = vcmp.ne.s16.totalorder %v10201_v33, 0 }
 0x429   : > { %v9276_v42 = vrot.slane %v4260_v43, 7  ;;  %v3617_v27 = vpop.permute.xlu1 %3616 }
 0x42a   : > { %5520 = vmatmul.mubr.msk.bf16.vlgmr.msra.gmra.mrb[36].mxu0 %vm2397_vm6, %v4127_v13 }
 0x42b   : > { %5523 = vmatprep.mubr.msk.bf16.mxu0 %vm2397_vm6, %v4149_v53 }
 0x42d   : > { %v3667_v34 = vpop.permute.xlu1 %3666 }
 0x432   : > { %5524 = vmatmul.mubr.msk.bf16.gmra.mrb[40].mxu0 %vm2397_vm6, %v8644_v60  ;;  %v3777_v10 = vpop.permute.xlu0 %3776  ;;  %v4265_v60 = vor.u32 %v4263_v41, %v9276_v42 }
 0x433   : > { %v4016_v23 = vsel %vm3877_vm3, %v3982_v22, %v3777_v10  ;;  %v5511_v16 = vpop.f32.mrb[28].mxu0  ;;  %5527 = vmatprep.mubr.msk.bf16.mxu0 %vm2397_vm6, %v8735_v20 }
 0x434   : > { %v4267_v2 = vshrl.u32 %v4016_v23, 16  ;;  %v2755_v32 = vadd.f32 %v5649_v56, %v5511_v16  ;;  %v2749_v59 = vpop.f32.mrb[29].mxu0  ;;  %v4270_v15 = vshll.u32 %v4016_v23, 16  ;;  %v4266_v54 = vsel %vm10203_vm8, %v9202_v61, %v4265_v60 }
 0x435   : > { %v2750_v38 = vadd.f32 %v5649_v56, %v2749_v59 }
 0x436   : > { %v9282_v52 = vrot.slane %v4267_v2, 7  ;;  %v2797_v7 = vmax.f32 %v2755_v32, 0.0  ;;  %v3710_v13 = vpop.permute.xlu0 %3709 }
 0x437   : > { %v2796_v62 = vmax.f32 %v2750_v38, 0.0 }
 0x438   : > { %v4272_v5 = vor.u32 %v4270_v15, %v9282_v52  ;;  %v10206_v15 = vld [vmem:[#allocation136_spill] sm:$0xff] }
 0x439   : > { %v2814_v55 = vpack.c.bf16 %v2797_v7, %v2796_v62  ;;  %vm3367_vm2 = vcmp.ne.s16.totalorder %v10206_v15, 0 }
 0x43a   : > { %5528 = vmatmul.mubr.msk.bf16.gmra.mrb[44].mxu0 %vm2397_vm6, %v8829_v29  ;;  %v4273_v20 = vsel %vm10200_vm9, %v9191_v45, %v4272_v5  ;;  %v3744_v46 = vpop.permute.xlu0 %3743 }
 0x43b   : > { %4720 = vmatprep.mubr.bf16.mxu1 %v4273_v20  ;;  %5531 = vmatprep.mubr.msk.bf16.mxu0 %vm2397_vm6, %v8896_v14  ;;  %v3504_v6 = vshll.u32 %v2814_v55, 16  ;;  %v9297_v0 = vsel %vm3366_vm11, %v2814_v55, 0  ;;  %v9300_v45 = vsel %vm3082_vm4, %v2814_v55, 0  ;;  %vm10213_vm11 = vmmov %vm10208_vm5 }
 0x43c   : > { %4721 = vmatmul.mubr.bf16.gmra.mrb[28].mxu1 %v4266_v54  ;;  %v3592_v29 = vrot.slane %v9297_v0, 1 }
 0x43d   : > { %v3506_v39 = vrot.slane %v3504_v6, 1 }
 0x43e   : > { %v3593_v14 = vsel %vm1196_vm1, %v3590_v24, %v3592_v29 }
 0x43f   : > { %v9307_v61 = vsel %vm10204_vm15, %v3502_v9, %v3506_v39  ;;  %v4363_v36 = vshrl.u32 %v3593_v14, 16  ;;  %v4366_v1 = vshll.u32 %v3593_v14, 16 }
 0x440   : > { %3541 = vrot.lane.b32.xlu1 %v9307_v61, %s5739_s11  ;;  %3784 = vrot.lane.b32.xlu0 %v9307_v61, %s5741_s22 }
 0x441   : > { %v9313_v58 = vrot.slane %v4363_v36, 7  ;;  %v3534_v36 = vpop.permute.xlu1 %3533 }
 0x442   : > { %5532 = vmatmul.mubr.msk.bf16.gmra.mrb[48].mxu0 %vm2397_vm6, %v8999_v25  ;;  %v3508_v25 = vshrl.u32 %v2814_v55, 16 }
 0x443   : > { %5535 = vmatprep.mubr.msk.bf16.mxu0 %vm2397_vm6, %v9061_v12  ;;  %v4368_v48 = vor.u32 %v4366_v1, %v9313_v58  ;;  %v3823_v12 = vsel %vm2397_vm6, %v8866_v18, %v3532_v37  ;;  %v3944_v18 = vsel %vm2397_vm6, %v9051_v31, %v3710_v13  ;;  %v10207_v31 = vld [vmem:[#allocation106_spill] sm:$0xff] }
 0x444   : > { %3626 = vrot.lane.b32.xlu1 %v3593_v14, %s5740_s17  ;;  %3717 = vrot.lane.b32.xlu0 %v3593_v14, %s5739_s11  ;;  %v3510_v53 = vor.u32 %v3508_v25, %v3506_v39  ;;  %v3864_v4 = vsel %vm3842_vm7, %v3823_v12, %v3617_v27  ;;  %v3984_v23 = vsel %vm3842_vm7, %v3944_v18, %v3744_v46  ;;  %vm3083_vm0 = vcmp.ne.s16.totalorder %v10207_v31, 0 }
 0x445   : > { %v4369_v24 = vsel %vm10205_vm10, %v9245_v11, %v4368_v48  ;;  %v3899_v11 = vsel %vm3877_vm3, %v3864_v4, %v3667_v34  ;;  %v4429_v14 = vshrl.u32 %v8542_v19, 16  ;;  %v4432_v25 = vshll.u32 %v8542_v19, 16 }
 0x446   : > { %v4282_v43 = vshrl.u32 %v3899_v11, 16 }
 0x448   : > { %3676 = vrot.lane.b32.xlu1 %v9300_v45, %s5741_s22  ;;  %3751 = vrot.lane.b32.xlu0 %v9300_v45, %s5740_s17  ;;  %v9342_v2 = vrot.slane %v4282_v43, 7 }
 0x44a   : > { %5536 = vmatmul.mubr.msk.bf16.gmra.mrb[52].mxu0 %vm2397_vm6, %v9111_v21 }
 0x44b   : > { %5539 = vmatprep.mubr.msk.bf16.mxu0 %vm2397_vm6, %v9169_v40 }
 0x44c   : > { %3543 = vrot.lane.b32.xlu1 %v3510_v53, %s5739_s11 }
 0x44e   : > { %v5514_v28 = vpop.f32.mrb[30].mxu0 }
 0x44f   : > { %v2765_v26 = vadd.f32 %v5649_v56, %v5514_v28  ;;  %v2759_v22 = vpop.f32.mrb[31].mxu0 }
 0x450   : > { %v2760_v10 = vadd.f32 %v5649_v56, %v2759_v22  ;;  %v4285_v56 = vshll.u32 %v3899_v11, 16 }
 0x451   : > { %v2799_v21 = vmax.f32 %v2765_v26, 0.0  ;;  %v3826_v26 = vsel %vm2397_vm6, %v8959_v47, %v3534_v36 }
 0x452   : > { %v2798_v16 = vmax.f32 %v2760_v10, 0.0  ;;  %5540 = vmatmul.mubr.msk.bf16.gmra.mrb[56].mxu0 %vm2397_vm6, %v9257_v57  ;;  %v3779_v40 = vpop.permute.xlu0 %3778  ;;  %v4287_v5 = vor.u32 %v4285_v56, %v9342_v2 }
 0x453   : > { %v4018_v32 = vsel %vm3877_vm3, %v3984_v23, %v3779_v40  ;;  %5543 = vmatprep.mubr.msk.bf16.mxu0 %vm2397_vm6, %v4369_v24 }
 0x454   : > { %v2815_v59 = vpack.c.bf16 %v2799_v21, %v2798_v16  ;;  %v4289_v41 = vshrl.u32 %v4018_v32, 16  ;;  %v4292_v38 = vshll.u32 %v4018_v32, 16  ;;  %v4288_v37 = vsel %vm10210_vm14, %v9276_v42, %v4287_v5 }
 0x455   : > { %v4431_v42 = vrot.slane %v4429_v14, 7 }
 0x456   : > { %v9348_v7 = vrot.slane %v4289_v41, 7  ;;  %v3383_v60 = vsel %vm3367_vm2, %v2815_v59, 0  ;;  %v3681_v62 = vshll.u32 %v2815_v59, 16  ;;  %v3099_v57 = vsel %vm3083_vm0, %v2815_v59, 0  ;;  %v3712_v11 = vpop.permute.xlu0 %3711 }
 0x457   : > { %v3594_v55 = vrot.slane %v3383_v60, 1  ;;  %v3685_v13 = vshrl.u32 %v2815_v59, 16  ;;  %v4434_v4 = vor.u32 %v4432_v25, %v4431_v42  ;;  %v3947_v47 = vsel %vm2397_vm6, %v9102_v30, %v3712_v11 }
 0x458   : > { %v4294_v20 = vor.u32 %v4292_v38, %v9348_v7  ;;  %v3683_v33 = vrot.slane %v3681_v62, 1 }
 0x459   : > { %v3595_v49 = vsel %vm1196_vm1, %v3592_v29, %v3594_v55  ;;  %v3688_v54 = vsel %vm1196_vm1, %v3594_v55, %v8542_v19  ;;  %vm10211_vm1 = vmmov %vm10203_vm8 }
 0x45a   : > { %v4385_v8 = vshrl.u32 %v3595_v49, 16  ;;  %3628 = vrot.lane.b32.xlu1 %v3595_v49, %s5740_s17  ;;  %v9357_v6 = vsel %vm10208_vm5, %v3510_v53, %v3683_v33  ;;  %v4295_v0 = vsel %vm10209_vm13, %v9282_v52, %v4294_v20  ;;  %v4407_v29 = vshrl.u32 %v3688_v54, 16  ;;  %vm10212_vm9 = vmmov %vm10211_vm1  ;;  %v3619_v53 = vpop.permute.xlu1 %3618  ;;  %v3746_v32 = vpop.permute.xlu0 %3745 }
 0x45b   : > { %3786 = vrot.lane.b32.xlu0 %v9357_v6, %s5741_s22  ;;  %4728 = vmatprep.mubr.bf16.mxu1 %v4295_v0  ;;  %v4388_v39 = vshll.u32 %v3595_v49, 16  ;;  %v4410_v27 = vshll.u32 %v3688_v54, 16  ;;  %v9374_v12 = vor.u32 %v3685_v13, %v3683_v33  ;;  %vm10214_vm4 = vmmov %vm10211_vm1  ;;  %v3866_v10 = vsel %vm3842_vm7, %v3826_v26, %v3619_v53 }
 0x45c   : > { %v4387_v9 = vrot.slane %v4385_v8, 7  ;;  %4729 = vmatmul.mubr.bf16.gmra.mrb[32].mxu1 %v4288_v37  ;;  %v4409_v1 = vrot.slane %v4407_v29, 7  ;;  %v3986_v41 = vsel %vm3842_vm7, %v3947_v47, %v3746_v32  ;;  %vm10215_vm8 = vmmov %vm10211_vm1 }
 0x45d   : > { %vm10216_vm15 = vmmov %vm10211_vm1 }
 0x45e   : > { %3678 = vrot.lane.b32.xlu1 %v3099_v57, %s5741_s22  ;;  %v4390_v48 = vor.u32 %v4388_v39, %v4387_v9  ;;  %v4412_v52 = vor.u32 %v4410_v27, %v4409_v1  ;;  %v4435_v46 = vsel %vm10214_vm4, %v4409_v1, %v4434_v4  ;;  %v3669_v28 = vpop.permute.xlu1 %3668  ;;  %vm10217_vm10 = vmmov %vm10211_vm1 }
 0x45f   : > { %3719 = vrot.lane.b32.xlu0 %v3595_v49, %s5739_s11  ;;  %v3901_v23 = vsel %vm3877_vm3, %v3866_v10, %v3669_v28  ;;  %vm10218_vm2 = vmmov %vm10211_vm1 }
 0x460   : > { %v4391_v24 = vsel %vm10211_vm1, %v9313_v58, %v4390_v48  ;;  %v4413_v34 = vsel %vm10212_vm9, %v4387_v9, %v4412_v52  ;;  %v3757_v58 = vsel %vm10213_vm11, %v9374_v12, %v8542_v19  ;;  %v4304_v59 = vshrl.u32 %v3901_v23, 16  ;;  %vm10219_vm0 = vmmov %vm10211_vm1 }
 0x461   : > { %5544 = vmatmul.mubr.msk.bf16.gmra.mrb[60].mxu0 %vm2397_vm6, %v4391_v24  ;;  %v4307_v60 = vshll.u32 %v3901_v23, 16  ;;  %vm10220_vm5 = vmmov %vm10219_vm0 }
 0x462   : > { %5547 = vmatprep.mubr.msk.bf16.mxu0 %vm2397_vm6, %v4413_v34  ;;  %v4306_v38 = vrot.slane %v4304_v59, 7  ;;  %v3536_v0 = vpop.permute.xlu1 %3535  ;;  %vm10221_vm13 = vmmov %vm10219_vm0 }
 0x463   : > { %3753 = vrot.lane.b32.xlu0 %v3099_v57, %s5740_s17  ;;  %v3829_v48 = vsel %vm2397_vm6, %v9044_v50, %v3536_v0  ;;  %vm10222_vm14 = vmmov %vm10219_vm0 }
 0x464   : > { %v4309_v5 = vor.u32 %v4307_v60, %v4306_v38  ;;  %vm10223_vm1 = vmmov %vm10219_vm0 }
 0x465   : > { %vm10224_vm9 = vmmov %vm10219_vm0 }
 0x466   : > { %v4310_v8 = vsel %vm10216_vm15, %v9342_v2, %v4309_v5  ;;  %v3621_v37 = vpop.permute.xlu1 %3620  ;;  %vm10225_vm11 = vmmov %vm10219_vm0 }
 0x467   : > { %3788 = vrot.lane.b32.xlu0 %v3757_v58, %s5741_s22  ;;  %v3868_v2 = vsel %vm3842_vm7, %v3829_v48, %v3621_v37  ;;  %vm10226_vm4 = vmmov %vm10219_vm0 }
 0x469   : > { %v5349_v43 = vpop.f32.mrb[0].mxu1  ;;  %5548 = vmatmul.mubr.msk.bf16.gmra.mrb[64].mxu0 %vm2397_vm6, %v4435_v46 }
 0x46a   : > { %v5350_v22 = vpop.f32.mrb[1].mxu1 }
 0x46b   : > { %v9386_v18 = vadd.f32 %v5350_v22, %v5349_v43  ;;  %3721 = vrot.lane.b32.xlu0 %v3688_v54, %s5739_s11  ;;  %v5352_v21 = vpop.f32.mrb[2].mxu1 }
 0x46c   : > { %v5353_v16 = vpop.f32.mrb[3].mxu1 }
 0x46d   : > { %v9390_v40 = vadd.f32 %v5353_v16, %v5352_v21 }
 0x46f   : > { %3755 = vrot.lane.b32.xlu0 %v9855_v35, %s5740_s17 }
 0x472   : > { %v3781_v56 = vpop.permute.xlu0 %3780 }
 0x473   : > { %v4020_v15 = vsel %vm3877_vm3, %v3986_v41, %v3781_v56  ;;  %3790 = vrot.lane.b32.xlu0 %v8542_v19, %s5741_s22 }
 0x474   : > { %v4311_v31 = vshrl.u32 %v4020_v15, 16  ;;  %v4314_v57 = vshll.u32 %v4020_v15, 16 }
 0x476   : > { %v4313_v62 = vrot.slane %v4311_v31, 7  ;;  %v3714_v27 = vpop.permute.xlu0 %3713 }
 0x477   : > { %v3950_v4 = vsel %vm2397_vm6, %v9157_v17, %v3714_v27 }
 0x478   : > { %v4316_v55 = vor.u32 %v4314_v57, %v4313_v62  ;;  %v5355_v20 = vpop.f32.mrb[4].mxu1 }
 0x479   : > { %v5356_v35 = vpop.f32.mrb[5].mxu1 }
 0x47a   : > { %v9400_v33 = vadd.f32 %v5356_v35, %v5355_v20  ;;  %v5358_v30 = vpop.f32.mrb[6].mxu1  ;;  %v4317_v49 = vsel %vm10215_vm8, %v9348_v7, %v4316_v55  ;;  %v3671_v7 = vpop.permute.xlu1 %3670 }
 0x47b   : > { %v5359_v54 = vpop.f32.mrb[7].mxu1  ;;  %4736 = vmatprep.mubr.bf16.mxu1 %v4317_v49  ;;  %v3903_v52 = vsel %vm3877_vm3, %v3868_v2, %v3671_v7  ;;  %v3748_v24 = vpop.permute.xlu0 %3747 }
 0x47c   : > { %v9406_v19 = vadd.f32 %v5359_v54, %v5358_v30  ;;  %4737 = vmatmul.mubr.bf16.gmra.mrb[36].mxu1 %v4310_v8  ;;  %v4326_v42 = vshrl.u32 %v3903_v52, 16  ;;  %v3988_v11 = vsel %vm3842_vm7, %v3950_v4, %v3748_v24  ;;  %v4329_v22 = vshll.u32 %v3903_v52, 16 }
 0x47e   : > { %v4328_v28 = vrot.slane %v4326_v42, 7  ;;  %v3538_v59 = vpop.permute.xlu1 %3537 }
 0x47f   : > { %v3832_v15 = vsel %vm2397_vm6, %v9097_v51, %v3538_v59 }
 0x480   : > { %v4331_v23 = vor.u32 %v4329_v22, %v4328_v28 }
 0x482   : > { %v4332_v17 = vsel %vm10218_vm2, %v4306_v38, %v4331_v23  ;;  %v3623_v47 = vpop.permute.xlu1 %3622 }
 0x483   : > { %v3870_v31 = vsel %vm3842_vm7, %v3832_v15, %v3623_v47 }
 0x484   : > { %v5361_v29 = vpop.f32.mrb[8].mxu1 }
 0x485   : > { %v5362_v9 = vpop.f32.mrb[9].mxu1 }
 0x486   : > { %v9408_v39 = vadd.f32 %v5362_v9, %v5361_v29  ;;  %v5364_v14 = vpop.f32.mrb[10].mxu1  ;;  %v3673_v56 = vpop.permute.xlu1 %3672 }
 0x487   : > { %v5365_v36 = vpop.f32.mrb[11].mxu1  ;;  %v3905_v60 = vsel %vm3877_vm3, %v3870_v31, %v3673_v56 }
 0x488   : > { %v9410_v1 = vadd.f32 %v5365_v36, %v5364_v14  ;;  %v4348_v55 = vshrl.u32 %v3905_v60, 16  ;;  %v4351_v9 = vshll.u32 %v3905_v60, 16 }
 0x48a   : > { %v4350_v0 = vrot.slane %v4348_v55, 7 }
 0x48c   : > { %v4353_v7 = vor.u32 %v4351_v9, %v4350_v0 }
 0x48f   : > { %v5367_v13 = vpop.f32.mrb[12].mxu1 }
 0x490   : > { %v5368_v25 = vpop.f32.mrb[13].mxu1 }
 0x491   : > { %v9416_v34 = vadd.f32 %v5368_v25, %v5367_v13  ;;  %v5370_v53 = vpop.f32.mrb[14].mxu1 }
 0x492   : > { %v5371_v58 = vpop.f32.mrb[15].mxu1  ;;  %v3783_v50 = vpop.permute.xlu0 %3782 }
 0x493   : > { %v9421_v46 = vadd.f32 %v5371_v58, %v5370_v53  ;;  %v4022_v43 = vsel %vm3877_vm3, %v3988_v11, %v3783_v50  ;;  %v3540_v20 = vpop.permute.xlu1 %3539 }
 0x494   : > { %v4333_v26 = vshrl.u32 %v4022_v43, 16  ;;  %v4336_v21 = vshll.u32 %v4022_v43, 16  ;;  %v3835_v42 = vsel %vm2397_vm6, %v9147_v63, %v3540_v20 }
 0x496   : > { %v4335_v10 = vrot.slane %v4333_v26, 7  ;;  %v3716_v41 = vpop.permute.xlu0 %3715 }
 0x497   : > { %v3953_v30 = vsel %vm2397_vm6, %v9233_v3, %v3716_v41  ;;  %v3625_v14 = vpop.permute.xlu1 %3624  ;;  %v4354_v3 = vsel %vm10220_vm5, %v4328_v28, %v4353_v7 }
 0x498   : > { %v4338_v16 = vor.u32 %v4336_v21, %v4335_v10  ;;  %v3872_v25 = vsel %vm3842_vm7, %v3835_v42, %v3625_v14 }
 0x49a   : > { %v4339_v32 = vsel %vm10217_vm10, %v4313_v62, %v4338_v16  ;;  %v3750_v57 = vpop.permute.xlu0 %3749 }
 0x49b   : > { %4744 = vmatprep.mubr.bf16.mxu1 %v4339_v32  ;;  %v3990_v54 = vsel %vm3842_vm7, %v3953_v30, %v3750_v57  ;;  %v3675_v52 = vpop.permute.xlu1 %3674 }
 0x49c   : > { %4745 = vmatmul.mubr.bf16.gmra.mrb[40].mxu1 %v4332_v17  ;;  %v3907_v4 = vsel %vm3877_vm3, %v3872_v25, %v3675_v52 }
 0x49d   : > { %v4370_v11 = vshrl.u32 %v3907_v4, 16  ;;  %v4373_v63 = vshll.u32 %v3907_v4, 16 }
 0x49f   : > { %v4372_v22 = vrot.slane %v4370_v11, 7 }
 0x4a1   : > { %v4375_v56 = vor.u32 %v4373_v63, %v4372_v22 }
 0x4a3   : > { %v4376_v30 = vsel %vm10222_vm14, %v4350_v0, %v4375_v56 }
 0x4af   : > { %v5373_v5 = vpop.f32.mrb[16].mxu1 }
 0x4b0   : > { %v5374_v62 = vpop.f32.mrb[17].mxu1 }
 0x4b1   : > { %v9430_v35 = vadd.f32 %v5374_v62, %v5373_v5  ;;  %v5376_v38 = vpop.f32.mrb[18].mxu1 }
 0x4b2   : > { %v5377_v49 = vpop.f32.mrb[19].mxu1  ;;  %v3785_v51 = vpop.permute.xlu0 %3784 }
 0x4b3   : > { %v9435_v8 = vadd.f32 %v5377_v49, %v5376_v38  ;;  %v4024_v37 = vsel %vm3877_vm3, %v3990_v54, %v3785_v51  ;;  %v3542_v24 = vpop.permute.xlu1 %3541 }
 0x4b4   : > { %v4355_v29 = vshrl.u32 %v4024_v37, 16  ;;  %v4358_v27 = vshll.u32 %v4024_v37, 16  ;;  %v3838_v32 = vsel %vm2397_vm6, %v9222_v44, %v3542_v24 }
 0x4b6   : > { %v4357_v36 = vrot.slane %v4355_v29, 7  ;;  %v3718_v13 = vpop.permute.xlu0 %3717 }
 0x4b7   : > { %v3627_v53 = vpop.permute.xlu1 %3626  ;;  %v3956_v50 = vsel %vm2397_vm6, %v9307_v61, %v3718_v13 }
 0x4b8   : > { %v4360_v48 = vor.u32 %v4358_v27, %v4357_v36  ;;  %v3874_v15 = vsel %vm3842_vm7, %v3838_v32, %v3627_v53 }
 0x4ba   : > { %v4361_v2 = vsel %vm10219_vm0, %v4335_v10, %v4360_v48  ;;  %v3752_v58 = vpop.permute.xlu0 %3751 }
 0x4bb   : > { %4752 = vmatprep.mubr.bf16.mxu1 %v4361_v2  ;;  %v3677_v43 = vpop.permute.xlu1 %3676  ;;  %v3992_v26 = vsel %vm3842_vm7, %v3956_v50, %v3752_v58 }
 0x4bc   : > { %4753 = vmatmul.mubr.bf16.gmra.mrb[44].mxu1 %v4354_v3  ;;  %v3909_v57 = vsel %vm3877_vm3, %v3874_v15, %v3677_v43 }
 0x4bd   : > { %v4392_v44 = vshrl.u32 %v3909_v57, 16  ;;  %v4395_v14 = vshll.u32 %v3909_v57, 16  ;;  %v9481_v57 = vld [vmem:[%s9635_s8] ss:$0 sm:$0xff] }
 0x4bf   : > { %v3544_v31 = vpop.permute.xlu1 %3543  ;;  %v4394_v37 = vrot.slane %v4392_v44, 7 }
 0x4c1   : > { %v4397_v0 = vor.u32 %v4395_v14, %v4394_v37 }
 0x4c3   : > { %v4398_v25 = vsel %vm10224_vm9, %v4372_v22, %v4397_v0  ;;  %v5653_v0 = vld [vmem:[%s6111_s26 + $0x18] sm:$0xff] }
 0x4cc   : > { %v3629_v38 = vpop.permute.xlu1 %3628 }
 0x4cd   : > { %v3787_v28 = vpop.permute.xlu0 %3786 }
 0x4ce   : > { %v4026_v10 = vsel %vm3877_vm3, %v3992_v26, %v3787_v28 }
 0x4cf   : > { %v4377_v21 = vshrl.u32 %v4026_v10, 16  ;;  %v5379_v23 = vpop.f32.mrb[20].mxu1  ;;  %v4380_v59 = vshll.u32 %v4026_v10, 16 }
 0x4d0   : > { %v5380_v16 = vpop.f32.mrb[21].mxu1  ;;  %v3679_v27 = vpop.permute.xlu1 %3678 }
 0x4d1   : > { %v4379_v17 = vrot.slane %v4377_v21, 7  ;;  %v9450_v47 = vadd.f32 %v5380_v16, %v5379_v23  ;;  %v5382_v41 = vpop.f32.mrb[22].mxu1  ;;  %v3720_v61 = vpop.permute.xlu0 %3719 }
 0x4d2   : > { %v5383_v60 = vpop.f32.mrb[23].mxu1  ;;  %v3959_v49 = vsel %vm2397_vm6, %v9357_v6, %v3720_v61 }
 0x4d3   : > { %v4382_v5 = vor.u32 %v4380_v59, %v4379_v17  ;;  %v9454_v55 = vadd.f32 %v5383_v60, %v5382_v41 }
 0x4d5   : > { %v3754_v20 = vpop.permute.xlu0 %3753  ;;  %v4383_v62 = vsel %vm10221_vm13, %v4357_v36, %v4382_v5  ;;  %v3841_v36 = vsel %vm2397_vm6, %v9300_v45, %v3544_v31  ;;  %v4667_v5 = vadd.f32 %v9386_v18, %v9481_v57 }
 0x4d6   : > { %4760 = vmatprep.mubr.bf16.mxu1 %v4383_v62  ;;  %v3994_v54 = vsel %vm3842_vm7, %v3959_v49, %v3754_v20  ;;  %v3876_v52 = vsel %vm3842_vm7, %v3841_v36, %v3629_v38  ;;  %v5652_v36 = vld [vmem:[%s6111_s26 + $0x8] sm:$0xff] }
 0x4d7   : > { %4761 = vmatmul.mubr.bf16.gmra.mrb[48].mxu1 %v4376_v30  ;;  %v3911_v6 = vsel %vm3877_vm3, %v3876_v52, %v3679_v27  ;;  %v5650_v30 = vld [vmem:[%s6111_s26] sm:$0xff]  ;;  %v4949_v52 = vsel %vm2166_vm12, %v5653_v0, 0.0 }
 0x4d8   : > { %v4414_v42 = vshrl.u32 %v3911_v6, 16  ;;  %v4417_v43 = vshll.u32 %v3911_v6, 16  ;;  %v4946_v49 = vsel %vm2166_vm12, %v5650_v30, 0.0  ;;  %v4691_v30 = vadd.f32 %v9416_v34, %v9481_v57 }
 0x4d9   : > { %v3789_v51 = vpop.permute.xlu0 %3788  ;;  %v4694_v34 = vadd.f32 %v9421_v46, %v9481_v57 }
 0x4da   : > { %v4028_v29 = vsel %vm3877_vm3, %v3994_v54, %v3789_v51  ;;  %v4416_v58 = vrot.slane %v4414_v42, 7  ;;  %v4670_v54 = vadd.f32 %v9390_v40, %v9481_v57 }
 0x4db   : > { %v4399_v9 = vshrl.u32 %v4028_v29, 16  ;;  %v4402_v48 = vshll.u32 %v4028_v29, 16 }
 0x4dc   : > { %v4419_v10 = vor.u32 %v4417_v43, %v4416_v58  ;;  %v5654_v58 = vld [vmem:[%s6111_s26 + $0x20] sm:$0xff] }
 0x4dd   : > { %v4401_v7 = vrot.slane %v4399_v9, 7  ;;  %v3722_v2 = vpop.permute.xlu0 %3721  ;;  %v5651_v9 = vld [vmem:[%s6111_s26 + $0x10] sm:$0xff] }
 0x4de   : > { %v3962_v45 = vsel %vm2397_vm6, %v9374_v12, %v3722_v2  ;;  %v4420_v22 = vsel %vm10226_vm4, %v4394_v37, %v4419_v10  ;;  %v4948_v14 = vsel %vm2166_vm12, %v5651_v9, 0.0  ;;  %v4678_v10 = vadd.f32 %v9406_v19, %v9481_v57 }
 0x4df   : > { %v4404_v3 = vor.u32 %v4402_v48, %v4401_v7 }
 0x4e1   : > { %v3756_v24 = vpop.permute.xlu0 %3755  ;;  %v4405_v13 = vsel %vm10223_vm1, %v4379_v17, %v4404_v3  ;;  %v4683_v3 = vadd.f32 %v9408_v39, %v9481_v57 }
 0x4e2   : > { %4768 = vmatprep.mubr.bf16.mxu1 %v4405_v13  ;;  %v3996_v53 = vsel %vm3842_vm7, %v3962_v45, %v3756_v24  ;;  %v4675_v45 = vadd.f32 %v9400_v33, %v9481_v57 }
 0x4e3   : > { %4769 = vmatmul.mubr.bf16.gmra.mrb[52].mxu1 %v4398_v25 }
 0x4e5   : > { %v3791_v4 = vpop.permute.xlu0 %3790 }
 0x4e6   : > { %v4030_v11 = vsel %vm3877_vm3, %v3996_v53, %v3791_v4 }
 0x4e7   : > { %v4421_v50 = vshrl.u32 %v4030_v11, 16  ;;  %v4424_v28 = vshll.u32 %v4030_v11, 16  ;;  %v4950_v11 = vsel %vm2166_vm12, %v5654_v58, 0.0 }
 0x4e9   : > { %v4423_v26 = vrot.slane %v4421_v50, 7  ;;  %v4686_v50 = vadd.f32 %v9410_v1, %v9481_v57 }
 0x4eb   : > { %v4426_v21 = vor.u32 %v4424_v28, %v4423_v26 }
 0x4ed   : > { %v4427_v23 = vsel %vm10225_vm11, %v4401_v7, %v4426_v21  ;;  %v4947_v7 = vsel %vm2166_vm12, %v5652_v36, 0.0  ;;  %v5655_v21 = vld [vmem:[%s6111_s26 + $0x30] sm:$0xff] }
 0x4ee   : > { %4776 = vmatprep.mubr.bf16.mxu1 %v4427_v23  ;;  %v4952_v23 = vsel %vm2166_vm12, %v5655_v21, 0.0  ;;  %v4707_v21 = vadd.f32 %v9450_v47, %v9481_v57 }
 0x4ef   : > { %4777 = vmatmul.mubr.bf16.gmra.mrb[56].mxu1 %v4420_v22  ;;  %v5656_v22 = vld [vmem:[%s6111_s26 + $0x38] sm:$0xff] }
 0x4f2   : > { %v5385_v63 = vpop.f32.mrb[24].mxu1 }
 0x4f3   : > { %v5386_v12 = vpop.f32.mrb[25].mxu1 }
 0x4f4   : > { %v9474_v16 = vadd.f32 %v5386_v12, %v5385_v63  ;;  %v5388_v32 = vpop.f32.mrb[26].mxu1  ;;  %v4953_v63 = vsel %vm2166_vm12, %v5656_v22, 0.0  ;;  %v5662_v22 = vld [vmem:[%s6111_s26 + $0x60] sm:$0xff] }
 0x4f5   : > { %v5343_v17 = vpop.f32.mrb[32].mxu0  ;;  %v5389_v59 = vpop.f32.mrb[27].mxu1 }
 0x4f6   : > { %v9476_v41 = vadd.f32 %v5389_v59, %v5388_v32  ;;  %v5344_v61 = vpop.f32.mrb[33].mxu0  ;;  %v5657_v32 = vld [vmem:[%s6111_s26 + $0x28] sm:$0xff] }
 0x4f7   : > { %v5345_v56 = vadd.f32 %v5344_v61, %v5343_v17  ;;  %v5346_v15 = vpop.f32.mrb[34].mxu0  ;;  %v4951_v17 = vsel %vm2166_vm12, %v5657_v32, 0.0 }
 0x4f8   : > { %v5347_v31 = vpop.f32.mrb[35].mxu0 }
 0x4f9   : > { %v5348_v60 = vadd.f32 %v5347_v31, %v5346_v15  ;;  %v4659_v62 = vadd.f32 %v5345_v56, %v9481_v57 }
 0x4fb   : > { %v4662_v29 = vadd.f32 %v5348_v60, %v9481_v57 }
 0x4fd   : > { %v5521_v20 = vpop.f32.mrb[36].mxu0 }
 0x4fe   : > { %v4828_v44 = vadd.f32 %v5521_v20, %v4667_v5  ;;  %v4819_v38 = vpop.f32.mrb[37].mxu0  ;;  %v4699_v20 = vadd.f32 %v9430_v35, %v9481_v57 }
 0x4ff   : > { %v4820_v51 = vadd.f32 %v4819_v38, %v4659_v62  ;;  %v5522_v37 = vpop.f32.mrb[38].mxu0 }
 0x500   : > { %v4831_v18 = vadd.f32 %v5522_v37, %v4670_v54  ;;  %v4822_v27 = vpop.f32.mrb[39].mxu0  ;;  %v4980_v6 = vsub.f32 %v4948_v14, %v4828_v44  ;;  %v5658_v54 = vld [vmem:[%s6111_s26 + $0x50] sm:$0xff]  ;;  %v4702_v14 = vadd.f32 %v9435_v8, %v9481_v57 }
 0x501   : > { %v4978_v48 = vsub.f32 %v4946_v49, %v4820_v51  ;;  %v4823_v2 = vadd.f32 %v4822_v27, %v4662_v29  ;;  %v4956_v51 = vsel %vm2166_vm12, %v5658_v54, 0.0  ;;  %v5659_v29 = vld [vmem:[%s6111_s26 + $0x40] sm:$0xff] }
 0x502   : > { %v4981_v13 = vsub.f32 %v4949_v52, %v4831_v18  ;;  %v5012_v43 = vmul.f32 %v4980_v6, %v4980_v6  ;;  %v4954_v9 = vsel %vm2166_vm12, %v5659_v29, 0.0  ;;  %v5660_v6 = vld [vmem:[%s6111_s26 + $0x48] sm:$0xff] }
 0x503   : > { %v4979_v40 = vsub.f32 %v4947_v7, %v4823_v2  ;;  %v5010_v24 = vmul.f32 %v4978_v48, %v4978_v48 }
 0x504   : > { %v5013_v1 = vmul.f32 %v4981_v13, %v4981_v13 }
 0x505   : > { %v5011_v42 = vmul.f32 %v4979_v40, %v4979_v40  ;;  %v5525_v25 = vpop.f32.mrb[40].mxu0  ;;  %v4955_v40 = vsel %vm2166_vm12, %v5660_v6, 0.0 }
 0x506   : > { %v4844_v53 = vadd.f32 %v5525_v25, %v4683_v3  ;;  %v4835_v4 = vpop.f32.mrb[41].mxu0 }
 0x507   : > { %v5042_v39 = vadd.f32 %v5011_v42, %v5010_v24  ;;  %v4836_v26 = vadd.f32 %v4835_v4, %v4675_v45  ;;  %v5526_v28 = vpop.f32.mrb[42].mxu0  ;;  %v5661_v45 = vld [vmem:[%s6111_s26 + $0x58] sm:$0xff] }
 0x508   : > { %v4847_v33 = vadd.f32 %v5526_v28, %v4686_v50  ;;  %v4838_v12 = vpop.f32.mrb[43].mxu0  ;;  %v4984_v15 = vsub.f32 %v4952_v23, %v4844_v53  ;;  %v4957_v53 = vsel %vm2166_vm12, %v5661_v45, 0.0 }
 0x509   : > { %v5043_v59 = vadd.f32 %v5042_v39, %v5012_v43  ;;  %v4982_v61 = vsub.f32 %v4950_v11, %v4836_v26  ;;  %v4839_v56 = vadd.f32 %v4838_v12, %v4678_v10  ;;  %v4715_v43 = vadd.f32 %v9474_v16, %v9481_v57 }
 0x50a   : > { %v4985_v5 = vsub.f32 %v4953_v63, %v4847_v33  ;;  %v5016_v18 = vmul.f32 %v4984_v15, %v4984_v15  ;;  %v4958_v63 = vsel %vm2166_vm12, %v5662_v22, 0.0  ;;  %v4718_v12 = vadd.f32 %v9476_v41, %v9481_v57 }
 0x50b   : > { %v5014_v31 = vmul.f32 %v4982_v61, %v4982_v61  ;;  %v5044_v19 = vadd.f32 %v5043_v59, %v5013_v1  ;;  %v4983_v60 = vsub.f32 %v4951_v17, %v4839_v56  ;;  %v4710_v59 = vadd.f32 %v9454_v55, %v9481_v57  ;;  %v5663_v61 = vld [vmem:[%s6111_s26 + $0x70] sm:$0xff] }
 0x50c   : > { %v5017_v48 = vmul.f32 %v4985_v5, %v4985_v5  ;;  %v4960_v56 = vsel %vm2166_vm12, %v5663_v61, 0.0 }
 0x50d   : > { %v5045_v62 = vadd.f32 %v5044_v19, %v5014_v31  ;;  %v5015_v44 = vmul.f32 %v4983_v60, %v4983_v60  ;;  %v5529_v38 = vpop.f32.mrb[44].mxu0  ;;  %v5664_v31 = vld [vmem:[%s6111_s26 + $0x68] sm:$0xff] }
 0x50e   : > { %v4860_v49 = vadd.f32 %v5529_v38, %v4699_v20  ;;  %v4851_v37 = vpop.f32.mrb[45].mxu0  ;;  %v4959_v19 = vsel %vm2166_vm12, %v5664_v31, 0.0 }
 0x50f   : > { %v5046_v35 = vadd.f32 %v5045_v62, %v5015_v44  ;;  %v4852_v27 = vadd.f32 %v4851_v37, %v4691_v30  ;;  %v5391_v36 = vpop.f32.mrb[28].mxu1  ;;  %v5530_v7 = vpop.f32.mrb[46].mxu0  ;;  %v5665_v62 = vld [vmem:[%s6111_s26 + $0x78] sm:$0xff] }
 0x510   : > { %v4863_v2 = vadd.f32 %v5530_v7, %v4702_v14  ;;  %v5392_v0 = vpop.f32.mrb[29].mxu1  ;;  %v4854_v52 = vpop.f32.mrb[47].mxu0  ;;  %v4988_v25 = vsub.f32 %v4956_v51, %v4860_v49  ;;  %v4961_v44 = vsel %vm2166_vm12, %v5665_v62, 0.0 }
 0x511   : > { %v5047_v3 = vadd.f32 %v5046_v35, %v5016_v18  ;;  %v4986_v24 = vsub.f32 %v4954_v9, %v4852_v27  ;;  %v5393_v13 = vadd.f32 %v5392_v0, %v5391_v36  ;;  %v4855_v8 = vadd.f32 %v4854_v52, %v4694_v34  ;;  %v5394_v42 = vpop.f32.mrb[30].mxu1  ;;  %v5666_v18 = vld [vmem:[%s6111_s26 + $0x80] sm:$0xff]  ;;  %v5667_v0 = vld [vmem:[%s6111_s26 + $0x88] sm:$0xff] }
 0x512   : > { %v5395_v4 = vpop.f32.mrb[31].mxu1  ;;  %v4989_v26 = vsub.f32 %v4957_v53, %v4863_v2  ;;  %v5020_v32 = vmul.f32 %v4988_v25, %v4988_v25  ;;  %v4962_v35 = vsel %vm2166_vm12, %v5666_v18, 0.0  ;;  %v4963_v52 = vsel %vm2166_vm12, %v5667_v0, 0.0  ;;  %v5671_v18 = vld [vmem:[%s6111_s26 + $0xa8] sm:$0xff] }
 0x513   : > { %v5018_v58 = vmul.f32 %v4986_v24, %v4986_v24  ;;  %v5048_v46 = vadd.f32 %v5047_v3, %v5017_v48  ;;  %v4987_v11 = vsub.f32 %v4955_v40, %v4855_v8  ;;  %v5396_v50 = vadd.f32 %v5395_v4, %v5394_v42 }
 0x514   : > { %v5021_v60 = vmul.f32 %v4989_v26, %v4989_v26  ;;  %v4723_v9 = vadd.f32 %v5393_v13, %v9481_v57 }
 0x515   : > { %v5049_v39 = vadd.f32 %v5048_v46, %v5018_v58  ;;  %v5019_v28 = vmul.f32 %v4987_v11, %v4987_v11  ;;  %v5533_v10 = vpop.f32.mrb[48].mxu0  ;;  %v4726_v48 = vadd.f32 %v5396_v50, %v9481_v57 }
 0x516   : > { %v4876_v23 = vadd.f32 %v5533_v10, %v4715_v43  ;;  %v4867_v33 = vpop.f32.mrb[49].mxu0 }
 0x517   : > { %v5050_v16 = vadd.f32 %v5049_v39, %v5019_v28  ;;  %v4868_v17 = vadd.f32 %v4867_v33, %v4707_v21  ;;  %v5534_v1 = vpop.f32.mrb[50].mxu0 }
 0x518   : > { %v4879_v47 = vadd.f32 %v5534_v1, %v4718_v12  ;;  %v4870_v15 = vpop.f32.mrb[51].mxu0  ;;  %v4992_v38 = vsub.f32 %v4960_v56, %v4876_v23  ;;  %v5668_v23 = vld [vmem:[%s6111_s26 + $0x90] sm:$0xff] }
 0x519   : > { %v5051_v5 = vadd.f32 %v5050_v16, %v5020_v32  ;;  %v4990_v41 = vsub.f32 %v4958_v63, %v4868_v17  ;;  %v4871_v20 = vadd.f32 %v4870_v15, %v4710_v59  ;;  %v4964_v33 = vsel %vm2166_vm12, %v5668_v23, 0.0  ;;  %v5669_v16 = vld [vmem:[%s6111_s26 + $0x98] sm:$0xff] }
 0x51a   : > { %v4993_v51 = vsub.f32 %v4961_v44, %v4879_v47  ;;  %v5024_v27 = vmul.f32 %v4992_v38, %v4992_v38  ;;  %v4965_v17 = vsel %vm2166_vm12, %v5669_v16, 0.0 }
 0x51b   : > { %v5022_v30 = vmul.f32 %v4990_v41, %v4990_v41  ;;  %v5052_v49 = vadd.f32 %v5051_v5, %v5021_v60  ;;  %v4991_v55 = vsub.f32 %v4959_v19, %v4871_v20 }
 0x51c   : > { %v5025_v6 = vmul.f32 %v4993_v51, %v4993_v51 }
 0x51d   : > { %v5053_v54 = vadd.f32 %v5052_v49, %v5022_v30  ;;  %v5023_v37 = vmul.f32 %v4991_v55, %v4991_v55  ;;  %v5537_v29 = vpop.f32.mrb[52].mxu0 }
 0x51e   : > { %v4883_v14 = vpop.f32.mrb[53].mxu0 }
 0x51f   : > { %v5054_v36 = vadd.f32 %v5053_v54, %v5023_v37  ;;  %v4884_v7 = vadd.f32 %v4883_v14, %v4723_v9  ;;  %v5538_v34 = vpop.f32.mrb[54].mxu0  ;;  %v5670_v37 = vld [vmem:[%s6111_s26 + $0xa0] sm:$0xff] }
 0x520   : > { %v4886_v2 = vpop.f32.mrb[55].mxu0 }
 0x521   : > { %v5055_v40 = vadd.f32 %v5054_v36, %v5024_v27  ;;  %v4994_v3 = vsub.f32 %v4962_v35, %v4884_v7  ;;  %v4887_v24 = vadd.f32 %v4886_v2, %v4726_v48  ;;  %v4967_v35 = vsel %vm2166_vm12, %v5671_v18, 0.0  ;;  %v5676_v18 = vld [vmem:[%s6111_s26 + $0xd0] sm:$0xff] }
 0x523   : > { %v5026_v8 = vmul.f32 %v4994_v3, %v4994_v3  ;;  %v5056_v13 = vadd.f32 %v5055_v40, %v5025_v6  ;;  %v4995_v42 = vsub.f32 %v4963_v52, %v4887_v24 }
 0x525   : > { %v5057_v25 = vadd.f32 %v5056_v13, %v5026_v8  ;;  %v5027_v45 = vmul.f32 %v4995_v42, %v4995_v42  ;;  %v5541_v53 = vpop.f32.mrb[56].mxu0  ;;  %v5672_v42 = vld [vmem:[%s6111_s26 + $0xb0] sm:$0xff] }
 0x526   : > { %v4899_v4 = vpop.f32.mrb[57].mxu0 }
 0x527   : > { %v5058_v58 = vadd.f32 %v5057_v25, %v5027_v45  ;;  %v9551_v46 = vpop.f32.mrb[58].mxu0  ;;  %v4968_v25 = vsel %vm2166_vm12, %v5672_v42, 0.0 }
 0x528   : > { %v4902_v11 = vpop.f32.mrb[59].mxu0 }
 0x52f   : > { %v5397_v50 = vpop.f32.mrb[32].mxu1 }
 0x530   : > { %v5398_v43 = vpop.f32.mrb[33].mxu1 }
 0x531   : > { %v5399_v39 = vadd.f32 %v5398_v43, %v5397_v50  ;;  %v5400_v26 = vpop.f32.mrb[34].mxu1 }
 0x532   : > { %v5401_v28 = vpop.f32.mrb[35].mxu1 }
 0x533   : > { %v4731_v10 = vadd.f32 %v5399_v39, %v9481_v57  ;;  %v5402_v21 = vadd.f32 %v5401_v28, %v5400_v26 }
 0x534   : > { %v9556_v22 = vpop.f32.mrb[60].mxu0 }
 0x535   : > { %v4892_v63 = vadd.f32 %v5537_v29, %v4731_v10  ;;  %v4734_v12 = vadd.f32 %v5402_v21, %v9481_v57  ;;  %v9559_v32 = vpop.f32.mrb[61].mxu0  ;;  %v4966_v29 = vsel %vm2166_vm12, %v5670_v37, 0.0 }
 0x536   : > { %v9563_v1 = vpop.f32.mrb[62].mxu0 }
 0x537   : > { %v4996_v59 = vsub.f32 %v4964_v33, %v4892_v63  ;;  %v4895_v61 = vadd.f32 %v5538_v34, %v4734_v12  ;;  %v9565_v56 = vpop.f32.mrb[63].mxu0 }
 0x539   : > { %v5028_v47 = vmul.f32 %v4996_v59, %v4996_v59  ;;  %v4997_v15 = vsub.f32 %v4965_v17, %v4895_v61  ;;  %v5674_v59 = vld [vmem:[%s6111_s26 + $0xc0] sm:$0xff] }
 0x53a   : > { %v4970_v61 = vsel %vm2166_vm12, %v5674_v59, 0.0  ;;  %v5680_v59 = vld [vmem:[%s6111_s26 + $0xf0] sm:$0xff] }
 0x53b   : > { %v5059_v31 = vadd.f32 %v5058_v58, %v5028_v47  ;;  %v5029_v19 = vmul.f32 %v4997_v15, %v4997_v15  ;;  %v5673_v58 = vld [vmem:[%s6111_s26 + $0xb8] sm:$0xff]  ;;  %v5675_v15 = vld [vmem:[%s6111_s26 + $0xc8] sm:$0xff] }
 0x53c   : > { %v9567_v60 = vpop.f32.mrb[64].mxu0 }
 0x53d   : > { %v5060_v5 = vadd.f32 %v5059_v31, %v5029_v19  ;;  %v9569_v41 = vpop.f32.mrb[65].mxu0  ;;  %v4971_v31 = vsel %vm2166_vm12, %v5675_v15, 0.0 }
 0x53e   : > { %v9571_v20 = vpop.f32.mrb[66].mxu0 }
 0x53f   : > { %v9573_v62 = vpop.f32.mrb[67].mxu0 }
 0x54f   : > { %v5403_v44 = vpop.f32.mrb[36].mxu1 }
 0x550   : > { %v5404_v38 = vpop.f32.mrb[37].mxu1 }
 0x551   : > { %v5405_v30 = vadd.f32 %v5404_v38, %v5403_v44  ;;  %v5406_v49 = vpop.f32.mrb[38].mxu1 }
 0x552   : > { %v5407_v55 = vpop.f32.mrb[39].mxu1 }
 0x553   : > { %v4739_v54 = vadd.f32 %v5405_v30, %v9481_v57  ;;  %v5408_v51 = vadd.f32 %v5407_v55, %v5406_v49 }
 0x555   : > { %v4900_v9 = vadd.f32 %v4899_v4, %v4739_v54  ;;  %v4742_v14 = vadd.f32 %v5408_v51, %v9481_v57 }
 0x557   : > { %v4998_v27 = vsub.f32 %v4966_v29, %v4900_v9  ;;  %v4903_v36 = vadd.f32 %v4902_v11, %v4742_v14  ;;  %v4969_v11 = vsel %vm2166_vm12, %v5673_v58, 0.0 }
 0x559   : > { %v5030_v7 = vmul.f32 %v4998_v27, %v4998_v27  ;;  %v4999_v34 = vsub.f32 %v4967_v35, %v4903_v36  ;;  %v4972_v35 = vsel %vm2166_vm12, %v5676_v18, 0.0  ;;  %v5677_v36 = vld [vmem:[%s6111_s26 + $0xd8] sm:$0xff] }
 0x55b   : > { %v5061_v48 = vadd.f32 %v5060_v5, %v5030_v7  ;;  %v5031_v2 = vmul.f32 %v4999_v34, %v4999_v34  ;;  %v4973_v7 = vsel %vm2166_vm12, %v5677_v36, 0.0 }
 0x55d   : > { %v5062_v0 = vadd.f32 %v5061_v48, %v5031_v2 }
 0x56f   : > { %v5409_v52 = vpop.f32.mrb[40].mxu1 }
 0x570   : > { %v5410_v6 = vpop.f32.mrb[41].mxu1 }
 0x571   : > { %v5411_v40 = vadd.f32 %v5410_v6, %v5409_v52  ;;  %v5412_v3 = vpop.f32.mrb[42].mxu1 }
 0x572   : > { %v5413_v24 = vpop.f32.mrb[43].mxu1 }
 0x573   : > { %v4747_v8 = vadd.f32 %v5411_v40, %v9481_v57  ;;  %v5414_v13 = vadd.f32 %v5413_v24, %v5412_v3 }
 0x575   : > { %v4908_v45 = vadd.f32 %v5541_v53, %v4747_v8  ;;  %v4750_v4 = vadd.f32 %v5414_v13, %v9481_v57 }
 0x577   : > { %v5000_v50 = vsub.f32 %v4968_v25, %v4908_v45  ;;  %v4911_v43 = vadd.f32 %v9551_v46, %v4750_v4  ;;  %v5678_v45 = vld [vmem:[%s6111_s26 + $0xe0] sm:$0xff] }
 0x578   : > { %v4974_v4 = vsel %vm2166_vm12, %v5678_v45, 0.0 }
 0x579   : > { %v5032_v39 = vmul.f32 %v5000_v50, %v5000_v50  ;;  %v5001_v26 = vsub.f32 %v4969_v11, %v4911_v43  ;;  %v5679_v11 = vld [vmem:[%s6111_s26 + $0xe8] sm:$0xff] }
 0x57a   : > { %v4975_v50 = vsel %vm2166_vm12, %v5679_v11, 0.0 }
 0x57b   : > { %v5063_v28 = vadd.f32 %v5062_v0, %v5032_v39  ;;  %v5033_v10 = vmul.f32 %v5001_v26, %v5001_v26 }
 0x57d   : > { %v5064_v21 = vadd.f32 %v5063_v28, %v5033_v10 }
 0x58f   : > { %v5415_v23 = vpop.f32.mrb[44].mxu1 }
 0x590   : > { %v5416_v33 = vpop.f32.mrb[45].mxu1 }
 0x591   : > { %v5417_v63 = vadd.f32 %v5416_v33, %v5415_v23  ;;  %v5418_v12 = vpop.f32.mrb[46].mxu1 }
 0x592   : > { %v5419_v53 = vpop.f32.mrb[47].mxu1 }
 0x593   : > { %v4755_v16 = vadd.f32 %v5417_v63, %v9481_v57  ;;  %v5420_v17 = vadd.f32 %v5419_v53, %v5418_v12 }
 0x595   : > { %v4916_v47 = vadd.f32 %v9559_v32, %v4755_v16  ;;  %v4758_v46 = vadd.f32 %v5420_v17, %v9481_v57 }
 0x597   : > { %v5002_v19 = vsub.f32 %v4970_v61, %v4916_v47  ;;  %v4919_v5 = vadd.f32 %v9565_v56, %v4758_v46  ;;  %v4976_v61 = vsel %vm2166_vm12, %v5680_v59, 0.0  ;;  %v5681_v46 = vld [vmem:[%s6111_s26 + $0xf8] sm:$0xff] }
 0x598   : > { %v4977_v15 = vsel %vm2166_vm12, %v5681_v46, 0.0 }
 0x599   : > { %v5034_v44 = vmul.f32 %v5002_v19, %v5002_v19  ;;  %v5003_v38 = vsub.f32 %v4971_v31, %v4919_v5 }
 0x59b   : > { %v5065_v30 = vadd.f32 %v5064_v21, %v5034_v44  ;;  %v5035_v49 = vmul.f32 %v5003_v38, %v5003_v38 }
 0x59d   : > { %v5066_v55 = vadd.f32 %v5065_v30, %v5035_v49 }
 0x5aa   : > { %v5421_v54 = vpop.f32.mrb[48].mxu1 }
 0x5ab   : > { %v5422_v51 = vpop.f32.mrb[49].mxu1 }
 0x5ac   : > { %v5423_v37 = vadd.f32 %v5422_v51, %v5421_v54  ;;  %v5424_v29 = vpop.f32.mrb[50].mxu1 }
 0x5ad   : > { %v5425_v32 = vpop.f32.mrb[51].mxu1 }
 0x5ae   : > { %v4763_v9 = vadd.f32 %v5423_v37, %v9481_v57  ;;  %v5426_v14 = vadd.f32 %v5425_v32, %v5424_v29 }
 0x5b0   : > { %v4924_v27 = vadd.f32 %v9556_v22, %v4763_v9  ;;  %v4766_v56 = vadd.f32 %v5426_v14, %v9481_v57 }
 0x5b2   : > { %v5004_v34 = vsub.f32 %v4972_v35, %v4924_v27  ;;  %v4927_v48 = vadd.f32 %v9563_v1, %v4766_v56 }
 0x5b4   : > { %v5036_v2 = vmul.f32 %v5004_v34, %v5004_v34  ;;  %v5005_v0 = vsub.f32 %v4973_v7, %v4927_v48 }
 0x5b6   : > { %v5067_v52 = vadd.f32 %v5066_v55, %v5036_v2  ;;  %v5037_v6 = vmul.f32 %v5005_v0, %v5005_v0  ;;  %v5427_v40 = vpop.f32.mrb[52].mxu1 }
 0x5b7   : > { %v5428_v3 = vpop.f32.mrb[53].mxu1 }
 0x5b8   : > { %v5068_v24 = vadd.f32 %v5067_v52, %v5037_v6  ;;  %v5429_v8 = vadd.f32 %v5428_v3, %v5427_v40  ;;  %v5430_v13 = vpop.f32.mrb[54].mxu1 }
 0x5b9   : > { %v5431_v22 = vpop.f32.mrb[55].mxu1 }
 0x5ba   : > { %v4771_v42 = vadd.f32 %v5429_v8, %v9481_v57  ;;  %v5432_v25 = vadd.f32 %v5431_v22, %v5430_v13 }
 0x5bc   : > { %v4932_v58 = vadd.f32 %v9569_v41, %v4771_v42  ;;  %v4774_v1 = vadd.f32 %v5432_v25, %v9481_v57 }
 0x5be   : > { %v5006_v43 = vsub.f32 %v4974_v4, %v4932_v58  ;;  %v4935_v39 = vadd.f32 %v9573_v62, %v4774_v1 }
 0x5c0   : > { %v5038_v26 = vmul.f32 %v5006_v43, %v5006_v43  ;;  %v5007_v28 = vsub.f32 %v4975_v50, %v4935_v39 }
 0x5c2   : > { %v5069_v10 = vadd.f32 %v5068_v24, %v5038_v26  ;;  %v5039_v21 = vmul.f32 %v5007_v28, %v5007_v28  ;;  %v5433_v23 = vpop.f32.mrb[56].mxu1 }
 0x5c3   : > { %v5434_v33 = vpop.f32.mrb[57].mxu1 }
 0x5c4   : > { %v5070_v63 = vadd.f32 %v5069_v10, %v5039_v21  ;;  %v5435_v12 = vadd.f32 %v5434_v33, %v5433_v23  ;;  %v5436_v53 = vpop.f32.mrb[58].mxu1 }
 0x5c5   : > { %v5437_v41 = vpop.f32.mrb[59].mxu1 }
 0x5c6   : > { %v4779_v16 = vadd.f32 %v5435_v12, %v9481_v57  ;;  %v5438_v17 = vadd.f32 %v5437_v41, %v5436_v53 }
 0x5c8   : > { %v4940_v47 = vadd.f32 %v9567_v60, %v4779_v16  ;;  %v4782_v62 = vadd.f32 %v5438_v17, %v9481_v57 }
 0x5ca   : > { %v5008_v31 = vsub.f32 %v4976_v61, %v4940_v47  ;;  %v4943_v19 = vadd.f32 %v9571_v20, %v4782_v62 }
 0x5cc   : > { %v5040_v5 = vmul.f32 %v5008_v31, %v5008_v31  ;;  %v5009_v44 = vsub.f32 %v4977_v15, %v4943_v19 }
 0x5ce   : > { %v5071_v38 = vadd.f32 %v5070_v63, %v5040_v5  ;;  %v5041_v30 = vmul.f32 %v5009_v44, %v5009_v44 }
 0x5d0   : > { %v5072_v49 = vadd.f32 %v5071_v38, %v5041_v30 }
 0x5d2   : > { %v5073_v55 = vrot.slane %v5072_v49, 4 }
 0x5d4   : > { %v5074_v54 = vadd.f32 %v5073_v55, %v5072_v49 }
 0x5d6   : > { %v5075_v51 = vrot.slane %v5074_v54, 2 }
 0x5d8   : > { %v5076_v37 = vadd.f32 %v5075_v51, %v5074_v54 }
 0x5da   : > { %v5077_v29 = vrot.slane %v5076_v37, 1 }
 0x5dc   : > { %v5078_v57 = vadd.f32 %v5077_v29, %v5076_v37 }
 0x5de   : > { %5079 = vst [vmem:[%s389_s29] sm:$0x1] %v5078_v57 }
 0x5df PF: > { %s21_s30 = sadd.s32 1, %s5726_s30  }
 0x5e0   : > { %p18_p5 = scmp.ge.s32.totalorder %s21_s30, 4  }
 0x5e2   :  { %20 = sbr.rel (!%p18_p5) target bundleno = 2 (0x2), region = 101 }
 0x5e9   :  { %5097 = vsyncpa [#allocation3], 1 }
 0x5ea   :  { %5099 = vsyncpa [#allocation3 + $0x1], 1 }
 0x5eb   :  { %5100 = vsyncpa [#allocation5], 1 }

</bundles_post_ra>
